<compile_context>
chip_gen: v7x
topology: tpu7x:2x2x1
jax: 0.10.0
libtpu: 0.0.40
codegen_flags: <defaults>
</compile_context>

<pallas_src>
import math

import jax
import jax.numpy as jnp
from jax import lax
from jax.experimental import pallas as pl
from jax.experimental.pallas import tpu as pltpu

# ----------------------------- configuration (args) -----------------------------
BATCH = 2
SHAPELIST = [16, 16]          # args.shapelist  (power of two -> padding == [0, 0])
SPACE_DIM = 2                 # args.space_dim
FUN_DIM = 4                   # args.fun_dim
N_HIDDEN = 32                 # args.n_hidden
N_LAYERS = 2                  # args.n_layers
OUT_DIM = 1                   # args.out_dim
K = 2                         # args.mwt_k
C = 1                         # c
MODES = 2                     # alpha (sparseKernelFT2d modes)
L_LEVEL = 0                   # L
K2 = K * K
WMT_DIM = C * K2              # c * k**2  (geotype != structured_1D)
D = C * K2                    # channel dim inside spectral layers
TARGET = 2 ** math.ceil(math.log2(max(SHAPELIST)))
PADDING = [TARGET - s for s in SHAPELIST]      # == [0, 0]
AUG_RES = [TARGET, TARGET]
N_POINTS = SHAPELIST[0] * SHAPELIST[1]


def exact_gelu(x):
    # F.gelu default in PyTorch is the exact erf-based GELU (used in XLA between layers).
    return jax.nn.gelu(x, approximate=False)


# ----------------------------- in-kernel exact-GELU ------------------------------
def _erf_poly(x):
    # Abramowitz & Stegun 7.1.26 erf, |abs err| < 1.5e-7 (f32 epsilon level).
    # Stands in for lax.erf inside the kernel (only mul/add/div/exp/where -> safe lowering).
    p = 0.3275911
    a1, a2, a3, a4, a5 = 0.254829592, -0.284496736, 1.421413741, -1.453152027, 1.061405429
    z = jnp.abs(x)
    t = 1.0 / (1.0 + p * z)
    poly = ((((a5 * t + a4) * t + a3) * t + a2) * t + a1) * t
    e = 1.0 - poly * jnp.exp(-z * z)
    return jnp.where(x >= 0, e, -e)


def _gelu_in_kernel(x):
    return 0.5 * x * (1.0 + _erf_poly(x * 0.7071067811865476))


# ----------------------------- Pallas kernels -----------------------------------
def _linear_kernel(x_ref, w_ref, b_ref, o_ref):
    acc = jnp.dot(x_ref[...], w_ref[...], preferred_element_type=jnp.float32)
    o_ref[...] = (acc + b_ref[...]).astype(o_ref.dtype)


def _pick_tm(M, Din, Dout):
    # Full block whenever it comfortably fits VMEM (it always does at this config);
    # guard against silently huge blocks for larger shapes.
    full_bytes = 4 * M * (Din + Dout)
    if full_bytes <= (4 << 20):
        return M
    for tm in (1024, 512, 256, 128):
        if M % tm == 0:
            return tm
    return M


def pallas_linear(x2d, w, b=None):
    """y = x2d @ w + b  with x2d:(M,Din), w:(Din,Dout). Single full-M block at these sizes."""
    M, Din = x2d.shape
    Dout = w.shape[1]
    if b is None:
        b2 = jnp.zeros((1, Dout), x2d.dtype)
    else:
        b2 = b.reshape(1, Dout).astype(x2d.dtype)
    tm = _pick_tm(M, Din, Dout)
    grid = (M // tm,)
    sem = ("parallel",) if grid[0] > 1 else ("arbitrary",)
    cost = pl.CostEstimate(flops=2 * M * Din * Dout, transcendentals=0,
                           bytes_accessed=4 * (M * Din + Din * Dout + Dout + M * Dout))
    return pl.pallas_call(
        _linear_kernel,
        out_shape=jax.ShapeDtypeStruct((M, Dout), x2d.dtype),
        grid_spec=pltpu.PrefetchScalarGridSpec(
            num_scalar_prefetch=0,
            grid=grid,
            in_specs=[
                pl.BlockSpec((tm, Din), lambda i: (i, 0)),
                pl.BlockSpec((Din, Dout), lambda i: (0, 0)),
                pl.BlockSpec((1, Dout), lambda i: (0, 0)),
            ],
            out_specs=pl.BlockSpec((tm, Dout), lambda i: (i, 0)),
        ),
        compiler_params=pltpu.CompilerParams(dimension_semantics=sem),
        cost_estimate=cost,
    )(x2d, w, b2)


def _mlp2_kernel(x_ref, w1_ref, b1_ref, w2_ref, b2_ref, o_ref):
    h = jnp.dot(x_ref[...], w1_ref[...], preferred_element_type=jnp.float32) + b1_ref[...]
    h = _gelu_in_kernel(h)
    o = jnp.dot(h, w2_ref[...], preferred_element_type=jnp.float32) + b2_ref[...]
    o_ref[...] = o.astype(o_ref.dtype)


def pallas_mlp2(x2d, w1, b1, w2, b2):
    """Fused Linear -> GELU(exact, erf poly) -> Linear, one pallas_call, full block."""
    M, Din = x2d.shape
    Dh = w1.shape[1]
    Dout = w2.shape[1]
    b1_ = b1.reshape(1, Dh).astype(jnp.float32)
    b2_ = b2.reshape(1, Dout).astype(jnp.float32)
    cost = pl.CostEstimate(
        flops=2 * M * Din * Dh + 2 * M * Dh * Dout,
        transcendentals=M * Dh,
        bytes_accessed=4 * (M * Din + Din * Dh + Dh + Dh * Dout + Dout + M * Dout))
    return pl.pallas_call(
        _mlp2_kernel,
        out_shape=jax.ShapeDtypeStruct((M, Dout), x2d.dtype),
        grid_spec=pltpu.PrefetchScalarGridSpec(
            num_scalar_prefetch=0,
            grid=(1,),
            in_specs=[
                pl.BlockSpec((M, Din), lambda i: (0, 0)),
                pl.BlockSpec((Din, Dh), lambda i: (0, 0)),
                pl.BlockSpec((1, Dh), lambda i: (0, 0)),
                pl.BlockSpec((Dh, Dout), lambda i: (0, 0)),
                pl.BlockSpec((1, Dout), lambda i: (0, 0)),
            ],
            out_specs=pl.BlockSpec((M, Dout), lambda i: (0, 0)),
        ),
        compiler_params=pltpu.CompilerParams(dimension_semantics=("arbitrary",)),
        cost_estimate=cost,
    )(x2d, w1, b1_, w2, b2_)


def _cmix_kernel(xr_ref, xi_ref, wr_ref, wi_ref, or_ref, oi_ref):
    # Batched (per-mode/corner) complex matmul, all modes in ONE grid step,
    # Karatsuba 3-multiply form (3 batched MXU pushes instead of 4).
    xr = xr_ref[...]
    xi = xi_ref[...]
    wr = wr_ref[...]
    wi = wi_ref[...]
    t1 = jnp.einsum('mbi,mio->mbo', xr, wr, preferred_element_type=jnp.float32)
    t2 = jnp.einsum('mbi,mio->mbo', xi, wi, preferred_element_type=jnp.float32)
    t3 = jnp.einsum('mbi,mio->mbo', xr + xi, wr + wi, preferred_element_type=jnp.float32)
    or_ref[...] = t1 - t2
    oi_ref[...] = t3 - t1 - t2


def pallas_cmix(xr, xi, wr, wi):
    """Per-mode complex channel mixing: out[m] = x[m] @ W[m] over complex values."""
    nm, B, Din = xr.shape
    Dout = wr.shape[2]
    shape = jax.ShapeDtypeStruct((nm, B, Dout), jnp.float32)
    cost = pl.CostEstimate(
        flops=3 * 2 * nm * B * Din * Dout, transcendentals=0,
        bytes_accessed=4 * (2 * nm * B * Din + 2 * nm * Din * Dout + 2 * nm * B * Dout))
    return pl.pallas_call(
        _cmix_kernel,
        out_shape=(shape, shape),
        grid_spec=pltpu.PrefetchScalarGridSpec(
            num_scalar_prefetch=0,
            grid=(1,),
            in_specs=[
                pl.BlockSpec((nm, B, Din), lambda i: (0, 0, 0)),
                pl.BlockSpec((nm, B, Din), lambda i: (0, 0, 0)),
                pl.BlockSpec((nm, Din, Dout), lambda i: (0, 0, 0)),
                pl.BlockSpec((nm, Din, Dout), lambda i: (0, 0, 0)),
            ],
            out_specs=[
                pl.BlockSpec((nm, B, Dout), lambda i: (0, 0, 0)),
                pl.BlockSpec((nm, B, Dout), lambda i: (0, 0, 0)),
            ],
        ),
        compiler_params=pltpu.CompilerParams(dimension_semantics=("arbitrary",)),
        cost_estimate=cost,
    )(xr, xi, wr, wi)


# ----------------------------- MWT building blocks (JAX glue + Pallas) ----------
def wavelet_transform_2d(x, ec_ds):
    """Fused ec_d / ec_s matmul (single pallas_call); returns (d, s)."""
    xa = jnp.concatenate(
        [x[:, ::2, ::2, :, :], x[:, ::2, 1::2, :, :],
         x[:, 1::2, ::2, :, :], x[:, 1::2, 1::2, :, :]],
        axis=-1)                                                  # (B, Nx/2, Ny/2, c, 4k^2)
    B, nx, ny, cc, four_k2 = xa.shape
    k2 = four_k2 // 4
    ds = pallas_linear(xa.reshape(-1, four_k2), ec_ds)            # (M, 2k^2) = [d | s]
    ds = ds.reshape(B, nx, ny, cc, 2, k2)
    return ds[..., 0, :], ds[..., 1, :]


def fused_spectral(d, x, wr_full, wi_full, modes):
    """Fused A(d)+B(x) and C(d) sparseKernelFT2d kernels for one wavelet level.

    Shares one rfft2 over [d;x] channels and one irfft2 over [Ud;Us] channels;
    both Fourier corners and all modes are mixed in a single Pallas call.
    The corner-2 write overwrites corner-1 where the ranges overlap (Nx == l1),
    exactly mirroring the reference out_ft indexing.
    """
    B, Nx, Ny, cc, ich = d.shape
    Dch = cc * ich
    Nyh = Ny // 2 + 1
    l1 = min(modes, Nx // 2 + 1)
    l2 = min(modes, Nyh)

    dx = jnp.concatenate([d.reshape(B, Nx, Ny, Dch), x.reshape(B, Nx, Ny, Dch)], axis=-1)
    dx = dx.transpose(0, 3, 1, 2)                                  # (B, 2D, Nx, Ny)
    dx_ft = jnp.fft.rfft2(dx)                                      # (B, 2D, Nx, Nyh)

    c1 = dx_ft[:, :, :l1, :l2]
    c2 = dx_ft[:, :, Nx - l1:, :l2]
    xin = jnp.stack([c1, c2], axis=0)                              # (2, B, 2D, l1, l2)
    xin = xin.transpose(0, 3, 4, 1, 2).reshape(2 * l1 * l2, B, 2 * Dch)
    xr = jnp.real(xin)
    xi = jnp.imag(xin)

    wr = wr_full[:, :l1, :l2].reshape(2 * l1 * l2, 2 * Dch, 2 * Dch)
    wi = wi_full[:, :l1, :l2].reshape(2 * l1 * l2, 2 * Dch, 2 * Dch)

    o_r, o_i = pallas_cmix(xr, xi, wr, wi)                         # (nblk, B, 2D) each
    o = lax.complex(o_r, o_i)
    o = o.reshape(2, l1, l2, B, 2 * Dch).transpose(0, 3, 4, 1, 2)  # (2, B, 2D, l1, l2)

    out_ft = jnp.zeros((B, 2 * Dch, Nx, Nyh), jnp.complex64)
    out_ft = out_ft.at[:, :, :l1, :l2].set(o[0])
    out_ft = out_ft.at[:, :, Nx - l1:, :l2].set(o[1])              # overwrite-on-overlap

    y = jnp.fft.irfft2(out_ft, s=(Nx, Ny)).astype(d.dtype)         # (B, 2D, Nx, Ny)
    y = y.transpose(0, 2, 3, 1)                                    # (B, Nx, Ny, 2D)
    ud = y[..., :Dch].reshape(B, Nx, Ny, cc, ich)
    us = y[..., Dch:].reshape(B, Nx, Ny, cc, ich)
    return ud, us


def even_odd_2d(x, rc_all):
    B, Nx, Ny, cc, ich = x.shape                                  # ich == 2*k^2
    k2 = ich // 2
    y = pallas_linear(x.reshape(-1, ich), rc_all)                 # (M, 4*k^2)
    y = y.reshape(B, Nx, Ny, cc, 4, k2)
    x_ee, x_eo, x_oe, x_oo = y[..., 0, :], y[..., 1, :], y[..., 2, :], y[..., 3, :]
    # interleave even/odd on both spatial axes: out[2i+p, 2j+q] = x_{pq}[i, j]
    row0 = jnp.stack([x_ee, x_eo], axis=3)                        # (B, Nx, Ny, 2, c, k2)
    row1 = jnp.stack([x_oe, x_oo], axis=3)
    t = jnp.stack([row0, row1], axis=2)                           # (B, Nx, 2, Ny, 2, c, k2)
    return t.reshape(B, Nx * 2, Ny * 2, cc, k2)


def mwt_cz2d(x, lp, L, modes):
    """One MWT_CZ2d spectral layer (decompose -> spectral kernels -> reconstruct)."""
    B, Nx, Ny, cc, ich = x.shape
    ns = int(math.floor(math.log2(Nx)))
    Ud, Us = [], []
    for _ in range(ns - L):
        d, x = wavelet_transform_2d(x, lp['ec_ds'])
        ud, us = fused_spectral(d, x, lp['spec_wr'], lp['spec_wi'], modes)
        Ud.append(ud)
        Us.append(us)
    nL = 2 ** L
    xf = pallas_linear(x.reshape(B * nL * nL, cc * ich), lp['T0_w'], lp['T0_b'])
    x = xf.reshape(B, nL, nL, cc, ich)
    for i in range(ns - 1 - L, -1, -1):
        x = x + Us[i]
        x = jnp.concatenate([x, Ud[i]], axis=-1)
        x = even_odd_2d(x, lp['rc_all'])
    return x


# ----------------------------- Model forward (structured_geo) -------------------
def model_forward(params, x, fx):
    B, N, _ = x.shape
    Hs, Ws = SHAPELIST
    Ht, Wt = AUG_RES
    # preprocess = MLP(fun_dim+space_dim, 2*n_hidden, WMT_dim, n_layers=0): Lin -> GELU -> Lin
    inp = jnp.concatenate([x, fx], axis=-1).reshape(B * N, -1)
    fx2 = pallas_mlp2(inp, params['pre_w1'], params['pre_b1'],
                      params['pre_w2'], params['pre_b2'])
    fx2 = fx2.reshape(B, N, WMT_DIM)

    # permute/reshape to grid; padding == [0, 0] so F.pad is skipped (as in the reference)
    xg = jnp.transpose(fx2, (0, 2, 1)).reshape(B, WMT_DIM, Hs, Ws)
    xg = xg.reshape(B, WMT_DIM, -1).transpose(0, 2, 1).reshape(B, Ht, Wt, C, K2)

    for i in range(N_LAYERS):
        xg = mwt_cz2d(xg, params['layers'][i], L_LEVEL, MODES)
        if i < N_LAYERS - 1:
            xg = exact_gelu(xg)

    xg = xg.reshape(B, -1, WMT_DIM).transpose(0, 2, 1).reshape(B, WMT_DIM, Ht, Wt)
    xg = xg.reshape(B, WMT_DIM, -1).transpose(0, 2, 1)            # (B, N, WMT_dim)

    # output head: fc1 -> GELU -> fc2, fused in one kernel
    out = pallas_mlp2(xg.reshape(B * N, WMT_DIM), params['fc1_w'], params['fc1_b'],
                      params['fc2_w'], params['fc2_b'])
    return out.reshape(B, N, OUT_DIM)


# ----------------------------- parameter init + packing -------------------------
def _combine_spectral_weights(lp):
    """Build per-corner block weight [[A, C], [B, 0]]: (2, MODES, MODES, 2D, 2D)."""
    def corner(aw, bw, cw):
        a = jnp.transpose(aw, (2, 3, 0, 1))      # (M, M, Din, Dout)
        b = jnp.transpose(bw, (2, 3, 0, 1))
        c = jnp.transpose(cw, (2, 3, 0, 1))
        z = jnp.zeros_like(a)
        top = jnp.concatenate([a, c], axis=-1)   # d-input rows -> [Ud | Us]
        bot = jnp.concatenate([b, z], axis=-1)   # x-input rows -> [Ud | 0 ]
        return jnp.concatenate([top, bot], axis=-2)
    wr = jnp.stack([corner(lp['A_w1r'], lp['B_w1r'], lp['C_w1r']),
                    corner(lp['A_w2r'], lp['B_w2r'], lp['C_w2r'])], axis=0)
    wi = jnp.stack([corner(lp['A_w1i'], lp['B_w1i'], lp['C_w1i']),
                    corner(lp['A_w2i'], lp['B_w2i'], lp['C_w2i'])], axis=0)
    return wr, wi


def init_params(key):
    keys = iter(jax.random.split(key, 128))

    def nrm(shape, scale=0.1):
        return scale * jax.random.normal(next(keys), shape, jnp.float32)

    p = {
        'pre_w1': nrm((FUN_DIM + SPACE_DIM, 2 * N_HIDDEN)), 'pre_b1': nrm((2 * N_HIDDEN,)),
        'pre_w2': nrm((2 * N_HIDDEN, WMT_DIM)), 'pre_b2': nrm((WMT_DIM,)),
        'fc1_w': nrm((WMT_DIM, N_HIDDEN)), 'fc1_b': nrm((N_HIDDEN,)),
        'fc2_w': nrm((N_HIDDEN, OUT_DIM)), 'fc2_b': nrm((OUT_DIM,)),
    }
    layers = []
    for _ in range(N_LAYERS):
        lp = {
            # filter-derived buffers (placeholder deterministic init, see TODO above)
            'ec_d': nrm((4 * K2, K2)), 'ec_s': nrm((4 * K2, K2)),
            'rc_ee': nrm((2 * K2, K2)), 'rc_eo': nrm((2 * K2, K2)),
            'rc_oe': nrm((2 * K2, K2)), 'rc_oo': nrm((2 * K2, K2)),
            'T0_w': nrm((D, D)), 'T0_b': nrm((D,)),
        }
        for nm in ('A', 'B', 'C'):
            lp[f'{nm}_w1r'] = nrm((D, D, MODES, MODES))
            lp[f'{nm}_w1i'] = nrm((D, D, MODES, MODES))
            lp[f'{nm}_w2r'] = nrm((D, D, MODES, MODES))
            lp[f'{nm}_w2i'] = nrm((D, D, MODES, MODES))
        # --- one-time packing of fused weight buffers (out of the forward graph) ---
        lp['ec_ds'] = jnp.concatenate([lp['ec_d'], lp['ec_s']], axis=1)
        lp['rc_all'] = jnp.concatenate([lp['rc_ee'], lp['rc_eo'],
                                        lp['rc_oe'], lp['rc_oo']], axis=1)
        lp['spec_wr'], lp['spec_wi'] = _combine_spectral_weights(lp)
        layers.append(lp)
    p['layers'] = layers
    return p


# ----------------------------- main ----------------------------------------------
if __name__ == "__main__":
    key = jax.random.PRNGKey(0)
    kp, kx, kf = jax.random.split(key, 3)
    params = init_params(kp)
    x = jax.random.normal(kx, (BATCH, N_POINTS, SPACE_DIM), jnp.float32)   # coordinates
    fx = jax.random.normal(kf, (BATCH, N_POINTS, FUN_DIM), jnp.float32)    # input fields

    fwd = jax.jit(model_forward)
    out = fwd(params, x, fx)
    jax.block_until_ready(out)
    assert out.shape == (BATCH, N_POINTS, OUT_DIM)
    assert bool(jnp.all(jnp.isfinite(out)))
    print("KERNEL_OK")
</pallas_src>

<mosaic_0001>
module attributes {stable_mosaic.version = 11 : i64} {
  func.func @_mlp2_kernel(%arg0: i32, %arg1: memref<512x6xf32, #tpu.memory_space<vmem>>, %arg2: memref<6x64xf32, #tpu.memory_space<vmem>>, %arg3: memref<1x64xf32, #tpu.memory_space<vmem>>, %arg4: memref<64x4xf32, #tpu.memory_space<vmem>>, %arg5: memref<1x4xf32, #tpu.memory_space<vmem>>, %arg6: memref<512x4xf32, #tpu.memory_space<vmem>>) attributes {dimension_semantics = [#tpu.dimension_semantics<arbitrary>], iteration_bounds = array<i64: 1>, scalar_prefetch = 0 : i64, scratch_operands = 0 : i64, tpu.core_type = #tpu.core_type<tc>, window_params = [{pipeline_mode = #tpu.pipeline_mode<synchronous>, transform_indices = @transform_0, window_bounds = array<i64: 512, 6>}, {pipeline_mode = #tpu.pipeline_mode<synchronous>, transform_indices = @transform_1, window_bounds = array<i64: 6, 64>}, {pipeline_mode = #tpu.pipeline_mode<synchronous>, transform_indices = @transform_2, window_bounds = array<i64: 1, 64>}, {pipeline_mode = #tpu.pipeline_mode<synchronous>, transform_indices = @transform_3, window_bounds = array<i64: 64, 4>}, {pipeline_mode = #tpu.pipeline_mode<synchronous>, transform_indices = @transform_4, window_bounds = array<i64: 1, 4>}, {pipeline_mode = #tpu.pipeline_mode<synchronous>, transform_indices = @transform_5, window_bounds = array<i64: 512, 4>}]} {
    %c0 = arith.constant 0 : index
    %c0_0 = arith.constant 0 : index
    %0 = vector.load %arg1[%c0, %c0_0] : memref<512x6xf32, #tpu.memory_space<vmem>>, vector<512x6xf32>
    %c0_1 = arith.constant 0 : index
    %c0_2 = arith.constant 0 : index
    %1 = vector.load %arg2[%c0_1, %c0_2] : memref<6x64xf32, #tpu.memory_space<vmem>>, vector<6x64xf32>
    %cst = arith.constant dense<0.000000e+00> : vector<512x64xf32>
    %2 = tpu.matmul %0, %1, %cst {dimension_numbers = #tpu.dot_dimension_numbers<[1], [0], [0], [1], [0, 0, 1, 1], [], []>} : vector<512x6xf32>, vector<6x64xf32>, vector<512x64xf32> -> vector<512x64xf32>
    %c0_3 = arith.constant 0 : index
    %c0_4 = arith.constant 0 : index
    %3 = vector.load %arg3[%c0_3, %c0_4] : memref<1x64xf32, #tpu.memory_space<vmem>>, vector<1x64xf32>
    %4 = vector.broadcast %3 : vector<1x64xf32> to vector<512x64xf32>
    %5 = arith.addf %2, %4 : vector<512x64xf32>
    %cst_5 = arith.constant 5.000000e-01 : f32
    %6 = vector.broadcast %cst_5 : f32 to vector<512x64xf32>
    %7 = arith.mulf %6, %5 : vector<512x64xf32>
    %cst_6 = arith.constant 0.707106769 : f32
    %8 = vector.broadcast %cst_6 : f32 to vector<512x64xf32>
    %9 = arith.mulf %5, %8 : vector<512x64xf32>
    %10 = math.absf %9 : vector<512x64xf32>
    %cst_7 = arith.constant 0.327591091 : f32
    %11 = vector.broadcast %cst_7 : f32 to vector<512x64xf32>
    %12 = arith.mulf %11, %10 : vector<512x64xf32>
    %cst_8 = arith.constant 1.000000e+00 : f32
    %13 = vector.broadcast %cst_8 : f32 to vector<512x64xf32>
    %14 = arith.addf %13, %12 : vector<512x64xf32>
    %cst_9 = arith.constant 1.000000e+00 : f32
    %15 = vector.broadcast %cst_9 : f32 to vector<512x64xf32>
    %16 = arith.divf %15, %14 : vector<512x64xf32>
    %cst_10 = arith.constant 1.06140542 : f32
    %17 = vector.broadcast %cst_10 : f32 to vector<512x64xf32>
    %18 = arith.mulf %17, %16 : vector<512x64xf32>
    %cst_11 = arith.constant -1.45315206 : f32
    %19 = vector.broadcast %cst_11 : f32 to vector<512x64xf32>
    %20 = arith.addf %18, %19 : vector<512x64xf32>
    %21 = arith.mulf %20, %16 : vector<512x64xf32>
    %cst_12 = arith.constant 1.42141378 : f32
    %22 = vector.broadcast %cst_12 : f32 to vector<512x64xf32>
    %23 = arith.addf %21, %22 : vector<512x64xf32>
    %24 = arith.mulf %23, %16 : vector<512x64xf32>
    %cst_13 = arith.constant -0.284496725 : f32
    %25 = vector.broadcast %cst_13 : f32 to vector<512x64xf32>
    %26 = arith.addf %24, %25 : vector<512x64xf32>
    %27 = arith.mulf %26, %16 : vector<512x64xf32>
    %cst_14 = arith.constant 0.254829586 : f32
    %28 = vector.broadcast %cst_14 : f32 to vector<512x64xf32>
    %29 = arith.addf %27, %28 : vector<512x64xf32>
    %30 = arith.mulf %29, %16 : vector<512x64xf32>
    %cst_15 = arith.constant 0.000000e+00 : f32
    %31 = vector.broadcast %cst_15 : f32 to vector<512x64xf32>
    %32 = arith.subf %31, %10 : vector<512x64xf32>
    %33 = arith.mulf %32, %10 : vector<512x64xf32>
    %34 = math.exp %33 : vector<512x64xf32>
    %35 = arith.mulf %30, %34 : vector<512x64xf32>
    %cst_16 = arith.constant 1.000000e+00 : f32
    %36 = vector.broadcast %cst_16 : f32 to vector<512x64xf32>
    %37 = arith.subf %36, %35 : vector<512x64xf32>
    %cst_17 = arith.constant 0.000000e+00 : f32
    %38 = vector.broadcast %cst_17 : f32 to vector<512x64xf32>
    %39 = arith.cmpf oge, %9, %38 : vector<512x64xf32>
    %cst_18 = arith.constant 0.000000e+00 : f32
    %40 = vector.broadcast %cst_18 : f32 to vector<512x64xf32>
    %41 = arith.subf %40, %37 : vector<512x64xf32>
    %42 = arith.select %39, %37, %41 : vector<512x64xi1>, vector<512x64xf32>
    %cst_19 = arith.constant 1.000000e+00 : f32
    %43 = vector.broadcast %cst_19 : f32 to vector<512x64xf32>
    %44 = arith.addf %43, %42 : vector<512x64xf32>
    %45 = arith.mulf %7, %44 : vector<512x64xf32>
    %c0_20 = arith.constant 0 : index
    %c0_21 = arith.constant 0 : index
    %46 = vector.load %arg4[%c0_20, %c0_21] : memref<64x4xf32, #tpu.memory_space<vmem>>, vector<64x4xf32>
    %cst_22 = arith.constant dense<0.000000e+00> : vector<512x4xf32>
    %47 = tpu.matmul %45, %46, %cst_22 {dimension_numbers = #tpu.dot_dimension_numbers<[1], [0], [0], [1], [0, 0, 1, 1], [], []>} : vector<512x64xf32>, vector<64x4xf32>, vector<512x4xf32> -> vector<512x4xf32>
    %c0_23 = arith.constant 0 : index
    %c0_24 = arith.constant 0 : index
    %48 = vector.load %arg5[%c0_23, %c0_24] : memref<1x4xf32, #tpu.memory_space<vmem>>, vector<1x4xf32>
    %49 = vector.broadcast %48 : vector<1x4xf32> to vector<512x4xf32>
    %50 = arith.addf %47, %49 : vector<512x4xf32>
    %c0_25 = arith.constant 0 : index
    %c0_26 = arith.constant 0 : index
    %51 = vector.load %arg6[%c0_25, %c0_26] : memref<512x4xf32, #tpu.memory_space<vmem>>, vector<512x4xf32>
    tpu.vector_store %arg6[%c0_25, %c0_26], %50 {strides = array<i32>} : memref<512x4xf32, #tpu.memory_space<vmem>>, vector<512x4xf32>,
    return
  }
  func.func @transform_0(%arg0: i32) -> (i32, i32) {
    %c0_i32 = arith.constant 0 : i32
    %c0_i32_0 = arith.constant 0 : i32
    %c0_i32_1 = arith.constant 0 : i32
    return %c0_i32, %c0_i32_0 : i32, i32
  }
  func.func @transform_1(%arg0: i32) -> (i32, i32) {
    %c0_i32 = arith.constant 0 : i32
    %c0_i32_0 = arith.constant 0 : i32
    %c0_i32_1 = arith.constant 0 : i32
    return %c0_i32, %c0_i32_0 : i32, i32
  }
  func.func @transform_2(%arg0: i32) -> (i32, i32) {
    %c0_i32 = arith.constant 0 : i32
    %c0_i32_0 = arith.constant 0 : i32
    %c0_i32_1 = arith.constant 0 : i32
    return %c0_i32, %c0_i32_0 : i32, i32
  }
  func.func @transform_3(%arg0: i32) -> (i32, i32) {
    %c0_i32 = arith.constant 0 : i32
    %c0_i32_0 = arith.constant 0 : i32
    %c0_i32_1 = arith.constant 0 : i32
    return %c0_i32, %c0_i32_0 : i32, i32
  }
  func.func @transform_4(%arg0: i32) -> (i32, i32) {
    %c0_i32 = arith.constant 0 : i32
    %c0_i32_0 = arith.constant 0 : i32
    %c0_i32_1 = arith.constant 0 : i32
    return %c0_i32, %c0_i32_0 : i32, i32
  }
  func.func @transform_5(%arg0: i32) -> (i32, i32) {
    %c0_i32 = arith.constant 0 : i32
    %c0_i32_0 = arith.constant 0 : i32
    %c0_i32_1 = arith.constant 0 : i32
    return %c0_i32, %c0_i32_0 : i32, i32
  }
}

module attributes {stable_mosaic.version = 11 : i64} {
  func.func @_linear_kernel(%arg0: i32, %arg1: memref<128x16xf32, #tpu.memory_space<vmem>>, %arg2: memref<16x8xf32, #tpu.memory_space<vmem>>, %arg3: memref<1x8xf32, #tpu.memory_space<vmem>>, %arg4: memref<128x8xf32, #tpu.memory_space<vmem>>) attributes {dimension_semantics = [#tpu.dimension_semantics<arbitrary>], iteration_bounds = array<i64: 1>, scalar_prefetch = 0 : i64, scratch_operands = 0 : i64, tpu.core_type = #tpu.core_type<tc>, window_params = [{transform_indices = @transform_0, window_bounds = array<i64: 128, 16>}, {pipeline_mode = #tpu.pipeline_mode<synchronous>, transform_indices = @transform_1, window_bounds = array<i64: 16, 8>}, {pipeline_mode = #tpu.pipeline_mode<synchronous>, transform_indices = @transform_2, window_bounds = array<i64: 1, 8>}, {transform_indices = @transform_3, window_bounds = array<i64: 128, 8>}]} {
    %c0 = arith.constant 0 : index
    %c0_0 = arith.constant 0 : index
    %0 = vector.load %arg1[%c0, %c0_0] : memref<128x16xf32, #tpu.memory_space<vmem>>, vector<128x16xf32>
    %c0_1 = arith.constant 0 : index
    %c0_2 = arith.constant 0 : index
    %1 = vector.load %arg2[%c0_1, %c0_2] : memref<16x8xf32, #tpu.memory_space<vmem>>, vector<16x8xf32>
    %cst = arith.constant dense<0.000000e+00> : vector<128x8xf32>
    %2 = tpu.matmul %0, %1, %cst {dimension_numbers = #tpu.dot_dimension_numbers<[1], [0], [0], [1], [0, 0, 1, 1], [], []>} : vector<128x16xf32>, vector<16x8xf32>, vector<128x8xf32> -> vector<128x8xf32>
    %c0_3 = arith.constant 0 : index
    %c0_4 = arith.constant 0 : index
    %3 = vector.load %arg3[%c0_3, %c0_4] : memref<1x8xf32, #tpu.memory_space<vmem>>, vector<1x8xf32>
    %4 = vector.broadcast %3 : vector<1x8xf32> to vector<128x8xf32>
    %5 = arith.addf %2, %4 : vector<128x8xf32>
    %c0_5 = arith.constant 0 : index
    %c0_6 = arith.constant 0 : index
    %6 = vector.load %arg4[%c0_5, %c0_6] : memref<128x8xf32, #tpu.memory_space<vmem>>, vector<128x8xf32>
    tpu.vector_store %arg4[%c0_5, %c0_6], %5 {strides = array<i32>} : memref<128x8xf32, #tpu.memory_space<vmem>>, vector<128x8xf32>,
    return
  }
  func.func @transform_0(%arg0: i32) -> (i32, i32) {
    %c0_i32 = arith.constant 0 : i32
    %c0_i32_0 = arith.constant 0 : i32
    return %arg0, %c0_i32 : i32, i32
  }
  func.func @transform_1(%arg0: i32) -> (i32, i32) {
    %c0_i32 = arith.constant 0 : i32
    %c0_i32_0 = arith.constant 0 : i32
    %c0_i32_1 = arith.constant 0 : i32
    return %c0_i32, %c0_i32_0 : i32, i32
  }
  func.func @transform_2(%arg0: i32) -> (i32, i32) {
    %c0_i32 = arith.constant 0 : i32
    %c0_i32_0 = arith.constant 0 : i32
    %c0_i32_1 = arith.constant 0 : i32
    return %c0_i32, %c0_i32_0 : i32, i32
  }
  func.func @transform_3(%arg0: i32) -> (i32, i32) {
    %c0_i32 = arith.constant 0 : i32
    %c0_i32_0 = arith.constant 0 : i32
    return %arg0, %c0_i32 : i32, i32
  }
}

module attributes {stable_mosaic.version = 11 : i64} {
  func.func @_cmix_kernel(%arg0: i32, %arg1: memref<8x2x8xf32, #tpu.memory_space<vmem>>, %arg2: memref<8x2x8xf32, #tpu.memory_space<vmem>>, %arg3: memref<8x8x8xf32, #tpu.memory_space<vmem>>, %arg4: memref<8x8x8xf32, #tpu.memory_space<vmem>>, %arg5: memref<8x2x8xf32, #tpu.memory_space<vmem>>, %arg6: memref<8x2x8xf32, #tpu.memory_space<vmem>>) attributes {dimension_semantics = [#tpu.dimension_semantics<arbitrary>], iteration_bounds = array<i64: 1>, scalar_prefetch = 0 : i64, scratch_operands = 0 : i64, tpu.core_type = #tpu.core_type<tc>, window_params = [{pipeline_mode = #tpu.pipeline_mode<synchronous>, transform_indices = @transform_0, window_bounds = array<i64: 8, 2, 8>}, {pipeline_mode = #tpu.pipeline_mode<synchronous>, transform_indices = @transform_1, window_bounds = array<i64: 8, 2, 8>}, {pipeline_mode = #tpu.pipeline_mode<synchronous>, transform_indices = @transform_2, window_bounds = array<i64: 8, 8, 8>}, {pipeline_mode = #tpu.pipeline_mode<synchronous>, transform_indices = @transform_3, window_bounds = array<i64: 8, 8, 8>}, {pipeline_mode = #tpu.pipeline_mode<synchronous>, transform_indices = @transform_4, window_bounds = array<i64: 8, 2, 8>}, {pipeline_mode = #tpu.pipeline_mode<synchronous>, transform_indices = @transform_5, window_bounds = array<i64: 8, 2, 8>}]} {
    %c0 = arith.constant 0 : index
    %c0_0 = arith.constant 0 : index
    %c0_1 = arith.constant 0 : index
    %0 = vector.load %arg1[%c0, %c0_0, %c0_1] : memref<8x2x8xf32, #tpu.memory_space<vmem>>, vector<8x2x8xf32>
    %c0_2 = arith.constant 0 : index
    %c0_3 = arith.constant 0 : index
    %c0_4 = arith.constant 0 : index
    %1 = vector.load %arg2[%c0_2, %c0_3, %c0_4] : memref<8x2x8xf32, #tpu.memory_space<vmem>>, vector<8x2x8xf32>
    %c0_5 = arith.constant 0 : index
    %c0_6 = arith.constant 0 : index
    %c0_7 = arith.constant 0 : index
    %2 = vector.load %arg3[%c0_5, %c0_6, %c0_7] : memref<8x8x8xf32, #tpu.memory_space<vmem>>, vector<8x8x8xf32>
    %c0_8 = arith.constant 0 : index
    %c0_9 = arith.constant 0 : index
    %c0_10 = arith.constant 0 : index
    %3 = vector.load %arg4[%c0_8, %c0_9, %c0_10] : memref<8x8x8xf32, #tpu.memory_space<vmem>>, vector<8x8x8xf32>
    "tpu.trace_start"() <{level = 10 : i32, message = "mbi,mio->mbo"}> : () -> ()
    %cst = arith.constant dense<0.000000e+00> : vector<8x2x8xf32>
    %4 = tpu.matmul %0, %2, %cst {dimension_numbers = #tpu.dot_dimension_numbers<[2], [1], [1], [2], [0, 0, 0, 1, 1, 2], [0], [0]>} : vector<8x2x8xf32>, vector<8x8x8xf32>, vector<8x2x8xf32> -> vector<8x2x8xf32>
    %cst_11 = arith.constant dense<0.000000e+00> : vector<8x2x8xf32>
    %5 = tpu.matmul %1, %3, %cst_11 {dimension_numbers = #tpu.dot_dimension_numbers<[2], [1], [1], [2], [0, 0, 0, 1, 1, 2], [0], [0]>} : vector<8x2x8xf32>, vector<8x8x8xf32>, vector<8x2x8xf32> -> vector<8x2x8xf32>
    "tpu.trace_stop"() : () -> ()
    %6 = arith.addf %0, %1 : vector<8x2x8xf32>
    %7 = arith.addf %2, %3 : vector<8x8x8xf32>
    "tpu.trace_start"() <{level = 10 : i32, message = "mbi,mio->mbo"}> : () -> ()
    %cst_12 = arith.constant dense<0.000000e+00> : vector<8x2x8xf32>
    %8 = tpu.matmul %6, %7, %cst_12 {dimension_numbers = #tpu.dot_dimension_numbers<[2], [1], [1], [2], [0, 0, 0, 1, 1, 2], [0], [0]>} : vector<8x2x8xf32>, vector<8x8x8xf32>, vector<8x2x8xf32> -> vector<8x2x8xf32>
    "tpu.trace_stop"() : () -> ()
    %9 = arith.subf %4, %5 : vector<8x2x8xf32>
    %c0_13 = arith.constant 0 : index
    %c0_14 = arith.constant 0 : index
    %c0_15 = arith.constant 0 : index
    %10 = vector.load %arg5[%c0_13, %c0_14, %c0_15] : memref<8x2x8xf32, #tpu.memory_space<vmem>>, vector<8x2x8xf32>
    tpu.vector_store %arg5[%c0_13, %c0_14, %c0_15], %9 {strides = array<i32>} : memref<8x2x8xf32, #tpu.memory_space<vmem>>, vector<8x2x8xf32>,
    %11 = arith.subf %8, %4 : vector<8x2x8xf32>
    %12 = arith.subf %11, %5 : vector<8x2x8xf32>
    %c0_16 = arith.constant 0 : index
    %c0_17 = arith.constant 0 : index
    %c0_18 = arith.constant 0 : index
    %13 = vector.load %arg6[%c0_16, %c0_17, %c0_18] : memref<8x2x8xf32, #tpu.memory_space<vmem>>, vector<8x2x8xf32>
    tpu.vector_store %arg6[%c0_16, %c0_17, %c0_18], %12 {strides = array<i32>} : memref<8x2x8xf32, #tpu.memory_space<vmem>>, vector<8x2x8xf32>,
    return
  }
  func.func @transform_0(%arg0: i32) -> (i32, i32, i32) {
    %c0_i32 = arith.constant 0 : i32
    %c0_i32_0 = arith.constant 0 : i32
    %c0_i32_1 = arith.constant 0 : i32
    %c0_i32_2 = arith.constant 0 : i32
    return %c0_i32, %c0_i32_0, %c0_i32_1 : i32, i32, i32
  }
  func.func @transform_1(%arg0: i32) -> (i32, i32, i32) {
    %c0_i32 = arith.constant 0 : i32
    %c0_i32_0 = arith.constant 0 : i32
    %c0_i32_1 = arith.constant 0 : i32
    %c0_i32_2 = arith.constant 0 : i32
    return %c0_i32, %c0_i32_0, %c0_i32_1 : i32, i32, i32
  }
  func.func @transform_2(%arg0: i32) -> (i32, i32, i32) {
    %c0_i32 = arith.constant 0 : i32
    %c0_i32_0 = arith.constant 0 : i32
    %c0_i32_1 = arith.constant 0 : i32
    %c0_i32_2 = arith.constant 0 : i32
    return %c0_i32, %c0_i32_0, %c0_i32_1 : i32, i32, i32
  }
  func.func @transform_3(%arg0: i32) -> (i32, i32, i32) {
    %c0_i32 = arith.constant 0 : i32
    %c0_i32_0 = arith.constant 0 : i32
    %c0_i32_1 = arith.constant 0 : i32
    %c0_i32_2 = arith.constant 0 : i32
    return %c0_i32, %c0_i32_0, %c0_i32_1 : i32, i32, i32
  }
  func.func @transform_4(%arg0: i32) -> (i32, i32, i32) {
    %c0_i32 = arith.constant 0 : i32
    %c0_i32_0 = arith.constant 0 : i32
    %c0_i32_1 = arith.constant 0 : i32
    %c0_i32_2 = arith.constant 0 : i32
    return %c0_i32, %c0_i32_0, %c0_i32_1 : i32, i32, i32
  }
  func.func @transform_5(%arg0: i32) -> (i32, i32, i32) {
    %c0_i32 = arith.constant 0 : i32
    %c0_i32_0 = arith.constant 0 : i32
    %c0_i32_1 = arith.constant 0 : i32
    %c0_i32_2 = arith.constant 0 : i32
    return %c0_i32, %c0_i32_0, %c0_i32_1 : i32, i32, i32
  }
}

module attributes {stable_mosaic.version = 11 : i64} {
  func.func @_linear_kernel(%arg0: i32, %arg1: memref<32x16xf32, #tpu.memory_space<vmem>>, %arg2: memref<16x8xf32, #tpu.memory_space<vmem>>, %arg3: memref<1x8xf32, #tpu.memory_space<vmem>>, %arg4: memref<32x8xf32, #tpu.memory_space<vmem>>) attributes {dimension_semantics = [#tpu.dimension_semantics<arbitrary>], iteration_bounds = array<i64: 1>, scalar_prefetch = 0 : i64, scratch_operands = 0 : i64, tpu.core_type = #tpu.core_type<tc>, window_params = [{transform_indices = @transform_0, window_bounds = array<i64: 32, 16>}, {pipeline_mode = #tpu.pipeline_mode<synchronous>, transform_indices = @transform_1, window_bounds = array<i64: 16, 8>}, {pipeline_mode = #tpu.pipeline_mode<synchronous>, transform_indices = @transform_2, window_bounds = array<i64: 1, 8>}, {transform_indices = @transform_3, window_bounds = array<i64: 32, 8>}]} {
    %c0 = arith.constant 0 : index
    %c0_0 = arith.constant 0 : index
    %0 = vector.load %arg1[%c0, %c0_0] : memref<32x16xf32, #tpu.memory_space<vmem>>, vector<32x16xf32>
    %c0_1 = arith.constant 0 : index
    %c0_2 = arith.constant 0 : index
    %1 = vector.load %arg2[%c0_1, %c0_2] : memref<16x8xf32, #tpu.memory_space<vmem>>, vector<16x8xf32>
    %cst = arith.constant dense<0.000000e+00> : vector<32x8xf32>
    %2 = tpu.matmul %0, %1, %cst {dimension_numbers = #tpu.dot_dimension_numbers<[1], [0], [0], [1], [0, 0, 1, 1], [], []>} : vector<32x16xf32>, vector<16x8xf32>, vector<32x8xf32> -> vector<32x8xf32>
    %c0_3 = arith.constant 0 : index
    %c0_4 = arith.constant 0 : index
    %3 = vector.load %arg3[%c0_3, %c0_4] : memref<1x8xf32, #tpu.memory_space<vmem>>, vector<1x8xf32>
    %4 = vector.broadcast %3 : vector<1x8xf32> to vector<32x8xf32>
    %5 = arith.addf %2, %4 : vector<32x8xf32>
    %c0_5 = arith.constant 0 : index
    %c0_6 = arith.constant 0 : index
    %6 = vector.load %arg4[%c0_5, %c0_6] : memref<32x8xf32, #tpu.memory_space<vmem>>, vector<32x8xf32>
    tpu.vector_store %arg4[%c0_5, %c0_6], %5 {strides = array<i32>} : memref<32x8xf32, #tpu.memory_space<vmem>>, vector<32x8xf32>,
    return
  }
  func.func @transform_0(%arg0: i32) -> (i32, i32) {
    %c0_i32 = arith.constant 0 : i32
    %c0_i32_0 = arith.constant 0 : i32
    return %arg0, %c0_i32 : i32, i32
  }
  func.func @transform_1(%arg0: i32) -> (i32, i32) {
    %c0_i32 = arith.constant 0 : i32
    %c0_i32_0 = arith.constant 0 : i32
    %c0_i32_1 = arith.constant 0 : i32
    return %c0_i32, %c0_i32_0 : i32, i32
  }
  func.func @transform_2(%arg0: i32) -> (i32, i32) {
    %c0_i32 = arith.constant 0 : i32
    %c0_i32_0 = arith.constant 0 : i32
    %c0_i32_1 = arith.constant 0 : i32
    return %c0_i32, %c0_i32_0 : i32, i32
  }
  func.func @transform_3(%arg0: i32) -> (i32, i32) {
    %c0_i32 = arith.constant 0 : i32
    %c0_i32_0 = arith.constant 0 : i32
    return %arg0, %c0_i32 : i32, i32
  }
}

module attributes {stable_mosaic.version = 11 : i64} {
  func.func @_linear_kernel(%arg0: i32, %arg1: memref<8x16xf32, #tpu.memory_space<vmem>>, %arg2: memref<16x8xf32, #tpu.memory_space<vmem>>, %arg3: memref<1x8xf32, #tpu.memory_space<vmem>>, %arg4: memref<8x8xf32, #tpu.memory_space<vmem>>) attributes {dimension_semantics = [#tpu.dimension_semantics<arbitrary>], iteration_bounds = array<i64: 1>, scalar_prefetch = 0 : i64, scratch_operands = 0 : i64, tpu.core_type = #tpu.core_type<tc>, window_params = [{transform_indices = @transform_0, window_bounds = array<i64: 8, 16>}, {pipeline_mode = #tpu.pipeline_mode<synchronous>, transform_indices = @transform_1, window_bounds = array<i64: 16, 8>}, {pipeline_mode = #tpu.pipeline_mode<synchronous>, transform_indices = @transform_2, window_bounds = array<i64: 1, 8>}, {transform_indices = @transform_3, window_bounds = array<i64: 8, 8>}]} {
    %c0 = arith.constant 0 : index
    %c0_0 = arith.constant 0 : index
    %0 = vector.load %arg1[%c0, %c0_0] : memref<8x16xf32, #tpu.memory_space<vmem>>, vector<8x16xf32>
    %c0_1 = arith.constant 0 : index
    %c0_2 = arith.constant 0 : index
    %1 = vector.load %arg2[%c0_1, %c0_2] : memref<16x8xf32, #tpu.memory_space<vmem>>, vector<16x8xf32>
    %cst = arith.constant dense<0.000000e+00> : vector<8x8xf32>
    %2 = tpu.matmul %0, %1, %cst {dimension_numbers = #tpu.dot_dimension_numbers<[1], [0], [0], [1], [0, 0, 1, 1], [], []>} : vector<8x16xf32>, vector<16x8xf32>, vector<8x8xf32> -> vector<8x8xf32>
    %c0_3 = arith.constant 0 : index
    %c0_4 = arith.constant 0 : index
    %3 = vector.load %arg3[%c0_3, %c0_4] : memref<1x8xf32, #tpu.memory_space<vmem>>, vector<1x8xf32>
    %4 = vector.broadcast %3 : vector<1x8xf32> to vector<8x8xf32>
    %5 = arith.addf %2, %4 : vector<8x8xf32>
    %c0_5 = arith.constant 0 : index
    %c0_6 = arith.constant 0 : index
    %6 = vector.load %arg4[%c0_5, %c0_6] : memref<8x8xf32, #tpu.memory_space<vmem>>, vector<8x8xf32>
    tpu.vector_store %arg4[%c0_5, %c0_6], %5 {strides = array<i32>} : memref<8x8xf32, #tpu.memory_space<vmem>>, vector<8x8xf32>,
    return
  }
  func.func @transform_0(%arg0: i32) -> (i32, i32) {
    %c0_i32 = arith.constant 0 : i32
    %c0_i32_0 = arith.constant 0 : i32
    return %arg0, %c0_i32 : i32, i32
  }
  func.func @transform_1(%arg0: i32) -> (i32, i32) {
    %c0_i32 = arith.constant 0 : i32
    %c0_i32_0 = arith.constant 0 : i32
    %c0_i32_1 = arith.constant 0 : i32
    return %c0_i32, %c0_i32_0 : i32, i32
  }
  func.func @transform_2(%arg0: i32) -> (i32, i32) {
    %c0_i32 = arith.constant 0 : i32
    %c0_i32_0 = arith.constant 0 : i32
    %c0_i32_1 = arith.constant 0 : i32
    return %c0_i32, %c0_i32_0 : i32, i32
  }
  func.func @transform_3(%arg0: i32) -> (i32, i32) {
    %c0_i32 = arith.constant 0 : i32
    %c0_i32_0 = arith.constant 0 : i32
    return %arg0, %c0_i32 : i32, i32
  }
}

module attributes {stable_mosaic.version = 11 : i64} {
  func.func @_linear_kernel(%arg0: i32, %arg1: memref<2x4xf32, #tpu.memory_space<vmem>>, %arg2: memref<4x4xf32, #tpu.memory_space<vmem>>, %arg3: memref<1x4xf32, #tpu.memory_space<vmem>>, %arg4: memref<2x4xf32, #tpu.memory_space<vmem>>) attributes {dimension_semantics = [#tpu.dimension_semantics<arbitrary>], iteration_bounds = array<i64: 1>, scalar_prefetch = 0 : i64, scratch_operands = 0 : i64, tpu.core_type = #tpu.core_type<tc>, window_params = [{transform_indices = @transform_0, window_bounds = array<i64: 2, 4>}, {pipeline_mode = #tpu.pipeline_mode<synchronous>, transform_indices = @transform_1, window_bounds = array<i64: 4, 4>}, {pipeline_mode = #tpu.pipeline_mode<synchronous>, transform_indices = @transform_2, window_bounds = array<i64: 1, 4>}, {transform_indices = @transform_3, window_bounds = array<i64: 2, 4>}]} {
    %c0 = arith.constant 0 : index
    %c0_0 = arith.constant 0 : index
    %0 = vector.load %arg1[%c0, %c0_0] : memref<2x4xf32, #tpu.memory_space<vmem>>, vector<2x4xf32>
    %c0_1 = arith.constant 0 : index
    %c0_2 = arith.constant 0 : index
    %1 = vector.load %arg2[%c0_1, %c0_2] : memref<4x4xf32, #tpu.memory_space<vmem>>, vector<4x4xf32>
    %cst = arith.constant dense<0.000000e+00> : vector<2x4xf32>
    %2 = tpu.matmul %0, %1, %cst {dimension_numbers = #tpu.dot_dimension_numbers<[1], [0], [0], [1], [0, 0, 1, 1], [], []>} : vector<2x4xf32>, vector<4x4xf32>, vector<2x4xf32> -> vector<2x4xf32>
    %c0_3 = arith.constant 0 : index
    %c0_4 = arith.constant 0 : index
    %3 = vector.load %arg3[%c0_3, %c0_4] : memref<1x4xf32, #tpu.memory_space<vmem>>, vector<1x4xf32>
    %4 = vector.broadcast %3 : vector<1x4xf32> to vector<2x4xf32>
    %5 = arith.addf %2, %4 : vector<2x4xf32>
    %c0_5 = arith.constant 0 : index
    %c0_6 = arith.constant 0 : index
    %6 = vector.load %arg4[%c0_5, %c0_6] : memref<2x4xf32, #tpu.memory_space<vmem>>, vector<2x4xf32>
    tpu.vector_store %arg4[%c0_5, %c0_6], %5 {strides = array<i32>} : memref<2x4xf32, #tpu.memory_space<vmem>>, vector<2x4xf32>,
    return
  }
  func.func @transform_0(%arg0: i32) -> (i32, i32) {
    %c0_i32 = arith.constant 0 : i32
    %c0_i32_0 = arith.constant 0 : i32
    return %arg0, %c0_i32 : i32, i32
  }
  func.func @transform_1(%arg0: i32) -> (i32, i32) {
    %c0_i32 = arith.constant 0 : i32
    %c0_i32_0 = arith.constant 0 : i32
    %c0_i32_1 = arith.constant 0 : i32
    return %c0_i32, %c0_i32_0 : i32, i32
  }
  func.func @transform_2(%arg0: i32) -> (i32, i32) {
    %c0_i32 = arith.constant 0 : i32
    %c0_i32_0 = arith.constant 0 : i32
    %c0_i32_1 = arith.constant 0 : i32
    return %c0_i32, %c0_i32_0 : i32, i32
  }
  func.func @transform_3(%arg0: i32) -> (i32, i32) {
    %c0_i32 = arith.constant 0 : i32
    %c0_i32_0 = arith.constant 0 : i32
    return %arg0, %c0_i32 : i32, i32
  }
}

module attributes {stable_mosaic.version = 11 : i64} {
  func.func @_linear_kernel(%arg0: i32, %arg1: memref<2x16xf32, #tpu.memory_space<vmem>>, %arg2: memref<16x8xf32, #tpu.memory_space<vmem>>, %arg3: memref<1x8xf32, #tpu.memory_space<vmem>>, %arg4: memref<2x8xf32, #tpu.memory_space<vmem>>) attributes {dimension_semantics = [#tpu.dimension_semantics<arbitrary>], iteration_bounds = array<i64: 1>, scalar_prefetch = 0 : i64, scratch_operands = 0 : i64, tpu.core_type = #tpu.core_type<tc>, window_params = [{transform_indices = @transform_0, window_bounds = array<i64: 2, 16>}, {pipeline_mode = #tpu.pipeline_mode<synchronous>, transform_indices = @transform_1, window_bounds = array<i64: 16, 8>}, {pipeline_mode = #tpu.pipeline_mode<synchronous>, transform_indices = @transform_2, window_bounds = array<i64: 1, 8>}, {transform_indices = @transform_3, window_bounds = array<i64: 2, 8>}]} {
    %c0 = arith.constant 0 : index
    %c0_0 = arith.constant 0 : index
    %0 = vector.load %arg1[%c0, %c0_0] : memref<2x16xf32, #tpu.memory_space<vmem>>, vector<2x16xf32>
    %c0_1 = arith.constant 0 : index
    %c0_2 = arith.constant 0 : index
    %1 = vector.load %arg2[%c0_1, %c0_2] : memref<16x8xf32, #tpu.memory_space<vmem>>, vector<16x8xf32>
    %cst = arith.constant dense<0.000000e+00> : vector<2x8xf32>
    %2 = tpu.matmul %0, %1, %cst {dimension_numbers = #tpu.dot_dimension_numbers<[1], [0], [0], [1], [0, 0, 1, 1], [], []>} : vector<2x16xf32>, vector<16x8xf32>, vector<2x8xf32> -> vector<2x8xf32>
    %c0_3 = arith.constant 0 : index
    %c0_4 = arith.constant 0 : index
    %3 = vector.load %arg3[%c0_3, %c0_4] : memref<1x8xf32, #tpu.memory_space<vmem>>, vector<1x8xf32>
    %4 = vector.broadcast %3 : vector<1x8xf32> to vector<2x8xf32>
    %5 = arith.addf %2, %4 : vector<2x8xf32>
    %c0_5 = arith.constant 0 : index
    %c0_6 = arith.constant 0 : index
    %6 = vector.load %arg4[%c0_5, %c0_6] : memref<2x8xf32, #tpu.memory_space<vmem>>, vector<2x8xf32>
    tpu.vector_store %arg4[%c0_5, %c0_6], %5 {strides = array<i32>} : memref<2x8xf32, #tpu.memory_space<vmem>>, vector<2x8xf32>,
    return
  }
  func.func @transform_0(%arg0: i32) -> (i32, i32) {
    %c0_i32 = arith.constant 0 : i32
    %c0_i32_0 = arith.constant 0 : i32
    return %arg0, %c0_i32 : i32, i32
  }
  func.func @transform_1(%arg0: i32) -> (i32, i32) {
    %c0_i32 = arith.constant 0 : i32
    %c0_i32_0 = arith.constant 0 : i32
    %c0_i32_1 = arith.constant 0 : i32
    return %c0_i32, %c0_i32_0 : i32, i32
  }
  func.func @transform_2(%arg0: i32) -> (i32, i32) {
    %c0_i32 = arith.constant 0 : i32
    %c0_i32_0 = arith.constant 0 : i32
    %c0_i32_1 = arith.constant 0 : i32
    return %c0_i32, %c0_i32_0 : i32, i32
  }
  func.func @transform_3(%arg0: i32) -> (i32, i32) {
    %c0_i32 = arith.constant 0 : i32
    %c0_i32_0 = arith.constant 0 : i32
    return %arg0, %c0_i32 : i32, i32
  }
}

module attributes {stable_mosaic.version = 11 : i64} {
  func.func @_cmix_kernel(%arg0: i32, %arg1: memref<2x2x8xf32, #tpu.memory_space<vmem>>, %arg2: memref<2x2x8xf32, #tpu.memory_space<vmem>>, %arg3: memref<2x8x8xf32, #tpu.memory_space<vmem>>, %arg4: memref<2x8x8xf32, #tpu.memory_space<vmem>>, %arg5: memref<2x2x8xf32, #tpu.memory_space<vmem>>, %arg6: memref<2x2x8xf32, #tpu.memory_space<vmem>>) attributes {dimension_semantics = [#tpu.dimension_semantics<arbitrary>], iteration_bounds = array<i64: 1>, scalar_prefetch = 0 : i64, scratch_operands = 0 : i64, tpu.core_type = #tpu.core_type<tc>, window_params = [{pipeline_mode = #tpu.pipeline_mode<synchronous>, transform_indices = @transform_0, window_bounds = array<i64: 2, 2, 8>}, {pipeline_mode = #tpu.pipeline_mode<synchronous>, transform_indices = @transform_1, window_bounds = array<i64: 2, 2, 8>}, {pipeline_mode = #tpu.pipeline_mode<synchronous>, transform_indices = @transform_2, window_bounds = array<i64: 2, 8, 8>}, {pipeline_mode = #tpu.pipeline_mode<synchronous>, transform_indices = @transform_3, window_bounds = array<i64: 2, 8, 8>}, {pipeline_mode = #tpu.pipeline_mode<synchronous>, transform_indices = @transform_4, window_bounds = array<i64: 2, 2, 8>}, {pipeline_mode = #tpu.pipeline_mode<synchronous>, transform_indices = @transform_5, window_bounds = array<i64: 2, 2, 8>}]} {
    %c0 = arith.constant 0 : index
    %c0_0 = arith.constant 0 : index
    %c0_1 = arith.constant 0 : index
    %0 = vector.load %arg1[%c0, %c0_0, %c0_1] : memref<2x2x8xf32, #tpu.memory_space<vmem>>, vector<2x2x8xf32>
    %c0_2 = arith.constant 0 : index
    %c0_3 = arith.constant 0 : index
    %c0_4 = arith.constant 0 : index
    %1 = vector.load %arg2[%c0_2, %c0_3, %c0_4] : memref<2x2x8xf32, #tpu.memory_space<vmem>>, vector<2x2x8xf32>
    %c0_5 = arith.constant 0 : index
    %c0_6 = arith.constant 0 : index
    %c0_7 = arith.constant 0 : index
    %2 = vector.load %arg3[%c0_5, %c0_6, %c0_7] : memref<2x8x8xf32, #tpu.memory_space<vmem>>, vector<2x8x8xf32>
    %c0_8 = arith.constant 0 : index
    %c0_9 = arith.constant 0 : index
    %c0_10 = arith.constant 0 : index
    %3 = vector.load %arg4[%c0_8, %c0_9, %c0_10] : memref<2x8x8xf32, #tpu.memory_space<vmem>>, vector<2x8x8xf32>
    "tpu.trace_start"() <{level = 10 : i32, message = "mbi,mio->mbo"}> : () -> ()
    %cst = arith.constant dense<0.000000e+00> : vector<2x2x8xf32>
    %4 = tpu.matmul %0, %2, %cst {dimension_numbers = #tpu.dot_dimension_numbers<[2], [1], [1], [2], [0, 0, 0, 1, 1, 2], [0], [0]>} : vector<2x2x8xf32>, vector<2x8x8xf32>, vector<2x2x8xf32> -> vector<2x2x8xf32>
    %cst_11 = arith.constant dense<0.000000e+00> : vector<2x2x8xf32>
    %5 = tpu.matmul %1, %3, %cst_11 {dimension_numbers = #tpu.dot_dimension_numbers<[2], [1], [1], [2], [0, 0, 0, 1, 1, 2], [0], [0]>} : vector<2x2x8xf32>, vector<2x8x8xf32>, vector<2x2x8xf32> -> vector<2x2x8xf32>
    "tpu.trace_stop"() : () -> ()
    %6 = arith.addf %0, %1 : vector<2x2x8xf32>
    %7 = arith.addf %2, %3 : vector<2x8x8xf32>
    "tpu.trace_start"() <{level = 10 : i32, message = "mbi,mio->mbo"}> : () -> ()
    %cst_12 = arith.constant dense<0.000000e+00> : vector<2x2x8xf32>
    %8 = tpu.matmul %6, %7, %cst_12 {dimension_numbers = #tpu.dot_dimension_numbers<[2], [1], [1], [2], [0, 0, 0, 1, 1, 2], [0], [0]>} : vector<2x2x8xf32>, vector<2x8x8xf32>, vector<2x2x8xf32> -> vector<2x2x8xf32>
    "tpu.trace_stop"() : () -> ()
    %9 = arith.subf %4, %5 : vector<2x2x8xf32>
    %c0_13 = arith.constant 0 : index
    %c0_14 = arith.constant 0 : index
    %c0_15 = arith.constant 0 : index
    %10 = vector.load %arg5[%c0_13, %c0_14, %c0_15] : memref<2x2x8xf32, #tpu.memory_space<vmem>>, vector<2x2x8xf32>
    tpu.vector_store %arg5[%c0_13, %c0_14, %c0_15], %9 {strides = array<i32>} : memref<2x2x8xf32, #tpu.memory_space<vmem>>, vector<2x2x8xf32>,
    %11 = arith.subf %8, %4 : vector<2x2x8xf32>
    %12 = arith.subf %11, %5 : vector<2x2x8xf32>
    %c0_16 = arith.constant 0 : index
    %c0_17 = arith.constant 0 : index
    %c0_18 = arith.constant 0 : index
    %13 = vector.load %arg6[%c0_16, %c0_17, %c0_18] : memref<2x2x8xf32, #tpu.memory_space<vmem>>, vector<2x2x8xf32>
    tpu.vector_store %arg6[%c0_16, %c0_17, %c0_18], %12 {strides = array<i32>} : memref<2x2x8xf32, #tpu.memory_space<vmem>>, vector<2x2x8xf32>,
    return
  }
  func.func @transform_0(%arg0: i32) -> (i32, i32, i32) {
    %c0_i32 = arith.constant 0 : i32
    %c0_i32_0 = arith.constant 0 : i32
    %c0_i32_1 = arith.constant 0 : i32
    %c0_i32_2 = arith.constant 0 : i32
    return %c0_i32, %c0_i32_0, %c0_i32_1 : i32, i32, i32
  }
  func.func @transform_1(%arg0: i32) -> (i32, i32, i32) {
    %c0_i32 = arith.constant 0 : i32
    %c0_i32_0 = arith.constant 0 : i32
    %c0_i32_1 = arith.constant 0 : i32
    %c0_i32_2 = arith.constant 0 : i32
    return %c0_i32, %c0_i32_0, %c0_i32_1 : i32, i32, i32
  }
  func.func @transform_2(%arg0: i32) -> (i32, i32, i32) {
    %c0_i32 = arith.constant 0 : i32
    %c0_i32_0 = arith.constant 0 : i32
    %c0_i32_1 = arith.constant 0 : i32
    %c0_i32_2 = arith.constant 0 : i32
    return %c0_i32, %c0_i32_0, %c0_i32_1 : i32, i32, i32
  }
  func.func @transform_3(%arg0: i32) -> (i32, i32, i32) {
    %c0_i32 = arith.constant 0 : i32
    %c0_i32_0 = arith.constant 0 : i32
    %c0_i32_1 = arith.constant 0 : i32
    %c0_i32_2 = arith.constant 0 : i32
    return %c0_i32, %c0_i32_0, %c0_i32_1 : i32, i32, i32
  }
  func.func @transform_4(%arg0: i32) -> (i32, i32, i32) {
    %c0_i32 = arith.constant 0 : i32
    %c0_i32_0 = arith.constant 0 : i32
    %c0_i32_1 = arith.constant 0 : i32
    %c0_i32_2 = arith.constant 0 : i32
    return %c0_i32, %c0_i32_0, %c0_i32_1 : i32, i32, i32
  }
  func.func @transform_5(%arg0: i32) -> (i32, i32, i32) {
    %c0_i32 = arith.constant 0 : i32
    %c0_i32_0 = arith.constant 0 : i32
    %c0_i32_1 = arith.constant 0 : i32
    %c0_i32_2 = arith.constant 0 : i32
    return %c0_i32, %c0_i32_0, %c0_i32_1 : i32, i32, i32
  }
}

module attributes {stable_mosaic.version = 11 : i64} {
  func.func @_linear_kernel(%arg0: i32, %arg1: memref<2x8xf32, #tpu.memory_space<vmem>>, %arg2: memref<8x16xf32, #tpu.memory_space<vmem>>, %arg3: memref<1x16xf32, #tpu.memory_space<vmem>>, %arg4: memref<2x16xf32, #tpu.memory_space<vmem>>) attributes {dimension_semantics = [#tpu.dimension_semantics<arbitrary>], iteration_bounds = array<i64: 1>, scalar_prefetch = 0 : i64, scratch_operands = 0 : i64, tpu.core_type = #tpu.core_type<tc>, window_params = [{transform_indices = @transform_0, window_bounds = array<i64: 2, 8>}, {pipeline_mode = #tpu.pipeline_mode<synchronous>, transform_indices = @transform_1, window_bounds = array<i64: 8, 16>}, {pipeline_mode = #tpu.pipeline_mode<synchronous>, transform_indices = @transform_2, window_bounds = array<i64: 1, 16>}, {transform_indices = @transform_3, window_bounds = array<i64: 2, 16>}]} {
    %c0 = arith.constant 0 : index
    %c0_0 = arith.constant 0 : index
    %0 = vector.load %arg1[%c0, %c0_0] : memref<2x8xf32, #tpu.memory_space<vmem>>, vector<2x8xf32>
    %c0_1 = arith.constant 0 : index
    %c0_2 = arith.constant 0 : index
    %1 = vector.load %arg2[%c0_1, %c0_2] : memref<8x16xf32, #tpu.memory_space<vmem>>, vector<8x16xf32>
    %cst = arith.constant dense<0.000000e+00> : vector<2x16xf32>
    %2 = tpu.matmul %0, %1, %cst {dimension_numbers = #tpu.dot_dimension_numbers<[1], [0], [0], [1], [0, 0, 1, 1], [], []>} : vector<2x8xf32>, vector<8x16xf32>, vector<2x16xf32> -> vector<2x16xf32>
    %c0_3 = arith.constant 0 : index
    %c0_4 = arith.constant 0 : index
    %3 = vector.load %arg3[%c0_3, %c0_4] : memref<1x16xf32, #tpu.memory_space<vmem>>, vector<1x16xf32>
    %4 = vector.broadcast %3 : vector<1x16xf32> to vector<2x16xf32>
    %5 = arith.addf %2, %4 : vector<2x16xf32>
    %c0_5 = arith.constant 0 : index
    %c0_6 = arith.constant 0 : index
    %6 = vector.load %arg4[%c0_5, %c0_6] : memref<2x16xf32, #tpu.memory_space<vmem>>, vector<2x16xf32>
    tpu.vector_store %arg4[%c0_5, %c0_6], %5 {strides = array<i32>} : memref<2x16xf32, #tpu.memory_space<vmem>>, vector<2x16xf32>,
    return
  }
  func.func @transform_0(%arg0: i32) -> (i32, i32) {
    %c0_i32 = arith.constant 0 : i32
    %c0_i32_0 = arith.constant 0 : i32
    return %arg0, %c0_i32 : i32, i32
  }
  func.func @transform_1(%arg0: i32) -> (i32, i32) {
    %c0_i32 = arith.constant 0 : i32
    %c0_i32_0 = arith.constant 0 : i32
    %c0_i32_1 = arith.constant 0 : i32
    return %c0_i32, %c0_i32_0 : i32, i32
  }
  func.func @transform_2(%arg0: i32) -> (i32, i32) {
    %c0_i32 = arith.constant 0 : i32
    %c0_i32_0 = arith.constant 0 : i32
    %c0_i32_1 = arith.constant 0 : i32
    return %c0_i32, %c0_i32_0 : i32, i32
  }
  func.func @transform_3(%arg0: i32) -> (i32, i32) {
    %c0_i32 = arith.constant 0 : i32
    %c0_i32_0 = arith.constant 0 : i32
    return %arg0, %c0_i32 : i32, i32
  }
}

module attributes {stable_mosaic.version = 11 : i64} {
  func.func @_linear_kernel(%arg0: i32, %arg1: memref<8x8xf32, #tpu.memory_space<vmem>>, %arg2: memref<8x16xf32, #tpu.memory_space<vmem>>, %arg3: memref<1x16xf32, #tpu.memory_space<vmem>>, %arg4: memref<8x16xf32, #tpu.memory_space<vmem>>) attributes {dimension_semantics = [#tpu.dimension_semantics<arbitrary>], iteration_bounds = array<i64: 1>, scalar_prefetch = 0 : i64, scratch_operands = 0 : i64, tpu.core_type = #tpu.core_type<tc>, window_params = [{transform_indices = @transform_0, window_bounds = array<i64: 8, 8>}, {pipeline_mode = #tpu.pipeline_mode<synchronous>, transform_indices = @transform_1, window_bounds = array<i64: 8, 16>}, {pipeline_mode = #tpu.pipeline_mode<synchronous>, transform_indices = @transform_2, window_bounds = array<i64: 1, 16>}, {transform_indices = @transform_3, window_bounds = array<i64: 8, 16>}]} {
    %c0 = arith.constant 0 : index
    %c0_0 = arith.constant 0 : index
    %0 = vector.load %arg1[%c0, %c0_0] : memref<8x8xf32, #tpu.memory_space<vmem>>, vector<8x8xf32>
    %c0_1 = arith.constant 0 : index
    %c0_2 = arith.constant 0 : index
    %1 = vector.load %arg2[%c0_1, %c0_2] : memref<8x16xf32, #tpu.memory_space<vmem>>, vector<8x16xf32>
    %cst = arith.constant dense<0.000000e+00> : vector<8x16xf32>
    %2 = tpu.matmul %0, %1, %cst {dimension_numbers = #tpu.dot_dimension_numbers<[1], [0], [0], [1], [0, 0, 1, 1], [], []>} : vector<8x8xf32>, vector<8x16xf32>, vector<8x16xf32> -> vector<8x16xf32>
    %c0_3 = arith.constant 0 : index
    %c0_4 = arith.constant 0 : index
    %3 = vector.load %arg3[%c0_3, %c0_4] : memref<1x16xf32, #tpu.memory_space<vmem>>, vector<1x16xf32>
    %4 = vector.broadcast %3 : vector<1x16xf32> to vector<8x16xf32>
    %5 = arith.addf %2, %4 : vector<8x16xf32>
    %c0_5 = arith.constant 0 : index
    %c0_6 = arith.constant 0 : index
    %6 = vector.load %arg4[%c0_5, %c0_6] : memref<8x16xf32, #tpu.memory_space<vmem>>, vector<8x16xf32>
    tpu.vector_store %arg4[%c0_5, %c0_6], %5 {strides = array<i32>} : memref<8x16xf32, #tpu.memory_space<vmem>>, vector<8x16xf32>,
    return
  }
  func.func @transform_0(%arg0: i32) -> (i32, i32) {
    %c0_i32 = arith.constant 0 : i32
    %c0_i32_0 = arith.constant 0 : i32
    return %arg0, %c0_i32 : i32, i32
  }
  func.func @transform_1(%arg0: i32) -> (i32, i32) {
    %c0_i32 = arith.constant 0 : i32
    %c0_i32_0 = arith.constant 0 : i32
    %c0_i32_1 = arith.constant 0 : i32
    return %c0_i32, %c0_i32_0 : i32, i32
  }
  func.func @transform_2(%arg0: i32) -> (i32, i32) {
    %c0_i32 = arith.constant 0 : i32
    %c0_i32_0 = arith.constant 0 : i32
    %c0_i32_1 = arith.constant 0 : i32
    return %c0_i32, %c0_i32_0 : i32, i32
  }
  func.func @transform_3(%arg0: i32) -> (i32, i32) {
    %c0_i32 = arith.constant 0 : i32
    %c0_i32_0 = arith.constant 0 : i32
    return %arg0, %c0_i32 : i32, i32
  }
}

module attributes {stable_mosaic.version = 11 : i64} {
  func.func @_linear_kernel(%arg0: i32, %arg1: memref<32x8xf32, #tpu.memory_space<vmem>>, %arg2: memref<8x16xf32, #tpu.memory_space<vmem>>, %arg3: memref<1x16xf32, #tpu.memory_space<vmem>>, %arg4: memref<32x16xf32, #tpu.memory_space<vmem>>) attributes {dimension_semantics = [#tpu.dimension_semantics<arbitrary>], iteration_bounds = array<i64: 1>, scalar_prefetch = 0 : i64, scratch_operands = 0 : i64, tpu.core_type = #tpu.core_type<tc>, window_params = [{transform_indices = @transform_0, window_bounds = array<i64: 32, 8>}, {pipeline_mode = #tpu.pipeline_mode<synchronous>, transform_indices = @transform_1, window_bounds = array<i64: 8, 16>}, {pipeline_mode = #tpu.pipeline_mode<synchronous>, transform_indices = @transform_2, window_bounds = array<i64: 1, 16>}, {transform_indices = @transform_3, window_bounds = array<i64: 32, 16>}]} {
    %c0 = arith.constant 0 : index
    %c0_0 = arith.constant 0 : index
    %0 = vector.load %arg1[%c0, %c0_0] : memref<32x8xf32, #tpu.memory_space<vmem>>, vector<32x8xf32>
    %c0_1 = arith.constant 0 : index
    %c0_2 = arith.constant 0 : index
    %1 = vector.load %arg2[%c0_1, %c0_2] : memref<8x16xf32, #tpu.memory_space<vmem>>, vector<8x16xf32>
    %cst = arith.constant dense<0.000000e+00> : vector<32x16xf32>
    %2 = tpu.matmul %0, %1, %cst {dimension_numbers = #tpu.dot_dimension_numbers<[1], [0], [0], [1], [0, 0, 1, 1], [], []>} : vector<32x8xf32>, vector<8x16xf32>, vector<32x16xf32> -> vector<32x16xf32>
    %c0_3 = arith.constant 0 : index
    %c0_4 = arith.constant 0 : index
    %3 = vector.load %arg3[%c0_3, %c0_4] : memref<1x16xf32, #tpu.memory_space<vmem>>, vector<1x16xf32>
    %4 = vector.broadcast %3 : vector<1x16xf32> to vector<32x16xf32>
    %5 = arith.addf %2, %4 : vector<32x16xf32>
    %c0_5 = arith.constant 0 : index
    %c0_6 = arith.constant 0 : index
    %6 = vector.load %arg4[%c0_5, %c0_6] : memref<32x16xf32, #tpu.memory_space<vmem>>, vector<32x16xf32>
    tpu.vector_store %arg4[%c0_5, %c0_6], %5 {strides = array<i32>} : memref<32x16xf32, #tpu.memory_space<vmem>>, vector<32x16xf32>,
    return
  }
  func.func @transform_0(%arg0: i32) -> (i32, i32) {
    %c0_i32 = arith.constant 0 : i32
    %c0_i32_0 = arith.constant 0 : i32
    return %arg0, %c0_i32 : i32, i32
  }
  func.func @transform_1(%arg0: i32) -> (i32, i32) {
    %c0_i32 = arith.constant 0 : i32
    %c0_i32_0 = arith.constant 0 : i32
    %c0_i32_1 = arith.constant 0 : i32
    return %c0_i32, %c0_i32_0 : i32, i32
  }
  func.func @transform_2(%arg0: i32) -> (i32, i32) {
    %c0_i32 = arith.constant 0 : i32
    %c0_i32_0 = arith.constant 0 : i32
    %c0_i32_1 = arith.constant 0 : i32
    return %c0_i32, %c0_i32_0 : i32, i32
  }
  func.func @transform_3(%arg0: i32) -> (i32, i32) {
    %c0_i32 = arith.constant 0 : i32
    %c0_i32_0 = arith.constant 0 : i32
    return %arg0, %c0_i32 : i32, i32
  }
}

module attributes {stable_mosaic.version = 11 : i64} {
  func.func @_linear_kernel(%arg0: i32, %arg1: memref<128x8xf32, #tpu.memory_space<vmem>>, %arg2: memref<8x16xf32, #tpu.memory_space<vmem>>, %arg3: memref<1x16xf32, #tpu.memory_space<vmem>>, %arg4: memref<128x16xf32, #tpu.memory_space<vmem>>) attributes {dimension_semantics = [#tpu.dimension_semantics<arbitrary>], iteration_bounds = array<i64: 1>, scalar_prefetch = 0 : i64, scratch_operands = 0 : i64, tpu.core_type = #tpu.core_type<tc>, window_params = [{transform_indices = @transform_0, window_bounds = array<i64: 128, 8>}, {pipeline_mode = #tpu.pipeline_mode<synchronous>, transform_indices = @transform_1, window_bounds = array<i64: 8, 16>}, {pipeline_mode = #tpu.pipeline_mode<synchronous>, transform_indices = @transform_2, window_bounds = array<i64: 1, 16>}, {transform_indices = @transform_3, window_bounds = array<i64: 128, 16>}]} {
    %c0 = arith.constant 0 : index
    %c0_0 = arith.constant 0 : index
    %0 = vector.load %arg1[%c0, %c0_0] : memref<128x8xf32, #tpu.memory_space<vmem>>, vector<128x8xf32>
    %c0_1 = arith.constant 0 : index
    %c0_2 = arith.constant 0 : index
    %1 = vector.load %arg2[%c0_1, %c0_2] : memref<8x16xf32, #tpu.memory_space<vmem>>, vector<8x16xf32>
    %cst = arith.constant dense<0.000000e+00> : vector<128x16xf32>
    %2 = tpu.matmul %0, %1, %cst {dimension_numbers = #tpu.dot_dimension_numbers<[1], [0], [0], [1], [0, 0, 1, 1], [], []>} : vector<128x8xf32>, vector<8x16xf32>, vector<128x16xf32> -> vector<128x16xf32>
    %c0_3 = arith.constant 0 : index
    %c0_4 = arith.constant 0 : index
    %3 = vector.load %arg3[%c0_3, %c0_4] : memref<1x16xf32, #tpu.memory_space<vmem>>, vector<1x16xf32>
    %4 = vector.broadcast %3 : vector<1x16xf32> to vector<128x16xf32>
    %5 = arith.addf %2, %4 : vector<128x16xf32>
    %c0_5 = arith.constant 0 : index
    %c0_6 = arith.constant 0 : index
    %6 = vector.load %arg4[%c0_5, %c0_6] : memref<128x16xf32, #tpu.memory_space<vmem>>, vector<128x16xf32>
    tpu.vector_store %arg4[%c0_5, %c0_6], %5 {strides = array<i32>} : memref<128x16xf32, #tpu.memory_space<vmem>>, vector<128x16xf32>,
    return
  }
  func.func @transform_0(%arg0: i32) -> (i32, i32) {
    %c0_i32 = arith.constant 0 : i32
    %c0_i32_0 = arith.constant 0 : i32
    return %arg0, %c0_i32 : i32, i32
  }
  func.func @transform_1(%arg0: i32) -> (i32, i32) {
    %c0_i32 = arith.constant 0 : i32
    %c0_i32_0 = arith.constant 0 : i32
    %c0_i32_1 = arith.constant 0 : i32
    return %c0_i32, %c0_i32_0 : i32, i32
  }
  func.func @transform_2(%arg0: i32) -> (i32, i32) {
    %c0_i32 = arith.constant 0 : i32
    %c0_i32_0 = arith.constant 0 : i32
    %c0_i32_1 = arith.constant 0 : i32
    return %c0_i32, %c0_i32_0 : i32, i32
  }
  func.func @transform_3(%arg0: i32) -> (i32, i32) {
    %c0_i32 = arith.constant 0 : i32
    %c0_i32_0 = arith.constant 0 : i32
    return %arg0, %c0_i32 : i32, i32
  }
}

module attributes {stable_mosaic.version = 11 : i64} {
  func.func @_mlp2_kernel(%arg0: i32, %arg1: memref<512x4xf32, #tpu.memory_space<vmem>>, %arg2: memref<4x32xf32, #tpu.memory_space<vmem>>, %arg3: memref<1x32xf32, #tpu.memory_space<vmem>>, %arg4: memref<32x1xf32, #tpu.memory_space<vmem>>, %arg5: memref<1x1xf32, #tpu.memory_space<vmem>>, %arg6: memref<512x1xf32, #tpu.memory_space<vmem>>) attributes {dimension_semantics = [#tpu.dimension_semantics<arbitrary>], iteration_bounds = array<i64: 1>, scalar_prefetch = 0 : i64, scratch_operands = 0 : i64, tpu.core_type = #tpu.core_type<tc>, window_params = [{pipeline_mode = #tpu.pipeline_mode<synchronous>, transform_indices = @transform_0, window_bounds = array<i64: 512, 4>}, {pipeline_mode = #tpu.pipeline_mode<synchronous>, transform_indices = @transform_1, window_bounds = array<i64: 4, 32>}, {pipeline_mode = #tpu.pipeline_mode<synchronous>, transform_indices = @transform_2, window_bounds = array<i64: 1, 32>}, {pipeline_mode = #tpu.pipeline_mode<synchronous>, transform_indices = @transform_3, window_bounds = array<i64: 32, 1>}, {pipeline_mode = #tpu.pipeline_mode<synchronous>, transform_indices = @transform_4, window_bounds = array<i64: 1, 1>}, {pipeline_mode = #tpu.pipeline_mode<synchronous>, transform_indices = @transform_5, window_bounds = array<i64: 512, 1>}]} {
    %c0 = arith.constant 0 : index
    %c0_0 = arith.constant 0 : index
    %0 = vector.load %arg1[%c0, %c0_0] : memref<512x4xf32, #tpu.memory_space<vmem>>, vector<512x4xf32>
    %c0_1 = arith.constant 0 : index
    %c0_2 = arith.constant 0 : index
    %1 = vector.load %arg2[%c0_1, %c0_2] : memref<4x32xf32, #tpu.memory_space<vmem>>, vector<4x32xf32>
    %cst = arith.constant dense<0.000000e+00> : vector<512x32xf32>
    %2 = tpu.matmul %0, %1, %cst {dimension_numbers = #tpu.dot_dimension_numbers<[1], [0], [0], [1], [0, 0, 1, 1], [], []>} : vector<512x4xf32>, vector<4x32xf32>, vector<512x32xf32> -> vector<512x32xf32>
    %c0_3 = arith.constant 0 : index
    %c0_4 = arith.constant 0 : index
    %3 = vector.load %arg3[%c0_3, %c0_4] : memref<1x32xf32, #tpu.memory_space<vmem>>, vector<1x32xf32>
    %4 = vector.broadcast %3 : vector<1x32xf32> to vector<512x32xf32>
    %5 = arith.addf %2, %4 : vector<512x32xf32>
    %cst_5 = arith.constant 5.000000e-01 : f32
    %6 = vector.broadcast %cst_5 : f32 to vector<512x32xf32>
    %7 = arith.mulf %6, %5 : vector<512x32xf32>
    %cst_6 = arith.constant 0.707106769 : f32
    %8 = vector.broadcast %cst_6 : f32 to vector<512x32xf32>
    %9 = arith.mulf %5, %8 : vector<512x32xf32>
    %10 = math.absf %9 : vector<512x32xf32>
    %cst_7 = arith.constant 0.327591091 : f32
    %11 = vector.broadcast %cst_7 : f32 to vector<512x32xf32>
    %12 = arith.mulf %11, %10 : vector<512x32xf32>
    %cst_8 = arith.constant 1.000000e+00 : f32
    %13 = vector.broadcast %cst_8 : f32 to vector<512x32xf32>
    %14 = arith.addf %13, %12 : vector<512x32xf32>
    %cst_9 = arith.constant 1.000000e+00 : f32
    %15 = vector.broadcast %cst_9 : f32 to vector<512x32xf32>
    %16 = arith.divf %15, %14 : vector<512x32xf32>
    %cst_10 = arith.constant 1.06140542 : f32
    %17 = vector.broadcast %cst_10 : f32 to vector<512x32xf32>
    %18 = arith.mulf %17, %16 : vector<512x32xf32>
    %cst_11 = arith.constant -1.45315206 : f32
    %19 = vector.broadcast %cst_11 : f32 to vector<512x32xf32>
    %20 = arith.addf %18, %19 : vector<512x32xf32>
    %21 = arith.mulf %20, %16 : vector<512x32xf32>
    %cst_12 = arith.constant 1.42141378 : f32
    %22 = vector.broadcast %cst_12 : f32 to vector<512x32xf32>
    %23 = arith.addf %21, %22 : vector<512x32xf32>
    %24 = arith.mulf %23, %16 : vector<512x32xf32>
    %cst_13 = arith.constant -0.284496725 : f32
    %25 = vector.broadcast %cst_13 : f32 to vector<512x32xf32>
    %26 = arith.addf %24, %25 : vector<512x32xf32>
    %27 = arith.mulf %26, %16 : vector<512x32xf32>
    %cst_14 = arith.constant 0.254829586 : f32
    %28 = vector.broadcast %cst_14 : f32 to vector<512x32xf32>
    %29 = arith.addf %27, %28 : vector<512x32xf32>
    %30 = arith.mulf %29, %16 : vector<512x32xf32>
    %cst_15 = arith.constant 0.000000e+00 : f32
    %31 = vector.broadcast %cst_15 : f32 to vector<512x32xf32>
    %32 = arith.subf %31, %10 : vector<512x32xf32>
    %33 = arith.mulf %32, %10 : vector<512x32xf32>
    %34 = math.exp %33 : vector<512x32xf32>
    %35 = arith.mulf %30, %34 : vector<512x32xf32>
    %cst_16 = arith.constant 1.000000e+00 : f32
    %36 = vector.broadcast %cst_16 : f32 to vector<512x32xf32>
    %37 = arith.subf %36, %35 : vector<512x32xf32>
    %cst_17 = arith.constant 0.000000e+00 : f32
    %38 = vector.broadcast %cst_17 : f32 to vector<512x32xf32>
    %39 = arith.cmpf oge, %9, %38 : vector<512x32xf32>
    %cst_18 = arith.constant 0.000000e+00 : f32
    %40 = vector.broadcast %cst_18 : f32 to vector<512x32xf32>
    %41 = arith.subf %40, %37 : vector<512x32xf32>
    %42 = arith.select %39, %37, %41 : vector<512x32xi1>, vector<512x32xf32>
    %cst_19 = arith.constant 1.000000e+00 : f32
    %43 = vector.broadcast %cst_19 : f32 to vector<512x32xf32>
    %44 = arith.addf %43, %42 : vector<512x32xf32>
    %45 = arith.mulf %7, %44 : vector<512x32xf32>
    %c0_20 = arith.constant 0 : index
    %c0_21 = arith.constant 0 : index
    %46 = vector.load %arg4[%c0_20, %c0_21] : memref<32x1xf32, #tpu.memory_space<vmem>>, vector<32x1xf32>
    %cst_22 = arith.constant dense<0.000000e+00> : vector<512x1xf32>
    %47 = tpu.matmul %45, %46, %cst_22 {dimension_numbers = #tpu.dot_dimension_numbers<[1], [0], [0], [1], [0, 0, 1, 1], [], []>} : vector<512x32xf32>, vector<32x1xf32>, vector<512x1xf32> -> vector<512x1xf32>
    %c0_23 = arith.constant 0 : index
    %c0_24 = arith.constant 0 : index
    %48 = vector.load %arg5[%c0_23, %c0_24] : memref<1x1xf32, #tpu.memory_space<vmem>>, vector<1x1xf32>
    %49 = vector.broadcast %48 : vector<1x1xf32> to vector<512x1xf32>
    %50 = arith.addf %47, %49 : vector<512x1xf32>
    %c0_25 = arith.constant 0 : index
    %c0_26 = arith.constant 0 : index
    %51 = vector.load %arg6[%c0_25, %c0_26] : memref<512x1xf32, #tpu.memory_space<vmem>>, vector<512x1xf32>
    tpu.vector_store %arg6[%c0_25, %c0_26], %50 {strides = array<i32>} : memref<512x1xf32, #tpu.memory_space<vmem>>, vector<512x1xf32>,
    return
  }
  func.func @transform_0(%arg0: i32) -> (i32, i32) {
    %c0_i32 = arith.constant 0 : i32
    %c0_i32_0 = arith.constant 0 : i32
    %c0_i32_1 = arith.constant 0 : i32
    return %c0_i32, %c0_i32_0 : i32, i32
  }
  func.func @transform_1(%arg0: i32) -> (i32, i32) {
    %c0_i32 = arith.constant 0 : i32
    %c0_i32_0 = arith.constant 0 : i32
    %c0_i32_1 = arith.constant 0 : i32
    return %c0_i32, %c0_i32_0 : i32, i32
  }
  func.func @transform_2(%arg0: i32) -> (i32, i32) {
    %c0_i32 = arith.constant 0 : i32
    %c0_i32_0 = arith.constant 0 : i32
    %c0_i32_1 = arith.constant 0 : i32
    return %c0_i32, %c0_i32_0 : i32, i32
  }
  func.func @transform_3(%arg0: i32) -> (i32, i32) {
    %c0_i32 = arith.constant 0 : i32
    %c0_i32_0 = arith.constant 0 : i32
    %c0_i32_1 = arith.constant 0 : i32
    return %c0_i32, %c0_i32_0 : i32, i32
  }
  func.func @transform_4(%arg0: i32) -> (i32, i32) {
    %c0_i32 = arith.constant 0 : i32
    %c0_i32_0 = arith.constant 0 : i32
    %c0_i32_1 = arith.constant 0 : i32
    return %c0_i32, %c0_i32_0 : i32, i32
  }
  func.func @transform_5(%arg0: i32) -> (i32, i32) {
    %c0_i32 = arith.constant 0 : i32
    %c0_i32_0 = arith.constant 0 : i32
    %c0_i32_1 = arith.constant 0 : i32
    return %c0_i32, %c0_i32_0 : i32, i32
  }
}

</mosaic_0001>

<bundles_post_ra>
// kernel: model_forward.29
= control target key start
LH: loop header
LB: loop body
LE: loop exit
PB: predicated region body
PF: predicated region fallthrough
CT: control target
= control target key end

     0   :  { %vm39_vm0 = vcmask 130048   ;;  %vm233_vm1 = vcmask 64512   ;;  %s480_s1 = inlined_call_operand.vmem [shape: f32[16,8], index: 1, kind: input, shape index: {}]   ;;  %s481_s0 = inlined_call_operand.vmem [shape: f32[128,16], index: 0, kind: input, shape index: {}]   ;;  %s482_s2 = inlined_call_operand.vmem [shape: f32[1,8], index: 2, kind: input, shape index: {}]   ;;  %s483_s3 = inlined_call_operand.vmem [shape: f32[128,8], index: 3, kind: output, shape index: {}]  }
   0x1   :  { %v30_v0 = vld [vmem:[%s480_s1] sm:$0xff]  ;;  %v31_v1 = vld [vmem:[%s480_s1 + $0x8] sm:$0xff]  ;;  %v16_v7 = vld [vmem:[%s481_s0 + $0x10] sm:$0xff] }
   0x2   :  { %v14_v2 = vld [vmem:[%s481_s0] sm:$0xff]  ;;  %v317_v3 = vpack.c.bf16 %v31_v1, %v30_v0  ;;  %v15_v5 = vld [vmem:[%s481_s0 + $0x8] sm:$0xff]  ;;  %v24_v8 = vld [vmem:[%s481_s0 + $0x50] sm:$0xff] }
   0x3   :  { %293 = vmatprep.mubr.msk.f32.mxu0 %vm39_vm0, %v14_v2  ;;  %v22_v4 = vld [vmem:[%s481_s0 + $0x40] sm:$0xff]  ;;  %v23_v6 = vld [vmem:[%s481_s0 + $0x48] sm:$0xff]  ;;  %v17_v9 = vld [vmem:[%s481_s0 + $0x18] sm:$0xff] }
   0x4   :  { %305 = vmatprep.mubr.msk.f32.mxu1 %vm39_vm0, %v22_v4  ;;  %318 = vmatprep.subr.bf16.mxu0 %v317_v3  ;;  %v25_v10 = vld [vmem:[%s481_s0 + $0x58] sm:$0xff]  ;;  %v18_v11 = vld [vmem:[%s481_s0 + $0x20] sm:$0xff]  ;;  %v19_v13 = vld [vmem:[%s481_s0 + $0x28] sm:$0xff] }
   0x5   :  { %321 = vmatprep.subr.bf16.mxu1 %v317_v3  ;;  %320 = vmatpush3.bf16.msra.mxu0 %v317_v3  ;;  %v26_v12 = vld [vmem:[%s481_s0 + $0x60] sm:$0xff]  ;;  %v27_v14 = vld [vmem:[%s481_s0 + $0x68] sm:$0xff]  ;;  %v20_v15 = vld [vmem:[%s481_s0 + $0x30] sm:$0xff] }
   0x6   :  { %322 = vmatpush3.bf16.msra.mxu1 %v317_v3  ;;  %v28_v16 = vld [vmem:[%s481_s0 + $0x70] sm:$0xff]  ;;  %v21_v17 = vld [vmem:[%s481_s0 + $0x38] sm:$0xff]  ;;  %v254_v19 = vld [vmem:[%s482_s2] ss:$0 sm:$0xff] }
   0x7   :  { %v29_v18 = vld [vmem:[%s481_s0 + $0x78] sm:$0xff] }
   0x8   :  { %294 = vmatmul.mubr.msk.f32.vlgmr.msra.gmra.mrb[0].mxu0 %vm39_vm0, %v15_v5 }
   0x9   :  { %306 = vmatmul.mubr.msk.f32.vlgmr.msra.gmra.mrb[0].mxu1 %vm39_vm0, %v23_v6  ;;  %296 = vmatprep.mubr.msk.f32.mxu0 %vm39_vm0, %v16_v7 }
   0xa   :  { %308 = vmatprep.mubr.msk.f32.mxu1 %vm39_vm0, %v24_v8 }
   0xc   :  { %297 = vmatmul.mubr.msk.f32.gmra.mrb[2].mxu0 %vm39_vm0, %v17_v9 }
   0xd   :  { %309 = vmatmul.mubr.msk.f32.gmra.mrb[2].mxu1 %vm39_vm0, %v25_v10  ;;  %299 = vmatprep.mubr.msk.f32.mxu0 %vm39_vm0, %v18_v11 }
   0xe   :  { %311 = vmatprep.mubr.msk.f32.mxu1 %vm39_vm0, %v26_v12 }
  0x10   :  { %300 = vmatmul.mubr.msk.f32.gmra.mrb[4].mxu0 %vm39_vm0, %v19_v13 }
  0x11   :  { %312 = vmatmul.mubr.msk.f32.gmra.mrb[4].mxu1 %vm39_vm0, %v27_v14  ;;  %302 = vmatprep.mubr.msk.f32.mxu0 %vm39_vm0, %v20_v15 }
  0x12   :  { %314 = vmatprep.mubr.msk.f32.mxu1 %vm39_vm0, %v28_v16 }
  0x14   :  { %303 = vmatmul.mubr.msk.f32.gmra.mrb[6].mxu0 %vm39_vm0, %v21_v17 }
  0x15   :  { %315 = vmatmul.mubr.msk.f32.gmra.mrb[6].mxu1 %vm39_vm0, %v29_v18 }
  0xdb   :  { %v295_v20 = vpop.f32.mrb[0].mxu0 }
  0xdc   :  { %v307_v21 = vpop.f32.mrb[0].mxu1  ;;  %v160_v22 = vadd.f32 %v295_v20, %v254_v19  ;;  %v154_v24 = vpop.f32.mrb[1].mxu0 }
  0xdd   :  { %v200_v23 = vadd.f32 %v307_v21, %v254_v19  ;;  %v194_v25 = vpop.f32.mrb[1].mxu1  ;;  %v155_v26 = vadd.f32 %v254_v19, %v154_v24 }
  0xde   :  { %v195_v27 = vadd.f32 %v254_v19, %v194_v25  ;;  %235 = vst.msk [vmem:[%s483_s3 + $0x8] sm:$0xff] %vm233_vm1, %v160_v22 }
  0xdf   :  { %243 = vst.msk [vmem:[%s483_s3 + $0x48] sm:$0xff] %vm233_vm1, %v200_v23  ;;  %234 = vst.msk [vmem:[%s483_s3] sm:$0xff] %vm233_vm1, %v155_v26  ;;  %v298_v28 = vpop.f32.mrb[2].mxu0 }
  0xe0   :  { %242 = vst.msk [vmem:[%s483_s3 + $0x40] sm:$0xff] %vm233_vm1, %v195_v27  ;;  %v310_v29 = vpop.f32.mrb[2].mxu1  ;;  %v170_v30 = vadd.f32 %v298_v28, %v254_v19  ;;  %v164_v32 = vpop.f32.mrb[3].mxu0 }
  0xe1   :  { %v210_v31 = vadd.f32 %v310_v29, %v254_v19  ;;  %v204_v33 = vpop.f32.mrb[3].mxu1  ;;  %v165_v34 = vadd.f32 %v254_v19, %v164_v32 }
  0xe2   :  { %v205_v35 = vadd.f32 %v254_v19, %v204_v33  ;;  %237 = vst.msk [vmem:[%s483_s3 + $0x18] sm:$0xff] %vm233_vm1, %v170_v30 }
  0xe3   :  { %245 = vst.msk [vmem:[%s483_s3 + $0x58] sm:$0xff] %vm233_vm1, %v210_v31  ;;  %236 = vst.msk [vmem:[%s483_s3 + $0x10] sm:$0xff] %vm233_vm1, %v165_v34  ;;  %v301_v36 = vpop.f32.mrb[4].mxu0 }
  0xe4   :  { %244 = vst.msk [vmem:[%s483_s3 + $0x50] sm:$0xff] %vm233_vm1, %v205_v35  ;;  %v313_v37 = vpop.f32.mrb[4].mxu1  ;;  %v180_v38 = vadd.f32 %v301_v36, %v254_v19  ;;  %v174_v40 = vpop.f32.mrb[5].mxu0 }
  0xe5   :  { %v220_v39 = vadd.f32 %v313_v37, %v254_v19  ;;  %v214_v41 = vpop.f32.mrb[5].mxu1  ;;  %v175_v42 = vadd.f32 %v254_v19, %v174_v40 }
  0xe6   :  { %v215_v43 = vadd.f32 %v254_v19, %v214_v41  ;;  %239 = vst.msk [vmem:[%s483_s3 + $0x28] sm:$0xff] %vm233_vm1, %v180_v38 }
  0xe7   :  { %247 = vst.msk [vmem:[%s483_s3 + $0x68] sm:$0xff] %vm233_vm1, %v220_v39  ;;  %238 = vst.msk [vmem:[%s483_s3 + $0x20] sm:$0xff] %vm233_vm1, %v175_v42  ;;  %v304_v44 = vpop.f32.mrb[6].mxu0 }
  0xe8   :  { %246 = vst.msk [vmem:[%s483_s3 + $0x60] sm:$0xff] %vm233_vm1, %v215_v43  ;;  %v316_v45 = vpop.f32.mrb[6].mxu1  ;;  %v190_v46 = vadd.f32 %v304_v44, %v254_v19  ;;  %v184_v48 = vpop.f32.mrb[7].mxu0 }
  0xe9   :  { %v230_v47 = vadd.f32 %v316_v45, %v254_v19  ;;  %v224_v49 = vpop.f32.mrb[7].mxu1  ;;  %v185_v50 = vadd.f32 %v254_v19, %v184_v48 }
  0xea   :  { %v225_v51 = vadd.f32 %v254_v19, %v224_v49  ;;  %241 = vst.msk [vmem:[%s483_s3 + $0x38] sm:$0xff] %vm233_vm1, %v190_v46 }
  0xeb   :  { %249 = vst.msk [vmem:[%s483_s3 + $0x78] sm:$0xff] %vm233_vm1, %v230_v47  ;;  %240 = vst.msk [vmem:[%s483_s3 + $0x30] sm:$0xff] %vm233_vm1, %v185_v50 }
  0xec   :  { %248 = vst.msk [vmem:[%s483_s3 + $0x70] sm:$0xff] %vm233_vm1, %v225_v51 }

// kernel: model_forward.28
= control target key start
LH: loop header
LB: loop body
LE: loop exit
PB: predicated region body
PF: predicated region fallthrough
CT: control target
= control target key end

     0   :  { %vm285_vm0 = vcmask 1045504   ;;  %vm92_vm1 = vcmask 48128   ;;  %s6394_s1 = inlined_call_operand.vmem [shape: f32[6,64], index: 1, kind: input, shape index: {}]   ;;  %s6395_s0 = inlined_call_operand.vmem [shape: f32[512,6], index: 0, kind: input, shape index: {}]   ;;  %s6396_s3 = inlined_call_operand.vmem [shape: f32[64,4], index: 3, kind: input, shape index: {}]   ;;  %s6397_s2 = inlined_call_operand.vmem [shape: f32[1,64], index: 2, kind: input, shape index: {}]   ;;  %s6398_s4 = inlined_call_operand.vmem [shape: f32[1,4], index: 4, kind: input, shape index: {}]   ;;  %s6399_s5 = inlined_call_operand.vmem [shape: f32[512,4], index: 5, kind: output, shape index: {}]  }
   0x1   :  { %v84_v0 = vld [vmem:[%s6394_s1] sm:$0x3f]  ;;  %v21_v2 = vld [vmem:[%s6395_s0 + $0x8] sm:$0xff]  ;;  %v22_v3 = vld [vmem:[%s6395_s0 + $0x10] sm:$0xff] }
   0x2   :  { %v20_v1 = vld [vmem:[%s6395_s0] sm:$0xff]  ;;  %3332 = vmatprep.subr.msk.mxu0 %vm285_vm0, %v84_v0  ;;  %v23_v4 = vld [vmem:[%s6395_s0 + $0x18] sm:$0xff]  ;;  %v25_v6 = vld [vmem:[%s6395_s0 + $0x28] sm:$0xff] }
   0x3   :  { %3334 = vmatprep.mubr.msk.f32.mxu0 %vm92_vm1, %v20_v1  ;;  %3333 = vmatpush3.msk.msra.mxu0 %vm285_vm0, %v84_v0  ;;  %v24_v5 = vld [vmem:[%s6395_s0 + $0x20] sm:$0xff]  ;;  %v26_v7 = vld [vmem:[%s6395_s0 + $0x30] sm:$0xff]  ;;  %v27_v8 = vld [vmem:[%s6395_s0 + $0x38] sm:$0xff] }
   0x4   :  { %3335 = vmatmul.mubr.msk.f32.vlgmr.msra.gmra.mrb[0].mxu0 %vm92_vm1, %v21_v2  ;;  %v28_v9 = vld [vmem:[%s6395_s0 + $0x40] sm:$0xff]  ;;  %v29_v10 = vld [vmem:[%s6395_s0 + $0x48] sm:$0xff]  ;;  %v30_v11 = vld [vmem:[%s6395_s0 + $0x50] sm:$0xff] }
   0x5   :  { %3337 = vmatprep.mubr.msk.f32.mxu0 %vm92_vm1, %v22_v3  ;;  %v31_v12 = vld [vmem:[%s6395_s0 + $0x58] sm:$0xff]  ;;  %v32_v13 = vld [vmem:[%s6395_s0 + $0x60] sm:$0xff]  ;;  %v33_v14 = vld [vmem:[%s6395_s0 + $0x68] sm:$0xff] }
   0x6   :  { %v34_v15 = vld [vmem:[%s6395_s0 + $0x70] sm:$0xff]  ;;  %v35_v16 = vld [vmem:[%s6395_s0 + $0x78] sm:$0xff]  ;;  %v36_v17 = vld [vmem:[%s6395_s0 + $0x80] sm:$0xff] }
   0x7   :  { %v37_v18 = vld [vmem:[%s6395_s0 + $0x88] sm:$0xff]  ;;  %v38_v19 = vld [vmem:[%s6395_s0 + $0x90] sm:$0xff]  ;;  %v39_v20 = vld [vmem:[%s6395_s0 + $0x98] sm:$0xff] }
   0x8   :  { %3338 = vmatmul.mubr.msk.f32.gmra.mrb[2].mxu0 %vm92_vm1, %v23_v4  ;;  %v40_v21 = vld [vmem:[%s6395_s0 + $0xa0] sm:$0xff]  ;;  %v41_v22 = vld [vmem:[%s6395_s0 + $0xa8] sm:$0xff]  ;;  %v42_v23 = vld [vmem:[%s6395_s0 + $0xb0] sm:$0xff] }
   0x9   :  { %3340 = vmatprep.mubr.msk.f32.mxu0 %vm92_vm1, %v24_v5  ;;  %v43_v24 = vld [vmem:[%s6395_s0 + $0xb8] sm:$0xff]  ;;  %v44_v25 = vld [vmem:[%s6395_s0 + $0xc0] sm:$0xff]  ;;  %v45_v26 = vld [vmem:[%s6395_s0 + $0xc8] sm:$0xff] }
   0xa   :  { %v46_v27 = vld [vmem:[%s6395_s0 + $0xd0] sm:$0xff]  ;;  %v47_v28 = vld [vmem:[%s6395_s0 + $0xd8] sm:$0xff]  ;;  %v48_v29 = vld [vmem:[%s6395_s0 + $0xe0] sm:$0xff] }
   0xb   :  { %v49_v30 = vld [vmem:[%s6395_s0 + $0xe8] sm:$0xff]  ;;  %v50_v31 = vld [vmem:[%s6395_s0 + $0xf0] sm:$0xff]  ;;  %v51_v32 = vld [vmem:[%s6395_s0 + $0xf8] sm:$0xff] }
   0xc   :  { %3341 = vmatmul.mubr.msk.f32.gmra.mrb[4].mxu0 %vm92_vm1, %v25_v6  ;;  %v52_v33 = vld [vmem:[%s6395_s0 + $0x100] sm:$0xff]  ;;  %v53_v34 = vld [vmem:[%s6395_s0 + $0x108] sm:$0xff]  ;;  %v54_v35 = vld [vmem:[%s6395_s0 + $0x110] sm:$0xff] }
   0xd   :  { %3343 = vmatprep.mubr.msk.f32.mxu0 %vm92_vm1, %v26_v7  ;;  %v55_v36 = vld [vmem:[%s6395_s0 + $0x118] sm:$0xff]  ;;  %v56_v37 = vld [vmem:[%s6395_s0 + $0x120] sm:$0xff]  ;;  %v57_v38 = vld [vmem:[%s6395_s0 + $0x128] sm:$0xff] }
   0xe   :  { %v58_v39 = vld [vmem:[%s6395_s0 + $0x130] sm:$0xff]  ;;  %v59_v40 = vld [vmem:[%s6395_s0 + $0x138] sm:$0xff]  ;;  %v60_v41 = vld [vmem:[%s6395_s0 + $0x140] sm:$0xff] }
   0xf   :  { %v61_v42 = vld [vmem:[%s6395_s0 + $0x148] sm:$0xff]  ;;  %v62_v43 = vld [vmem:[%s6395_s0 + $0x150] sm:$0xff]  ;;  %v63_v44 = vld [vmem:[%s6395_s0 + $0x158] sm:$0xff] }
  0x10   :  { %3344 = vmatmul.mubr.msk.f32.gmra.mrb[6].mxu0 %vm92_vm1, %v27_v8  ;;  %v64_v45 = vld [vmem:[%s6395_s0 + $0x160] sm:$0xff]  ;;  %v65_v46 = vld [vmem:[%s6395_s0 + $0x168] sm:$0xff]  ;;  %v66_v47 = vld [vmem:[%s6395_s0 + $0x170] sm:$0xff] }
  0x11   :  { %3346 = vmatprep.mubr.msk.f32.mxu0 %vm92_vm1, %v28_v9  ;;  %v67_v48 = vld [vmem:[%s6395_s0 + $0x178] sm:$0xff]  ;;  %v68_v49 = vld [vmem:[%s6395_s0 + $0x180] sm:$0xff]  ;;  %v69_v50 = vld [vmem:[%s6395_s0 + $0x188] sm:$0xff] }
  0x12   :  { %v70_v51 = vld [vmem:[%s6395_s0 + $0x190] sm:$0xff]  ;;  %v71_v52 = vld [vmem:[%s6395_s0 + $0x198] sm:$0xff]  ;;  %v72_v53 = vld [vmem:[%s6395_s0 + $0x1a0] sm:$0xff] }
  0x13   :  { %v73_v54 = vld [vmem:[%s6395_s0 + $0x1a8] sm:$0xff]  ;;  %v74_v55 = vld [vmem:[%s6395_s0 + $0x1b0] sm:$0xff]  ;;  %v75_v56 = vld [vmem:[%s6395_s0 + $0x1b8] sm:$0xff] }
  0x14   :  { %3347 = vmatmul.mubr.msk.f32.gmra.mrb[8].mxu0 %vm92_vm1, %v29_v10  ;;  %v76_v57 = vld [vmem:[%s6395_s0 + $0x1c0] sm:$0xff]  ;;  %v77_v58 = vld [vmem:[%s6395_s0 + $0x1c8] sm:$0xff]  ;;  %v78_v59 = vld [vmem:[%s6395_s0 + $0x1d0] sm:$0xff] }
  0x15   :  { %3349 = vmatprep.mubr.msk.f32.mxu0 %vm92_vm1, %v30_v11  ;;  %v79_v60 = vld [vmem:[%s6395_s0 + $0x1d8] sm:$0xff]  ;;  %v80_v61 = vld [vmem:[%s6395_s0 + $0x1e0] sm:$0xff]  ;;  %v81_v62 = vld [vmem:[%s6395_s0 + $0x1e8] sm:$0xff] }
  0x16   :  { %v82_v63 = vld [vmem:[%s6395_s0 + $0x1f0] sm:$0xff]  ;;  %v83_v0 = vld [vmem:[%s6395_s0 + $0x1f8] sm:$0xff]  ;;  %v2402_v1 = vld [vmem:[%s6396_s3] sm:$0xff] }
  0x17   :  { %v2403_v2 = vld [vmem:[%s6396_s3 + $0x8] sm:$0xff]  ;;  %v2404_v4 = vld [vmem:[%s6396_s3 + $0x10] sm:$0xff]  ;;  %v2405_v5 = vld [vmem:[%s6396_s3 + $0x18] sm:$0xff] }
  0x18   :  { %3350 = vmatmul.mubr.msk.f32.gmra.mrb[10].mxu0 %vm92_vm1, %v31_v12  ;;  %v3542_v3 = vpack.c.bf16 %v2403_v2, %v2402_v1  ;;  %v3546_v6 = vpack.c.bf16 %v2405_v5, %v2404_v4  ;;  %v4129_v7 = vld [vmem:[%s6397_s2] ss:$0 sm:$0xff] }
  0x19   :  { %3352 = vmatprep.mubr.msk.f32.mxu0 %vm92_vm1, %v32_v13 }
  0x1a   :  { %3543 = vmatprep.subr.bf16.mxu0 %v3542_v3  ;;  %3558 = vmatprep.subr.bf16.mxu1 %v3542_v3 }
  0x1b   :  { %3545 = vmatpush3.bf16.msra.mxu0 %v3542_v3  ;;  %3562 = vmatpush3.bf16.msra.mxu1 %v3542_v3 }
  0x1c   :  { %3353 = vmatmul.mubr.msk.f32.gmra.mrb[12].mxu0 %vm92_vm1, %v33_v14  ;;  %3547 = vmatprep.subr.bf16.mxu0 %v3546_v6 }
  0x1d   :  { %3355 = vmatprep.mubr.msk.f32.mxu0 %vm92_vm1, %v34_v15  ;;  %3559 = vmatprep.subr.bf16.mxu1 %v3546_v6  ;;  %v2406_v15 = vld [vmem:[%s6396_s3 + $0x20] sm:$0xff] }
  0x1f   :  { %3549 = vmatpush3.bf16.msra.mxu0 %v3546_v6  ;;  %3563 = vmatpush3.bf16.msra.mxu1 %v3546_v6 }
  0x20   :  { %3356 = vmatmul.mubr.msk.f32.gmra.mrb[14].mxu0 %vm92_vm1, %v35_v16  ;;  %v2407_v16 = vld [vmem:[%s6396_s3 + $0x28] sm:$0xff] }
  0x21   :  { %3358 = vmatprep.mubr.msk.f32.mxu0 %vm92_vm1, %v36_v17 }
  0x24   :  { %3359 = vmatmul.mubr.msk.f32.gmra.mrb[16].mxu0 %vm92_vm1, %v37_v18 }
  0x25   :  { %3361 = vmatprep.mubr.msk.f32.mxu0 %vm92_vm1, %v38_v19 }
  0x28   :  { %3362 = vmatmul.mubr.msk.f32.gmra.mrb[18].mxu0 %vm92_vm1, %v39_v20  ;;  %v3550_v20 = vpack.c.bf16 %v2407_v16, %v2406_v15 }
  0x29   :  { %3364 = vmatprep.mubr.msk.f32.mxu0 %vm92_vm1, %v40_v21 }
  0x2a   :  { %3551 = vmatprep.subr.bf16.mxu0 %v3550_v20  ;;  %3560 = vmatprep.subr.bf16.mxu1 %v3550_v20 }
  0x2b   :  { %3553 = vmatpush3.bf16.msra.mxu0 %v3550_v20  ;;  %3564 = vmatpush3.bf16.msra.mxu1 %v3550_v20 }
  0x2c   :  { %3365 = vmatmul.mubr.msk.f32.gmra.mrb[20].mxu0 %vm92_vm1, %v41_v22 }
  0x2d   :  { %3367 = vmatprep.mubr.msk.f32.mxu0 %vm92_vm1, %v42_v23 }
  0x30   :  { %3368 = vmatmul.mubr.msk.f32.gmra.mrb[22].mxu0 %vm92_vm1, %v43_v24 }
  0x31   :  { %3370 = vmatprep.mubr.msk.f32.mxu0 %vm92_vm1, %v44_v25 }
  0x34   :  { %3371 = vmatmul.mubr.msk.f32.gmra.mrb[24].mxu0 %vm92_vm1, %v45_v26 }
  0x35   :  { %3373 = vmatprep.mubr.msk.f32.mxu0 %vm92_vm1, %v46_v27 }
  0x38   :  { %3374 = vmatmul.mubr.msk.f32.gmra.mrb[26].mxu0 %vm92_vm1, %v47_v28 }
  0x39   :  { %3376 = vmatprep.mubr.msk.f32.mxu0 %vm92_vm1, %v48_v29 }
  0x3c   :  { %3377 = vmatmul.mubr.msk.f32.gmra.mrb[28].mxu0 %vm92_vm1, %v49_v30 }
  0x3d   :  { %3379 = vmatprep.mubr.msk.f32.mxu0 %vm92_vm1, %v50_v31 }
  0x40   :  { %3380 = vmatmul.mubr.msk.f32.gmra.mrb[30].mxu0 %vm92_vm1, %v51_v32 }
  0x41   :  { %3382 = vmatprep.mubr.msk.f32.mxu0 %vm92_vm1, %v52_v33 }
  0x44   :  { %3383 = vmatmul.mubr.msk.f32.gmra.mrb[32].mxu0 %vm92_vm1, %v53_v34 }
  0x45   :  { %3385 = vmatprep.mubr.msk.f32.mxu0 %vm92_vm1, %v54_v35 }
  0x48   :  { %3386 = vmatmul.mubr.msk.f32.gmra.mrb[34].mxu0 %vm92_vm1, %v55_v36 }
  0x49   :  { %3388 = vmatprep.mubr.msk.f32.mxu0 %vm92_vm1, %v56_v37 }
  0x4c   :  { %3389 = vmatmul.mubr.msk.f32.gmra.mrb[36].mxu0 %vm92_vm1, %v57_v38 }
  0x4d   :  { %3391 = vmatprep.mubr.msk.f32.mxu0 %vm92_vm1, %v58_v39 }
  0x50   :  { %3392 = vmatmul.mubr.msk.f32.gmra.mrb[38].mxu0 %vm92_vm1, %v59_v40 }
  0x51   :  { %3394 = vmatprep.mubr.msk.f32.mxu0 %vm92_vm1, %v60_v41 }
  0x54   :  { %3395 = vmatmul.mubr.msk.f32.gmra.mrb[40].mxu0 %vm92_vm1, %v61_v42 }
  0x55   :  { %3397 = vmatprep.mubr.msk.f32.mxu0 %vm92_vm1, %v62_v43 }
  0x58   :  { %3398 = vmatmul.mubr.msk.f32.gmra.mrb[42].mxu0 %vm92_vm1, %v63_v44 }
  0x59   :  { %3400 = vmatprep.mubr.msk.f32.mxu0 %vm92_vm1, %v64_v45 }
  0x5c   :  { %3401 = vmatmul.mubr.msk.f32.gmra.mrb[44].mxu0 %vm92_vm1, %v65_v46 }
  0x5d   :  { %3403 = vmatprep.mubr.msk.f32.mxu0 %vm92_vm1, %v66_v47 }
  0x60   :  { %3404 = vmatmul.mubr.msk.f32.gmra.mrb[46].mxu0 %vm92_vm1, %v67_v48 }
  0x61   :  { %3406 = vmatprep.mubr.msk.f32.mxu0 %vm92_vm1, %v68_v49 }
  0x64   :  { %3407 = vmatmul.mubr.msk.f32.gmra.mrb[48].mxu0 %vm92_vm1, %v69_v50 }
  0x65   :  { %3409 = vmatprep.mubr.msk.f32.mxu0 %vm92_vm1, %v70_v51 }
  0x68   :  { %3410 = vmatmul.mubr.msk.f32.gmra.mrb[50].mxu0 %vm92_vm1, %v71_v52 }
  0x69   :  { %3412 = vmatprep.mubr.msk.f32.mxu0 %vm92_vm1, %v72_v53 }
  0x6c   :  { %3413 = vmatmul.mubr.msk.f32.gmra.mrb[52].mxu0 %vm92_vm1, %v73_v54 }
  0x6d   :  { %3415 = vmatprep.mubr.msk.f32.mxu0 %vm92_vm1, %v74_v55 }
  0x70   :  { %3416 = vmatmul.mubr.msk.f32.gmra.mrb[54].mxu0 %vm92_vm1, %v75_v56 }
  0x71   :  { %3418 = vmatprep.mubr.msk.f32.mxu0 %vm92_vm1, %v76_v57 }
  0x74   :  { %3419 = vmatmul.mubr.msk.f32.gmra.mrb[56].mxu0 %vm92_vm1, %v77_v58 }
  0x75   :  { %3421 = vmatprep.mubr.msk.f32.mxu0 %vm92_vm1, %v78_v59 }
  0x78   :  { %3422 = vmatmul.mubr.msk.f32.gmra.mrb[58].mxu0 %vm92_vm1, %v79_v60 }
  0x79   :  { %3424 = vmatprep.mubr.msk.f32.mxu0 %vm92_vm1, %v80_v61 }
  0x7c   :  { %3425 = vmatmul.mubr.msk.f32.gmra.mrb[60].mxu0 %vm92_vm1, %v81_v62 }
  0x7d   :  { %3427 = vmatprep.mubr.msk.f32.mxu0 %vm92_vm1, %v82_v63 }
  0x80   :  { %3428 = vmatmul.mubr.msk.f32.gmra.mrb[62].mxu0 %vm92_vm1, %v83_v0 }
  0xd7   :  { %v3336_v8 = vpop.f32.mrb[0].mxu0 }
  0xd8   :  { %v4132_v9 = vadd.f32 %v3336_v8, %v4129_v7  ;;  %v355_v10 = vpop.f32.mrb[1].mxu0 }
  0xd9   :  { %v4135_v11 = vadd.f32 %v4129_v7, %v355_v10 }
  0xda   :  { %v4138_v12 = vmul.f32 0.70710677, %v4132_v9 }
  0xdb   :  { %v4141_v13 = vmul.f32 0.70710677, %v4135_v11  ;;  %v3339_v14 = vpop.f32.mrb[2].mxu0 }
  0xdc   :  { %v4150_v17 = vand.u32 2147483647, %v4138_v12  ;;  %v4153_v18 = vadd.f32 %v3339_v14, %v4129_v7  ;;  %v365_v19 = vpop.f32.mrb[3].mxu0  ;;  %vm2083_vm2 = vcmp.ge.f32.partialorder %v4138_v12, 0.0 }
  0xdd   :  { %v4156_v21 = vand.u32 2147483647, %v4141_v13  ;;  %v4218_v58 = vadd.f32 %v4129_v7, %v365_v19  ;;  %vm2082_vm3 = vcmp.ge.f32.partialorder %v4141_v13, 0.0 }
  0xde   :  { %v867_v22 = vmul.f32 0.3275911, %v4150_v17  ;;  %v4160_v23 = vmul.f32 0.70710677, %v4153_v18  ;;  %v1699_v61 = vsub.f32 0.0, %v4150_v17 }
  0xdf   :  { %v866_v24 = vmul.f32 0.3275911, %v4156_v21  ;;  %v3342_v27 = vpop.f32.mrb[4].mxu0  ;;  %v1698_v5 = vsub.f32 0.0, %v4156_v21  ;;  %v4234_v10 = vmul.f32 0.70710677, %v4218_v58 }
  0xe0   :  { %v931_v25 = vadd.f32 1.0, %v867_v22  ;;  %v4164_v26 = vand.u32 2147483647, %v4160_v23  ;;  %v375_v29 = vpop.f32.mrb[5].mxu0  ;;  %v4168_v33 = vadd.f32 %v3342_v27, %v4129_v7  ;;  %v1763_v22 = vmul.f32 %v1699_v61, %v4150_v17 }
  0xe1   :  { %v930_v28 = vadd.f32 1.0, %v866_v24  ;;  %v4171_v35 = vadd.f32 %v4129_v7, %v375_v29  ;;  %6407 = vst [vmem:[#allocation2_spill] sm:$0xff] %v4234_v10  ;;  %v4253_v17 = vand.u32 2147483647, %v4234_v10  ;;  %vm2085_vm4 = vcmp.ge.f32.partialorder %v4160_v23, 0.0 }
  0xe2   :  { %3566 = vrcp.f32 %v931_v25  ;;  %v869_v30 = vmul.f32 0.3275911, %v4164_v26  ;;  %v4174_v36 = vmul.f32 0.70710677, %v4168_v33  ;;  %v1701_v19 = vsub.f32 0.0, %v4164_v26 }
  0xe3   :  { %3568 = vrcp.f32 %v930_v28  ;;  %v3345_v31 = vpop.f32.mrb[6].mxu0  ;;  %v4177_v37 = vmul.f32 0.70710677, %v4171_v35 }
  0xe4   :  { %v933_v32 = vadd.f32 1.0, %v869_v30  ;;  %v385_v34 = vpop.f32.mrb[7].mxu0  ;;  %v4180_v39 = vand.u32 2147483647, %v4174_v36  ;;  %v4183_v40 = vadd.f32 %v3345_v31, %v4129_v7  ;;  %v1762_v30 = vmul.f32 %v1698_v5, %v4156_v21 }
  0xe5   :  { %v4188_v42 = vand.u32 2147483647, %v4177_v37  ;;  %v4191_v43 = vadd.f32 %v4129_v7, %v385_v34  ;;  %v1765_v34 = vmul.f32 %v1701_v19, %v4164_v26  ;;  %vm2087_vm5 = vcmp.ge.f32.partialorder %v4174_v36, 0.0 }
  0xe6   :  { %3570 = vrcp.f32 %v933_v32  ;;  %v871_v44 = vmul.f32 0.3275911, %v4180_v39  ;;  %v4195_v45 = vmul.f32 0.70710677, %v4183_v40  ;;  %vm2086_vm6 = vcmp.ge.f32.partialorder %v4177_v37, 0.0 }
  0xe7   :  { %v3348_v38 = vpop.f32.mrb[8].mxu0  ;;  %v870_v46 = vmul.f32 0.3275911, %v4188_v42  ;;  %v4199_v47 = vmul.f32 0.70710677, %v4191_v43 }
  0xe8   :  { %v4185_v41 = vpop.f32.mrb[9].mxu0  ;;  %v935_v49 = vadd.f32 1.0, %v871_v44  ;;  %v4204_v50 = vand.u32 2147483647, %v4195_v45  ;;  %v4238_v20 = vadd.f32 %v3348_v38, %v4129_v7  ;;  %vm2089_vm7 = vcmp.ge.f32.partialorder %v4195_v45, 0.0 }
  0xe9   :  { %v934_v54 = vadd.f32 1.0, %v870_v46  ;;  %v4212_v55 = vand.u32 2147483647, %v4199_v47  ;;  %v1828_v46 = vmul.f32 1.442695, %v1763_v22  ;;  %vm2088_vm8 = vcmp.ge.f32.partialorder %v4199_v47, 0.0 }
  0xea   :  { %3572 = vrcp.f32 %v935_v49  ;;  %v873_v59 = vmul.f32 0.3275911, %v4204_v50  ;;  %v4249_v31 = vmul.f32 0.70710677, %v4238_v20 }
  0xeb   :  { %v4206_v51 = vpop.f32.mrb[10].mxu0  ;;  %3574 = vrcp.f32 %v934_v54  ;;  %v872_v2 = vmul.f32 0.3275911, %v4212_v55  ;;  %v4267_v54 = vmul.f32 0.5, %v4132_v9  ;;  %v1703_v9 = vsub.f32 0.0, %v4180_v39 }
  0xec   :  { %v4201_v48 = vpop.eup %3566  ;;  %v4214_v56 = vpop.f32.mrb[11].mxu0  ;;  %v937_v1 = vadd.f32 1.0, %v873_v59  ;;  %6408 = vst [vmem:[#allocation3_spill] sm:$0xff] %v4249_v31  ;;  %v4260_v49 = vand.u32 2147483647, %v4249_v31  ;;  %v1704_v31 = vsub.f32 0.0, %v4212_v55 }
  0xed   :  { %v4208_v52 = vpop.eup %3568  ;;  %v1123_v53 = vmul.f32 1.0614054, %v4201_v48  ;;  %v936_v14 = vadd.f32 1.0, %v872_v2  ;;  %v1832_v2 = vmul.f32 1.442695, %v1765_v34  ;;  %v4291_v34 = vadd.f32 %v4129_v7, %v4185_v41 }
  0xee   :  { %v1122_v57 = vmul.f32 1.0614054, %v4208_v52  ;;  %3576 = vrcp.f32 %v937_v1 }
  0xef   :  { %v1187_v60 = vadd.f32 -1.4531521, %v1123_v53  ;;  %v4222_v62 = vpop.f32.mrb[12].mxu0  ;;  %3578 = vrcp.f32 %v936_v14 }
  0xf0   :  { %v4224_v63 = vpop.eup %3570  ;;  %v1186_v0 = vadd.f32 -1.4531521, %v1122_v57  ;;  %v4227_v3 = vpop.f32.mrb[13].mxu0  ;;  %3580 = vpow2.f32 %v1828_v46 }
  0xf1   :  { %v1251_v4 = vmul.f32 %v4201_v48, %v1187_v60  ;;  %v1125_v6 = vmul.f32 1.0614054, %v4224_v63  ;;  %v1826_v60 = vmul.f32 1.442695, %v1762_v30 }
  0xf2   :  { %v1250_v8 = vmul.f32 %v4208_v52, %v1186_v0  ;;  %v875_v0 = vmul.f32 0.3275911, %v4260_v49 }
  0xf3   :  { %v1315_v15 = vadd.f32 1.4214138, %v1251_v4  ;;  %v1189_v16 = vadd.f32 -1.4531521, %v1125_v6  ;;  %v4241_v24 = vpop.f32.mrb[14].mxu0 }
  0xf4   :  { %v1314_v27 = vadd.f32 1.4214138, %v1250_v8  ;;  %v4245_v29 = vpop.f32.mrb[15].mxu0  ;;  %v4257_v44 = vpop.eup %3572  ;;  %v868_v4 = vmul.f32 0.3275911, %v4253_v17  ;;  %v939_v14 = vadd.f32 1.0, %v875_v0 }
  0xf5   :  { %v1379_v25 = vmul.f32 %v4201_v48, %v1315_v15  ;;  %v1253_v28 = vmul.f32 %v4224_v63, %v1189_v16  ;;  %v4264_v21 = vpop.eup %3574  ;;  %v1127_v59 = vmul.f32 1.0614054, %v4257_v44  ;;  %v4482_v37 = vadd.f32 %v4129_v7, %v4245_v29 }
  0xf6   :  { %v1378_v26 = vmul.f32 %v4208_v52, %v1314_v27  ;;  %v1126_v61 = vmul.f32 1.0614054, %v4264_v21  ;;  %3582 = vrcp.f32 %v939_v14  ;;  %v1767_v14 = vmul.f32 %v1703_v9, %v4180_v39 }
  0xf7   :  { %v1317_v32 = vadd.f32 1.4214138, %v1253_v28  ;;  %v4255_v38 = vpop.f32.mrb[16].mxu0  ;;  %v1443_v57 = vadd.f32 -0.28449672, %v1379_v25  ;;  %3584 = vpow2.f32 %v1826_v60  ;;  %v1705_v60 = vsub.f32 0.0, %v4204_v50 }
  0xf8   :  { %v4262_v53 = vpop.f32.mrb[17].mxu0  ;;  %v1191_v5 = vadd.f32 -1.4531521, %v1127_v59  ;;  %v4275_v6 = vpop.eup %3576  ;;  %v1190_v8 = vadd.f32 -1.4531521, %v1126_v61  ;;  %v1700_v59 = vsub.f32 0.0, %v4253_v17  ;;  %3586 = vpow2.f32 %v1832_v2 }
  0xf9   :  { %v1381_v1 = vmul.f32 %v4224_v63, %v1317_v32  ;;  %v1507_v16 = vmul.f32 %v4201_v48, %v1443_v57  ;;  %v1442_v19 = vadd.f32 -0.28449672, %v1378_v26  ;;  %v1129_v25 = vmul.f32 1.0614054, %v4275_v6  ;;  %v4285_v28 = vpop.eup %3578 }
  0xfa   :  { %v1255_v22 = vmul.f32 %v4257_v44, %v1191_v5  ;;  %v1254_v30 = vmul.f32 %v4264_v21, %v1190_v8  ;;  %v1702_v32 = vsub.f32 0.0, %v4188_v42  ;;  %v1128_v0 = vmul.f32 1.0614054, %v4285_v28 }
  0xfb   :  { %v4278_v15 = vpop.f32.mrb[18].mxu0  ;;  %v1445_v46 = vadd.f32 -0.28449672, %v1381_v1  ;;  %v1193_v26 = vadd.f32 -1.4531521, %v1129_v25  ;;  %v1506_v8 = vmul.f32 %v4208_v52, %v1442_v19  ;;  %v1769_v2 = vmul.f32 %v1705_v60, %v4204_v50 }
  0xfc   :  { %6409 = vst [vmem:[#allocation4_spill] sm:$0xff] %v4278_v15  ;;  %v4283_v27 = vpop.f32.mrb[19].mxu0  ;;  %v1319_v57 = vadd.f32 1.4214138, %v1255_v22  ;;  %v1318_v61 = vadd.f32 1.4214138, %v1254_v30  ;;  %v1766_v1 = vmul.f32 %v1702_v32, %v4188_v42  ;;  %v4536_v47 = vadd.f32 %v4129_v7, %v4262_v53 }
  0xfd   :  { %6410 = vst [vmem:[#allocation5_spill] sm:$0xff] %v4283_v27  ;;  %v1571_v10 = vadd.f32 0.2548296, %v1507_v16  ;;  %v1257_v27 = vmul.f32 %v4275_v6, %v1193_v26  ;;  %v1192_v22 = vadd.f32 -1.4531521, %v1128_v0  ;;  %v4308_v30 = vmul.f32 0.5, %v4135_v11 }
  0xfe   :  { %v4305_v25 = vmul.f32 0.70710677, %v4291_v34  ;;  %v1509_v16 = vmul.f32 %v4224_v63, %v1445_v46  ;;  %v1383_v19 = vmul.f32 %v4257_v44, %v1319_v57  ;;  %v4315_v26 = vmul.f32 0.5, %v4153_v18 }
  0xff   :  { %v4295_v5 = vpop.f32.mrb[20].mxu0  ;;  %v1321_v39 = vadd.f32 1.4214138, %v1257_v27  ;;  %v1382_v42 = vmul.f32 %v4264_v21, %v1318_v61  ;;  %v1635_v11 = vmul.f32 %v4201_v48, %v1571_v10  ;;  %v932_v46 = vadd.f32 1.0, %v868_v4  ;;  %v3581_v27 = vpop.eup %3580 }
 0x100   :  { %6411 = vst [vmem:[#allocation6_spill] sm:$0xff] %v4295_v5  ;;  %v4300_v41 = vpop.f32.mrb[21].mxu0  ;;  %6413 = vst [vmem:[#allocation8_spill] sm:$0xff] %v4305_v25  ;;  %v4319_v32 = vand.u32 2147483647, %v4305_v25  ;;  %v1256_v57 = vmul.f32 %v4285_v28, %v1192_v22  ;;  %v4332_v48 = vmul.f32 0.5, %v4218_v58 }
 0x101   :  { %6412 = vst [vmem:[#allocation7_spill] sm:$0xff] %v4300_v41  ;;  %v1570_v41 = vadd.f32 0.2548296, %v1506_v8  ;;  %v1836_v5 = vmul.f32 1.442695, %v1767_v14  ;;  %v1385_v25 = vmul.f32 %v4275_v6, %v1321_v39  ;;  %3588 = vrcp.f32 %v932_v46 }
 0x102   :  { %v1834_v18 = vmul.f32 1.442695, %v1766_v1  ;;  %v1573_v15 = vadd.f32 0.2548296, %v1509_v16  ;;  %v1447_v61 = vadd.f32 -0.28449672, %v1383_v19  ;;  %v1768_v39 = vmul.f32 %v1704_v31, %v4212_v55 }
 0x103   :  { %v4312_v9 = vpop.f32.mrb[22].mxu0  ;;  %6416 = vst [vmem:[#allocation11_spill] sm:$0xff] %v4332_v48  ;;  %v1446_v10 = vadd.f32 -0.28449672, %v1382_v42  ;;  %v874_v4 = vmul.f32 0.3275911, %v4319_v32  ;;  %3590 = vpow2.f32 %v1836_v5  ;;  %v4350_v5 = vadd.f32 %v4206_v51, %v4129_v7 }
 0x104   :  { %6414 = vst [vmem:[#allocation9_spill] sm:$0xff] %v4312_v9  ;;  %v4321_v0 = vpop.f32.mrb[23].mxu0  ;;  %v1764_v9 = vmul.f32 %v1700_v59, %v4253_v17  ;;  %v1955_v17 = vmul.f32 %v3581_v27, %v1635_v11  ;;  %v1634_v59 = vmul.f32 %v4208_v52, %v1570_v41  ;;  %v1320_v50 = vadd.f32 1.4214138, %v1256_v57 }
 0x105   :  { %6415 = vst [vmem:[#allocation10_spill] sm:$0xff] %v4321_v0  ;;  %v4329_v0 = vpop.eup %3582  ;;  %v1840_v22 = vmul.f32 1.442695, %v1769_v2  ;;  %v1637_v58 = vmul.f32 %v4224_v63, %v1573_v15  ;;  %v1449_v19 = vadd.f32 -0.28449672, %v1385_v25  ;;  %v938_v42 = vadd.f32 1.0, %v874_v4 }
 0x106   :  { %v3585_v1 = vpop.eup %3584  ;;  %v1830_v60 = vmul.f32 1.442695, %v1764_v9  ;;  %v1131_v16 = vmul.f32 1.0614054, %v4329_v0  ;;  %v1511_v52 = vmul.f32 %v4257_v44, %v1447_v61  ;;  %v1510_v41 = vmul.f32 %v4264_v21, %v1446_v10 }
 0x107   :  { %v4335_v8 = vpop.f32.mrb[24].mxu0  ;;  %3592 = vpow2.f32 %v1834_v18  ;;  %v2019_v63 = vsub.f32 1.0, %v1955_v17  ;;  %v1954_v15 = vmul.f32 %v3585_v1, %v1634_v59  ;;  %v1384_v55 = vmul.f32 %v4285_v28, %v1320_v50  ;;  %v3587_v31 = vpop.eup %3586 }
 0x108   :  { %v4338_v14 = vpop.f32.mrb[25].mxu0  ;;  %3594 = vrcp.f32 %v938_v42  ;;  %v4356_v25 = vmul.f32 0.5, %v4168_v33  ;;  %v4359_v11 = vmul.f32 0.5, %v4171_v35  ;;  %v1195_v46 = vadd.f32 -1.4531521, %v1131_v16 }
 0x109   :  { %3596 = vpow2.f32 %v1840_v22  ;;  %v1957_v57 = vmul.f32 %v3587_v31, %v1637_v58  ;;  %v1513_v51 = vmul.f32 %v4275_v6, %v1449_v19  ;;  %v1838_v27 = vmul.f32 1.442695, %v1768_v39 }
 0x10a   :  { %v1707_v18 = vsub.f32 0.0, %v4260_v49  ;;  %v1575_v61 = vadd.f32 0.2548296, %v1511_v52  ;;  %v1574_v10 = vadd.f32 0.2548296, %v1510_v41  ;;  %v4371_v35 = vadd.f32 %v4129_v7, %v4214_v56 }
 0x10b   :  { %v4343_v48 = vpop.f32.mrb[26].mxu0  ;;  %v4367_v33 = vmul.f32 0.70710677, %v4350_v5  ;;  %v2147_v4 = vsub.f32 0.0, %v2019_v63  ;;  %v2018_v17 = vsub.f32 1.0, %v1954_v15  ;;  %3598 = vpow2.f32 %v1830_v60  ;;  %v4384_v58 = vpop.eup %3588 }
 0x10c   :  { %v4352_v9 = vpop.f32.mrb[27].mxu0  ;;  %v1448_v59 = vadd.f32 -0.28449672, %v1384_v55  ;;  %v4375_v50 = vmul.f32 0.5, %v4183_v40  ;;  %v4378_v1 = vmul.f32 0.5, %v4191_v43  ;;  %v4381_v22 = vmul.f32 0.5, %v4238_v20 }
 0x10d   :  { %v1259_v16 = vmul.f32 %v4329_v0, %v1195_v46  ;;  %6418 = vst [vmem:[#allocation13_spill] sm:$0xff] %v4384_v58  ;;  %v2021_v56 = vsub.f32 1.0, %v1957_v57  ;;  %v1577_v19 = vadd.f32 0.2548296, %v1513_v51  ;;  %v1771_v60 = vmul.f32 %v1707_v18, %v4260_v49  ;;  %v3591_v42 = vpop.eup %3590 }
 0x10e   :  { %v4388_v39 = vand.u32 2147483647, %v4367_v33  ;;  %v1639_v40 = vmul.f32 %v4257_v44, %v1575_v61  ;;  %v1638_v43 = vmul.f32 %v4264_v21, %v1574_v10  ;;  %3600 = vpow2.f32 %v1838_v27 }
 0x10f   :  { %v4363_v2 = vpop.f32.mrb[28].mxu0  ;;  %v4393_v20 = vmul.f32 0.70710677, %v4371_v35  ;;  %v2211_v52 = vsel %vm2083_vm2, %v2019_v63, %v2147_v4  ;;  %v2146_v41 = vsub.f32 0.0, %v2018_v17  ;;  %v1512_v15 = vmul.f32 %v4285_v28, %v1448_v59 }
 0x110   :  { %6417 = vst [vmem:[#allocation12_spill] sm:$0xff] %v4363_v2  ;;  %v877_v49 = vmul.f32 0.3275911, %v4388_v39  ;;  %v1323_v31 = vadd.f32 1.4214138, %v1259_v16  ;;  %v4400_v46 = vmul.f32 0.5, %v4291_v34  ;;  %v4407_v21 = vadd.f32 %v4222_v62, %v4129_v7 }
 0x111   :  { %v3593_v55 = vpop.eup %3592  ;;  %v4403_v44 = vand.u32 2147483647, %v4393_v20  ;;  %v2149_v12 = vsub.f32 0.0, %v2021_v56  ;;  %v1641_v63 = vmul.f32 %v4275_v6, %v1577_v19  ;;  %v1844_v51 = vmul.f32 1.442695, %v1771_v60 }
 0x112   :  { %v4409_v57 = vpop.eup %3594  ;;  %v941_v27 = vadd.f32 1.0, %v877_v49  ;;  %v2275_v61 = vadd.f32 1.0, %v2211_v52  ;;  %v1959_v10 = vmul.f32 %v3591_v42, %v1639_v40  ;;  %v1958_v4 = vmul.f32 %v3593_v55, %v1638_v43 }
 0x113   :  { %v3597_v18 = vpop.eup %3596  ;;  %v1130_v34 = vmul.f32 1.0614054, %v4409_v57  ;;  %v2210_v59 = vsel %vm2082_vm3, %v2018_v17, %v2146_v41  ;;  %v1576_v16 = vadd.f32 0.2548296, %v1512_v15  ;;  %v876_v62 = vmul.f32 0.3275911, %v4403_v44 }
 0x114   :  { %3602 = vrcp.f32 %v941_v27  ;;  %v1387_v58 = vmul.f32 %v4329_v0, %v1323_v31  ;;  %v1706_v6 = vsub.f32 0.0, %v4319_v32  ;;  %v4419_v19 = vmul.f32 0.70710677, %v4407_v21 }
 0x115   :  { %v1194_v2 = vadd.f32 -1.4531521, %v1130_v34  ;;  %v4421_v60 = vpop.eup %3598  ;;  %v2213_v42 = vsel %vm2085_vm4, %v2021_v56, %v2149_v12  ;;  %v1961_v13 = vmul.f32 %v3597_v18, %v1641_v63  ;;  %v940_v17 = vadd.f32 1.0, %v876_v62 }
 0x116   :  { %6419 = vst [vmem:[#allocation14_spill] sm:$0xff] %v4421_v60  ;;  %v4429_v40 = vadd.f32 %v4129_v7, %v4227_v3  ;;  %v2274_v43 = vadd.f32 1.0, %v2210_v59  ;;  %v2023_v52 = vsub.f32 1.0, %v1959_v10  ;;  %v2022_v41 = vsub.f32 1.0, %v1958_v4 }
 0x117   :  { %v4432_v15 = vand.u32 2147483647, %v4419_v19  ;;  %v1640_v49 = vmul.f32 %v4285_v28, %v1576_v16  ;;  %v1258_v23 = vmul.f32 %v4409_v57, %v1194_v2  ;;  %3604 = vrcp.f32 %v940_v17 }
 0x118   :  { %v4437_v56 = vmul.f32 0.70710677, %v4429_v40  ;;  %v3601_v55 = vpop.eup %3600  ;;  %v2277_v31 = vadd.f32 1.0, %v2213_v42  ;;  %v1451_v3 = vadd.f32 -0.28449672, %v1387_v58  ;;  %3606 = vpow2.f32 %v1844_v51 }
 0x119   :  { %v1770_v12 = vmul.f32 %v1706_v6, %v4319_v32  ;;  %v2025_v63 = vsub.f32 1.0, %v1961_v13  ;;  %v879_v27 = vmul.f32 0.3275911, %v4432_v15  ;;  %v4447_v28 = vadd.f32 %v4241_v24, %v4129_v7 }
 0x11a   :  { %v4443_v18 = vand.u32 2147483647, %v4437_v56  ;;  %v4450_v2 = vmul.f32 %v2275_v61, %v4267_v54  ;;  %v4453_v10 = vmul.f32 %v2274_v43, %v4308_v30  ;;  %v2151_v58 = vsub.f32 0.0, %v2023_v52 }
 0x11b   :  { %v2150_v51 = vsub.f32 0.0, %v2022_v41  ;;  %v1960_v4 = vmul.f32 %v3601_v55, %v1640_v49  ;;  %v1322_v32 = vadd.f32 1.4214138, %v1258_v23  ;;  %v943_v34 = vadd.f32 1.0, %v879_v27 }
 0x11c   :  { %v878_v59 = vmul.f32 0.3275911, %v4443_v18  ;;  %v4457_v16 = vmul.f32 %v2277_v31, %v4315_v26  ;;  %v1515_v62 = vmul.f32 %v4329_v0, %v1451_v3  ;;  %v1842_v24 = vmul.f32 1.442695, %v1770_v12 }
 0x11d   :  { %v4461_v6 = vmul.f32 0.70710677, %v4447_v28  ;;  %v2153_v30 = vsub.f32 0.0, %v2025_v63  ;;  %v4466_v61 = vmul.f32 0.5, %v4350_v5  ;;  %3608 = vrcp.f32 %v943_v34 }
 0x11e   :  { %6420 = vst [vmem:[#allocation15_spill] sm:$0xff] %v4457_v16  ;;  %v4463_v54 = vpop.eup %3602  ;;  %v942_v42 = vadd.f32 1.0, %v878_v59  ;;  %v2215_v13 = vsel %vm2087_vm5, %v2023_v52, %v2151_v58  ;;  %v2214_v26 = vsel %vm2086_vm6, %v2022_v41, %v2150_v51  ;;  %v2024_v49 = vsub.f32 1.0, %v1960_v4 }
 0x11f   :  { %v1133_v17 = vmul.f32 1.0614054, %v4463_v54  ;;  %v4475_v43 = vand.u32 2147483647, %v4461_v6  ;;  %v1386_v23 = vmul.f32 %v4409_v57, %v1322_v32  ;;  %v1709_v5 = vsub.f32 0.0, %v4388_v39 }
 0x120   :  { %3610 = vrcp.f32 %v942_v42  ;;  %v1579_v55 = vadd.f32 0.2548296, %v1515_v62  ;;  %v2279_v41 = vadd.f32 1.0, %v2215_v13  ;;  %v2278_v3 = vadd.f32 1.0, %v2214_v26 }
 0x121   :  { %v1197_v31 = vadd.f32 -1.4531521, %v1133_v17  ;;  %v881_v36 = vmul.f32 0.3275911, %v4475_v43  ;;  %v4484_v52 = vpop.eup %3604  ;;  %v2217_v12 = vsel %vm2089_vm7, %v2025_v63, %v2153_v30  ;;  %3612 = vpow2.f32 %v1842_v24  ;;  %v4499_v30 = vpop.f32.mrb[29].mxu0 }
 0x122   :  { %v3607_v27 = vpop.eup %3606  ;;  %v1132_v51 = vmul.f32 1.0614054, %v4484_v52  ;;  %v4492_v32 = vadd.f32 %v4255_v38, %v4129_v7  ;;  %v2152_v29 = vsub.f32 0.0, %v2024_v49  ;;  %v1450_v34 = vadd.f32 -0.28449672, %v1386_v23  ;;  %6421 = vst [vmem:[#allocation16_spill] sm:$0xff] %v4499_v30 }
 0x123   :  { %v1261_v58 = vmul.f32 %v4463_v54, %v1197_v31  ;;  %v945_v4 = vadd.f32 1.0, %v881_v36  ;;  %v1773_v59 = vmul.f32 %v1709_v5, %v4388_v39  ;;  %v4496_v62 = vmul.f32 0.70710677, %v4482_v37  ;;  %v4525_v31 = vpop.f32.mrb[30].mxu0 }
 0x124   :  { %v1643_v45 = vmul.f32 %v4329_v0, %v1579_v55  ;;  %v1196_v24 = vadd.f32 -1.4531521, %v1132_v51  ;;  %v4502_v42 = vmul.f32 %v2279_v41, %v4356_v25  ;;  %v4505_v38 = vmul.f32 %v2278_v3, %v4359_v11  ;;  %6424 = vst [vmem:[#allocation19_spill] sm:$0xff] %v4525_v31 }
 0x125   :  { %v1325_v63 = vadd.f32 1.4214138, %v1261_v58  ;;  %3614 = vrcp.f32 %v945_v4  ;;  %v4508_v13 = vmul.f32 0.5, %v4371_v35  ;;  %v4511_v39 = vand.u32 2147483647, %v4496_v62 }
 0x126   :  { %6422 = vst [vmem:[#allocation17_spill] sm:$0xff] %v4502_v42  ;;  %6423 = vst [vmem:[#allocation18_spill] sm:$0xff] %v4505_v38  ;;  %v1260_v26 = vmul.f32 %v4484_v52, %v1196_v24  ;;  %v1708_v0 = vsub.f32 0.0, %v4403_v44  ;;  %v1711_v17 = vsub.f32 0.0, %v4432_v15  ;;  %v4517_v23 = vmul.f32 0.70710677, %v4492_v32 }
 0x127   :  { %v4519_v25 = vpop.eup %3608  ;;  %v2281_v5 = vadd.f32 1.0, %v2217_v12  ;;  %v2216_v11 = vsel %vm2088_vm8, %v2024_v49, %v2152_v29  ;;  %v1514_v35 = vmul.f32 %v4409_v57, %v1450_v34  ;;  %v880_v55 = vmul.f32 0.3275911, %v4511_v39  ;;  %v4538_v49 = vpop.f32.mrb[31].mxu0 }
 0x128   :  { %v1963_v36 = vmul.f32 %v3607_v27, %v1643_v45  ;;  %v1389_v41 = vmul.f32 %v4463_v54, %v1325_v63  ;;  %v1848_v3 = vmul.f32 1.442695, %v1773_v59  ;;  %v1324_v58 = vadd.f32 1.4214138, %v1260_v26  ;;  %6425 = vst [vmem:[#allocation20_spill] sm:$0xff] %v4538_v49  ;;  %v6426_v26 = vld [vmem:[#allocation3_spill] sm:$0xff] }
 0x129   :  { %v1135_v4 = vmul.f32 1.0614054, %v4519_v25  ;;  %v944_v24 = vadd.f32 1.0, %v880_v55  ;;  %v4532_v12 = vand.u32 2147483647, %v4517_v23  ;;  %v1772_v27 = vmul.f32 %v1708_v0, %v4403_v44  ;;  %v4547_v53 = vpop.f32.mrb[32].mxu0 }
 0x12a   :  { %v4528_v51 = vpop.eup %3610  ;;  %v4542_v29 = vmul.f32 0.5, %v4407_v21  ;;  %v1775_v34 = vmul.f32 %v1711_v17, %v4432_v15  ;;  %v2280_v63 = vadd.f32 1.0, %v2216_v11  ;;  %vm2091_vm9 = vcmp.ge.f32.partialorder %v6426_v26, 0.0  ;;  %6427 = vst [vmem:[#allocation3_spill] sm:$0xff] %v4547_v53  ;;  %v4555_v11 = vpop.f32.mrb[33].mxu0 }
 0x12b   :  { %v1134_v59 = vmul.f32 1.0614054, %v4528_v51  ;;  %v3613_v45 = vpop.eup %3612  ;;  %v1578_v55 = vadd.f32 0.2548296, %v1514_v35  ;;  %v1199_v42 = vadd.f32 -1.4531521, %v1135_v4  ;;  %3616 = vrcp.f32 %v944_v24 }
 0x12c   :  { %v2027_v38 = vsub.f32 1.0, %v1963_v36  ;;  %v1453_v16 = vadd.f32 -0.28449672, %v1389_v41  ;;  %v1388_v44 = vmul.f32 %v4484_v52, %v1324_v58  ;;  %3618 = vpow2.f32 %v1848_v3  ;;  %6428 = vst [vmem:[#allocation21_spill] sm:$0xff] %v4555_v11  ;;  %v4564_v11 = vpop.f32.mrb[34].mxu0 }
 0x12d   :  { %v1198_v0 = vadd.f32 -1.4531521, %v1134_v59  ;;  %v1263_v21 = vmul.f32 %v4519_v25, %v1199_v42  ;;  %v883_v15 = vmul.f32 0.3275911, %v4532_v12  ;;  %v4553_v17 = vmul.f32 0.70710677, %v4536_v47 }
 0x12e   :  { %v1846_v4 = vmul.f32 1.442695, %v1772_v27  ;;  %v1852_v24 = vmul.f32 1.442695, %v1775_v34  ;;  %v1710_v41 = vsub.f32 0.0, %v4443_v18  ;;  %v1642_v58 = vmul.f32 %v4409_v57, %v1578_v55  ;;  %v4570_v30 = vpop.f32.mrb[35].mxu0 }
 0x12f   :  { %v4557_v35 = vpop.eup %3614  ;;  %v1262_v36 = vmul.f32 %v4528_v51, %v1198_v0  ;;  %v1327_v3 = vadd.f32 1.4214138, %v1263_v21  ;;  %v947_v59 = vadd.f32 1.0, %v883_v15  ;;  %v2155_v60 = vsub.f32 0.0, %v2027_v38  ;;  %6429 = vst [vmem:[#allocation22_spill] sm:$0xff] %v4570_v30 }
 0x130   :  { %v1137_v42 = vmul.f32 1.0614054, %v4557_v35  ;;  %v1517_v53 = vmul.f32 %v4463_v54, %v1453_v16  ;;  %v1452_v49 = vadd.f32 -0.28449672, %v1388_v44  ;;  %v4568_v0 = vand.u32 2147483647, %v4553_v17 }
 0x131   :  { %v1326_v31 = vadd.f32 1.4214138, %v1262_v36  ;;  %v1391_v27 = vmul.f32 %v4519_v25, %v1327_v3  ;;  %3620 = vrcp.f32 %v947_v59  ;;  %v4573_v57 = vmul.f32 %v2281_v5, %v4375_v50  ;;  %v4579_v3 = vpop.f32.mrb[36].mxu0 }
 0x132   :  { %v1201_v34 = vadd.f32 -1.4531521, %v1137_v42  ;;  %3622 = vpow2.f32 %v1846_v4  ;;  %v1774_v16 = vmul.f32 %v1710_v41, %v4443_v18  ;;  %v1962_v44 = vmul.f32 %v3613_v45, %v1642_v58  ;;  %6431 = vst [vmem:[#allocation24_spill] sm:$0xff] %v4579_v3  ;;  %v6433_v58 = vld [vmem:[#allocation8_spill] sm:$0xff] }
 0x133   :  { %6430 = vst [vmem:[#allocation23_spill] sm:$0xff] %v4573_v57  ;;  %v1390_v55 = vmul.f32 %v4528_v51, %v1326_v31  ;;  %v1455_v21 = vadd.f32 -0.28449672, %v1391_v27  ;;  %v882_v36 = vmul.f32 0.3275911, %v4568_v0  ;;  %v4582_v42 = vmul.f32 %v2280_v63, %v4378_v1  ;;  %v6434_v63 = vld [vmem:[#allocation4_spill] sm:$0xff] }
 0x134   :  { %v1265_v15 = vmul.f32 %v4557_v35, %v1201_v34  ;;  %v2219_v50 = vsel %vm2091_vm9, %v2027_v38, %v2155_v60  ;;  %3624 = vpow2.f32 %v1852_v24  ;;  %v1713_v5 = vsub.f32 0.0, %v4475_v43  ;;  %v4597_v38 = vpop.f32.mrb[37].mxu0 }
 0x135   :  { %6432 = vst [vmem:[#allocation25_spill] sm:$0xff] %v4582_v42  ;;  %v4587_v31 = vpop.eup %3616  ;;  %v1581_v18 = vadd.f32 0.2548296, %v1517_v53  ;;  %v1516_v45 = vmul.f32 %v4484_v52, %v1452_v49  ;;  %v946_v41 = vadd.f32 1.0, %v882_v36  ;;  %vm2090_vm10 = vcmp.ge.f32.partialorder %v6433_v58, 0.0  ;;  %6435 = vst [vmem:[#allocation8_spill] sm:$0xff] %v4597_v38 }
 0x136   :  { %v1329_v4 = vadd.f32 1.4214138, %v1265_v15  ;;  %v1519_v59 = vmul.f32 %v4519_v25, %v1455_v21  ;;  %v1454_v27 = vadd.f32 -0.28449672, %v1390_v55  ;;  %v1136_v1 = vmul.f32 1.0614054, %v4587_v31  ;;  %v3619_v26 = vpop.eup %3618 }
 0x137   :  { %v4595_v60 = vadd.f32 %v6434_v63, %v4129_v7  ;;  %v2026_v24 = vsub.f32 1.0, %v1962_v44  ;;  %v1850_v53 = vmul.f32 1.442695, %v1774_v16  ;;  %3626 = vrcp.f32 %v946_v41 }
 0x138   :  { %v1393_v49 = vmul.f32 %v4557_v35, %v1329_v4  ;;  %v2283_v34 = vadd.f32 1.0, %v2219_v50  ;;  %v4601_v15 = vmul.f32 0.5, %v4429_v40  ;;  %v4604_v55 = vmul.f32 0.5, %v4447_v28 }
 0x139   :  { %v1200_v21 = vadd.f32 -1.4531521, %v1136_v1  ;;  %v1645_v36 = vmul.f32 %v4463_v54, %v1581_v18  ;;  %v1580_v63 = vadd.f32 0.2548296, %v1516_v45  ;;  %v1777_v3 = vmul.f32 %v1713_v5, %v4475_v43 }
 0x13a   :  { %v1712_v38 = vsub.f32 0.0, %v4511_v39  ;;  %v1583_v44 = vadd.f32 0.2548296, %v1519_v59  ;;  %v1518_v16 = vmul.f32 %v4528_v51, %v1454_v27  ;;  %v4612_v50 = vmul.f32 0.70710677, %v4595_v60 }
 0x13b   :  { %v1264_v4 = vmul.f32 %v4587_v31, %v1200_v21  ;;  %v4614_v40 = vpop.eup %3620  ;;  %v2154_v28 = vsub.f32 0.0, %v2026_v24  ;;  %3628 = vpow2.f32 %v1850_v53  ;;  %v1457_v41 = vadd.f32 -0.28449672, %v1393_v49 }
 0x13c   :  { %v1715_v54 = vsub.f32 0.0, %v4532_v12  ;;  %v3623_v18 = vpop.eup %3622  ;;  %v4618_v43 = vmul.f32 %v2283_v34, %v4381_v22  ;;  %v1139_v45 = vmul.f32 1.0614054, %v4614_v40  ;;  %v4622_v59 = vand.u32 2147483647, %v4612_v50 }
 0x13d   :  { %v1328_v5 = vadd.f32 1.4214138, %v1264_v4  ;;  %v1965_v27 = vmul.f32 %v3619_v26, %v1645_v36  ;;  %v1644_v1 = vmul.f32 %v4484_v52, %v1580_v63  ;;  %v1856_v21 = vmul.f32 1.442695, %v1777_v3  ;;  %v4637_v3 = vpop.f32.mrb[38].mxu0  ;;  %v6437_v63 = vld [vmem:[#allocation5_spill] sm:$0xff] }
 0x13e   :  { %v1776_v30 = vmul.f32 %v1712_v38, %v4511_v39  ;;  %v3625_v53 = vpop.eup %3624  ;;  %v1647_v49 = vmul.f32 %v4519_v25, %v1583_v44  ;;  %v1582_v57 = vadd.f32 0.2548296, %v1518_v16  ;;  %v1203_v42 = vadd.f32 -1.4531521, %v1139_v45  ;;  %6436 = vst [vmem:[#allocation4_spill] sm:$0xff] %v4637_v3 }
 0x13f   :  { %v885_v22 = vmul.f32 0.3275911, %v4622_v59  ;;  %v2218_v34 = vsel %vm2090_vm10, %v2026_v24, %v2154_v28  ;;  %v4631_v4 = vmul.f32 0.5, %v4482_v37  ;;  %v1392_v26 = vmul.f32 %v4587_v31, %v1328_v5 }
 0x140   :  { %v4635_v52 = vmul.f32 0.5, %v4492_v32  ;;  %vm2093_vm11 = vcmp.ge.f32.partialorder %v4367_v33, 0.0  ;;  %v1521_v39 = vmul.f32 %v4557_v35, %v1457_v41  ;;  %v1267_v25 = vmul.f32 %v4614_v40, %v1203_v42 }
 0x141   :  { %v1779_v38 = vmul.f32 %v1715_v54, %v4532_v12  ;;  %v949_v58 = vadd.f32 1.0, %v885_v22  ;;  %v4643_v24 = vpop.eup %3626  ;;  %v2029_v37 = vsub.f32 1.0, %v1965_v27  ;;  %3630 = vpow2.f32 %v1856_v21 }
 0x142   :  { %v1854_v36 = vmul.f32 1.442695, %v1776_v30  ;;  %v4647_v32 = vadd.f32 %v4129_v7, %v6437_v63  ;;  %v1964_v44 = vmul.f32 %v3623_v18, %v1644_v1  ;;  %v1967_v16 = vmul.f32 %v3625_v53, %v1647_v49 }
 0x143   :  { %v1646_v28 = vmul.f32 %v4528_v51, %v1582_v57  ;;  %v1331_v5 = vadd.f32 1.4214138, %v1267_v25  ;;  %v2282_v41 = vadd.f32 1.0, %v2218_v34  ;;  %v1456_v45 = vadd.f32 -0.28449672, %v1392_v26  ;;  %v4657_v57 = vpop.f32.mrb[39].mxu0 }
 0x144   :  { %v1138_v42 = vmul.f32 1.0614054, %v4643_v24  ;;  %3632 = vrcp.f32 %v949_v58  ;;  %v1585_v12 = vadd.f32 0.2548296, %v1521_v39  ;;  %v1860_v27 = vmul.f32 1.442695, %v1779_v38 }
 0x145   :  { %v1395_v54 = vmul.f32 %v4614_v40, %v1331_v5  ;;  %v1714_v30 = vsub.f32 0.0, %v4568_v0  ;;  %v3629_v21 = vpop.eup %3628  ;;  %v2157_v22 = vsub.f32 0.0, %v2029_v37  ;;  %vm2092_vm12 = vcmp.ge.f32.partialorder %v4393_v20, 0.0  ;;  %6438 = vst [vmem:[#allocation5_spill] sm:$0xff] %v4657_v57  ;;  %v6439_v34 = vld [vmem:[#allocation6_spill] sm:$0xff] }
 0x146   :  { %3634 = vpow2.f32 %v1854_v36  ;;  %v1202_v18 = vadd.f32 -1.4531521, %v1138_v42  ;;  %v4655_v51 = vmul.f32 0.70710677, %v4647_v32  ;;  %v2028_v1 = vsub.f32 1.0, %v1964_v44 }
 0x147   :  { %v2031_v53 = vsub.f32 1.0, %v1967_v16  ;;  %vm2095_vm13 = vcmp.ge.f32.partialorder %v4419_v19, 0.0  ;;  %v1966_v49 = vmul.f32 %v3629_v21, %v1646_v28  ;;  %v4662_v26 = vadd.f32 %v6439_v34, %v4129_v7 }
 0x148   :  { %v1520_v39 = vmul.f32 %v4587_v31, %v1456_v45  ;;  %v1459_v25 = vadd.f32 -0.28449672, %v1395_v54  ;;  %v1266_v38 = vmul.f32 %v4643_v24, %v1202_v18  ;;  %v4667_v58 = vand.u32 2147483647, %v4655_v51  ;;  %v6440_v45 = vld [vmem:[#allocation7_spill] sm:$0xff] }
 0x149   :  { %v4670_v36 = vmul.f32 %v2282_v41, %v4400_v46  ;;  %v1649_v63 = vmul.f32 %v4557_v35, %v1585_v12  ;;  %3636 = vpow2.f32 %v1860_v27  ;;  %v4674_v44 = vmul.f32 0.5, %v4536_v47 }
 0x14a   :  { %v2221_v16 = vsel %vm2093_vm11, %v2029_v37, %v2157_v22  ;;  %vm2094_vm14 = vcmp.ge.f32.partialorder %v4437_v56, 0.0  ;;  %v1330_v28 = vadd.f32 1.4214138, %v1266_v38  ;;  %v884_v5 = vmul.f32 0.3275911, %v4667_v58 }
 0x14b   :  { %v4682_v42 = vadd.f32 %v4129_v7, %v6440_v45  ;;  %v2156_v46 = vsub.f32 0.0, %v2028_v1  ;;  %v2030_v41 = vsub.f32 1.0, %v1966_v49  ;;  %v1778_v35 = vmul.f32 %v1714_v30, %v4568_v0  ;;  %v3631_v47 = vpop.eup %3630  ;;  %v4695_v49 = vpop.f32.mrb[40].mxu0 }
 0x14c   :  { %v4686_v12 = vmul.f32 0.70710677, %v4662_v26  ;;  %v2159_v54 = vsub.f32 0.0, %v2031_v53  ;;  %v1584_v33 = vadd.f32 0.2548296, %v1520_v39  ;;  %v1523_v37 = vmul.f32 %v4614_v40, %v1459_v25  ;;  %6441 = vst [vmem:[#allocation6_spill] sm:$0xff] %v4695_v49 }
 0x14d   :  { %v948_v27 = vadd.f32 1.0, %v884_v5  ;;  %v2285_v21 = vadd.f32 1.0, %v2221_v16  ;;  %v1969_v22 = vmul.f32 %v3631_v47, %v1649_v63  ;;  %v4690_v18 = vmul.f32 0.5, %v4595_v60 }
 0x14e   :  { %v4693_v7 = vand.u32 2147483647, %v4686_v12  ;;  %v4697_v0 = vpop.eup %3632  ;;  %v1394_v30 = vmul.f32 %v4643_v24, %v1330_v28  ;;  %v1717_v34 = vsub.f32 0.0, %v4622_v59  ;;  %v4702_v39 = vmul.f32 0.70710677, %v4682_v42 }
 0x14f   :  { %3638 = vrcp.f32 %v948_v27  ;;  %v2220_v25 = vsel %vm2092_vm12, %v2028_v1, %v2156_v46  ;;  %v2158_v60 = vsub.f32 0.0, %v2030_v41  ;;  %v1141_v38 = vmul.f32 1.0614054, %v4697_v0 }
 0x150   :  { %v887_v63 = vmul.f32 0.3275911, %v4693_v7  ;;  %v3635_v16 = vpop.eup %3634  ;;  %v2223_v5 = vsel %vm2095_vm13, %v2031_v53, %v2159_v54  ;;  %vm2097_vm15 = vcmp.ge.f32.partialorder %v4461_v6, 0.0  ;;  %v1648_v28 = vmul.f32 %v4587_v31, %v1584_v33 }
 0x151   :  { %v1587_v45 = vadd.f32 0.2548296, %v1523_v37  ;;  %v1858_v47 = vmul.f32 1.442695, %v1778_v35  ;;  %v2033_v27 = vsub.f32 1.0, %v1969_v22  ;;  %v4716_v1 = vmul.f32 %v2285_v21, %v4466_v61  ;;  %v6443_v21 = vld [vmem:[#allocation9_spill] sm:$0xff] }
 0x152   :  { %v1205_v49 = vadd.f32 -1.4531521, %v1141_v38  ;;  %v951_v57 = vadd.f32 1.0, %v887_v63  ;;  %v4713_v20 = vand.u32 2147483647, %v4702_v39  ;;  %v2284_v46 = vadd.f32 1.0, %v2220_v25 }
 0x153   :  { %6442 = vst [vmem:[#allocation7_spill] sm:$0xff] %v4716_v1  ;;  %v1458_v3 = vadd.f32 -0.28449672, %v1394_v30  ;;  %v1781_v19 = vmul.f32 %v1717_v34, %v4622_v59  ;;  %v3637_v53 = vpop.eup %3636  ;;  %v2222_v54 = vsel %vm2094_vm14, %v2030_v41, %v2158_v60  ;;  %v2287_v33 = vadd.f32 1.0, %v2223_v5  ;;  %v4726_v61 = vld [vmem:[%s6397_s2] ss:$0 sm:$0xff] }
 0x154   :  { %v1269_v31 = vmul.f32 %v4697_v0, %v1205_v49  ;;  %3640 = vrcp.f32 %v951_v57  ;;  %v886_v35 = vmul.f32 0.3275911, %v4713_v20  ;;  %v1968_v37 = vmul.f32 %v3635_v16, %v1648_v28  ;;  %v4733_v57 = vpop.f32.mrb[41].mxu0  ;;  %v6445_v60 = vld [vmem:[#allocation10_spill] sm:$0xff] }
 0x155   :  { %3642 = vpow2.f32 %v1858_v47  ;;  %v4730_v59 = vadd.f32 %v4726_v61, %v6443_v21  ;;  %v2161_v22 = vsub.f32 0.0, %v2033_v27  ;;  %v1651_v56 = vmul.f32 %v4614_v40, %v1587_v45  ;;  %6444 = vst [vmem:[#allocation9_spill] sm:$0xff] %v4733_v57 }
 0x156   :  { %v1333_v41 = vadd.f32 1.4214138, %v1269_v31  ;;  %v950_v49 = vadd.f32 1.0, %v886_v35  ;;  %v2286_v30 = vadd.f32 1.0, %v2222_v54  ;;  %v1522_v34 = vmul.f32 %v4643_v24, %v1458_v3 }
 0x157   :  { %v1864_v25 = vmul.f32 1.442695, %v1781_v19  ;;  %v4738_v38 = vadd.f32 %v4726_v61, %v6445_v60  ;;  %vm2096_vm0 = vcmp.ge.f32.partialorder %v4496_v62, 0.0  ;;  %v1716_v16 = vsub.f32 0.0, %v4667_v58 }
 0x158   :  { %v1397_v63 = vmul.f32 %v4697_v0, %v1333_v41  ;;  %3644 = vrcp.f32 %v950_v49  ;;  %v4744_v40 = vmul.f32 0.70710677, %v4730_v59  ;;  %v4749_v28 = vmul.f32 %v2284_v46, %v4508_v13 }
 0x159   :  { %v4746_v5 = vpop.eup %3638  ;;  %v4752_v3 = vmul.f32 %v2287_v33, %v4542_v29  ;;  %v2032_v45 = vsub.f32 1.0, %v1968_v37  ;;  %v4755_v47 = vmul.f32 0.5, %v4647_v32  ;;  %v2225_v19 = vsel %vm2097_vm15, %v2033_v27, %v2161_v22 }
 0x15a   :  { %v1971_v54 = vmul.f32 %v3637_v53, %v1651_v56  ;;  %v1140_v31 = vmul.f32 1.0614054, %v4746_v5  ;;  %v4761_v35 = vand.u32 2147483647, %v4744_v40  ;;  %v4764_v21 = vmul.f32 %v2286_v30, %v4601_v15 }
 0x15b   :  { %6446 = vst [vmem:[#allocation10_spill] sm:$0xff] %v4752_v3  ;;  %v1586_v13 = vadd.f32 0.2548296, %v1522_v34  ;;  %3646 = vpow2.f32 %v1864_v25  ;;  %v4767_v29 = vmul.f32 0.70710677, %v4738_v38  ;;  %v1780_v33 = vmul.f32 %v1716_v16, %v4667_v58  ;;  %v4789_v16 = vpop.f32.mrb[42].mxu0 }
 0x15c   :  { %6447 = vst [vmem:[#allocation26_spill] sm:$0xff] %v4764_v21  ;;  %v1461_v46 = vadd.f32 -0.28449672, %v1397_v63  ;;  %v1204_v32 = vadd.f32 -1.4531521, %v1140_v31  ;;  %v2289_v27 = vadd.f32 1.0, %v2225_v19  ;;  %v4781_v58 = vadd.f32 %v4726_v61, %v4335_v8 }
 0x15d   :  { %v889_v6 = vmul.f32 0.3275911, %v4761_v35  ;;  %v2160_v53 = vsub.f32 0.0, %v2032_v45  ;;  %vm2099_vm1 = vcmp.ge.f32.partialorder %v4517_v23, 0.0  ;;  %v1719_v37 = vsub.f32 0.0, %v4693_v7  ;;  %6448 = vst [vmem:[#allocation27_spill] sm:$0xff] %v4789_v16 }
 0x15e   :  { %v4774_v15 = vand.u32 2147483647, %v4767_v29  ;;  %v4776_v22 = vpop.eup %3640  ;;  %v2035_v56 = vsub.f32 1.0, %v1971_v54  ;;  %v1268_v41 = vmul.f32 %v4746_v5, %v1204_v32  ;;  %v1650_v34 = vmul.f32 %v4643_v24, %v1586_v13 }
 0x15f   :  { %v953_v49 = vadd.f32 1.0, %v889_v6  ;;  %v3643_v30 = vpop.eup %3642  ;;  %v4785_v25 = vmul.f32 0.5, %v4662_v26  ;;  %v1143_v60 = vmul.f32 1.0614054, %v4776_v22  ;;  %v1525_v19 = vmul.f32 %v4697_v0, %v1461_v46 }
 0x160   :  { %v888_v63 = vmul.f32 0.3275911, %v4774_v15  ;;  %v1332_v54 = vadd.f32 1.4214138, %v1268_v41  ;;  %v1862_v31 = vmul.f32 1.442695, %v1780_v33  ;;  %v2224_v8 = vsel %vm2096_vm0, %v2032_v45, %v2160_v53 }
 0x161   :  { %3648 = vrcp.f32 %v953_v49  ;;  %v1207_v32 = vadd.f32 -1.4531521, %v1143_v60  ;;  %v1783_v24 = vmul.f32 %v1719_v37, %v4693_v7  ;;  %v2163_v6 = vsub.f32 0.0, %v2035_v56 }
 0x162   :  { %v952_v13 = vadd.f32 1.0, %v888_v63  ;;  %v4795_v26 = vpop.eup %3644  ;;  %v1396_v57 = vmul.f32 %v4746_v5, %v1332_v54  ;;  %v1718_v3 = vsub.f32 0.0, %v4713_v20  ;;  %v4800_v16 = vmul.f32 0.70710677, %v4781_v58  ;;  %v4819_v63 = vpop.f32.mrb[43].mxu0 }
 0x163   :  { %v4802_v46 = vmul.f32 %v3643_v30, %v1650_v34  ;;  %v1271_v33 = vmul.f32 %v4776_v22, %v1207_v32  ;;  %v1142_v62 = vmul.f32 1.0614054, %v4795_v26  ;;  %v4808_v7 = vadd.f32 %v4726_v61, %v4338_v14  ;;  %6450 = vst [vmem:[#allocation29_spill] sm:$0xff] %v4819_v63 }
 0x164   :  { %v1589_v45 = vadd.f32 0.2548296, %v1525_v19  ;;  %v1460_v53 = vadd.f32 -0.28449672, %v1396_v57  ;;  %3650 = vrcp.f32 %v952_v13  ;;  %v4811_v37 = vand.u32 2147483647, %v4800_v16 }
 0x165   :  { %v3647_v41 = vpop.eup %3646  ;;  %v4814_v49 = vmul.f32 %v2289_v27, %v4604_v55  ;;  %v1335_v30 = vadd.f32 1.4214138, %v1271_v33  ;;  %v4817_v34 = vmul.f32 0.5, %v4682_v42  ;;  %v1206_v60 = vadd.f32 -1.4531521, %v1142_v62 }
 0x166   :  { %v2288_v54 = vadd.f32 1.0, %v2224_v8  ;;  %v2227_v14 = vsel %vm2099_vm1, %v2035_v56, %v2163_v6  ;;  %v1782_v57 = vmul.f32 %v1718_v3, %v4713_v20  ;;  %v891_v19 = vmul.f32 0.3275911, %v4811_v37 }
 0x167   :  { %6449 = vst [vmem:[#allocation28_spill] sm:$0xff] %v4814_v49  ;;  %v1399_v32 = vmul.f32 %v4776_v22, %v1335_v30  ;;  %v1868_v13 = vmul.f32 1.442695, %v1783_v24  ;;  %v1270_v55 = vmul.f32 %v4795_v26, %v1206_v60  ;;  %v4828_v27 = vmul.f32 0.70710677, %v4808_v7  ;;  %v2408_v24 = vld [vmem:[%s6396_s3 + $0x30] sm:$0xff] }
 0x168   :  { %v2034_v42 = vsub.f32 1.0, %v4802_v46  ;;  %v1653_v33 = vmul.f32 %v4697_v0, %v1589_v45  ;;  %3652 = vpow2.f32 %v1862_v31  ;;  %v955_v8 = vadd.f32 1.0, %v891_v19  ;;  %v2409_v31 = vld [vmem:[%s6396_s3 + $0x38] sm:$0xff] }
 0x169   :  { %v2291_v23 = vadd.f32 1.0, %v2227_v14  ;;  %vm2098_vm2 = vcmp.ge.f32.partialorder %v4553_v17, 0.0  ;;  %v1524_v20 = vmul.f32 %v4746_v5, %v1460_v53  ;;  %v1463_v3 = vadd.f32 -0.28449672, %v1399_v32  ;;  %v4853_v32 = vpop.f32.mrb[44].mxu0 }
 0x16a   :  { %v1334_v56 = vadd.f32 1.4214138, %v1270_v55  ;;  %v1866_v62 = vmul.f32 1.442695, %v1782_v57  ;;  %v1721_v46 = vsub.f32 0.0, %v4761_v35  ;;  %3654 = vrcp.f32 %v955_v8 }
 0x16b   :  { %v4837_v6 = vpop.eup %3648  ;;  %v4841_v0 = vand.u32 2147483647, %v4828_v27  ;;  %v1527_v45 = vmul.f32 %v4776_v22, %v1463_v3  ;;  %3656 = vpow2.f32 %v1868_v13  ;;  %v2162_v60 = vsub.f32 0.0, %v2034_v42 }
 0x16c   :  { %v1398_v53 = vmul.f32 %v4795_v26, %v1334_v56  ;;  %v1145_v30 = vmul.f32 1.0614054, %v4837_v6  ;;  %v4849_v14 = vmul.f32 %v3647_v41, %v1653_v33  ;;  %v1720_v57 = vsub.f32 0.0, %v4774_v15  ;;  %v4862_v33 = vpop.f32.mrb[45].mxu0 }
 0x16d   :  { %v890_v19 = vmul.f32 0.3275911, %v4841_v0  ;;  %v1588_v55 = vadd.f32 0.2548296, %v1524_v20  ;;  %v3554_v49 = vpack.c.bf16 %v2409_v31, %v2408_v24  ;;  %3658 = vpow2.f32 %v1866_v62  ;;  %6451 = vst [vmem:[#allocation30_spill] sm:$0xff] %v4862_v33 }
 0x16e   :  { %v1462_v8 = vadd.f32 -0.28449672, %v1398_v53  ;;  %v1209_v63 = vadd.f32 -1.4531521, %v1145_v30  ;;  %v4855_v21 = vpop.eup %3650  ;;  %v1785_v13 = vmul.f32 %v1721_v46, %v4761_v35  ;;  %v4860_v41 = vadd.f32 %v4726_v61, %v4343_v48 }
 0x16f   :  { %v954_v3 = vadd.f32 1.0, %v890_v19  ;;  %v1591_v56 = vadd.f32 0.2548296, %v1527_v45  ;;  %v1144_v53 = vmul.f32 1.0614054, %v4855_v21  ;;  %3555 = vmatprep.subr.bf16.mxu0 %v3554_v49  ;;  %3561 = vmatprep.subr.bf16.mxu1 %v3554_v49  ;;  %v4868_v24 = vmul.f32 %v2288_v54, %v4631_v4 }
 0x170   :  { %v1526_v1 = vmul.f32 %v4795_v26, %v1462_v8  ;;  %v1273_v20 = vmul.f32 %v4837_v6, %v1209_v63  ;;  %vm2101_vm3 = vcmp.ge.f32.partialorder %v4612_v50, 0.0  ;;  %v4872_v35 = vmul.f32 0.5, %v4730_v59  ;;  %3557 = vmatpush3.bf16.msra.mxu0 %v3554_v49  ;;  %3565 = vmatpush3.bf16.msra.mxu1 %v3554_v49  ;;  %v6453_v50 = vld [vmem:[#allocation12_spill] sm:$0xff] }
 0x171   :  { %v1784_v48 = vmul.f32 %v1720_v57, %v4774_v15  ;;  %3660 = vrcp.f32 %v954_v3  ;;  %v2037_v62 = vsub.f32 1.0, %v4849_v14  ;;  %v1652_v63 = vmul.f32 %v4746_v5, %v1588_v55 }
 0x172   :  { %v1337_v46 = vadd.f32 1.4214138, %v1273_v20  ;;  %v1208_v31 = vadd.f32 -1.4531521, %v1144_v53  ;;  %v3653_v45 = vpop.eup %3652  ;;  %v2226_v4 = vsel %vm2098_vm2, %v2034_v42, %v2162_v60  ;;  %v1590_v54 = vadd.f32 0.2548296, %v1526_v1 }
 0x173   :  { %v4880_v30 = vmul.f32 0.70710677, %v4860_v41  ;;  %vm2417_vm4 = vcmask 523264   ;;  %v4883_v59 = vmul.f32 %v2291_v23, %v4635_v52  ;;  %v1655_v15 = vmul.f32 %v4776_v22, %v1591_v56  ;;  %v4909_v56 = vpop.f32.mrb[46].mxu0 }
 0x174   :  { %v1401_v49 = vmul.f32 %v4837_v6, %v1337_v46  ;;  %v1872_v14 = vmul.f32 1.442695, %v1785_v13  ;;  %3446 = vmatprep.mubr.msk.f32.mxu0 %vm2417_vm4, %v4453_v10  ;;  %v4889_v5 = vpop.eup %3654  ;;  %v4892_v17 = vmul.f32 0.5, %v4738_v38  ;;  %v1272_v1 = vmul.f32 %v4855_v21, %v1208_v31  ;;  %6452 = vst [vmem:[#allocation31_spill] sm:$0xff] %v4909_v56 }
 0x175   :  { %v4896_v42 = vmul.f32 0.5, %v4781_v58  ;;  %v4899_v52 = vand.u32 2147483647, %v4880_v30  ;;  %3447 = vmatmul.mubr.msk.f32.vlgmr.msra.gmra.mrb[64].mxu0 %vm2417_vm4, %v4450_v2  ;;  %v3657_v22 = vpop.eup %3656  ;;  %v2290_v23 = vadd.f32 1.0, %v2226_v4  ;;  %v2165_v60 = vsub.f32 0.0, %v2037_v62 }
 0x176   :  { %v1972_v10 = vmul.f32 %v3653_v45, %v1652_v63  ;;  %v1870_v57 = vmul.f32 1.442695, %v1784_v48  ;;  %v1654_v19 = vmul.f32 %v4795_v26, %v1590_v54  ;;  %v1336_v38 = vadd.f32 1.4214138, %v1272_v1 }
 0x177   :  { %v1147_v55 = vmul.f32 1.0614054, %v4889_v5  ;;  %v893_v8 = vmul.f32 0.3275911, %v4899_v52  ;;  %v4906_v58 = vmul.f32 %v3657_v22, %v1655_v15  ;;  %v1465_v13 = vadd.f32 -0.28449672, %v1401_v49  ;;  %v3659_v2 = vpop.eup %3658 }
 0x178   :  { %3662 = vpow2.f32 %v1872_v14  ;;  %v1723_v3 = vsub.f32 0.0, %v4811_v37  ;;  %vm2100_vm5 = vcmp.ge.f32.partialorder %v4655_v51, 0.0  ;;  %v1400_v20 = vmul.f32 %v4855_v21, %v1336_v38 }
 0x179   :  { %v1211_v53 = vadd.f32 -1.4531521, %v1147_v55  ;;  %v957_v26 = vadd.f32 1.0, %v893_v8  ;;  %v4915_v48 = vadd.f32 %v4726_v61, %v4352_v9  ;;  %v4918_v63 = vmul.f32 %v2290_v23, %v4674_v44 }
 0x17a   :  { %v2229_v46 = vsel %vm2101_vm3, %v2037_v62, %v2165_v60  ;;  %v2036_v31 = vsub.f32 1.0, %v1972_v10  ;;  %3664 = vpow2.f32 %v1870_v57  ;;  %v1974_v4 = vmul.f32 %v3659_v2, %v1654_v19 }
 0x17b   :  { %v4922_v45 = vpop.eup %3660  ;;  %v1275_v54 = vmul.f32 %v4889_v5, %v1211_v53  ;;  %v1722_v15 = vsub.f32 0.0, %v4841_v0  ;;  %3666 = vrcp.f32 %v957_v26  ;;  %v2039_v49 = vsub.f32 1.0, %v4906_v58 }
 0x17c   :  { %vm2103_vm6 = vcmp.ge.f32.partialorder %v4686_v12, 0.0  ;;  %v1529_v9 = vmul.f32 %v4837_v6, %v1465_v13  ;;  %v1146_v44 = vmul.f32 1.0614054, %v4922_v45  ;;  %v4932_v62 = vadd.f32 %v4726_v61, %v6453_v50 }
 0x17d   :  { %v1464_v14 = vadd.f32 -0.28449672, %v1400_v20  ;;  %v1339_v1 = vadd.f32 1.4214138, %v1275_v54  ;;  %v1787_v22 = vmul.f32 %v1723_v3, %v4811_v37  ;;  %v4936_v23 = vmul.f32 0.70710677, %v4915_v48 }
 0x17e   :  { %v2293_v60 = vadd.f32 1.0, %v2229_v46  ;;  %v2164_v10 = vsub.f32 0.0, %v2036_v31  ;;  %vm2102_vm7 = vcmp.ge.f32.partialorder %v4702_v39, 0.0  ;;  %v4940_v57 = vmul.f32 0.5, %v4808_v7  ;;  %v4952_v20 = vpop.f32.mrb[47].mxu0 }
 0x17f   :  { %v1210_v19 = vadd.f32 -1.4531521, %v1146_v44  ;;  %v2038_v38 = vsub.f32 1.0, %v1974_v4  ;;  %v1403_v55 = vmul.f32 %v4889_v5, %v1339_v1  ;;  %v1786_v8 = vmul.f32 %v1722_v15, %v4841_v0  ;;  %6454 = vst [vmem:[#allocation12_spill] sm:$0xff] %v4952_v20 }
 0x180   :  { %v4945_v58 = vand.u32 2147483647, %v4936_v23  ;;  %v1593_v37 = vadd.f32 0.2548296, %v1529_v9  ;;  %v1725_v3 = vsub.f32 0.0, %v4899_v52  ;;  %v2167_v7 = vsub.f32 0.0, %v2039_v49 }
 0x181   :  { %v1274_v13 = vmul.f32 %v4922_v45, %v1210_v19  ;;  %v4950_v2 = vmul.f32 0.70710677, %v4932_v62  ;;  %v1528_v53 = vmul.f32 %v4855_v21, %v1464_v14  ;;  %v1876_v26 = vmul.f32 1.442695, %v1787_v22 }
 0x182   :  { %v892_v46 = vmul.f32 0.3275911, %v4945_v58  ;;  %v3663_v0 = vpop.eup %3662  ;;  %v4957_v4 = vmul.f32 %v2293_v60, %v4690_v18  ;;  %v2228_v54 = vsel %vm2100_vm5, %v2036_v31, %v2164_v10  ;;  %v2166_v44 = vsub.f32 0.0, %v2038_v38 }
 0x183   :  { %v1338_v15 = vadd.f32 1.4214138, %v1274_v13  ;;  %v4962_v9 = vand.u32 2147483647, %v4950_v2  ;;  %v1467_v50 = vadd.f32 -0.28449672, %v1403_v55  ;;  %v1657_v14 = vmul.f32 %v4837_v6, %v1593_v37 }
 0x184   :  { %v1874_v1 = vmul.f32 1.442695, %v1786_v8  ;;  %v956_v19 = vadd.f32 1.0, %v892_v46  ;;  %v3665_v20 = vpop.eup %3664  ;;  %v1789_v56 = vmul.f32 %v1725_v3, %v4899_v52  ;;  %v2292_v51 = vadd.f32 1.0, %v2228_v54  ;;  %v4972_v55 = vpop.f32.mrb[48].mxu0 }
 0x185   :  { %v1402_v22 = vmul.f32 %v4922_v45, %v1338_v15  ;;  %v895_v18 = vmul.f32 0.3275911, %v4962_v9  ;;  %v4968_v60 = vpop.eup %3666  ;;  %v2231_v31 = vsel %vm2103_vm6, %v2039_v49, %v2167_v7  ;;  %v1592_v10 = vadd.f32 0.2548296, %v1528_v53  ;;  %6455 = vst [vmem:[#allocation32_spill] sm:$0xff] %v4972_v55 }
 0x186   :  { %3668 = vrcp.f32 %v956_v19  ;;  %v4975_v6 = vmul.f32 0.5, %v4860_v41  ;;  %v1149_v37 = vmul.f32 1.0614054, %v4968_v60  ;;  %v2230_v52 = vsel %vm2102_vm7, %v2038_v38, %v2166_v44  ;;  %v6456_v41 = vld [vmem:[#allocation13_spill] sm:$0xff] }
 0x187   :  { %3670 = vpow2.f32 %v1876_v26  ;;  %v1466_v8 = vadd.f32 -0.28449672, %v1402_v22  ;;  %v1531_v13 = vmul.f32 %v4889_v5, %v1467_v50  ;;  %v959_v3 = vadd.f32 1.0, %v895_v18  ;;  %v6457_v50 = vld [vmem:[#allocation16_spill] sm:$0xff] }
 0x188   :  { %3672 = vpow2.f32 %v1874_v1  ;;  %v2295_v12 = vadd.f32 1.0, %v2231_v31  ;;  %v1977_v49 = vmul.f32 %v3663_v0, %v1657_v14  ;;  %v1213_v7 = vadd.f32 -1.4531521, %v1149_v37 }
 0x189   :  { %v1880_v53 = vmul.f32 1.442695, %v1789_v56  ;;  %v4982_v46 = vmul.f32 %v2292_v51, %v4755_v47  ;;  %v1656_v26 = vmul.f32 %v4855_v21, %v1592_v10  ;;  %3674 = vrcp.f32 %v959_v3  ;;  %v6458_v21 = vld [vmem:[#allocation19_spill] sm:$0xff]  ;;  %v5010_v10 = vpop.f32.mrb[49].mxu0 }
 0x18a   :  { %v1124_v54 = vmul.f32 1.0614054, %v6456_v41  ;;  %v2294_v15 = vadd.f32 1.0, %v2230_v52  ;;  %v1530_v39 = vmul.f32 %v4922_v45, %v1466_v8  ;;  %v1277_v38 = vmul.f32 %v4968_v60, %v1213_v7  ;;  %6459 = vst [vmem:[#allocation13_spill] sm:$0xff] %v5010_v10 }
 0x18b   :  { %v4989_v44 = vmul.f32 0.5, %v4915_v48  ;;  %vm2105_vm8 = vcmp.ge.f32.partialorder %v4744_v40, 0.0  ;;  %v1595_v0 = vadd.f32 0.2548296, %v1531_v13  ;;  %v4994_v47 = vadd.f32 %v4726_v61, %v6457_v50 }
 0x18c   :  { %v1188_v56 = vadd.f32 -1.4531521, %v1124_v54  ;;  %v4998_v1 = vadd.f32 %v4726_v61, %v6458_v21  ;;  %v5001_v19 = vmul.f32 %v2295_v12, %v4785_v25  ;;  %v2041_v14 = vsub.f32 1.0, %v1977_v49 }
 0x18d   :  { %v1341_v22 = vadd.f32 1.4214138, %v1277_v38  ;;  %3676 = vpow2.f32 %v1880_v53  ;;  %v1976_v48 = vmul.f32 %v3665_v20, %v1656_v26  ;;  %v5004_v18 = vmul.f32 0.5, %v4932_v62 }
 0x18e   :  { %v1252_v51 = vmul.f32 %v6456_v41, %v1188_v56  ;;  %v5008_v31 = vmul.f32 0.70710677, %v4994_v47  ;;  %v1594_v8 = vadd.f32 0.2548296, %v1530_v39  ;;  %v1724_v25 = vsub.f32 0.0, %v4945_v58 }
 0x18f   :  { %v1405_v37 = vmul.f32 %v4968_v60, %v1341_v22  ;;  %v5015_v52 = vmul.f32 0.70710677, %v4998_v1  ;;  %v5020_v62 = vmul.f32 %v2294_v15, %v4817_v34  ;;  %v1659_v20 = vmul.f32 %v4889_v5, %v1595_v0 }
 0x190   :  { %v5017_v13 = vpop.eup %3668  ;;  %v1316_v3 = vadd.f32 1.4214138, %v1252_v51  ;;  %v5024_v12 = vand.u32 2147483647, %v5008_v31  ;;  %v2169_v7 = vsub.f32 0.0, %v2041_v14  ;;  %vm2104_vm9 = vcmp.ge.f32.partialorder %v4767_v29, 0.0 }
 0x191   :  { %v3671_v49 = vpop.eup %3670  ;;  %v1469_v53 = vadd.f32 -0.28449672, %v1405_v37  ;;  %v1148_v26 = vmul.f32 1.0614054, %v5017_v13  ;;  %v1727_v54 = vsub.f32 0.0, %v4962_v9  ;;  %v2040_v38 = vsub.f32 1.0, %v1976_v48 }
 0x192   :  { %v3673_v39 = vpop.eup %3672  ;;  %v1380_v34 = vmul.f32 %v6456_v41, %v1316_v3  ;;  %v894_v15 = vmul.f32 0.3275911, %v5024_v12  ;;  %v5032_v5 = vand.u32 2147483647, %v5015_v52  ;;  %v1658_v0 = vmul.f32 %v4922_v45, %v1594_v8  ;;  %v5045_v8 = vpop.f32.mrb[50].mxu0 }
 0x193   :  { %v1533_v56 = vmul.f32 %v4968_v60, %v1469_v53  ;;  %v1212_v50 = vadd.f32 -1.4531521, %v1148_v26  ;;  %v1788_v21 = vmul.f32 %v1724_v25, %v4945_v58  ;;  %v5037_v22 = vpop.eup %3674  ;;  %v1979_v51 = vmul.f32 %v3671_v49, %v1659_v20  ;;  %6460 = vst [vmem:[#allocation16_spill] sm:$0xff] %v5045_v8 }
 0x194   :  { %v1444_v37 = vadd.f32 -0.28449672, %v1380_v34  ;;  %v958_v10 = vadd.f32 1.0, %v894_v15  ;;  %v897_v48 = vmul.f32 0.3275911, %v5032_v5  ;;  %v2233_v3 = vsel %vm2105_vm8, %v2041_v14, %v2169_v7 }
 0x195   :  { %v1276_v55 = vmul.f32 %v5017_v13, %v1212_v50  ;;  %v1151_v33 = vmul.f32 1.0614054, %v5037_v22  ;;  %v1791_v45 = vmul.f32 %v1727_v54, %v4962_v9  ;;  %v2168_v53 = vsub.f32 0.0, %v2040_v38  ;;  %v6461_v50 = vld [vmem:[#allocation20_spill] sm:$0xff]  ;;  %v6462_v54 = vld [vmem:[#allocation2_spill] sm:$0xff] }
 0x196   :  { %v1597_v58 = vadd.f32 0.2548296, %v1533_v56  ;;  %v1508_v25 = vmul.f32 %v6456_v41, %v1444_v37  ;;  %3678 = vrcp.f32 %v958_v10  ;;  %vm2107_vm10 = vcmp.ge.f32.partialorder %v4800_v16, 0.0 }
 0x197   :  { %v3677_v20 = vpop.eup %3676  ;;  %v1978_v49 = vmul.f32 %v3673_v39, %v1658_v0  ;;  %v1340_v26 = vadd.f32 1.4214138, %v1276_v55  ;;  %v1215_v40 = vadd.f32 -1.4531521, %v1151_v33  ;;  %v961_v14 = vadd.f32 1.0, %v897_v48 }
 0x198   :  { %v2297_v7 = vadd.f32 1.0, %v2233_v3  ;;  %v2043_v34 = vsub.f32 1.0, %v1979_v51  ;;  %v1572_v15 = vadd.f32 0.2548296, %v1508_v25  ;;  %v5051_v9 = vadd.f32 %v4726_v61, %v6461_v50  ;;  %v6463_v25 = vld [vmem:[#allocation3_spill] sm:$0xff] }
 0x199   :  { %vm2084_vm11 = vcmp.ge.f32.partialorder %v6462_v54, 0.0  ;;  %v1404_v56 = vmul.f32 %v5017_v13, %v1340_v26  ;;  %v1878_v37 = vmul.f32 1.442695, %v1788_v21  ;;  %v1279_v10 = vmul.f32 %v5037_v22, %v1215_v40  ;;  %v5065_v21 = vpop.f32.mrb[51].mxu0 }
 0x19a   :  { %3680 = vrcp.f32 %v961_v14  ;;  %v2232_v55 = vsel %vm2104_vm9, %v2040_v38, %v2168_v53  ;;  %vm2106_vm12 = vcmp.ge.f32.partialorder %v4828_v27, 0.0  ;;  %v1661_v33 = vmul.f32 %v4968_v60, %v1597_v58  ;;  %6464 = vst [vmem:[#allocation19_spill] sm:$0xff] %v5065_v21  ;;  %v6465_v38 = vld [vmem:[#allocation14_spill] sm:$0xff]  ;;  %v5102_v21 = vpop.f32.mrb[52].mxu0  ;;  %v6467_v27 = vld [vmem:[#allocation21_spill] sm:$0xff] }
 0x19b   :  { %v1884_v39 = vmul.f32 1.442695, %v1791_v45  ;;  %v1636_v0 = vmul.f32 %v6456_v41, %v1572_v15  ;;  %v2042_v51 = vsub.f32 1.0, %v1978_v49  ;;  %v1468_v48 = vadd.f32 -0.28449672, %v1404_v56 }
 0x19c   :  { %v1343_v3 = vadd.f32 1.4214138, %v1279_v10  ;;  %v5063_v26 = vadd.f32 %v4726_v61, %v6463_v25  ;;  %v5068_v40 = vmul.f32 %v2297_v7, %v4872_v35  ;;  %v2171_v29 = vsub.f32 0.0, %v2043_v34 }
 0x19d   :  { %v1956_v53 = vmul.f32 %v6465_v38, %v1636_v0  ;;  %v5072_v60 = vmul.f32 0.70710677, %v5051_v9  ;;  %v2296_v45 = vadd.f32 1.0, %v2232_v55  ;;  %v1532_v41 = vmul.f32 %v5017_v13, %v1468_v48 }
 0x19e   :  { %3682 = vpow2.f32 %v1878_v37  ;;  %v1407_v58 = vmul.f32 %v5037_v22, %v1343_v3  ;;  %v1981_v49 = vmul.f32 %v3677_v20, %v1661_v33  ;;  %v1726_v15 = vsub.f32 0.0, %v5024_v12 }
 0x19f   :  { %v2020_v14 = vsub.f32 1.0, %v1956_v53  ;;  %v5078_v50 = vand.u32 2147483647, %v5072_v60  ;;  %v2170_v35 = vsub.f32 0.0, %v2042_v51  ;;  %3684 = vpow2.f32 %v1884_v39 }
 0x1a0   :  { %v1471_v7 = vadd.f32 -0.28449672, %v1407_v58  ;;  %v5081_v56 = vmul.f32 0.70710677, %v5063_v26  ;;  %v5083_v10 = vpop.eup %3678  ;;  %v2235_v37 = vsel %vm2107_vm10, %v2043_v34, %v2171_v29  ;;  %v1729_v20 = vsub.f32 0.0, %v5032_v5 }
 0x1a1   :  { %v2148_v55 = vsub.f32 0.0, %v2020_v14  ;;  %v896_v33 = vmul.f32 0.3275911, %v5078_v50  ;;  %vm2109_vm13 = vcmp.ge.f32.partialorder %v4880_v30, 0.0  ;;  %v1596_v0 = vadd.f32 0.2548296, %v1532_v41 }
 0x1a2   :  { %v1535_v48 = vmul.f32 %v5037_v22, %v1471_v7  ;;  %v1150_v39 = vmul.f32 1.0614054, %v5083_v10  ;;  %v5093_v3 = vand.u32 2147483647, %v5081_v56  ;;  %v2045_v25 = vsub.f32 1.0, %v1981_v49 }
 0x1a3   :  { %v2212_v16 = vsel %vm2084_vm11, %v2020_v14, %v2148_v55  ;;  %v1790_v34 = vmul.f32 %v1726_v15, %v5024_v12  ;;  %v960_v29 = vadd.f32 1.0, %v896_v33  ;;  %v2234_v53 = vsel %vm2106_vm12, %v2042_v51, %v2170_v35  ;;  %v6466_v14 = vld [vmem:[#allocation11_spill] sm:$0xff] }
 0x1a4   :  { %v5098_v38 = vpop.eup %3680  ;;  %v1599_v41 = vadd.f32 0.2548296, %v1535_v48  ;;  %v2276_v58 = vadd.f32 1.0, %v2212_v16  ;;  %v1214_v7 = vadd.f32 -1.4531521, %v1150_v39  ;;  %v1793_v49 = vmul.f32 %v1729_v20, %v5032_v5 }
 0x1a5   :  { %v1153_v8 = vmul.f32 1.0614054, %v5098_v38  ;;  %3686 = vrcp.f32 %v960_v29  ;;  %v899_v54 = vmul.f32 0.3275911, %v5093_v3  ;;  %v1660_v12 = vmul.f32 %v5017_v13, %v1596_v0  ;;  %v5122_v29 = vpop.f32.mrb[53].mxu0 }
 0x1a6   :  { %v2340_v15 = vmul.f32 %v2276_v58, %v6466_v14  ;;  %v1278_v55 = vmul.f32 %v5083_v10, %v1214_v7  ;;  %v5112_v51 = vadd.f32 %v4726_v61, %v6467_v27  ;;  %v5115_v35 = vmul.f32 %v2296_v45, %v4892_v17  ;;  %v6468_v14 = vld [vmem:[#allocation15_spill] sm:$0xff] }
 0x1a7   :  { %v2173_v33 = vsub.f32 0.0, %v2045_v25  ;;  %v1217_v48 = vadd.f32 -1.4531521, %v1153_v8  ;;  %v963_v39 = vadd.f32 1.0, %v899_v54  ;;  %v2299_v20 = vadd.f32 1.0, %v2235_v37 }
 0x1a8   :  { %v3683_v5 = vpop.eup %3682  ;;  %v1663_v16 = vmul.f32 %v5037_v22, %v1599_v41  ;;  %3449 = vmatprep.mubr.msk.f32.mxu1 %vm2417_vm4, %v2340_v15  ;;  %v5120_v13 = vmul.f32 0.5, %v4994_v47  ;;  %v1342_v0 = vadd.f32 1.4214138, %v1278_v55  ;;  %v2298_v58 = vadd.f32 1.0, %v2234_v53  ;;  %v6469_v41 = vld [vmem:[#allocation18_spill] sm:$0xff] }
 0x1a9   :  { %v1882_v7 = vmul.f32 1.442695, %v1790_v34  ;;  %3450 = vmatmul.mubr.msk.f32.vlgmr.msra.gmra.mrb[0].mxu1 %vm2417_vm4, %v6468_v14  ;;  %v1281_v17 = vmul.f32 %v5098_v38, %v1217_v48  ;;  %3688 = vrcp.f32 %v963_v39  ;;  %v3685_v8 = vpop.eup %3684  ;;  %v1980_v45 = vmul.f32 %v3683_v5, %v1660_v12  ;;  %v6471_v39 = vld [vmem:[#allocation25_spill] sm:$0xff] }
 0x1aa   :  { %v1406_v22 = vmul.f32 %v5083_v10, %v1342_v0  ;;  %v1888_v37 = vmul.f32 1.442695, %v1793_v49  ;;  %3452 = vmatprep.mubr.msk.f32.mxu1 %vm2417_vm4, %v6469_v41  ;;  %v5131_v47 = vmul.f32 0.70710677, %v5112_v51  ;;  %v2237_v34 = vsel %vm2109_vm13, %v2045_v25, %v2173_v33 }
 0x1ab   :  { %v5136_v53 = vmul.f32 0.5, %v4998_v1  ;;  %v1345_v54 = vadd.f32 1.4214138, %v1281_v17  ;;  %v5140_v15 = vadd.f32 %v4726_v61, %v4564_v11  ;;  %v5142_v12 = vmul.f32 %v3685_v8, %v1663_v16  ;;  %v6470_v1 = vld [vmem:[#allocation17_spill] sm:$0xff]  ;;  %v5172_v8 = vpop.f32.mrb[54].mxu0 }
 0x1ac   :  { %v1470_v49 = vadd.f32 -0.28449672, %v1406_v22  ;;  %v1728_v55 = vsub.f32 0.0, %v5078_v50  ;;  %v5146_v27 = vand.u32 2147483647, %v5131_v47  ;;  %v5149_v48 = vmul.f32 %v2299_v20, %v4896_v42  ;;  %6472 = vst [vmem:[#allocation20_spill] sm:$0xff] %v5172_v8 }
 0x1ad   :  { %v5152_v30 = vmul.f32 %v2298_v58, %v4940_v57  ;;  %vm2108_vm14 = vcmp.ge.f32.partialorder %v4936_v23, 0.0  ;;  %3690 = vpow2.f32 %v1882_v7  ;;  %v1409_v11 = vmul.f32 %v5098_v38, %v1345_v54  ;;  %3453 = vmatmul.mubr.msk.f32.gmra.mrb[2].mxu1 %vm2417_vm4, %v6470_v1 }
 0x1ae   :  { %v2044_v25 = vsub.f32 1.0, %v1980_v45  ;;  %v1534_v33 = vmul.f32 %v5083_v10, %v1470_v49  ;;  %3692 = vpow2.f32 %v1888_v37  ;;  %3455 = vmatprep.mubr.msk.f32.mxu1 %vm2417_vm4, %v6471_v39  ;;  %v898_v42 = vmul.f32 0.3275911, %v5146_v27  ;;  %v6473_v37 = vld [vmem:[#allocation23_spill] sm:$0xff] }
 0x1af   :  { %v5162_v5 = vpop.eup %3686  ;;  %v2301_v57 = vadd.f32 1.0, %v2237_v34  ;;  %vm2111_vm15 = vcmp.ge.f32.partialorder %v4950_v2, 0.0  ;;  %v1473_v20 = vadd.f32 -0.28449672, %v1409_v11  ;;  %v1731_v16 = vsub.f32 0.0, %v5093_v3  ;;  %v6474_v34 = vld [vmem:[#allocation22_spill] sm:$0xff] }
 0x1b0   :  { %v5167_v0 = vmul.f32 0.70710677, %v5140_v15  ;;  %v2047_v58 = vsub.f32 1.0, %v5142_v12  ;;  %v1152_v7 = vmul.f32 1.0614054, %v5162_v5  ;;  %v1792_v14 = vmul.f32 %v1728_v55, %v5078_v50 }
 0x1b1   :  { %v962_v17 = vadd.f32 1.0, %v898_v42  ;;  %v1598_v45 = vadd.f32 0.2548296, %v1534_v33  ;;  %v1537_v22 = vmul.f32 %v5098_v38, %v1473_v20  ;;  %3456 = vmatmul.mubr.msk.f32.gmra.mrb[4].mxu1 %vm2417_vm4, %v6473_v37  ;;  %v5182_v54 = vadd.f32 %v4726_v61, %v6474_v34 }
 0x1b2   :  { %v5178_v41 = vand.u32 2147483647, %v5167_v0  ;;  %v2172_v12 = vsub.f32 0.0, %v2044_v25  ;;  %v5185_v49 = vmul.f32 0.5, %v5051_v9  ;;  %v1216_v50 = vadd.f32 -1.4531521, %v1152_v7  ;;  %3458 = vmatprep.mubr.msk.f32.mxu1 %vm2417_vm4, %v4670_v36 }
 0x1b3   :  { %3694 = vrcp.f32 %v962_v17  ;;  %v5189_v55 = vpop.eup %3688  ;;  %v1601_v11 = vadd.f32 0.2548296, %v1537_v22  ;;  %v5192_v1 = vmul.f32 0.5, %v5063_v26  ;;  %v1795_v33 = vmul.f32 %v1731_v16, %v5093_v3  ;;  %v5201_v17 = vpop.f32.mrb[55].mxu0 }
 0x1b4   :  { %v901_v39 = vmul.f32 0.3275911, %v5178_v41  ;;  %v5197_v42 = vmul.f32 %v2301_v57, %v4975_v6  ;;  %v2175_v9 = vsub.f32 0.0, %v2047_v58  ;;  %v1280_v20 = vmul.f32 %v5162_v5, %v1216_v50  ;;  %6475 = vst [vmem:[#allocation2_spill] sm:$0xff] %v5201_v17 }
 0x1b5   :  { %v1155_v7 = vmul.f32 1.0614054, %v5189_v55  ;;  %v1662_v36 = vmul.f32 %v5083_v10, %v1598_v45  ;;  %v1886_v22 = vmul.f32 1.442695, %v1792_v14  ;;  %v5205_v26 = vmul.f32 0.70710677, %v5182_v54  ;;  %3459 = vmatmul.mubr.msk.f32.gmra.mrb[6].mxu1 %vm2417_vm4, %v4618_v43 }
 0x1b6   :  { %v965_v37 = vadd.f32 1.0, %v901_v39  ;;  %v2236_v6 = vsel %vm2108_vm14, %v2044_v25, %v2172_v12  ;;  %v1665_v3 = vmul.f32 %v5098_v38, %v1601_v11  ;;  %v1344_v57 = vadd.f32 1.4214138, %v1280_v20  ;;  %3461 = vmatprep.mubr.msk.f32.mxu1 %vm2417_vm4, %v4749_v28  ;;  %v6476_v25 = vld [vmem:[#allocation24_spill] sm:$0xff]  ;;  %v6477_v39 = vld [vmem:[#allocation7_spill] sm:$0xff] }
 0x1b7   :  { %v1219_v16 = vadd.f32 -1.4531521, %v1155_v7  ;;  %v3691_v34 = vpop.eup %3690  ;;  %v1892_v10 = vmul.f32 1.442695, %v1795_v33  ;;  %v1730_v14 = vsub.f32 0.0, %v5146_v27  ;;  %v2239_v43 = vsel %vm2111_vm15, %v2047_v58, %v2175_v9  ;;  %v6478_v7 = vld [vmem:[#allocation26_spill] sm:$0xff] }
 0x1b8   :  { %3696 = vrcp.f32 %v965_v37  ;;  %v5216_v45 = vand.u32 2147483647, %v5205_v26  ;;  %v3693_v50 = vpop.eup %3692  ;;  %v1408_v23 = vmul.f32 %v5162_v5, %v1344_v57  ;;  %v5224_v12 = vadd.f32 %v4726_v61, %v6476_v25  ;;  %v5238_v37 = vpop.f32.mrb[56].mxu0  ;;  %v6481_v25 = vld [vmem:[#allocation8_spill] sm:$0xff] }
 0x1b9   :  { %v1283_v38 = vmul.f32 %v5189_v55, %v1219_v16  ;;  %v2300_v28 = vadd.f32 1.0, %v2236_v6  ;;  %v5226_v11 = vmul.f32 %v3691_v34, %v1662_v36  ;;  %3698 = vpow2.f32 %v1886_v22  ;;  %3462 = vmatmul.mubr.msk.f32.gmra.mrb[8].mxu1 %vm2417_vm4, %v6477_v39  ;;  %6479 = vst [vmem:[#allocation3_spill] sm:$0xff] %v5238_v37 }
 0x1ba   :  { %v900_v33 = vmul.f32 0.3275911, %v5216_v45  ;;  %v5231_v20 = vmul.f32 %v3693_v50, %v1665_v3  ;;  %v1472_v2 = vadd.f32 -0.28449672, %v1408_v23  ;;  %v5234_v9 = vmul.f32 0.5, %v5112_v51  ;;  %3464 = vmatprep.mubr.msk.f32.mxu1 %vm2417_vm4, %v6478_v7  ;;  %v5277_v7 = vpop.f32.mrb[57].mxu0 }
 0x1bb   :  { %v1347_v58 = vadd.f32 1.4214138, %v1283_v38  ;;  %v2303_v36 = vadd.f32 1.0, %v2239_v43  ;;  %3700 = vpow2.f32 %v1892_v10  ;;  %v1794_v22 = vmul.f32 %v1730_v14, %v5146_v27  ;;  %v6480_v14 = vld [vmem:[#allocation10_spill] sm:$0xff]  ;;  %6482 = vst [vmem:[#allocation14_spill] sm:$0xff] %v5277_v7 }
 0x1bc   :  { %v964_v6 = vadd.f32 1.0, %v900_v33  ;;  %vm2110_vm0 = vcmp.ge.f32.partialorder %v5008_v31, 0.0  ;;  %v1536_v3 = vmul.f32 %v5162_v5, %v1472_v2  ;;  %v1733_v51 = vsub.f32 0.0, %v5178_v41 }
 0x1bd   :  { %v5241_v57 = vpop.eup %3694  ;;  %v1411_v16 = vmul.f32 %v5189_v55, %v1347_v58  ;;  %v5248_v34 = vmul.f32 0.70710677, %v5224_v12  ;;  %v5251_v50 = vmul.f32 %v2300_v28, %v4989_v44  ;;  %v2046_v10 = vsub.f32 1.0, %v5226_v11  ;;  %3465 = vmatmul.mubr.msk.f32.gmra.mrb[10].mxu1 %vm2417_vm4, %v6480_v14 }
 0x1be   :  { %vm2113_vm1 = vcmp.ge.f32.partialorder %v5015_v52, 0.0  ;;  %v1154_v27 = vmul.f32 1.0614054, %v5241_v57  ;;  %3702 = vrcp.f32 %v964_v6  ;;  %v2049_v43 = vsub.f32 1.0, %v5231_v20  ;;  %3467 = vmatprep.mubr.msk.f32.mxu1 %vm2417_vm4, %v4868_v24 }
 0x1bf   :  { %v1475_v23 = vadd.f32 -0.28449672, %v1411_v16  ;;  %v5260_v38 = vmul.f32 0.5, %v5140_v15  ;;  %v5264_v44 = vadd.f32 %v4726_v61, %v6481_v25  ;;  %v5269_v28 = vmul.f32 %v2303_v36, %v5004_v18  ;;  %v6483_v16 = vld [vmem:[#allocation28_spill] sm:$0xff] }
 0x1c0   :  { %v1600_v11 = vadd.f32 0.2548296, %v1536_v3  ;;  %v1218_v33 = vadd.f32 -1.4531521, %v1154_v27  ;;  %v839_v39 = vand.u32 2147483647, %v5248_v34  ;;  %v1797_v15 = vmul.f32 %v1733_v51, %v5178_v41 }
 0x1c1   :  { %v1539_v20 = vmul.f32 %v5189_v55, %v1475_v23  ;;  %v1890_v2 = vmul.f32 1.442695, %v1794_v22  ;;  %v5275_v58 = vmul.f32 0.5, %v5182_v54  ;;  %v2174_v24 = vsub.f32 0.0, %v2046_v10  ;;  %3468 = vmatmul.mubr.msk.f32.gmra.mrb[12].mxu1 %vm2417_vm4, %v6483_v16  ;;  %v6484_v54 = vld [vmem:[#allocation4_spill] sm:$0xff] }
 0x1c2   :  { %v5279_v6 = vpop.eup %3696  ;;  %v1282_v18 = vmul.f32 %v5241_v57, %v1218_v33  ;;  %v1732_v36 = vsub.f32 0.0, %v5216_v45  ;;  %v903_v3 = vmul.f32 0.3275911, %v839_v39  ;;  %v2177_v27 = vsub.f32 0.0, %v2049_v43  ;;  %3470 = vmatprep.mubr.msk.f32.mxu1 %vm2417_vm4, %v4918_v63 }
 0x1c3   :  { %v1157_v22 = vmul.f32 1.0614054, %v5279_v6  ;;  %v5287_v41 = vmul.f32 0.70710677, %v5264_v44  ;;  %v5291_v51 = vadd.f32 %v4726_v61, %v6484_v54  ;;  %v3699_v14 = vpop.eup %3698  ;;  %v1664_v23 = vmul.f32 %v5162_v5, %v1600_v11 }
 0x1c4   :  { %v1603_v25 = vadd.f32 0.2548296, %v1539_v20  ;;  %v1346_v33 = vadd.f32 1.4214138, %v1282_v18  ;;  %v967_v7 = vadd.f32 1.0, %v903_v3  ;;  %3704 = vpow2.f32 %v1890_v2 }
 0x1c5   :  { %v1221_v16 = vadd.f32 -1.4531521, %v1157_v22  ;;  %v1896_v37 = vmul.f32 1.442695, %v1797_v15  ;;  %v5297_v17 = vand.u32 2147483647, %v5287_v41  ;;  %v3701_v8 = vpop.eup %3700  ;;  %v2238_v61 = vsel %vm2110_vm0, %v2046_v10, %v2174_v24  ;;  %3471 = vmatmul.mubr.msk.f32.gmra.mrb[14].mxu1 %vm2417_vm4, %v4883_v59 }
 0x1c6   :  { %v1410_v54 = vmul.f32 %v5241_v57, %v1346_v33  ;;  %v1796_v63 = vmul.f32 %v1732_v36, %v5216_v45  ;;  %3706 = vrcp.f32 %v967_v7  ;;  %v2241_v5 = vsel %vm2113_vm1, %v2049_v43, %v2177_v27  ;;  %3473 = vmatprep.mubr.msk.f32.mxu1 %vm2417_vm4, %v4982_v46 }
 0x1c7   :  { %v1285_v11 = vmul.f32 %v5279_v6, %v1221_v16  ;;  %v1735_v20 = vsub.f32 0.0, %v839_v39  ;;  %v902_v2 = vmul.f32 0.3275911, %v5297_v17  ;;  %v5313_v10 = vmul.f32 %v3699_v14, %v1664_v23 }
 0x1c8   :  { %v5311_v31 = vpop.eup %3702  ;;  %v1667_v45 = vmul.f32 %v5189_v55, %v1603_v25  ;;  %v1474_v15 = vadd.f32 -0.28449672, %v1410_v54  ;;  %v5317_v59 = vmul.f32 0.70710677, %v5291_v51  ;;  %v2302_v52 = vadd.f32 1.0, %v2238_v61  ;;  %v5333_v25 = vpop.f32.mrb[58].mxu0 }
 0x1c9   :  { %v1349_v43 = vadd.f32 1.4214138, %v1285_v11  ;;  %3708 = vpow2.f32 %v1896_v37  ;;  %v1156_v7 = vmul.f32 1.0614054, %v5311_v31  ;;  %v2305_v24 = vadd.f32 1.0, %v2241_v5  ;;  %3474 = vmatmul.mubr.msk.f32.gmra.mrb[16].mxu1 %vm2417_vm4, %v4957_v4 }
 0x1ca   :  { %v1538_v18 = vmul.f32 %v5241_v57, %v1474_v15  ;;  %v1894_v36 = vmul.f32 1.442695, %v1796_v63  ;;  %v966_v46 = vadd.f32 1.0, %v902_v2  ;;  %vm2112_vm2 = vcmp.ge.f32.partialorder %v5072_v60, 0.0  ;;  %3476 = vmatprep.mubr.msk.f32.mxu1 %vm2417_vm4, %v5020_v62  ;;  %v6485_v2 = vld [vmem:[#allocation5_spill] sm:$0xff] }
 0x1cb   :  { %v1413_v55 = vmul.f32 %v5279_v6, %v1349_v43  ;;  %v1220_v3 = vadd.f32 -1.4531521, %v1156_v7  ;;  %v1799_v27 = vmul.f32 %v1735_v20, %v839_v39  ;;  %v5326_v22 = vand.u32 2147483647, %v5317_v59 }
 0x1cc   :  { %v2048_v37 = vsub.f32 1.0, %v5313_v10  ;;  %v5331_v14 = vmul.f32 %v3701_v8, %v1667_v45  ;;  %v1602_v23 = vadd.f32 0.2548296, %v1538_v18  ;;  %3710 = vrcp.f32 %v966_v46 }
 0x1cd   :  { %v1477_v4 = vadd.f32 -0.28449672, %v1413_v55  ;;  %v1284_v33 = vmul.f32 %v5311_v31, %v1220_v3  ;;  %v5337_v16 = vmul.f32 0.5, %v5224_v12  ;;  %v905_v39 = vmul.f32 0.3275911, %v5326_v22  ;;  %3477 = vmatmul.mubr.msk.f32.gmra.mrb[18].mxu1 %vm2417_vm4, %v5001_v19 }
 0x1ce   :  { %v5341_v61 = vmul.f32 %v2302_v52, %v5120_v13  ;;  %v5344_v62 = vmul.f32 %v2305_v24, %v5136_v53  ;;  %v1666_v8 = vmul.f32 %v5241_v57, %v1602_v23  ;;  %3712 = vpow2.f32 %v1894_v36  ;;  %v3705_v54 = vpop.eup %3704  ;;  %3479 = vmatprep.mubr.msk.f32.mxu1 %vm2417_vm4, %v5115_v35  ;;  %v5360_v19 = vld [vmem:[%s6397_s2] ss:$0 sm:$0xff]  ;;  %v5368_v52 = vpop.f32.mrb[59].mxu0 }
 0x1cf   :  { %vm2114_vm3 = vcmp.ge.f32.partialorder %v5131_v47, 0.0  ;;  %v1541_v12 = vmul.f32 %v5279_v6, %v1477_v4  ;;  %v1348_v63 = vadd.f32 1.4214138, %v1284_v33  ;;  %v1900_v5 = vmul.f32 1.442695, %v1799_v27  ;;  %v6486_v27 = vld [vmem:[#allocation6_spill] sm:$0xff] }
 0x1d0   :  { %v969_v11 = vadd.f32 1.0, %v905_v39  ;;  %v5353_v13 = vpop.eup %3706  ;;  %v2176_v53 = vsub.f32 0.0, %v2048_v37  ;;  %v2051_v57 = vsub.f32 1.0, %v5331_v14  ;;  %vm2115_vm5 = vcmp.ge.f32.partialorder %v5081_v56, 0.0 }
 0x1d1   :  { %v1986_v20 = vmul.f32 %v3705_v54, %v1666_v8  ;;  %v5364_v10 = vadd.f32 %v5360_v19, %v6485_v2  ;;  %v1605_v45 = vadd.f32 0.2548296, %v1541_v12  ;;  %v1412_v35 = vmul.f32 %v5311_v31, %v1348_v63  ;;  %3480 = vmatmul.mubr.msk.f32.gmra.mrb[20].mxu1 %vm2417_vm4, %v5068_v40 }
 0x1d2   :  { %v1159_v15 = vmul.f32 1.0614054, %v5353_v13  ;;  %3714 = vrcp.f32 %v969_v11  ;;  %v1734_v7 = vsub.f32 0.0, %v5297_v17  ;;  %v1737_v24 = vsub.f32 0.0, %v5326_v22  ;;  %3482 = vmatprep.mubr.msk.f32.mxu1 %vm2417_vm4, %v5152_v30 }
 0x1d3   :  { %v2050_v43 = vsub.f32 1.0, %v1986_v20  ;;  %v5373_v18 = vmul.f32 0.70710677, %v5364_v10  ;;  %v3709_v36 = vpop.eup %3708  ;;  %v1669_v46 = vmul.f32 %v5279_v6, %v1605_v45  ;;  %v1476_v55 = vadd.f32 -0.28449672, %v1412_v35 }
 0x1d4   :  { %v1223_v3 = vadd.f32 -1.4531521, %v1159_v15  ;;  %v5380_v14 = vadd.f32 %v5360_v19, %v6486_v27  ;;  %v2240_v23 = vsel %vm2112_vm2, %v2048_v37, %v2176_v53  ;;  %v5387_v33 = vmul.f32 0.5, %v5264_v44 }
 0x1d5   :  { %v2178_v4 = vsub.f32 0.0, %v2050_v43  ;;  %v5390_v40 = vand.u32 2147483647, %v5373_v18  ;;  %v2179_v6 = vsub.f32 0.0, %v2051_v57  ;;  %v5392_v39 = vmul.f32 %v3709_v36, %v1669_v46  ;;  %3483 = vmatmul.mubr.msk.f32.gmra.mrb[22].mxu1 %vm2417_vm4, %v5149_v48 }
 0x1d6   :  { %v1540_v8 = vmul.f32 %v5311_v31, %v1476_v55  ;;  %v1287_v54 = vmul.f32 %v5353_v13, %v1223_v3  ;;  %v5396_v12 = vpop.eup %3710  ;;  %3716 = vpow2.f32 %v1900_v5  ;;  %v1798_v60 = vmul.f32 %v1734_v7, %v5297_v17  ;;  %3485 = vmatprep.mubr.msk.f32.mxu1 %vm2417_vm4, %v5251_v50 }
 0x1d7   :  { %v904_v30 = vmul.f32 0.3275911, %v5390_v40  ;;  %v5401_v44 = vmul.f32 0.70710677, %v5380_v14  ;;  %v2304_v37 = vadd.f32 1.0, %v2240_v23  ;;  %v1801_v53 = vmul.f32 %v1737_v24, %v5326_v22 }
 0x1d8   :  { %v1604_v63 = vadd.f32 0.2548296, %v1540_v8  ;;  %v1351_v11 = vadd.f32 1.4214138, %v1287_v54  ;;  %v3713_v20 = vpop.eup %3712  ;;  %v2242_v17 = vsel %vm2114_vm3, %v2050_v43, %v2178_v4  ;;  %vm2117_vm6 = vcmp.ge.f32.partialorder %v5167_v0, 0.0 }
 0x1d9   :  { %vm2116_vm7 = vcmp.ge.f32.partialorder %v5205_v26, 0.0  ;;  %v1158_v5 = vmul.f32 1.0614054, %v5396_v12  ;;  %v968_v2 = vadd.f32 1.0, %v904_v30  ;;  %v5414_v48 = vand.u32 2147483647, %v5401_v44  ;;  %3486 = vmatmul.mubr.msk.f32.gmra.mrb[24].mxu1 %vm2417_vm4, %v5197_v42 }
 0x1da   :  { %v2243_v22 = vsel %vm2115_vm5, %v2051_v57, %v2179_v6  ;;  %v2053_v45 = vsub.f32 1.0, %v5392_v39  ;;  %v1668_v50 = vmul.f32 %v5311_v31, %v1604_v63  ;;  %v1415_v47 = vmul.f32 %v5353_v13, %v1351_v11  ;;  %3488 = vmatprep.mubr.msk.f32.mxu1 %vm2417_vm4, %v5341_v61  ;;  %v5429_v31 = vpop.f32.mrb[60].mxu0  ;;  %v6487_v11 = vld [vmem:[#allocation9_spill] sm:$0xff] }
 0x1db   :  { %v1222_v35 = vadd.f32 -1.4531521, %v1158_v5  ;;  %v1898_v15 = vmul.f32 1.442695, %v1798_v60  ;;  %3718 = vrcp.f32 %v968_v2  ;;  %v907_v43 = vmul.f32 0.3275911, %v5414_v48 }
 0x1dc   :  { %v5424_v7 = vpop.eup %3714  ;;  %v2368_v24 = vmul.f32 %v2304_v37, %v5185_v49  ;;  %v2306_v56 = vadd.f32 1.0, %v2242_v17  ;;  %v1988_v57 = vmul.f32 %v3713_v20, %v1668_v50  ;;  %v1479_v36 = vadd.f32 -0.28449672, %v1415_v47  ;;  %v6488_v20 = vld [vmem:[#allocation27_spill] sm:$0xff] }
 0x1dd   :  { %v2307_v46 = vadd.f32 1.0, %v2243_v22  ;;  %v1286_v55 = vmul.f32 %v5396_v12, %v1222_v35  ;;  %v1161_v3 = vmul.f32 1.0614054, %v5424_v7  ;;  %v1904_v27 = vmul.f32 1.442695, %v1801_v53  ;;  %3489 = vmatmul.mubr.msk.f32.gmra.mrb[26].mxu1 %vm2417_vm4, %v5269_v28  ;;  %v5455_v22 = vpop.f32.mrb[61].mxu0 }
 0x1de   :  { %v2181_v23 = vsub.f32 0.0, %v2053_v45  ;;  %v2052_v42 = vsub.f32 1.0, %v1988_v57  ;;  %v1543_v4 = vmul.f32 %v5353_v13, %v1479_v36  ;;  %v971_v6 = vadd.f32 1.0, %v907_v43  ;;  %3491 = vmatprep.mubr.msk.f32.mxu1 %vm2417_vm4, %v2368_v24 }
 0x1df   :  { %v1350_v49 = vadd.f32 1.4214138, %v1286_v55  ;;  %3720 = vpow2.f32 %v1898_v15  ;;  %v1225_v39 = vadd.f32 -1.4531521, %v1161_v3  ;;  %v1736_v8 = vsub.f32 0.0, %v5390_v40 }
 0x1e0   :  { %v2370_v61 = vmul.f32 %v2306_v56, %v5234_v9  ;;  %v2180_v54 = vsub.f32 0.0, %v2052_v42  ;;  %v1607_v60 = vadd.f32 0.2548296, %v1543_v4  ;;  %3722 = vrcp.f32 %v971_v6  ;;  %v3717_v30 = vpop.eup %3716 }
 0x1e1   :  { %v1414_v37 = vmul.f32 %v5396_v12, %v1350_v49  ;;  %v1289_v63 = vmul.f32 %v5424_v7, %v1225_v39  ;;  %v5443_v53 = vadd.f32 %v5360_v19, %v6487_v11  ;;  %v5447_v17 = vadd.f32 %v5360_v19, %v6488_v20  ;;  %3492 = vmatmul.mubr.msk.f32.gmra.mrb[28].mxu1 %vm2417_vm4, %v5344_v62 }
 0x1e2   :  { %v2371_v9 = vmul.f32 %v2307_v46, %v5192_v1  ;;  %v2245_v28 = vsel %vm2117_vm6, %v2053_v45, %v2181_v23  ;;  %v2244_v5 = vsel %vm2116_vm7, %v2052_v42, %v2180_v54  ;;  %v1671_v2 = vmul.f32 %v5353_v13, %v1607_v60  ;;  %3494 = vmatprep.mubr.msk.f32.mxu1 %vm2417_vm4, %v2370_v61 }
 0x1e3   :  { %v2308_v50 = vadd.f32 1.0, %v2244_v5  ;;  %v1478_v47 = vadd.f32 -0.28449672, %v1414_v37  ;;  %v1353_v35 = vadd.f32 1.4214138, %v1289_v63  ;;  %3724 = vpow2.f32 %v1904_v27 }
 0x1e4   :  { %v1991_v15 = vmul.f32 %v3717_v30, %v1671_v2  ;;  %v1800_v1 = vmul.f32 %v1736_v8, %v5390_v40  ;;  %v5461_v0 = vmul.f32 0.70710677, %v5443_v53  ;;  %v5464_v26 = vmul.f32 0.70710677, %v5447_v17  ;;  %v5485_v8 = vpop.f32.mrb[62].mxu0 }
 0x1e5   :  { %v5467_v13 = vpop.eup %3718  ;;  %v2309_v45 = vadd.f32 1.0, %v2245_v28  ;;  %v2372_v43 = vmul.f32 %v2308_v50, %v5275_v58  ;;  %vm2119_vm8 = vcmp.ge.f32.partialorder %v5248_v34, 0.0  ;;  %v1542_v62 = vmul.f32 %v5396_v12, %v1478_v47  ;;  %3495 = vmatmul.mubr.msk.f32.gmra.mrb[30].mxu1 %vm2417_vm4, %v2371_v9  ;;  %v6489_v28 = vld [vmem:[#allocation29_spill] sm:$0xff] }
 0x1e6   :  { %v1417_v24 = vmul.f32 %v5424_v7, %v1353_v35  ;;  %v2055_v40 = vsub.f32 1.0, %v1991_v15  ;;  %v1160_v56 = vmul.f32 1.0614054, %v5467_v13  ;;  %v1739_v57 = vsub.f32 0.0, %v5414_v48 }
 0x1e7   :  { %v842_v36 = vand.u32 2147483647, %v5461_v0  ;;  %v1606_v46 = vadd.f32 0.2548296, %v1542_v62  ;;  %v5477_v3 = vand.u32 2147483647, %v5464_v26  ;;  %3497 = vmatprep.mubr.msk.f32.mxu1 %vm2417_vm4, %v2372_v43  ;;  %v2373_v4 = vmul.f32 %v2309_v45, %v5260_v38 }
 0x1e8   :  { %v1481_v55 = vadd.f32 -0.28449672, %v1417_v24  ;;  %v1224_v58 = vadd.f32 -1.4531521, %v1160_v56  ;;  %v1902_v27 = vmul.f32 1.442695, %v1800_v1  ;;  %v1803_v30 = vmul.f32 %v1739_v57, %v5414_v48 }
 0x1e9   :  { %v906_v23 = vmul.f32 0.3275911, %v842_v36  ;;  %v3721_v42 = vpop.eup %3720  ;;  %v1670_v6 = vmul.f32 %v5396_v12, %v1606_v46  ;;  %v909_v39 = vmul.f32 0.3275911, %v5477_v3  ;;  %v2183_v54 = vsub.f32 0.0, %v2055_v40  ;;  %3498 = vmatmul.mubr.msk.f32.gmra.mrb[32].mxu1 %vm2417_vm4, %v2373_v4  ;;  %v5509_v24 = vpop.f32.mrb[63].mxu0 }
 0x1ea   :  { %v1545_v49 = vmul.f32 %v5424_v7, %v1481_v55  ;;  %v5487_v61 = vpop.eup %3722  ;;  %v1288_v60 = vmul.f32 %v5467_v13, %v1224_v58  ;;  %v5492_v11 = vmul.f32 0.5, %v5291_v51  ;;  %v5498_v5 = vadd.f32 %v5360_v19, %v6489_v28 }
 0x1eb   :  { %v970_v37 = vadd.f32 1.0, %v906_v23  ;;  %v1990_v63 = vmul.f32 %v3721_v42, %v1670_v6  ;;  %v1163_v12 = vmul.f32 1.0614054, %v5487_v61  ;;  %v973_v9 = vadd.f32 1.0, %v909_v39 }
 0x1ec   :  { %v1609_v38 = vadd.f32 0.2548296, %v1545_v49  ;;  %v1352_v20 = vadd.f32 1.4214138, %v1288_v60  ;;  %v2247_v51 = vsel %vm2119_vm8, %v2055_v40, %v2183_v54  ;;  %v1908_v15 = vmul.f32 1.442695, %v1803_v30 }
 0x1ed   :  { %3726 = vrcp.f32 %v970_v37  ;;  %v3725_v2 = vpop.eup %3724  ;;  %v2054_v50 = vsub.f32 1.0, %v1990_v63  ;;  %v1227_v47 = vadd.f32 -1.4531521, %v1163_v12  ;;  %v5506_v1 = vadd.f32 %v5360_v19, %v4853_v32 }
 0x1ee   :  { %v1673_v48 = vmul.f32 %v5424_v7, %v1609_v38  ;;  %3728 = vpow2.f32 %v1902_v27  ;;  %v1416_v35 = vmul.f32 %v5467_v13, %v1352_v20  ;;  %vm2118_vm9 = vcmp.ge.f32.partialorder %v5287_v41, 0.0 }
 0x1ef   :  { %v2182_v45 = vsub.f32 0.0, %v2054_v50  ;;  %v1291_v62 = vmul.f32 %v5487_v61, %v1227_v47  ;;  %3730 = vrcp.f32 %v973_v9  ;;  %v1738_v56 = vsub.f32 0.0, %v842_v36 }
 0x1f0   :  { %v1993_v43 = vmul.f32 %v3725_v2, %v1673_v48  ;;  %v1480_v7 = vadd.f32 -0.28449672, %v1416_v35  ;;  %v5513_v34 = vmul.f32 0.70710677, %v5498_v5  ;;  %v2311_v40 = vadd.f32 1.0, %v2247_v51 }
 0x1f1   :  { %v2246_v57 = vsel %vm2118_vm9, %v2054_v50, %v2182_v45  ;;  %vm2121_vm10 = vcmp.ge.f32.partialorder %v5317_v59, 0.0  ;;  %v1355_v32 = vadd.f32 1.4214138, %v1291_v62  ;;  %v1741_v46 = vsub.f32 0.0, %v5477_v3 }
 0x1f2   :  { %v2310_v55 = vadd.f32 1.0, %v2246_v57  ;;  %v2057_v58 = vsub.f32 1.0, %v1993_v43  ;;  %v1544_v27 = vmul.f32 %v5467_v13, %v1480_v7  ;;  %v844_v23 = vand.u32 2147483647, %v5513_v34 }
 0x1f3   :  { %v5520_v41 = vmul.f32 0.5, %v5364_v10  ;;  %v1419_v42 = vmul.f32 %v5487_v61, %v1355_v32  ;;  %3732 = vpow2.f32 %v1908_v15  ;;  %v5524_v4 = vmul.f32 0.70710677, %v5506_v1 }
 0x1f4   :  { %v2374_v6 = vmul.f32 %v2310_v55, %v5387_v33  ;;  %v1608_v49 = vadd.f32 0.2548296, %v1544_v27  ;;  %v1802_v39 = vmul.f32 %v1738_v56, %v842_v36  ;;  %v908_v54 = vmul.f32 0.3275911, %v844_v23 }
 0x1f5   :  { %v2375_v60 = vmul.f32 %v2311_v40, %v5337_v16  ;;  %vm2120_vm11 = vcmp.ge.f32.partialorder %v5373_v18, 0.0  ;;  %v1483_v30 = vadd.f32 -0.28449672, %v1419_v42  ;;  %v847_v37 = vand.u32 2147483647, %v5524_v4 }
 0x1f6   :  { %v2185_v63 = vsub.f32 0.0, %v2057_v58  ;;  %v1672_v38 = vmul.f32 %v5467_v13, %v1608_v49  ;;  %v1805_v12 = vmul.f32 %v1741_v46, %v5477_v3  ;;  %v972_v20 = vadd.f32 1.0, %v908_v54  ;;  %3500 = vmatprep.mubr.msk.f32.mxu1 %vm2417_vm4, %v2374_v6  ;;  %v6490_v13 = vld [vmem:[#allocation30_spill] sm:$0xff] }
 0x1f7   :  { %v5530_v10 = vpop.eup %3726  ;;  %v5536_v36 = vmul.f32 0.5, %v5380_v14  ;;  %v1547_v16 = vmul.f32 %v5487_v61, %v1483_v30  ;;  %v911_v28 = vmul.f32 0.3275911, %v847_v37  ;;  %3501 = vmatmul.mubr.msk.f32.gmra.mrb[34].mxu1 %vm2417_vm4, %v2375_v60  ;;  %v1906_v50 = vmul.f32 1.442695, %v1802_v39 }
 0x1f8   :  { %v3729_v33 = vpop.eup %3728  ;;  %v1162_v9 = vmul.f32 1.0614054, %v5530_v10  ;;  %3734 = vrcp.f32 %v972_v20  ;;  %v5543_v3 = vadd.f32 %v5360_v19, %v6490_v13  ;;  %v5548_v14 = vmul.f32 0.5, %v5443_v53  ;;  %v6492_v13 = vld [vmem:[#allocation12_spill] sm:$0xff] }
 0x1f9   :  { %v1992_v2 = vmul.f32 %v3729_v33, %v1672_v38  ;;  %v5545_v48 = vpop.eup %3730  ;;  %v1611_v47 = vadd.f32 0.2548296, %v1547_v16  ;;  %v975_v35 = vadd.f32 1.0, %v911_v28  ;;  %v2249_v15 = vsel %vm2121_vm10, %v2057_v58, %v2185_v63  ;;  %v6491_v58 = vld [vmem:[#allocation31_spill] sm:$0xff] }
 0x1fa   :  { %v1226_v51 = vadd.f32 -1.4531521, %v1162_v9  ;;  %v1165_v43 = vmul.f32 1.0614054, %v5545_v48  ;;  %v1912_v62 = vmul.f32 1.442695, %v1805_v12  ;;  %v5560_v42 = vadd.f32 %v5360_v19, %v6491_v58 }
 0x1fb   :  { %v2056_v45 = vsub.f32 1.0, %v1992_v2  ;;  %v1675_v7 = vmul.f32 %v5487_v61, %v1611_v47  ;;  %v1740_v40 = vsub.f32 0.0, %v844_v23  ;;  %3736 = vrcp.f32 %v975_v35 }
 0x1fc   :  { %v1290_v56 = vmul.f32 %v5530_v10, %v1226_v51  ;;  %v1229_v32 = vadd.f32 -1.4531521, %v1165_v43  ;;  %v1743_v46 = vsub.f32 0.0, %v847_v37  ;;  %v5556_v53 = vmul.f32 0.70710677, %v5543_v3 }
 0x1fd   :  { %v2184_v57 = vsub.f32 0.0, %v2056_v45  ;;  %v3733_v55 = vpop.eup %3732  ;;  %v2313_v27 = vadd.f32 1.0, %v2249_v15  ;;  %3738 = vpow2.f32 %v1906_v50  ;;  %v5568_v30 = vmul.f32 0.5, %v5447_v17 }
 0x1fe   :  { %v1354_v59 = vadd.f32 1.4214138, %v1290_v56  ;;  %v1995_v6 = vmul.f32 %v3733_v55, %v1675_v7  ;;  %v1293_v49 = vmul.f32 %v5545_v48, %v1229_v32  ;;  %v846_v39 = vand.u32 2147483647, %v5556_v53 }
 0x1ff   :  { %v2248_v61 = vsel %vm2120_vm11, %v2056_v45, %v2184_v57  ;;  %3740 = vpow2.f32 %v1912_v62  ;;  %v1804_v38 = vmul.f32 %v1740_v40, %v844_v23  ;;  %v1807_v12 = vmul.f32 %v1743_v46, %v847_v37 }
 0x200   :  { %v2312_v54 = vadd.f32 1.0, %v2248_v61  ;;  %v1418_v60 = vmul.f32 %v5530_v10, %v1354_v59  ;;  %v1357_v63 = vadd.f32 1.4214138, %v1293_v49  ;;  %v910_v20 = vmul.f32 0.3275911, %v846_v39  ;;  %v6493_v59 = vld [vmem:[#allocation32_spill] sm:$0xff] }
 0x201   :  { %v2377_v33 = vmul.f32 %v2313_v27, %v5492_v11  ;;  %vm2123_vm12 = vcmp.ge.f32.partialorder %v5401_v44, 0.0  ;;  %v5574_v9 = vmul.f32 0.70710677, %v5560_v42  ;;  %v2059_v2 = vsub.f32 1.0, %v1995_v6 }
 0x202   :  { %v2376_v18 = vmul.f32 %v2312_v54, %v5520_v41  ;;  %v1482_v16 = vadd.f32 -0.28449672, %v1418_v60  ;;  %v5576_v28 = vpop.eup %3734  ;;  %v1421_v17 = vmul.f32 %v5545_v48, %v1357_v63  ;;  %v974_v50 = vadd.f32 1.0, %v910_v20 }
 0x203   :  { %v5581_v23 = vadd.f32 %v5360_v19, %v6492_v13  ;;  %v5585_v41 = vmul.f32 0.5, %v5498_v5  ;;  %v1164_v37 = vmul.f32 1.0614054, %v5576_v28  ;;  %v5589_v47 = vand.u32 2147483647, %v5574_v9 }
 0x204   :  { %v1546_v11 = vmul.f32 %v5530_v10, %v1482_v16  ;;  %3503 = vmatprep.mubr.msk.f32.mxu1 %vm2417_vm4, %v2376_v18  ;;  %v1485_v51 = vadd.f32 -0.28449672, %v1421_v17  ;;  %v1910_v35 = vmul.f32 1.442695, %v1804_v38  ;;  %v1916_v15 = vmul.f32 1.442695, %v1807_v12 }
 0x205   :  { %3742 = vrcp.f32 %v974_v50  ;;  %3504 = vmatmul.mubr.msk.f32.gmra.mrb[36].mxu1 %vm2417_vm4, %v2377_v33  ;;  %v5593_v45 = vpop.eup %3736  ;;  %v1228_v62 = vadd.f32 -1.4531521, %v1164_v37  ;;  %v913_v5 = vmul.f32 0.3275911, %v5589_v47  ;;  %v2187_v7 = vsub.f32 0.0, %v2059_v2 }
 0x206   :  { %v1610_v43 = vadd.f32 0.2548296, %v1546_v11  ;;  %v1549_v56 = vmul.f32 %v5545_v48, %v1485_v51  ;;  %v1167_v40 = vmul.f32 1.0614054, %v5593_v45  ;;  %v5599_v57 = vmul.f32 0.70710677, %v5581_v23 }
 0x207   :  { %v3739_v32 = vpop.eup %3738  ;;  %v1292_v55 = vmul.f32 %v5576_v28, %v1228_v62  ;;  %v977_v27 = vadd.f32 1.0, %v913_v5  ;;  %v5605_v58 = vadd.f32 %v5360_v19, %v6493_v59  ;;  %3744 = vpow2.f32 %v1910_v35 }
 0x208   :  { %v1674_v46 = vmul.f32 %v5530_v10, %v1610_v43  ;;  %v1613_v61 = vadd.f32 0.2548296, %v1549_v56  ;;  %v1231_v6 = vadd.f32 -1.4531521, %v1167_v40  ;;  %v1742_v49 = vsub.f32 0.0, %v846_v39 }
 0x209   :  { %v3741_v54 = vpop.eup %3740  ;;  %vm2122_vm13 = vcmp.ge.f32.partialorder %v5461_v0, 0.0  ;;  %v1356_v63 = vadd.f32 1.4214138, %v1292_v55  ;;  %3746 = vrcp.f32 %v977_v27  ;;  %v2251_v10 = vsel %vm2123_vm12, %v2059_v2, %v2187_v7 }
 0x20a   :  { %v1994_v60 = vmul.f32 %v3739_v32, %v1674_v46  ;;  %v1677_v38 = vmul.f32 %v5545_v48, %v1613_v61  ;;  %v1295_v12 = vmul.f32 %v5593_v45, %v1231_v6  ;;  %v848_v20 = vand.u32 2147483647, %v5599_v57 }
 0x20b   :  { %v1420_v18 = vmul.f32 %v5576_v28, %v1356_v63  ;;  %3748 = vpow2.f32 %v1916_v15  ;;  %v5615_v16 = vmul.f32 0.70710677, %v5605_v58  ;;  %v1806_v13 = vmul.f32 %v1742_v49, %v846_v39 }
 0x20c   :  { %v2058_v33 = vsub.f32 1.0, %v1994_v60  ;;  %v1997_v17 = vmul.f32 %v3741_v54, %v1677_v38  ;;  %v1359_v50 = vadd.f32 1.4214138, %v1295_v12  ;;  %v912_v11 = vmul.f32 0.3275911, %v848_v20 }
 0x20d   :  { %v2315_v37 = vadd.f32 1.0, %v2251_v10  ;;  %v1484_v2 = vadd.f32 -0.28449672, %v1420_v18  ;;  %v5618_v48 = vand.u32 2147483647, %v5615_v16  ;;  %vm2125_vm14 = vcmp.ge.f32.partialorder %v5464_v26, 0.0 }
 0x20e   :  { %v2186_v44 = vsub.f32 0.0, %v2058_v33  ;;  %v2061_v35 = vsub.f32 1.0, %v1997_v17  ;;  %v1423_v15 = vmul.f32 %v5593_v45, %v1359_v50  ;;  %v1745_v43 = vsub.f32 0.0, %v5589_v47 }
 0x20f   :  { %v5620_v51 = vpop.eup %3742  ;;  %v976_v62 = vadd.f32 1.0, %v912_v11  ;;  %v1548_v5 = vmul.f32 %v5576_v28, %v1484_v2  ;;  %v915_v56 = vmul.f32 0.3275911, %v5618_v48  ;;  %v1744_v46 = vsub.f32 0.0, %v848_v20 }
 0x210   :  { %v2250_v39 = vsel %vm2122_vm13, %v2058_v33, %v2186_v44  ;;  %v1166_v7 = vmul.f32 1.0614054, %v5620_v51  ;;  %v1487_v32 = vadd.f32 -0.28449672, %v1423_v15  ;;  %v2379_v55 = vmul.f32 %v2315_v37, %v5536_v36  ;;  %v6494_v33 = vld [vmem:[#allocation13_spill] sm:$0xff] }
 0x211   :  { %v2314_v40 = vadd.f32 1.0, %v2250_v39  ;;  %3750 = vrcp.f32 %v976_v62  ;;  %v1612_v27 = vadd.f32 0.2548296, %v1548_v5  ;;  %v1914_v61 = vmul.f32 1.442695, %v1806_v13  ;;  %v3745_v6 = vpop.eup %3744 }
 0x212   :  { %v1230_v59 = vadd.f32 -1.4531521, %v1166_v7  ;;  %v1551_v0 = vmul.f32 %v5593_v45, %v1487_v32  ;;  %v1809_v54 = vmul.f32 %v1745_v43, %v5589_v47  ;;  %v979_v60 = vadd.f32 1.0, %v915_v56 }
 0x213   :  { %v2378_v49 = vmul.f32 %v2314_v40, %v5548_v14  ;;  %v5634_v63 = vpop.eup %3746  ;;  %v2189_v10 = vsub.f32 0.0, %v2061_v35  ;;  %v1676_v38 = vmul.f32 %v5576_v28, %v1612_v27  ;;  %v5640_v36 = vadd.f32 %v5360_v19, %v6494_v33 }
 0x214   :  { %v1294_v12 = vmul.f32 %v5620_v51, %v1230_v59  ;;  %v1615_v18 = vadd.f32 0.2548296, %v1551_v0  ;;  %v1169_v17 = vmul.f32 1.0614054, %v5634_v63  ;;  %v1808_v14 = vmul.f32 %v1744_v46, %v848_v20 }
 0x215   :  { %3752 = vrcp.f32 %v979_v60  ;;  %3506 = vmatprep.mubr.msk.f32.mxu1 %vm2417_vm4, %v2378_v49  ;;  %v3749_v47 = vpop.eup %3748  ;;  %v1996_v50 = vmul.f32 %v3745_v6, %v1676_v38  ;;  %vm2124_vm15 = vcmp.ge.f32.partialorder %v5513_v34, 0.0  ;;  %v5646_v13 = vmul.f32 0.5, %v5506_v1  ;;  %v6495_v49 = vld [vmem:[#allocation16_spill] sm:$0xff] }
 0x216   :  { %v1358_v28 = vadd.f32 1.4214138, %v1294_v12  ;;  %3507 = vmatmul.mubr.msk.f32.gmra.mrb[38].mxu1 %vm2417_vm4, %v2379_v55  ;;  %v1679_v11 = vmul.f32 %v5593_v45, %v1615_v18  ;;  %3754 = vpow2.f32 %v1914_v61  ;;  %v1233_v37 = vadd.f32 -1.4531521, %v1169_v17 }
 0x217   :  { %v1920_v44 = vmul.f32 1.442695, %v1809_v54  ;;  %v2253_v20 = vsel %vm2125_vm14, %v2061_v35, %v2189_v10  ;;  %v2060_v2 = vsub.f32 1.0, %v1996_v50  ;;  %v5654_v43 = vmul.f32 0.70710677, %v5640_v36 }
 0x218   :  { %v1422_v15 = vmul.f32 %v5620_v51, %v1358_v28  ;;  %v1999_v62 = vmul.f32 %v3749_v47, %v1679_v11  ;;  %v5657_v1 = vmul.f32 0.5, %v5543_v3  ;;  %v1297_v39 = vmul.f32 %v5634_v63, %v1233_v37  ;;  %v6496_v28 = vld [vmem:[#allocation19_spill] sm:$0xff] }
 0x219   :  { %v1918_v5 = vmul.f32 1.442695, %v1808_v14  ;;  %v2188_v45 = vsub.f32 0.0, %v2060_v2  ;;  %vm2127_vm0 = vcmp.ge.f32.partialorder %v5524_v4, 0.0  ;;  %v1747_v26 = vsub.f32 0.0, %v5618_v48 }
 0x21a   :  { %v1486_v7 = vadd.f32 -0.28449672, %v1422_v15  ;;  %v5663_v35 = vand.u32 2147483647, %v5654_v43  ;;  %v2317_v40 = vadd.f32 1.0, %v2253_v20  ;;  %v2063_v32 = vsub.f32 1.0, %v1999_v62 }
 0x21b   :  { %v5665_v56 = vpop.eup %3750  ;;  %v1361_v46 = vadd.f32 1.4214138, %v1297_v39  ;;  %3756 = vpow2.f32 %v1920_v44  ;;  %v2252_v3 = vsel %vm2124_vm15, %v2060_v2, %v2188_v45  ;;  %v5675_v0 = vadd.f32 %v5360_v19, %v6495_v49 }
 0x21c   :  { %v1550_v55 = vmul.f32 %v5620_v51, %v1486_v7  ;;  %v1168_v27 = vmul.f32 1.0614054, %v5665_v56  ;;  %v914_v59 = vmul.f32 0.3275911, %v5663_v35  ;;  %v2316_v61 = vadd.f32 1.0, %v2252_v3 }
 0x21d   :  { %v1425_v6 = vmul.f32 %v5634_v63, %v1361_v46  ;;  %3758 = vpow2.f32 %v1918_v5  ;;  %v1811_v10 = vmul.f32 %v1747_v26, %v5618_v48  ;;  %v2381_v12 = vmul.f32 %v2317_v40, %v5568_v30 }
 0x21e   :  { %v1614_v54 = vadd.f32 0.2548296, %v1550_v55  ;;  %v1232_v60 = vadd.f32 -1.4531521, %v1168_v27  ;;  %v978_v34 = vadd.f32 1.0, %v914_v59  ;;  %v2380_v33 = vmul.f32 %v2316_v61, %v5585_v41 }
 0x21f   :  { %v5678_v38 = vpop.eup %3752  ;;  %v2191_v18 = vsub.f32 0.0, %v2063_v32  ;;  %v1489_v17 = vadd.f32 -0.28449672, %v1425_v6  ;;  %v5687_v11 = vadd.f32 %v5360_v19, %v6496_v28  ;;  %vm2126_vm1 = vcmp.ge.f32.partialorder %v5556_v53, 0.0 }
 0x220   :  { %v1678_v14 = vmul.f32 %v5620_v51, %v1614_v54  ;;  %v1296_v47 = vmul.f32 %v5665_v56, %v1232_v60  ;;  %v1171_v50 = vmul.f32 1.0614054, %v5678_v38  ;;  %v3755_v48 = vpop.eup %3754  ;;  %3760 = vrcp.f32 %v978_v34  ;;  %3509 = vmatprep.mubr.msk.f32.mxu1 %vm2417_vm4, %v2380_v33 }
 0x221   :  { %v1553_v37 = vmul.f32 %v5634_v63, %v1489_v17  ;;  %v5692_v30 = vmul.f32 0.70710677, %v5675_v0  ;;  %v1924_v20 = vmul.f32 1.442695, %v1811_v10  ;;  %3510 = vmatmul.mubr.msk.f32.gmra.mrb[40].mxu1 %vm2417_vm4, %v2381_v12  ;;  %v2255_v2 = vsel %vm2127_vm0, %v2063_v32, %v2191_v18 }
 0x222   :  { %v1998_v41 = vmul.f32 %v3755_v48, %v1678_v14  ;;  %v1360_v51 = vadd.f32 1.4214138, %v1296_v47  ;;  %v1235_v44 = vadd.f32 -1.4531521, %v1171_v50  ;;  %v1746_v62 = vsub.f32 0.0, %v5663_v35 }
 0x223   :  { %v1617_v15 = vadd.f32 0.2548296, %v1553_v37  ;;  %v853_v39 = vand.u32 2147483647, %v5692_v30  ;;  %v5703_v26 = vmul.f32 0.70710677, %v5687_v11  ;;  %3762 = vpow2.f32 %v1924_v20 }
 0x224   :  { %v2062_v5 = vsub.f32 1.0, %v1998_v41  ;;  %v1424_v45 = vmul.f32 %v5665_v56, %v1360_v51  ;;  %v1299_v7 = vmul.f32 %v5678_v38, %v1235_v44  ;;  %v5706_v46 = vmul.f32 0.5, %v5560_v42 }
 0x225   :  { %v3757_v40 = vpop.eup %3756  ;;  %v1681_v4 = vmul.f32 %v5634_v63, %v1617_v15  ;;  %v5710_v32 = vmul.f32 0.5, %v5581_v23  ;;  %v917_v3 = vmul.f32 0.3275911, %v853_v39  ;;  %v2319_v6 = vadd.f32 1.0, %v2255_v2 }
 0x226   :  { %v2190_v55 = vsub.f32 0.0, %v2062_v5  ;;  %v1488_v27 = vadd.f32 -0.28449672, %v1424_v45  ;;  %v1363_v59 = vadd.f32 1.4214138, %v1299_v7  ;;  %v1810_v23 = vmul.f32 %v1746_v62, %v5663_v35 }
 0x227   :  { %v3759_v61 = vpop.eup %3758  ;;  %v2001_v49 = vmul.f32 %v3757_v40, %v1681_v4  ;;  %v981_v54 = vadd.f32 1.0, %v917_v3  ;;  %v852_v60 = vand.u32 2147483647, %v5703_v26  ;;  %v5720_v33 = vadd.f32 %v5360_v19, %v5102_v21 }
 0x228   :  { %v2254_v42 = vsel %vm2126_vm1, %v2062_v5, %v2190_v55  ;;  %v1552_v10 = vmul.f32 %v5665_v56, %v1488_v27  ;;  %v1427_v63 = vmul.f32 %v5678_v38, %v1363_v59  ;;  %v2383_v53 = vmul.f32 %v2319_v6, %v5646_v13 }
 0x229   :  { %v2318_v34 = vadd.f32 1.0, %v2254_v42  ;;  %v2065_v12 = vsub.f32 1.0, %v2001_v49  ;;  %3764 = vrcp.f32 %v981_v54  ;;  %v916_v14 = vmul.f32 0.3275911, %v852_v60 }
 0x22a   :  { %v1616_v18 = vadd.f32 0.2548296, %v1552_v10  ;;  %v1491_v17 = vadd.f32 -0.28449672, %v1427_v63  ;;  %v5722_v47 = vpop.eup %3760  ;;  %vm2129_vm2 = vcmp.ge.f32.partialorder %v5574_v9, 0.0  ;;  %v1749_v51 = vsub.f32 0.0, %v853_v39 }
 0x22b   :  { %v2382_v50 = vmul.f32 %v2318_v34, %v5657_v1  ;;  %v2193_v28 = vsub.f32 0.0, %v2065_v12  ;;  %v1170_v37 = vmul.f32 1.0614054, %v5722_v47  ;;  %v980_v21 = vadd.f32 1.0, %v916_v14  ;;  %v6497_v63 = vld [vmem:[#allocation20_spill] sm:$0xff] }
 0x22c   :  { %v1680_v35 = vmul.f32 %v5665_v56, %v1616_v18  ;;  %v1555_v48 = vmul.f32 %v5678_v38, %v1491_v17  ;;  %v1922_v41 = vmul.f32 1.442695, %v1810_v23  ;;  %v5731_v44 = vmul.f32 0.70710677, %v5720_v33 }
 0x22d   :  { %v5735_v13 = vadd.f32 %v5360_v19, %v5122_v29  ;;  %3512 = vmatprep.mubr.msk.f32.mxu1 %vm2417_vm4, %v2382_v50  ;;  %v1234_v2 = vadd.f32 -1.4531521, %v1170_v37  ;;  %v1748_v56 = vsub.f32 0.0, %v852_v60  ;;  %vm2128_vm3 = vcmp.ge.f32.partialorder %v5599_v57, 0.0  ;;  %v3763_v5 = vpop.eup %3762 }
 0x22e   :  { %v2000_v1 = vmul.f32 %v3759_v61, %v1680_v35  ;;  %v1619_v20 = vadd.f32 0.2548296, %v1555_v48  ;;  %3513 = vmatmul.mubr.msk.f32.gmra.mrb[42].mxu1 %vm2417_vm4, %v2383_v53  ;;  %v5741_v15 = vmul.f32 0.5, %v5605_v58  ;;  %3766 = vrcp.f32 %v980_v21 }
 0x22f   :  { %v855_v62 = vand.u32 2147483647, %v5731_v44  ;;  %v2257_v29 = vsel %vm2129_vm2, %v2065_v12, %v2193_v28  ;;  %v1298_v40 = vmul.f32 %v5722_v47, %v1234_v2  ;;  %3768 = vpow2.f32 %v1922_v41 }
 0x230   :  { %v2064_v45 = vsub.f32 1.0, %v2000_v1  ;;  %v1683_v7 = vmul.f32 %v5678_v38, %v1619_v20  ;;  %v1813_v4 = vmul.f32 %v1749_v51, %v853_v39  ;;  %v5749_v55 = vmul.f32 0.70710677, %v5735_v13  ;;  %v6498_v1 = vld [vmem:[#allocation2_spill] sm:$0xff] }
 0x231   :  { %v919_v3 = vmul.f32 0.3275911, %v855_v62  ;;  %v1362_v59 = vadd.f32 1.4214138, %v1298_v40  ;;  %v1812_v61 = vmul.f32 %v1748_v56, %v852_v60  ;;  %v2321_v49 = vadd.f32 1.0, %v2257_v29 }
 0x232   :  { %v2192_v58 = vsub.f32 0.0, %v2064_v45  ;;  %v2003_v27 = vmul.f32 %v3763_v5, %v1683_v7  ;;  %v1751_v54 = vsub.f32 0.0, %v855_v62  ;;  %v5754_v42 = vand.u32 2147483647, %v5749_v55 }
 0x233   :  { %v5751_v6 = vpop.eup %3764  ;;  %v983_v9 = vadd.f32 1.0, %v919_v3  ;;  %v1426_v39 = vmul.f32 %v5722_v47, %v1362_v59  ;;  %v5762_v23 = vadd.f32 %v5360_v19, %v6497_v63  ;;  %vm2131_vm5 = vcmp.ge.f32.partialorder %v5615_v16, 0.0 }
 0x234   :  { %v2256_v38 = vsel %vm2128_vm3, %v2064_v45, %v2192_v58  ;;  %v1173_v10 = vmul.f32 1.0614054, %v5751_v6  ;;  %v2067_v34 = vsub.f32 1.0, %v2003_v27  ;;  %v918_v12 = vmul.f32 0.3275911, %v5754_v42 }
 0x235   :  { %v2320_v60 = vadd.f32 1.0, %v2256_v38  ;;  %3770 = vrcp.f32 %v983_v9  ;;  %v5767_v18 = vmul.f32 0.5, %v5640_v36  ;;  %v1490_v57 = vadd.f32 -0.28449672, %v1426_v39 }
 0x236   :  { %v1237_v17 = vadd.f32 -1.4531521, %v1173_v10  ;;  %v1928_v53 = vmul.f32 1.442695, %v1813_v4  ;;  %v1815_v50 = vmul.f32 %v1751_v54, %v855_v62  ;;  %v982_v28 = vadd.f32 1.0, %v918_v12  ;;  %v6499_v54 = vld [vmem:[#allocation3_spill] sm:$0xff] }
 0x237   :  { %v2384_v14 = vmul.f32 %v2320_v60, %v5710_v32  ;;  %v2385_v35 = vmul.f32 %v2321_v49, %v5706_v46  ;;  %v1554_v48 = vmul.f32 %v5722_v47, %v1490_v57  ;;  %v1926_v21 = vmul.f32 1.442695, %v1812_v61 }
 0x238   :  { %v1301_v37 = vmul.f32 %v5751_v6, %v1237_v17  ;;  %v5773_v41 = vpop.eup %3766  ;;  %v2195_v51 = vsub.f32 0.0, %v2067_v34  ;;  %3772 = vrcp.f32 %v982_v28  ;;  %v5776_v36 = vmul.f32 0.70710677, %v5762_v23 }
 0x239   :  { %v5780_v32 = vadd.f32 %v5360_v19, %v6498_v1  ;;  %3515 = vmatprep.mubr.msk.f32.mxu1 %vm2417_vm4, %v2384_v14  ;;  %v1618_v20 = vadd.f32 0.2548296, %v1554_v48  ;;  %v1172_v2 = vmul.f32 1.0614054, %v5773_v41  ;;  %v3769_v56 = vpop.eup %3768  ;;  %vm2130_vm6 = vcmp.ge.f32.partialorder %v5654_v43, 0.0 }
 0x23a   :  { %v1365_v46 = vadd.f32 1.4214138, %v1301_v37  ;;  %3516 = vmatmul.mubr.msk.f32.gmra.mrb[44].mxu1 %vm2417_vm4, %v2385_v35  ;;  %3774 = vpow2.f32 %v1928_v53  ;;  %v1932_v62 = vmul.f32 1.442695, %v1815_v50  ;;  %v857_v5 = vand.u32 2147483647, %v5776_v36 }
 0x23b   :  { %v1682_v29 = vmul.f32 %v5722_v47, %v1618_v20  ;;  %v5789_v45 = vmul.f32 0.5, %v5675_v0  ;;  %v1236_v40 = vadd.f32 -1.4531521, %v1172_v2  ;;  %3776 = vpow2.f32 %v1926_v21 }
 0x23c   :  { %v1429_v7 = vmul.f32 %v5751_v6, %v1365_v46  ;;  %v1750_v4 = vsub.f32 0.0, %v5754_v42  ;;  %v921_v3 = vmul.f32 0.3275911, %v857_v5  ;;  %v5794_v58 = vmul.f32 0.70710677, %v5780_v32 }
 0x23d   :  { %v2259_v27 = vsel %vm2131_vm5, %v2067_v34, %v2195_v51  ;;  %v2002_v59 = vmul.f32 %v3769_v56, %v1682_v29  ;;  %v1300_v47 = vmul.f32 %v5773_v41, %v1236_v40  ;;  %3778 = vpow2.f32 %v1932_v62 }
 0x23e   :  { %v1493_v61 = vadd.f32 -0.28449672, %v1429_v7  ;;  %v985_v0 = vadd.f32 1.0, %v921_v3  ;;  %v5802_v9 = vand.u32 2147483647, %v5794_v58  ;;  %v5806_v38 = vadd.f32 %v5360_v19, %v6499_v54 }
 0x23f   :  { %v5799_v49 = vpop.eup %3770  ;;  %v2066_v39 = vsub.f32 1.0, %v2002_v59  ;;  %v1364_v16 = vadd.f32 1.4214138, %v1300_v47  ;;  %v2323_v60 = vadd.f32 1.0, %v2259_v27  ;;  %v5811_v34 = vmul.f32 0.5, %v5687_v11 }
 0x240   :  { %v1557_v10 = vmul.f32 %v5751_v6, %v1493_v61  ;;  %v1175_v63 = vmul.f32 1.0614054, %v5799_v49  ;;  %3780 = vrcp.f32 %v985_v0  ;;  %v920_v12 = vmul.f32 0.3275911, %v5802_v9 }
 0x241   :  { %v2194_v57 = vsub.f32 0.0, %v2066_v39  ;;  %v1428_v14 = vmul.f32 %v5773_v41, %v1364_v16  ;;  %v1814_v50 = vmul.f32 %v1750_v4, %v5754_v42  ;;  %v1753_v28 = vsub.f32 0.0, %v857_v5 }
 0x242   :  { %v1621_v17 = vadd.f32 0.2548296, %v1557_v10  ;;  %v1239_v53 = vadd.f32 -1.4531521, %v1175_v63  ;;  %v5815_v19 = vpop.eup %3772  ;;  %v984_v35 = vadd.f32 1.0, %v920_v12  ;;  %v2387_v20 = vmul.f32 %v2323_v60, %v5741_v15 }
 0x243   :  { %v5819_v48 = vmul.f32 0.70710677, %v5806_v38  ;;  %v2258_v11 = vsel %vm2130_vm6, %v2066_v39, %v2194_v57  ;;  %v1492_v21 = vadd.f32 -0.28449672, %v1428_v14  ;;  %vm2133_vm7 = vcmp.ge.f32.partialorder %v5692_v30, 0.0 }
 0x244   :  { %v1685_v37 = vmul.f32 %v5751_v6, %v1621_v17  ;;  %v1303_v51 = vmul.f32 %v5799_v49, %v1239_v53  ;;  %v3775_v1 = vpop.eup %3774  ;;  %v2322_v46 = vadd.f32 1.0, %v2258_v11  ;;  %v1174_v42 = vmul.f32 1.0614054, %v5815_v19 }
 0x245   :  { %3782 = vrcp.f32 %v984_v35  ;;  %v1556_v56 = vmul.f32 %v5773_v41, %v1492_v21  ;;  %v5830_v43 = vand.u32 2147483647, %v5819_v48  ;;  %v3777_v6 = vpop.eup %3776  ;;  %v1930_v40 = vmul.f32 1.442695, %v1814_v50 }
 0x246   :  { %v2005_v2 = vmul.f32 %v3775_v1, %v1685_v37  ;;  %v1367_v62 = vadd.f32 1.4214138, %v1303_v51  ;;  %v2386_v29 = vmul.f32 %v2322_v46, %v5767_v18  ;;  %v1238_v7 = vadd.f32 -1.4531521, %v1174_v42  ;;  %v5844_v18 = vld [vmem:[%s6397_s2] ss:$0 sm:$0xff] }
 0x247   :  { %v1817_v4 = vmul.f32 %v1753_v28, %v857_v5  ;;  %v1620_v3 = vadd.f32 0.2548296, %v1556_v56  ;;  %v923_v59 = vmul.f32 0.3275911, %v5830_v43  ;;  %v3779_v61 = vpop.eup %3778  ;;  %vm2132_vm8 = vcmp.ge.f32.partialorder %v5703_v26, 0.0  ;;  %v6500_v5 = vld [vmem:[#allocation14_spill] sm:$0xff] }
 0x248   :  { %v2069_v15 = vsub.f32 1.0, %v2005_v2  ;;  %v1431_v27 = vmul.f32 %v5799_v49, %v1367_v62  ;;  %v5837_v47 = vmul.f32 0.5, %v5720_v33  ;;  %v1302_v0 = vmul.f32 %v5815_v19, %v1238_v7  ;;  %3518 = vmatprep.mubr.msk.f32.mxu1 %vm2417_vm4, %v2386_v29  ;;  %v5865_v11 = vpop.f32.mrb[64].mxu0 }
 0x249   :  { %v1752_v54 = vsub.f32 0.0, %v5802_v9  ;;  %v5848_v39 = vadd.f32 %v5844_v18, %v6500_v5  ;;  %v1684_v16 = vmul.f32 %v5773_v41, %v1620_v3  ;;  %v987_v63 = vadd.f32 1.0, %v923_v59  ;;  %3519 = vmatmul.mubr.msk.f32.gmra.mrb[46].mxu1 %vm2417_vm4, %v2387_v20 }
 0x24a   :  { %v2197_v10 = vsub.f32 0.0, %v2069_v15  ;;  %v1495_v33 = vadd.f32 -0.28449672, %v1431_v27  ;;  %v5853_v60 = vpop.eup %3780  ;;  %v1366_v12 = vadd.f32 1.4214138, %v1302_v0  ;;  %3784 = vpow2.f32 %v1930_v40 }
 0x24b   :  { %v1936_v57 = vmul.f32 1.442695, %v1817_v4  ;;  %v5856_v17 = vmul.f32 0.70710677, %v5848_v39  ;;  %v2004_v14 = vmul.f32 %v3777_v6, %v1684_v16  ;;  %v1177_v50 = vmul.f32 1.0614054, %v5853_v60 }
 0x24c   :  { %v1559_v53 = vmul.f32 %v5799_v49, %v1495_v33  ;;  %v5861_v28 = vmul.f32 0.5, %v5735_v13  ;;  %v1430_v41 = vmul.f32 %v5815_v19, %v1366_v12  ;;  %v1816_v35 = vmul.f32 %v1752_v54, %v5802_v9  ;;  %v5878_v9 = vpop.f32.mrb[65].mxu0 }
 0x24d   :  { %3786 = vrcp.f32 %v987_v63  ;;  %v2261_v37 = vsel %vm2133_vm7, %v2069_v15, %v2197_v10  ;;  %v2068_v21 = vsub.f32 1.0, %v2004_v14  ;;  %v1241_v1 = vadd.f32 -1.4531521, %v1177_v50 }
 0x24e   :  { %v1623_v51 = vadd.f32 0.2548296, %v1559_v53  ;;  %v1494_v46 = vadd.f32 -0.28449672, %v1430_v41  ;;  %3788 = vpow2.f32 %v1936_v57  ;;  %v5872_v13 = vand.u32 2147483647, %v5856_v17 }
 0x24f   :  { %v5869_v20 = vpop.eup %3782  ;;  %v5876_v42 = vadd.f32 %v5844_v18, %v5333_v25  ;;  %v2196_v2 = vsub.f32 0.0, %v2068_v21  ;;  %v1305_v56 = vmul.f32 %v5853_v60, %v1241_v1  ;;  %v2325_v6 = vadd.f32 1.0, %v2261_v37 }
 0x250   :  { %v1687_v30 = vmul.f32 %v5799_v49, %v1623_v51  ;;  %v1176_v62 = vmul.f32 1.0614054, %v5869_v20  ;;  %v1558_v29 = vmul.f32 %v5815_v19, %v1494_v46  ;;  %v1934_v7 = vmul.f32 1.442695, %v1816_v35 }
 0x251   :  { %v922_v40 = vmul.f32 0.3275911, %v5872_v13  ;;  %v2260_v4 = vsel %vm2132_vm8, %v2068_v21, %v2196_v2  ;;  %v1369_v15 = vadd.f32 1.4214138, %v1305_v56  ;;  %v1755_v49 = vsub.f32 0.0, %v5830_v43 }
 0x252   :  { %v2007_v25 = vmul.f32 %v3779_v61, %v1687_v30  ;;  %v1240_v3 = vadd.f32 -1.4531521, %v1176_v62  ;;  %v2324_v27 = vadd.f32 1.0, %v2260_v4  ;;  %v1622_v59 = vadd.f32 0.2548296, %v1558_v29 }
 0x253   :  { %v986_v0 = vadd.f32 1.0, %v922_v40  ;;  %v1433_v5 = vmul.f32 %v5853_v60, %v1369_v15  ;;  %v5891_v16 = vmul.f32 0.70710677, %v5876_v42  ;;  %vm2135_vm9 = vcmp.ge.f32.partialorder %v5731_v44, 0.0 }
 0x254   :  { %v2071_v54 = vsub.f32 1.0, %v2007_v25  ;;  %v1304_v10 = vmul.f32 %v5869_v20, %v1240_v3  ;;  %v2388_v33 = vmul.f32 %v2324_v27, %v5811_v34  ;;  %v1686_v26 = vmul.f32 %v5815_v19, %v1622_v59  ;;  %v3785_v61 = vpop.eup %3784 }
 0x255   :  { %3790 = vrcp.f32 %v986_v0  ;;  %v2389_v63 = vmul.f32 %v2325_v6, %v5789_v45  ;;  %v1497_v57 = vadd.f32 -0.28449672, %v1433_v5  ;;  %v1819_v41 = vmul.f32 %v1755_v49, %v5830_v43 }
 0x256   :  { %v2199_v12 = vsub.f32 0.0, %v2071_v54  ;;  %v1368_v14 = vadd.f32 1.4214138, %v1304_v10  ;;  %v2006_v50 = vmul.f32 %v3785_v61, %v1686_v26  ;;  %3792 = vpow2.f32 %v1934_v7  ;;  %3521 = vmatprep.mubr.msk.f32.mxu1 %vm2417_vm4, %v2388_v33 }
 0x257   :  { %v5897_v53 = vpop.eup %3786  ;;  %v5901_v35 = vand.u32 2147483647, %v5891_v16  ;;  %vm2134_vm10 = vcmp.ge.f32.partialorder %v5749_v55, 0.0  ;;  %v1561_v34 = vmul.f32 %v5853_v60, %v1497_v57  ;;  %3522 = vmatmul.mubr.msk.f32.gmra.mrb[48].mxu1 %vm2417_vm4, %v2389_v63  ;;  %v5914_v1 = vadd.f32 %v5844_v18, %v5368_v52 }
 0x258   :  { %v1432_v45 = vmul.f32 %v5869_v20, %v1368_v14  ;;  %v1179_v19 = vmul.f32 1.0614054, %v5897_v53  ;;  %v3789_v37 = vpop.eup %3788  ;;  %v2263_v21 = vsel %vm2135_vm9, %v2071_v54, %v2199_v12  ;;  %v2070_v43 = vsub.f32 1.0, %v2006_v50 }
 0x259   :  { %v925_v51 = vmul.f32 0.3275911, %v5901_v35  ;;  %v1625_v46 = vadd.f32 0.2548296, %v1561_v34  ;;  %v1940_v62 = vmul.f32 1.442695, %v1819_v41  ;;  %v5927_v15 = vadd.f32 %v5844_v18, %v5429_v31 }
 0x25a   :  { %v1496_v2 = vadd.f32 -0.28449672, %v1432_v45  ;;  %v1243_v30 = vadd.f32 -1.4531521, %v1179_v19  ;;  %v2198_v56 = vsub.f32 0.0, %v2070_v43  ;;  %v1754_v6 = vsub.f32 0.0, %v5872_v13 }
 0x25b   :  { %v989_v29 = vadd.f32 1.0, %v925_v51  ;;  %v2327_v7 = vadd.f32 1.0, %v2263_v21  ;;  %v1689_v40 = vmul.f32 %v5853_v60, %v1625_v46  ;;  %v5923_v52 = vmul.f32 0.70710677, %v5914_v1 }
 0x25c   :  { %v1560_v44 = vmul.f32 %v5869_v20, %v1496_v2  ;;  %v1307_v4 = vmul.f32 %v5897_v53, %v1243_v30  ;;  %v2262_v25 = vsel %vm2134_vm10, %v2070_v43, %v2198_v56  ;;  %v729_v0 = vmul.f32 0.5, %v5762_v23 }
 0x25d   :  { %3794 = vrcp.f32 %v989_v29  ;;  %v2326_v3 = vadd.f32 1.0, %v2262_v25  ;;  %v2009_v27 = vmul.f32 %v3789_v37, %v1689_v40  ;;  %v1818_v55 = vmul.f32 %v1754_v6, %v5872_v13 }
 0x25e   :  { %v1624_v59 = vadd.f32 0.2548296, %v1560_v44  ;;  %v1371_v49 = vadd.f32 1.4214138, %v1307_v4  ;;  %3796 = vpow2.f32 %v1940_v62  ;;  %v860_v54 = vand.u32 2147483647, %v5923_v52 }
 0x25f   :  { %v5929_v60 = vpop.eup %3790  ;;  %v2390_v5 = vmul.f32 %v2326_v3, %v5861_v28  ;;  %v2073_v10 = vsub.f32 1.0, %v2009_v27  ;;  %v2391_v61 = vmul.f32 %v2327_v7, %v5837_v47  ;;  %vm2137_vm11 = vcmp.ge.f32.partialorder %v5776_v36, 0.0 }
 0x260   :  { %v1688_v33 = vmul.f32 %v5869_v20, %v1624_v59  ;;  %v1435_v31 = vmul.f32 %v5897_v53, %v1371_v49  ;;  %v3793_v26 = vpop.eup %3792  ;;  %v1178_v63 = vmul.f32 1.0614054, %v5929_v60  ;;  %v924_v23 = vmul.f32 0.3275911, %v860_v54 }
 0x261   :  { %v2201_v12 = vsub.f32 0.0, %v2073_v10  ;;  %v5941_v14 = vmul.f32 0.70710677, %v5927_v15  ;;  %3524 = vmatprep.mubr.msk.f32.mxu1 %vm2417_vm4, %v2390_v5  ;;  %v1938_v20 = vmul.f32 1.442695, %v1818_v55  ;;  %v1757_v50 = vsub.f32 0.0, %v5901_v35 }
 0x262   :  { %v2008_v57 = vmul.f32 %v3793_v26, %v1688_v33  ;;  %v1499_v13 = vadd.f32 -0.28449672, %v1435_v31  ;;  %v1242_v28 = vadd.f32 -1.4531521, %v1178_v63  ;;  %v988_v41 = vadd.f32 1.0, %v924_v23  ;;  %3525 = vmatmul.mubr.msk.f32.gmra.mrb[50].mxu1 %vm2417_vm4, %v2391_v61 }
 0x263   :  { %v2265_v47 = vsel %vm2137_vm11, %v2073_v10, %v2201_v12  ;;  %v5948_v45 = vand.u32 2147483647, %v5941_v14  ;;  %v728_v19 = vmul.f32 0.5, %v5780_v32  ;;  %v5954_v21 = vadd.f32 %v5844_v18, %v5455_v22 }
 0x264   :  { %v2072_v36 = vsub.f32 1.0, %v2008_v57  ;;  %v1563_v34 = vmul.f32 %v5897_v53, %v1499_v13  ;;  %v1306_v37 = vmul.f32 %v5929_v60, %v1242_v28  ;;  %3798 = vrcp.f32 %v988_v41 }
 0x265   :  { %vm2136_vm12 = vcmp.ge.f32.partialorder %v5794_v58, 0.0  ;;  %v927_v46 = vmul.f32 0.3275911, %v5948_v45  ;;  %v2329_v30 = vadd.f32 1.0, %v2265_v47  ;;  %3800 = vpow2.f32 %v1938_v20 }
 0x266   :  { %v2200_v43 = vsub.f32 0.0, %v2072_v36  ;;  %v1627_v51 = vadd.f32 0.2548296, %v1563_v34  ;;  %v1370_v56 = vadd.f32 1.4214138, %v1306_v37  ;;  %v1821_v32 = vmul.f32 %v1757_v50, %v5901_v35 }
 0x267   :  { %v5958_v2 = vpop.eup %3794  ;;  %v991_v22 = vadd.f32 1.0, %v927_v46  ;;  %v1756_v44 = vsub.f32 0.0, %v860_v54  ;;  %v5965_v4 = vmul.f32 0.70710677, %v5954_v21  ;;  %v5969_v35 = vadd.f32 %v5844_v18, %v5485_v8 }
 0x268   :  { %v2264_v62 = vsel %vm2136_vm12, %v2072_v36, %v2200_v43  ;;  %v1691_v6 = vmul.f32 %v5897_v53, %v1627_v51  ;;  %v1181_v29 = vmul.f32 1.0614054, %v5958_v2  ;;  %v3797_v7 = vpop.eup %3796  ;;  %v1434_v58 = vmul.f32 %v5929_v60, %v1370_v56 }
 0x269   :  { %v2328_v40 = vadd.f32 1.0, %v2264_v62  ;;  %3802 = vrcp.f32 %v991_v22  ;;  %v1944_v59 = vmul.f32 1.442695, %v1821_v32  ;;  %v5972_v49 = vand.u32 2147483647, %v5965_v4 }
 0x26a   :  { %v2011_v25 = vmul.f32 %v3797_v7, %v1691_v6  ;;  %v1245_v3 = vadd.f32 -1.4531521, %v1181_v29  ;;  %v1498_v53 = vadd.f32 -0.28449672, %v1434_v58  ;;  %v2393_v55 = vmul.f32 %v2329_v30, %v729_v0 }
 0x26b   :  { %v2392_v27 = vmul.f32 %v2328_v40, %v728_v19  ;;  %v1820_v31 = vmul.f32 %v1756_v44, %v860_v54  ;;  %v926_v26 = vmul.f32 0.3275911, %v5972_v49  ;;  %vm2139_vm13 = vcmp.ge.f32.partialorder %v5819_v48, 0.0  ;;  %v5989_v54 = vld [vmem:[%s6398_s4] ss:$0 sm:$0xff] }
 0x26c   :  { %v1309_v5 = vmul.f32 %v5958_v2, %v1245_v3  ;;  %v2075_v10 = vsub.f32 1.0, %v2011_v25  ;;  %v1562_v33 = vmul.f32 %v5929_v60, %v1498_v53  ;;  %v5980_v61 = vmul.f32 0.70710677, %v5969_v35 }
 0x26d   :  { %3527 = vmatprep.mubr.msk.f32.mxu1 %vm2417_vm4, %v2392_v27  ;;  %3804 = vpow2.f32 %v1944_v59  ;;  %v1759_v23 = vsub.f32 0.0, %v5948_v45  ;;  %v990_v12 = vadd.f32 1.0, %v926_v26  ;;  %v730_v57 = vmul.f32 0.5, %v5848_v39 }
 0x26e   :  { %v1373_v8 = vadd.f32 1.4214138, %v1309_v5  ;;  %3528 = vmatmul.mubr.msk.f32.gmra.mrb[52].mxu1 %vm2417_vm4, %v2393_v55  ;;  %v5983_v63 = vpop.eup %3798  ;;  %v1626_v0 = vadd.f32 0.2548296, %v1562_v33  ;;  %v865_v20 = vand.u32 2147483647, %v5980_v61  ;;  %v5998_v43 = vadd.f32 %v5844_v18, %v5509_v24 }
 0x26f   :  { %v1180_v28 = vmul.f32 1.0614054, %v5983_v63  ;;  %v3801_v50 = vpop.eup %3800  ;;  %v2203_v41 = vsub.f32 0.0, %v2075_v10  ;;  %v1942_v36 = vmul.f32 1.442695, %v1820_v31  ;;  %3806 = vrcp.f32 %v990_v12 }
 0x270   :  { %v1437_v13 = vmul.f32 %v5958_v2, %v1373_v8  ;;  %v1690_v47 = vmul.f32 %v5929_v60, %v1626_v0  ;;  %v929_v37 = vmul.f32 0.3275911, %v865_v20  ;;  %vm2138_vm14 = vcmp.ge.f32.partialorder %v5856_v17, 0.0 }
 0x271   :  { %v1244_v19 = vadd.f32 -1.4531521, %v1180_v28  ;;  %v1823_v51 = vmul.f32 %v1759_v23, %v5948_v45  ;;  %v2682_v46 = vadd.f32 %v5865_v11, %v5989_v54  ;;  %v2677_v62 = vadd.f32 %v5989_v54, %v5878_v9 }
 0x272   :  { %v1501_v34 = vadd.f32 -0.28449672, %v1437_v13  ;;  %v2010_v39 = vmul.f32 %v3801_v50, %v1690_v47  ;;  %v993_v32 = vadd.f32 1.0, %v929_v37  ;;  %v2267_v24 = vsel %vm2139_vm13, %v2075_v10, %v2203_v41 }
 0x273   :  { %v6004_v30 = vpop.eup %3802  ;;  %v1308_v56 = vmul.f32 %v5983_v63, %v1244_v19  ;;  %3808 = vpow2.f32 %v1942_v36  ;;  %v6014_v11 = vmul.f32 0.70710677, %v5998_v43  ;;  %v1758_v40 = vsub.f32 0.0, %v5972_v49 }
 0x274   :  { %v1565_v60 = vmul.f32 %v5958_v2, %v1501_v34  ;;  %v2074_v18 = vsub.f32 1.0, %v2010_v39  ;;  %v1183_v45 = vmul.f32 1.0614054, %v6004_v30  ;;  %3810 = vrcp.f32 %v993_v32 }
 0x275   :  { %v1372_v29 = vadd.f32 1.4214138, %v1308_v56  ;;  %vm2995_vm15 = vcmask 31744   ;;  %v1948_v58 = vmul.f32 1.442695, %v1823_v51  ;;  %v2331_v3 = vadd.f32 1.0, %v2267_v24 }
 0x276   :  { %v1629_v6 = vadd.f32 0.2548296, %v1565_v60  ;;  %v2202_v22 = vsub.f32 0.0, %v2074_v18  ;;  %v1247_v7 = vadd.f32 -1.4531521, %v1183_v45  ;;  %2997 = vst.msk [vmem:[%s6399_s5 + $0x8] sm:$0xff] %vm2995_vm15, %v2682_v46  ;;  %v1822_v8 = vmul.f32 %v1758_v40, %v5972_v49 }
 0x277   :  { %v1436_v48 = vmul.f32 %v5983_v63, %v1372_v29  ;;  %v6020_v44 = vand.u32 2147483647, %v6014_v11  ;;  %2996 = vst.msk [vmem:[%s6399_s5] sm:$0xff] %vm2995_vm15, %v2677_v62  ;;  %v3805_v25 = vpop.eup %3804  ;;  %v1761_v53 = vsub.f32 0.0, %v865_v20  ;;  %v731_v31 = vmul.f32 0.5, %v5806_v38 }
 0x278   :  { %v1693_v9 = vmul.f32 %v5958_v2, %v1629_v6  ;;  %v2266_v2 = vsel %vm2138_vm14, %v2074_v18, %v2202_v22  ;;  %v1311_v27 = vmul.f32 %v6004_v30, %v1247_v7  ;;  %3812 = vpow2.f32 %v1948_v58 }
 0x279   :  { %v2330_v59 = vadd.f32 1.0, %v2266_v2  ;;  %v1500_v5 = vadd.f32 -0.28449672, %v1436_v48  ;;  %v928_v10 = vmul.f32 0.3275911, %v6020_v44  ;;  %v6034_v33 = vpop.eup %3806  ;;  %v2395_v12 = vmul.f32 %v2331_v3, %v731_v31 }
 0x27a   :  { %v2013_v55 = vmul.f32 %v3805_v25, %v1693_v9  ;;  %v1375_v26 = vadd.f32 1.4214138, %v1311_v27  ;;  %v1182_v17 = vmul.f32 1.0614054, %v6034_v33  ;;  %v1825_v36 = vmul.f32 %v1761_v53, %v865_v20 }
 0x27b   :  { %v2394_v0 = vmul.f32 %v2330_v59, %v730_v57  ;;  %v1564_v23 = vmul.f32 %v5983_v63, %v1500_v5  ;;  %v992_v50 = vadd.f32 1.0, %v928_v10  ;;  %v1946_v19 = vmul.f32 1.442695, %v1822_v8 }
 0x27c   :  { %v2077_v13 = vsub.f32 1.0, %v2013_v55  ;;  %v1439_v28 = vmul.f32 %v6004_v30, %v1375_v26  ;;  %v1246_v47 = vadd.f32 -1.4531521, %v1182_v17  ;;  %v3451_v49 = vpop.f32.mrb[0].mxu1  ;;  %v1952_v24 = vmul.f32 1.442695, %v1825_v36 }
 0x27d   :  { %v1628_v41 = vadd.f32 0.2548296, %v1564_v23  ;;  %3530 = vmatprep.mubr.msk.f32.mxu1 %vm2417_vm4, %v2394_v0  ;;  %v3809_v38 = vpop.eup %3808  ;;  %3814 = vrcp.f32 %v992_v50  ;;  %v2692_v51 = vadd.f32 %v3451_v49, %v5989_v54  ;;  %v2686_v46 = vpop.f32.mrb[1].mxu1  ;;  %v1760_v6 = vsub.f32 0.0, %v6020_v44 }
 0x27e   :  { %v1503_v34 = vadd.f32 -0.28449672, %v1439_v28  ;;  %3531 = vmatmul.mubr.msk.f32.gmra.mrb[54].mxu1 %vm2417_vm4, %v2395_v12  ;;  %v6043_v57 = vpop.eup %3810  ;;  %v1310_v39 = vmul.f32 %v6034_v33, %v1246_v47  ;;  %v2205_v60 = vsub.f32 0.0, %v2077_v13  ;;  %3816 = vpow2.f32 %v1946_v19 }
 0x27f   :  { %v1692_v37 = vmul.f32 %v5983_v63, %v1628_v41  ;;  %v1185_v56 = vmul.f32 1.0614054, %v6043_v57  ;;  %2999 = vst.msk [vmem:[%s6399_s5 + $0x18] sm:$0xff] %vm2995_vm15, %v2692_v51  ;;  %v2687_v63 = vadd.f32 %v5989_v54, %v2686_v46  ;;  %vm2141_vm0 = vcmp.ge.f32.partialorder %v5891_v16, 0.0 }
 0x280   :  { %v1567_v20 = vmul.f32 %v6004_v30, %v1503_v34  ;;  %v1374_v62 = vadd.f32 1.4214138, %v1310_v39  ;;  %v3454_v29 = vpop.f32.mrb[2].mxu1  ;;  %v2269_v48 = vsel %vm2141_vm0, %v2077_v13, %v2205_v60  ;;  %v732_v16 = vmul.f32 0.5, %v5914_v1 }
 0x281   :  { %v2012_v32 = vmul.f32 %v3809_v38, %v1692_v37  ;;  %v1249_v45 = vadd.f32 -1.4531521, %v1185_v56  ;;  %2998 = vst.msk [vmem:[%s6399_s5 + $0x10] sm:$0xff] %vm2995_vm15, %v2687_v63  ;;  %v2702_v40 = vadd.f32 %v3454_v29, %v5989_v54  ;;  %v2696_v9 = vpop.f32.mrb[3].mxu1  ;;  %vm2140_vm1 = vcmp.ge.f32.partialorder %v5923_v52, 0.0 }
 0x282   :  { %v1631_v18 = vadd.f32 0.2548296, %v1567_v20  ;;  %v1438_v7 = vmul.f32 %v6034_v33, %v1374_v62  ;;  %v2697_v3 = vadd.f32 %v5989_v54, %v2696_v9  ;;  %v3813_v2 = vpop.eup %3812  ;;  %3818 = vpow2.f32 %v1952_v24 }
 0x283   :  { %v2076_v22 = vsub.f32 1.0, %v2012_v32  ;;  %v1313_v25 = vmul.f32 %v6043_v57, %v1249_v45  ;;  %3001 = vst.msk [vmem:[%s6399_s5 + $0x28] sm:$0xff] %vm2995_vm15, %v2702_v40  ;;  %v2333_v5 = vadd.f32 1.0, %v2269_v48  ;;  %v733_v12 = vmul.f32 0.5, %v5876_v42 }
 0x284   :  { %v1695_v58 = vmul.f32 %v6004_v30, %v1631_v18  ;;  %v1502_v53 = vadd.f32 -0.28449672, %v1438_v7  ;;  %v1824_v30 = vmul.f32 %v1760_v6, %v6020_v44  ;;  %3000 = vst.msk [vmem:[%s6399_s5 + $0x20] sm:$0xff] %vm2995_vm15, %v2697_v3  ;;  %v3457_v1 = vpop.f32.mrb[4].mxu1  ;;  %vm2143_vm2 = vcmp.ge.f32.partialorder %v5941_v14, 0.0 }
 0x285   :  { %v2204_v27 = vsub.f32 0.0, %v2076_v22  ;;  %v1377_v55 = vadd.f32 1.4214138, %v1313_v25  ;;  %v2712_v31 = vadd.f32 %v3457_v1, %v5989_v54  ;;  %v2706_v26 = vpop.f32.mrb[5].mxu1  ;;  %v2397_v36 = vmul.f32 %v2333_v5, %v733_v12 }
 0x286   :  { %v2015_v59 = vmul.f32 %v3813_v2, %v1695_v58  ;;  %v1566_v10 = vmul.f32 %v6034_v33, %v1502_v53  ;;  %v2707_v44 = vadd.f32 %v5989_v54, %v2706_v26  ;;  %v1950_v51 = vmul.f32 1.442695, %v1824_v30 }
 0x287   :  { %v2268_v52 = vsel %vm2140_vm1, %v2076_v22, %v2204_v27  ;;  %v6079_v8 = vpop.eup %3814  ;;  %v1441_v17 = vmul.f32 %v6043_v57, %v1377_v55  ;;  %3003 = vst.msk [vmem:[%s6399_s5 + $0x38] sm:$0xff] %vm2995_vm15, %v2712_v31  ;;  %vm2142_vm3 = vcmp.ge.f32.partialorder %v5965_v4, 0.0  ;;  %v734_v3 = vmul.f32 0.5, %v5954_v21 }
 0x288   :  { %v2332_v0 = vadd.f32 1.0, %v2268_v52  ;;  %v2079_v23 = vsub.f32 1.0, %v2015_v59  ;;  %v1630_v13 = vadd.f32 0.2548296, %v1566_v10  ;;  %v1184_v28 = vmul.f32 1.0614054, %v6079_v8  ;;  %v3817_v49 = vpop.eup %3816 }
 0x289   :  { %v1505_v41 = vadd.f32 -0.28449672, %v1441_v17  ;;  %3002 = vst.msk [vmem:[%s6399_s5 + $0x30] sm:$0xff] %vm2995_vm15, %v2707_v44  ;;  %v3460_v47 = vpop.f32.mrb[6].mxu1  ;;  %3820 = vpow2.f32 %v1950_v51  ;;  %v735_v4 = vmul.f32 0.5, %v5927_v15  ;;  %vm2145_vm5 = vcmp.ge.f32.partialorder %v5980_v61, 0.0 }
 0x28a   :  { %v2396_v50 = vmul.f32 %v2332_v0, %v732_v16  ;;  %v1694_v38 = vmul.f32 %v6034_v33, %v1630_v13  ;;  %v1248_v42 = vadd.f32 -1.4531521, %v1184_v28  ;;  %v2722_v34 = vadd.f32 %v3460_v47, %v5989_v54  ;;  %v2716_v19 = vpop.f32.mrb[7].mxu1 }
 0x28b   :  { %v2207_v37 = vsub.f32 0.0, %v2079_v23  ;;  %v1569_v39 = vmul.f32 %v6043_v57, %v1505_v41  ;;  %v2717_v46 = vadd.f32 %v5989_v54, %v2716_v19  ;;  %vm2144_vm6 = vcmp.ge.f32.partialorder %v6014_v11, 0.0 }
 0x28c   :  { %3533 = vmatprep.mubr.msk.f32.mxu1 %vm2417_vm4, %v2396_v50  ;;  %v2014_v60 = vmul.f32 %v3817_v49, %v1694_v38  ;;  %v1312_v20 = vmul.f32 %v6079_v8, %v1248_v42  ;;  %3005 = vst.msk [vmem:[%s6399_s5 + $0x48] sm:$0xff] %vm2995_vm15, %v2722_v34  ;;  %v3463_v56 = vpop.f32.mrb[8].mxu1  ;;  %v3819_v18 = vpop.eup %3818  ;;  %v736_v38 = vmul.f32 0.5, %v5998_v43  ;;  %v737_v11 = vmul.f32 0.5, %v5969_v35 }
 0x28d   :  { %3534 = vmatmul.mubr.msk.f32.gmra.mrb[56].mxu1 %vm2417_vm4, %v2397_v36  ;;  %v1633_v33 = vadd.f32 0.2548296, %v1569_v39  ;;  %3004 = vst.msk [vmem:[%s6399_s5 + $0x40] sm:$0xff] %vm2995_vm15, %v2717_v46  ;;  %v2732_v24 = vadd.f32 %v3463_v56, %v5989_v54  ;;  %v2726_v63 = vpop.f32.mrb[9].mxu1  ;;  %v2271_v45 = vsel %vm2143_vm2, %v2079_v23, %v2207_v37 }
 0x28e   :  { %v2078_v32 = vsub.f32 1.0, %v2014_v60  ;;  %v1376_v62 = vadd.f32 1.4214138, %v1312_v20  ;;  %v2727_v29 = vadd.f32 %v5989_v54, %v2726_v63  ;;  %v2335_v40 = vadd.f32 1.0, %v2271_v45 }
 0x28f   :  { %v1697_v6 = vmul.f32 %v6043_v57, %v1633_v33  ;;  %3007 = vst.msk [vmem:[%s6399_s5 + $0x58] sm:$0xff] %vm2995_vm15, %v2732_v24 }
 0x290   :  { %v2206_v22 = vsub.f32 0.0, %v2078_v32  ;;  %v1440_v7 = vmul.f32 %v6079_v8, %v1376_v62  ;;  %3006 = vst.msk [vmem:[%s6399_s5 + $0x50] sm:$0xff] %vm2995_vm15, %v2727_v29  ;;  %v3466_v57 = vpop.f32.mrb[10].mxu1  ;;  %v2399_v55 = vmul.f32 %v2335_v40, %v735_v4 }
 0x291   :  { %v2017_v14 = vmul.f32 %v3819_v18, %v1697_v6  ;;  %v2742_v58 = vadd.f32 %v3466_v57, %v5989_v54  ;;  %v2736_v25 = vpop.f32.mrb[11].mxu1 }
 0x292   :  { %v2270_v9 = vsel %vm2142_vm3, %v2078_v32, %v2206_v22  ;;  %v1504_v48 = vadd.f32 -0.28449672, %v1440_v7  ;;  %v2737_v16 = vadd.f32 %v5989_v54, %v2736_v25 }
 0x293   :  { %v2334_v2 = vadd.f32 1.0, %v2270_v9  ;;  %3009 = vst.msk [vmem:[%s6399_s5 + $0x68] sm:$0xff] %vm2995_vm15, %v2742_v58  ;;  %v2081_v59 = vsub.f32 1.0, %v2017_v14  ;;  %v3821_v10 = vpop.eup %3820 }
 0x294   :  { %v1568_v27 = vmul.f32 %v6079_v8, %v1504_v48  ;;  %3008 = vst.msk [vmem:[%s6399_s5 + $0x60] sm:$0xff] %vm2995_vm15, %v2737_v16  ;;  %v3469_v21 = vpop.f32.mrb[12].mxu1 }
 0x295   :  { %v2398_v53 = vmul.f32 %v2334_v2, %v734_v3  ;;  %v2752_v1 = vadd.f32 %v3469_v21, %v5989_v54  ;;  %v2746_v15 = vpop.f32.mrb[13].mxu1  ;;  %v2209_v31 = vsub.f32 0.0, %v2081_v59 }
 0x296   :  { %v1632_v30 = vadd.f32 0.2548296, %v1568_v27  ;;  %v2747_v5 = vadd.f32 %v5989_v54, %v2746_v15 }
 0x297   :  { %3536 = vmatprep.mubr.msk.f32.mxu1 %vm2417_vm4, %v2398_v53  ;;  %3011 = vst.msk [vmem:[%s6399_s5 + $0x78] sm:$0xff] %vm2995_vm15, %v2752_v1  ;;  %v2273_v12 = vsel %vm2145_vm5, %v2081_v59, %v2209_v31 }
 0x298   :  { %v1696_v52 = vmul.f32 %v6079_v8, %v1632_v30  ;;  %3537 = vmatmul.mubr.msk.f32.gmra.mrb[58].mxu1 %vm2417_vm4, %v2399_v55  ;;  %3010 = vst.msk [vmem:[%s6399_s5 + $0x70] sm:$0xff] %vm2995_vm15, %v2747_v5  ;;  %v3472_v26 = vpop.f32.mrb[14].mxu1  ;;  %v2337_v47 = vadd.f32 1.0, %v2273_v12 }
 0x299   :  { %v2762_v23 = vadd.f32 %v3472_v26, %v5989_v54  ;;  %v2756_v17 = vpop.f32.mrb[15].mxu1 }
 0x29a   :  { %v2016_v0 = vmul.f32 %v3821_v10, %v1696_v52  ;;  %v2757_v8 = vadd.f32 %v5989_v54, %v2756_v17  ;;  %v2401_v51 = vmul.f32 %v2337_v47, %v737_v11 }
 0x29b   :  { %3013 = vst.msk [vmem:[%s6399_s5 + $0x88] sm:$0xff] %vm2995_vm15, %v2762_v23 }
 0x29c   :  { %v2080_v44 = vsub.f32 1.0, %v2016_v0  ;;  %3012 = vst.msk [vmem:[%s6399_s5 + $0x80] sm:$0xff] %vm2995_vm15, %v2757_v8  ;;  %v3475_v13 = vpop.f32.mrb[16].mxu1 }
 0x29d   :  { %v2772_v50 = vadd.f32 %v3475_v13, %v5989_v54  ;;  %v2766_v41 = vpop.f32.mrb[17].mxu1 }
 0x29e   :  { %v2208_v28 = vsub.f32 0.0, %v2080_v44  ;;  %v2767_v61 = vadd.f32 %v5989_v54, %v2766_v41 }
 0x29f   :  { %3015 = vst.msk [vmem:[%s6399_s5 + $0x98] sm:$0xff] %vm2995_vm15, %v2772_v50 }
 0x2a0   :  { %v2272_v36 = vsel %vm2144_vm6, %v2080_v44, %v2208_v28  ;;  %3014 = vst.msk [vmem:[%s6399_s5 + $0x90] sm:$0xff] %vm2995_vm15, %v2767_v61  ;;  %v3478_v34 = vpop.f32.mrb[18].mxu1 }
 0x2a1   :  { %v2336_v42 = vadd.f32 1.0, %v2272_v36  ;;  %v2782_v19 = vadd.f32 %v3478_v34, %v5989_v54  ;;  %v2776_v49 = vpop.f32.mrb[19].mxu1 }
 0x2a2   :  { %v2777_v39 = vadd.f32 %v5989_v54, %v2776_v49 }
 0x2a3   :  { %v2400_v37 = vmul.f32 %v2336_v42, %v736_v38  ;;  %3017 = vst.msk [vmem:[%s6399_s5 + $0xa8] sm:$0xff] %vm2995_vm15, %v2782_v19 }
 0x2a4   :  { %3016 = vst.msk [vmem:[%s6399_s5 + $0xa0] sm:$0xff] %vm2995_vm15, %v2777_v39  ;;  %v3481_v35 = vpop.f32.mrb[20].mxu1 }
 0x2a5   :  { %3539 = vmatprep.mubr.msk.f32.mxu1 %vm2417_vm4, %v2400_v37  ;;  %v2792_v43 = vadd.f32 %v3481_v35, %v5989_v54  ;;  %v2786_v46 = vpop.f32.mrb[21].mxu1 }
 0x2a6   :  { %3540 = vmatmul.mubr.msk.f32.gmra.mrb[60].mxu1 %vm2417_vm4, %v2401_v51  ;;  %v2787_v60 = vadd.f32 %v5989_v54, %v2786_v46 }
 0x2a7   :  { %3019 = vst.msk [vmem:[%s6399_s5 + $0xb8] sm:$0xff] %vm2995_vm15, %v2792_v43 }
 0x2a8   :  { %3018 = vst.msk [vmem:[%s6399_s5 + $0xb0] sm:$0xff] %vm2995_vm15, %v2787_v60  ;;  %v3484_v20 = vpop.f32.mrb[22].mxu1 }
 0x2a9   :  { %v2802_v33 = vadd.f32 %v3484_v20, %v5989_v54  ;;  %v2796_v56 = vpop.f32.mrb[23].mxu1 }
 0x2aa   :  { %v2797_v32 = vadd.f32 %v5989_v54, %v2796_v56 }
 0x2ab   :  { %3021 = vst.msk [vmem:[%s6399_s5 + $0xc8] sm:$0xff] %vm2995_vm15, %v2802_v33 }
 0x2ac   :  { %3020 = vst.msk [vmem:[%s6399_s5 + $0xc0] sm:$0xff] %vm2995_vm15, %v2797_v32  ;;  %v3487_v62 = vpop.f32.mrb[24].mxu1 }
 0x2ad   :  { %v2812_v24 = vadd.f32 %v3487_v62, %v5989_v54  ;;  %v2806_v63 = vpop.f32.mrb[25].mxu1 }
 0x2ae   :  { %v2807_v18 = vadd.f32 %v5989_v54, %v2806_v63 }
 0x2af   :  { %3023 = vst.msk [vmem:[%s6399_s5 + $0xd8] sm:$0xff] %vm2995_vm15, %v2812_v24 }
 0x2b0   :  { %3022 = vst.msk [vmem:[%s6399_s5 + $0xd0] sm:$0xff] %vm2995_vm15, %v2807_v18  ;;  %v3490_v45 = vpop.f32.mrb[26].mxu1 }
 0x2b1   :  { %v2822_v6 = vadd.f32 %v3490_v45, %v5989_v54  ;;  %v2816_v29 = vpop.f32.mrb[27].mxu1 }
 0x2b2   :  { %v2817_v22 = vadd.f32 %v5989_v54, %v2816_v29 }
 0x2b3   :  { %3025 = vst.msk [vmem:[%s6399_s5 + $0xe8] sm:$0xff] %vm2995_vm15, %v2822_v6 }
 0x2b4   :  { %3024 = vst.msk [vmem:[%s6399_s5 + $0xe0] sm:$0xff] %vm2995_vm15, %v2817_v22  ;;  %v3493_v7 = vpop.f32.mrb[28].mxu1 }
 0x2b5   :  { %v2832_v14 = vadd.f32 %v3493_v7, %v5989_v54  ;;  %v2826_v57 = vpop.f32.mrb[29].mxu1 }
 0x2b6   :  { %v2827_v40 = vadd.f32 %v5989_v54, %v2826_v57 }
 0x2b7   :  { %3027 = vst.msk [vmem:[%s6399_s5 + $0xf8] sm:$0xff] %vm2995_vm15, %v2832_v14 }
 0x2b8   :  { %3026 = vst.msk [vmem:[%s6399_s5 + $0xf0] sm:$0xff] %vm2995_vm15, %v2827_v40  ;;  %v3496_v9 = vpop.f32.mrb[30].mxu1 }
 0x2b9   :  { %v2842_v48 = vadd.f32 %v3496_v9, %v5989_v54  ;;  %v2836_v58 = vpop.f32.mrb[31].mxu1 }
 0x2ba   :  { %v2837_v25 = vadd.f32 %v5989_v54, %v2836_v58 }
 0x2bb   :  { %3029 = vst.msk [vmem:[%s6399_s5 + $0x108] sm:$0xff] %vm2995_vm15, %v2842_v48 }
 0x2bc   :  { %3028 = vst.msk [vmem:[%s6399_s5 + $0x100] sm:$0xff] %vm2995_vm15, %v2837_v25  ;;  %v3499_v3 = vpop.f32.mrb[32].mxu1 }
 0x2bd   :  { %v2852_v2 = vadd.f32 %v3499_v3, %v5989_v54  ;;  %v2846_v16 = vpop.f32.mrb[33].mxu1 }
 0x2be   :  { %v2847_v4 = vadd.f32 %v5989_v54, %v2846_v16 }
 0x2bf   :  { %3031 = vst.msk [vmem:[%s6399_s5 + $0x118] sm:$0xff] %vm2995_vm15, %v2852_v2 }
 0x2c0   :  { %3030 = vst.msk [vmem:[%s6399_s5 + $0x110] sm:$0xff] %vm2995_vm15, %v2847_v4 }
 0x2ca   :  { %v3502_v27 = vpop.f32.mrb[34].mxu1 }
 0x2cb   :  { %v2862_v53 = vadd.f32 %v3502_v27, %v5989_v54  ;;  %v2856_v59 = vpop.f32.mrb[35].mxu1 }
 0x2cc   :  { %v2857_v21 = vadd.f32 %v5989_v54, %v2856_v59 }
 0x2cd   :  { %3033 = vst.msk [vmem:[%s6399_s5 + $0x128] sm:$0xff] %vm2995_vm15, %v2862_v53 }
 0x2ce   :  { %3032 = vst.msk [vmem:[%s6399_s5 + $0x120] sm:$0xff] %vm2995_vm15, %v2857_v21 }
 0x2d8   :  { %v3505_v55 = vpop.f32.mrb[36].mxu1 }
 0x2d9   :  { %v2872_v30 = vadd.f32 %v3505_v55, %v5989_v54  ;;  %v2866_v1 = vpop.f32.mrb[37].mxu1 }
 0x2da   :  { %v2867_v15 = vadd.f32 %v5989_v54, %v2866_v1 }
 0x2db   :  { %3035 = vst.msk [vmem:[%s6399_s5 + $0x138] sm:$0xff] %vm2995_vm15, %v2872_v30 }
 0x2dc   :  { %3034 = vst.msk [vmem:[%s6399_s5 + $0x130] sm:$0xff] %vm2995_vm15, %v2867_v15 }
 0x2e9   :  { %v3508_v5 = vpop.f32.mrb[38].mxu1 }
 0x2ea   :  { %v2882_v52 = vadd.f32 %v3508_v5, %v5989_v54  ;;  %v2876_v10 = vpop.f32.mrb[39].mxu1 }
 0x2eb   :  { %v2877_v31 = vadd.f32 %v5989_v54, %v2876_v10 }
 0x2ec   :  { %3037 = vst.msk [vmem:[%s6399_s5 + $0x148] sm:$0xff] %vm2995_vm15, %v2882_v52 }
 0x2ed   :  { %3036 = vst.msk [vmem:[%s6399_s5 + $0x140] sm:$0xff] %vm2995_vm15, %v2877_v31 }
 0x2f4   :  { %v3511_v26 = vpop.f32.mrb[40].mxu1 }
 0x2f5   :  { %v2892_v0 = vadd.f32 %v3511_v26, %v5989_v54  ;;  %v2886_v23 = vpop.f32.mrb[41].mxu1 }
 0x2f6   :  { %v2887_v17 = vadd.f32 %v5989_v54, %v2886_v23 }
 0x2f7   :  { %3039 = vst.msk [vmem:[%s6399_s5 + $0x158] sm:$0xff] %vm2995_vm15, %v2892_v0 }
 0x2f8   :  { %3038 = vst.msk [vmem:[%s6399_s5 + $0x150] sm:$0xff] %vm2995_vm15, %v2887_v17 }
 0x301   :  { %v3514_v8 = vpop.f32.mrb[42].mxu1 }
 0x302   :  { %v2902_v44 = vadd.f32 %v3514_v8, %v5989_v54  ;;  %v2896_v12 = vpop.f32.mrb[43].mxu1 }
 0x303   :  { %v2897_v13 = vadd.f32 %v5989_v54, %v2896_v12 }
 0x304   :  { %3041 = vst.msk [vmem:[%s6399_s5 + $0x168] sm:$0xff] %vm2995_vm15, %v2902_v44 }
 0x305   :  { %3040 = vst.msk [vmem:[%s6399_s5 + $0x160] sm:$0xff] %vm2995_vm15, %v2897_v13 }
 0x30d   :  { %v3517_v28 = vpop.f32.mrb[44].mxu1 }
 0x30e   :  { %v2912_v50 = vadd.f32 %v3517_v28, %v5989_v54  ;;  %v2906_v41 = vpop.f32.mrb[45].mxu1 }
 0x30f   :  { %v2907_v61 = vadd.f32 %v5989_v54, %v2906_v41 }
 0x310   :  { %3043 = vst.msk [vmem:[%s6399_s5 + $0x178] sm:$0xff] %vm2995_vm15, %v2912_v50 }
 0x311   :  { %3042 = vst.msk [vmem:[%s6399_s5 + $0x170] sm:$0xff] %vm2995_vm15, %v2907_v61 }
 0x31c   :  { %v3520_v47 = vpop.f32.mrb[46].mxu1 }
 0x31d   :  { %v2922_v36 = vadd.f32 %v3520_v47, %v5989_v54  ;;  %v2916_v38 = vpop.f32.mrb[47].mxu1 }
 0x31e   :  { %v2917_v42 = vadd.f32 %v5989_v54, %v2916_v38 }
 0x31f   :  { %3045 = vst.msk [vmem:[%s6399_s5 + $0x188] sm:$0xff] %vm2995_vm15, %v2922_v36 }
 0x320   :  { %3044 = vst.msk [vmem:[%s6399_s5 + $0x180] sm:$0xff] %vm2995_vm15, %v2917_v42 }
 0x32a   :  { %v3523_v34 = vpop.f32.mrb[48].mxu1 }
 0x32b   :  { %v2932_v11 = vadd.f32 %v3523_v34, %v5989_v54  ;;  %v2926_v19 = vpop.f32.mrb[49].mxu1 }
 0x32c   :  { %v2927_v49 = vadd.f32 %v5989_v54, %v2926_v19 }
 0x32d   :  { %3047 = vst.msk [vmem:[%s6399_s5 + $0x198] sm:$0xff] %vm2995_vm15, %v2932_v11 }
 0x32e   :  { %3046 = vst.msk [vmem:[%s6399_s5 + $0x190] sm:$0xff] %vm2995_vm15, %v2927_v49 }
 0x335   :  { %v3526_v37 = vpop.f32.mrb[50].mxu1 }
 0x336   :  { %v2942_v39 = vadd.f32 %v3526_v37, %v5989_v54  ;;  %v2936_v51 = vpop.f32.mrb[51].mxu1 }
 0x337   :  { %v2937_v35 = vadd.f32 %v5989_v54, %v2936_v51 }
 0x338   :  { %3049 = vst.msk [vmem:[%s6399_s5 + $0x1a8] sm:$0xff] %vm2995_vm15, %v2942_v39 }
 0x339   :  { %3048 = vst.msk [vmem:[%s6399_s5 + $0x1a0] sm:$0xff] %vm2995_vm15, %v2937_v35 }
 0x341   :  { %v3529_v43 = vpop.f32.mrb[52].mxu1 }
 0x342   :  { %v2952_v46 = vadd.f32 %v3529_v43, %v5989_v54  ;;  %v2946_v60 = vpop.f32.mrb[53].mxu1 }
 0x343   :  { %v2947_v20 = vadd.f32 %v5989_v54, %v2946_v60 }
 0x344   :  { %3051 = vst.msk [vmem:[%s6399_s5 + $0x1b8] sm:$0xff] %vm2995_vm15, %v2952_v46 }
 0x345   :  { %3050 = vst.msk [vmem:[%s6399_s5 + $0x1b0] sm:$0xff] %vm2995_vm15, %v2947_v20 }
 0x351   :  { %v3532_v33 = vpop.f32.mrb[54].mxu1 }
 0x352   :  { %v2962_v56 = vadd.f32 %v3532_v33, %v5989_v54  ;;  %v2956_v32 = vpop.f32.mrb[55].mxu1 }
 0x353   :  { %v2957_v62 = vadd.f32 %v5989_v54, %v2956_v32 }
 0x354   :  { %3053 = vst.msk [vmem:[%s6399_s5 + $0x1c8] sm:$0xff] %vm2995_vm15, %v2962_v56 }
 0x355   :  { %3052 = vst.msk [vmem:[%s6399_s5 + $0x1c0] sm:$0xff] %vm2995_vm15, %v2957_v62 }
 0x360   :  { %v3535_v24 = vpop.f32.mrb[56].mxu1 }
 0x361   :  { %v2972_v63 = vadd.f32 %v3535_v24, %v5989_v54  ;;  %v2966_v18 = vpop.f32.mrb[57].mxu1 }
 0x362   :  { %v2967_v45 = vadd.f32 %v5989_v54, %v2966_v18 }
 0x363   :  { %3055 = vst.msk [vmem:[%s6399_s5 + $0x1d8] sm:$0xff] %vm2995_vm15, %v2972_v63 }
 0x364   :  { %3054 = vst.msk [vmem:[%s6399_s5 + $0x1d0] sm:$0xff] %vm2995_vm15, %v2967_v45 }
 0x36b   :  { %v3538_v6 = vpop.f32.mrb[58].mxu1 }
 0x36c   :  { %v2982_v29 = vadd.f32 %v3538_v6, %v5989_v54  ;;  %v2976_v22 = vpop.f32.mrb[59].mxu1 }
 0x36d   :  { %v2977_v7 = vadd.f32 %v5989_v54, %v2976_v22 }
 0x36e   :  { %3057 = vst.msk [vmem:[%s6399_s5 + $0x1e8] sm:$0xff] %vm2995_vm15, %v2982_v29 }
 0x36f   :  { %3056 = vst.msk [vmem:[%s6399_s5 + $0x1e0] sm:$0xff] %vm2995_vm15, %v2977_v7 }
 0x379   :  { %v3541_v14 = vpop.f32.mrb[60].mxu1 }
 0x37a   :  { %v2992_v57 = vadd.f32 %v3541_v14, %v5989_v54  ;;  %v2986_v40 = vpop.f32.mrb[61].mxu1 }
 0x37b   :  { %v2987_v9 = vadd.f32 %v5989_v54, %v2986_v40 }
 0x37c   :  { %3059 = vst.msk [vmem:[%s6399_s5 + $0x1f8] sm:$0xff] %vm2995_vm15, %v2992_v57 }
 0x37d   :  { %3058 = vst.msk [vmem:[%s6399_s5 + $0x1f0] sm:$0xff] %vm2995_vm15, %v2987_v9 }

// kernel: model_forward.40
= control target key start
LH: loop header
LB: loop body
LE: loop exit
PB: predicated region body
PF: predicated region fallthrough
CT: control target
= control target key end

     0   :  { %v2063_v0 = vmov 0.0   ;;  %vm51_vm0 = vcmask 64512   ;;  %vm2064_vm1 = vmmov 0   ;;  %vm1828_vm2 = vcmask 58368   ;;  %s2439_s2 = inlined_call_operand.vmem [shape: f32[8,8,8], index: 2, kind: input, shape index: {}]   ;;  %s2440_s0 = inlined_call_operand.vmem [shape: f32[8,2,8], index: 0, kind: input, shape index: {}]   ;;  %s2441_s3 = inlined_call_operand.vmem [shape: f32[8,8,8], index: 3, kind: input, shape index: {}]   ;;  %s2442_s1 = inlined_call_operand.vmem [shape: f32[8,2,8], index: 1, kind: input, shape index: {}]   ;;  %s2443_s4 = inlined_call_operand.vmem [shape: f32[8,2,8], index: 4, kind: output, shape index: {0}]   ;;  %s2444_s5 = inlined_call_operand.vmem [shape: f32[8,2,8], index: 5, kind: output, shape index: {1}]  }
   0x1   :  { %1941 = vmatprep.subr.mxu0 %v2063_v0  ;;  %1946 = vmatprep.subr.mxu1 %v2063_v0  ;;  %v2100_v1 = vld [vmem:[%s2439_s2] sm:$0xff]  ;;  %v2105_v2 = vld [vmem:[%s2439_s2 + $0x8] sm:$0xff]  ;;  %v2126_v5 = vld [vmem:[%s2439_s2 + $0x10] sm:$0xff] }
   0x2   :  { %1942 = vmatpush3.msra.mxu0 %v2100_v1  ;;  %1943 = vmatprep.mubr.msk.f32.mxu0 %vm2064_vm1, %v2063_v0  ;;  %v2113_v3 = vld [vmem:[%s2440_s0] sm:$0x3]  ;;  %v2121_v4 = vld [vmem:[%s2440_s0 + $0x2] sm:$0x3]  ;;  %v2135_v6 = vld [vmem:[%s2439_s2 + $0x18] sm:$0xff] }
   0x3   :  { %1947 = vmatpush3.msra.mxu1 %v2105_v2  ;;  %1948 = vmatprep.mubr.msk.f32.mxu1 %vm2064_vm1, %v2063_v0  ;;  %v2142_v7 = vld [vmem:[%s2440_s0 + $0x4] sm:$0x3]  ;;  %v2147_v8 = vld [vmem:[%s2440_s0 + $0x6] sm:$0x3]  ;;  %v2163_v10 = vld [vmem:[%s2439_s2 + $0x28] sm:$0xff] }
   0x4   :  { %1944 = vmatmul.mubr.msk.f32.vlgmr.msra.gmra.mrb[0].mxu0 %vm51_vm0, %v2113_v3  ;;  %1949 = vmatmul.mubr.msk.f32.vlgmr.msra.gmra.mrb[0].mxu1 %vm51_vm0, %v2121_v4  ;;  %v2158_v9 = vld [vmem:[%s2439_s2 + $0x20] sm:$0xff]  ;;  %v2174_v11 = vld [vmem:[%s2440_s0 + $0x8] sm:$0x3]  ;;  %v2179_v12 = vld [vmem:[%s2440_s0 + $0xa] sm:$0x3] }
   0x5   :  { %1951 = vmatprep.subr.mxu0 %v2063_v0  ;;  %1956 = vmatprep.subr.mxu1 %v2063_v0  ;;  %v2190_v13 = vld [vmem:[%s2439_s2 + $0x30] sm:$0xff]  ;;  %v2195_v14 = vld [vmem:[%s2439_s2 + $0x38] sm:$0xff]  ;;  %v2206_v15 = vld [vmem:[%s2440_s0 + $0xc] sm:$0x3] }
   0x6   :  { %1952 = vmatpush3.msra.mxu0 %v2126_v5  ;;  %1957 = vmatpush3.msra.mxu1 %v2135_v6  ;;  %v2211_v16 = vld [vmem:[%s2440_s0 + $0xe] sm:$0x3]  ;;  %v43_v17 = vld [vmem:[%s2441_s3] sm:$0xff]  ;;  %v45_v21 = vld [vmem:[%s2441_s3 + $0x10] sm:$0xff] }
   0x7   :  { %1953 = vmatprep.mubr.msk.f32.mxu0 %vm2064_vm1, %v2063_v0  ;;  %1958 = vmatprep.mubr.msk.f32.mxu1 %vm2064_vm1, %v2063_v0  ;;  %v44_v18 = vld [vmem:[%s2441_s3 + $0x8] sm:$0xff]  ;;  %v27_v19 = vld [vmem:[%s2442_s1] sm:$0x3]  ;;  %v28_v20 = vld [vmem:[%s2442_s1 + $0x2] sm:$0x3]  ;;  %v1228_v33 = vadd.f32 %v43_v17, %v2100_v1  ;;  %v1230_v37 = vadd.f32 %v45_v21, %v2126_v5 }
   0x8   :  { %1954 = vmatmul.mubr.msk.f32.vlgmr.msra.gmra.mrb[2].mxu0 %vm51_vm0, %v2142_v7  ;;  %1959 = vmatmul.mubr.msk.f32.vlgmr.msra.gmra.mrb[2].mxu1 %vm51_vm0, %v2147_v8  ;;  %v46_v22 = vld [vmem:[%s2441_s3 + $0x18] sm:$0xff]  ;;  %v29_v23 = vld [vmem:[%s2442_s1 + $0x4] sm:$0x3]  ;;  %v30_v24 = vld [vmem:[%s2442_s1 + $0x6] sm:$0x3]  ;;  %v1229_v34 = vadd.f32 %v44_v18, %v2105_v2  ;;  %v1220_v35 = vadd.f32 %v27_v19, %v2113_v3  ;;  %v1221_v36 = vadd.f32 %v28_v20, %v2121_v4 }
   0x9   :  { %1961 = vmatprep.subr.mxu0 %v2063_v0  ;;  %1966 = vmatprep.subr.mxu1 %v2063_v0  ;;  %v47_v25 = vld [vmem:[%s2441_s3 + $0x20] sm:$0xff]  ;;  %v48_v26 = vld [vmem:[%s2441_s3 + $0x28] sm:$0xff]  ;;  %v49_v29 = vld [vmem:[%s2441_s3 + $0x30] sm:$0xff]  ;;  %v1231_v38 = vadd.f32 %v46_v22, %v2135_v6  ;;  %v1222_v39 = vadd.f32 %v29_v23, %v2142_v7  ;;  %v1223_v40 = vadd.f32 %v30_v24, %v2147_v8 }
   0xa   :  { %1962 = vmatpush3.msra.mxu0 %v2158_v9  ;;  %1967 = vmatpush3.msra.mxu1 %v2163_v10  ;;  %v31_v27 = vld [vmem:[%s2442_s1 + $0x8] sm:$0x3]  ;;  %v32_v28 = vld [vmem:[%s2442_s1 + $0xa] sm:$0x3]  ;;  %v50_v30 = vld [vmem:[%s2441_s3 + $0x38] sm:$0xff]  ;;  %v1232_v41 = vadd.f32 %v47_v25, %v2158_v9  ;;  %v1233_v42 = vadd.f32 %v48_v26, %v2163_v10  ;;  %v1234_v45 = vadd.f32 %v49_v29, %v2190_v13 }
   0xb   :  { %1963 = vmatprep.mubr.msk.f32.mxu0 %vm2064_vm1, %v2063_v0  ;;  %1968 = vmatprep.mubr.msk.f32.mxu1 %vm2064_vm1, %v2063_v0  ;;  %v33_v31 = vld [vmem:[%s2442_s1 + $0xc] sm:$0x3]  ;;  %v34_v32 = vld [vmem:[%s2442_s1 + $0xe] sm:$0x3]  ;;  %v1224_v43 = vadd.f32 %v31_v27, %v2174_v11  ;;  %v1225_v44 = vadd.f32 %v32_v28, %v2179_v12  ;;  %v1235_v46 = vadd.f32 %v50_v30, %v2195_v14 }
   0xc   :  { %1964 = vmatmul.mubr.msk.f32.vlgmr.msra.gmra.mrb[4].mxu0 %vm51_vm0, %v2174_v11  ;;  %1969 = vmatmul.mubr.msk.f32.vlgmr.msra.gmra.mrb[4].mxu1 %vm51_vm0, %v2179_v12  ;;  %v1226_v47 = vadd.f32 %v33_v31, %v2206_v15  ;;  %v1227_v48 = vadd.f32 %v34_v32, %v2211_v16 }
   0xd   :  { %1971 = vmatprep.subr.mxu0 %v2063_v0  ;;  %1976 = vmatprep.subr.mxu1 %v2063_v0 }
   0xe   :  { %1972 = vmatpush3.msra.mxu0 %v2190_v13  ;;  %1977 = vmatpush3.msra.mxu1 %v2195_v14 }
   0xf   :  { %1973 = vmatprep.mubr.msk.f32.mxu0 %vm2064_vm1, %v2063_v0  ;;  %1978 = vmatprep.mubr.msk.f32.mxu1 %vm2064_vm1, %v2063_v0 }
  0x10   :  { %1974 = vmatmul.mubr.msk.f32.vlgmr.msra.gmra.mrb[6].mxu0 %vm51_vm0, %v2206_v15  ;;  %1979 = vmatmul.mubr.msk.f32.vlgmr.msra.gmra.mrb[6].mxu1 %vm51_vm0, %v2211_v16 }
  0x11   :  { %1981 = vmatprep.subr.mxu0 %v2063_v0  ;;  %1986 = vmatprep.subr.mxu1 %v2063_v0 }
  0x12   :  { %1982 = vmatpush3.msra.mxu0 %v43_v17  ;;  %1987 = vmatpush3.msra.mxu1 %v44_v18 }
  0x13   :  { %1983 = vmatprep.mubr.msk.f32.mxu0 %vm2064_vm1, %v2063_v0  ;;  %1988 = vmatprep.mubr.msk.f32.mxu1 %vm2064_vm1, %v2063_v0 }
  0x14   :  { %1984 = vmatmul.mubr.msk.f32.vlgmr.msra.gmra.mrb[8].mxu0 %vm51_vm0, %v27_v19  ;;  %1989 = vmatmul.mubr.msk.f32.vlgmr.msra.gmra.mrb[8].mxu1 %vm51_vm0, %v28_v20 }
  0x15   :  { %1991 = vmatprep.subr.mxu0 %v2063_v0  ;;  %1996 = vmatprep.subr.mxu1 %v2063_v0 }
  0x16   :  { %1992 = vmatpush3.msra.mxu0 %v45_v21  ;;  %1997 = vmatpush3.msra.mxu1 %v46_v22 }
  0x17   :  { %1993 = vmatprep.mubr.msk.f32.mxu0 %vm2064_vm1, %v2063_v0  ;;  %1998 = vmatprep.mubr.msk.f32.mxu1 %vm2064_vm1, %v2063_v0 }
  0x18   :  { %1994 = vmatmul.mubr.msk.f32.vlgmr.msra.gmra.mrb[10].mxu0 %vm51_vm0, %v29_v23  ;;  %1999 = vmatmul.mubr.msk.f32.vlgmr.msra.gmra.mrb[10].mxu1 %vm51_vm0, %v30_v24 }
  0x19   :  { %2001 = vmatprep.subr.mxu0 %v2063_v0  ;;  %2006 = vmatprep.subr.mxu1 %v2063_v0 }
  0x1a   :  { %2002 = vmatpush3.msra.mxu0 %v47_v25  ;;  %2007 = vmatpush3.msra.mxu1 %v48_v26 }
  0x1b   :  { %2003 = vmatprep.mubr.msk.f32.mxu0 %vm2064_vm1, %v2063_v0  ;;  %2008 = vmatprep.mubr.msk.f32.mxu1 %vm2064_vm1, %v2063_v0 }
  0x1c   :  { %2004 = vmatmul.mubr.msk.f32.vlgmr.msra.gmra.mrb[12].mxu0 %vm51_vm0, %v31_v27  ;;  %2009 = vmatmul.mubr.msk.f32.vlgmr.msra.gmra.mrb[12].mxu1 %vm51_vm0, %v32_v28 }
  0x1d   :  { %2011 = vmatprep.subr.mxu0 %v2063_v0  ;;  %2016 = vmatprep.subr.mxu1 %v2063_v0 }
  0x1e   :  { %2012 = vmatpush3.msra.mxu0 %v49_v29  ;;  %2017 = vmatpush3.msra.mxu1 %v50_v30 }
  0x1f   :  { %2013 = vmatprep.mubr.msk.f32.mxu0 %vm2064_vm1, %v2063_v0  ;;  %2018 = vmatprep.mubr.msk.f32.mxu1 %vm2064_vm1, %v2063_v0 }
  0x20   :  { %2014 = vmatmul.mubr.msk.f32.vlgmr.msra.gmra.mrb[14].mxu0 %vm51_vm0, %v33_v31  ;;  %2019 = vmatmul.mubr.msk.f32.vlgmr.msra.gmra.mrb[14].mxu1 %vm51_vm0, %v34_v32 }
  0x21   :  { %2021 = vmatprep.subr.mxu0 %v2063_v0  ;;  %2026 = vmatprep.subr.mxu1 %v2063_v0 }
  0x22   :  { %2022 = vmatpush3.msra.mxu0 %v1228_v33  ;;  %2027 = vmatpush3.msra.mxu1 %v1229_v34 }
  0x23   :  { %2023 = vmatprep.mubr.msk.f32.mxu0 %vm2064_vm1, %v2063_v0  ;;  %2028 = vmatprep.mubr.msk.f32.mxu1 %vm2064_vm1, %v2063_v0 }
  0x24   :  { %2024 = vmatmul.mubr.msk.f32.vlgmr.msra.gmra.mrb[16].mxu0 %vm51_vm0, %v1220_v35  ;;  %2029 = vmatmul.mubr.msk.f32.vlgmr.msra.gmra.mrb[16].mxu1 %vm51_vm0, %v1221_v36 }
  0x25   :  { %2031 = vmatprep.subr.mxu0 %v2063_v0  ;;  %2036 = vmatprep.subr.mxu1 %v2063_v0 }
  0x26   :  { %2032 = vmatpush3.msra.mxu0 %v1230_v37  ;;  %2037 = vmatpush3.msra.mxu1 %v1231_v38 }
  0x27   :  { %2033 = vmatprep.mubr.msk.f32.mxu0 %vm2064_vm1, %v2063_v0  ;;  %2038 = vmatprep.mubr.msk.f32.mxu1 %vm2064_vm1, %v2063_v0 }
  0x28   :  { %2034 = vmatmul.mubr.msk.f32.vlgmr.msra.gmra.mrb[18].mxu0 %vm51_vm0, %v1222_v39  ;;  %2039 = vmatmul.mubr.msk.f32.vlgmr.msra.gmra.mrb[18].mxu1 %vm51_vm0, %v1223_v40 }
  0x29   :  { %2041 = vmatprep.subr.mxu0 %v2063_v0  ;;  %2046 = vmatprep.subr.mxu1 %v2063_v0 }
  0x2a   :  { %2042 = vmatpush3.msra.mxu0 %v1232_v41  ;;  %2047 = vmatpush3.msra.mxu1 %v1233_v42 }
  0x2b   :  { %2043 = vmatprep.mubr.msk.f32.mxu0 %vm2064_vm1, %v2063_v0  ;;  %2048 = vmatprep.mubr.msk.f32.mxu1 %vm2064_vm1, %v2063_v0 }
  0x2c   :  { %2044 = vmatmul.mubr.msk.f32.vlgmr.msra.gmra.mrb[20].mxu0 %vm51_vm0, %v1224_v43  ;;  %2049 = vmatmul.mubr.msk.f32.vlgmr.msra.gmra.mrb[20].mxu1 %vm51_vm0, %v1225_v44 }
  0x2d   :  { %2051 = vmatprep.subr.mxu0 %v2063_v0  ;;  %2056 = vmatprep.subr.mxu1 %v2063_v0 }
  0x2e   :  { %2052 = vmatpush3.msra.mxu0 %v1234_v45  ;;  %2057 = vmatpush3.msra.mxu1 %v1235_v46 }
  0x2f   :  { %2053 = vmatprep.mubr.msk.f32.mxu0 %vm2064_vm1, %v2063_v0  ;;  %2058 = vmatprep.mubr.msk.f32.mxu1 %vm2064_vm1, %v2063_v0 }
  0x30   :  { %2054 = vmatmul.mubr.msk.f32.vlgmr.msra.gmra.mrb[22].mxu0 %vm51_vm0, %v1226_v47  ;;  %2059 = vmatmul.mubr.msk.f32.vlgmr.msra.gmra.mrb[22].mxu1 %vm51_vm0, %v1227_v48 }
  0xd7   :  { %v121_v49 = vpop.f32.mrb[0].mxu0  ;;  %v194_v50 = vpop.f32.mrb[0].mxu1 }
  0xd8   :  { %v1945_v51 = vpop.f32.mrb[1].mxu0  ;;  %v1950_v52 = vpop.f32.mrb[1].mxu1 }
  0xdb   :  { %v2351_v53 = vpop.f32.mrb[2].mxu0  ;;  %v2353_v54 = vpop.f32.mrb[2].mxu1 }
  0xdc   :  { %v1955_v55 = vpop.f32.mrb[3].mxu0  ;;  %v1960_v56 = vpop.f32.mrb[3].mxu1 }
  0xdf   :  { %v2355_v57 = vpop.f32.mrb[4].mxu0  ;;  %v2357_v58 = vpop.f32.mrb[4].mxu1 }
  0xe0   :  { %v1965_v59 = vpop.f32.mrb[5].mxu0  ;;  %v1970_v60 = vpop.f32.mrb[5].mxu1 }
  0xe3   :  { %v2359_v61 = vpop.f32.mrb[6].mxu0  ;;  %v2361_v62 = vpop.f32.mrb[6].mxu1 }
  0xe4   :  { %v1975_v63 = vpop.f32.mrb[7].mxu0  ;;  %v1980_v0 = vpop.f32.mrb[7].mxu1 }
  0xe7   :  { %v705_v1 = vpop.f32.mrb[8].mxu0  ;;  %v778_v2 = vpop.f32.mrb[8].mxu1 }
  0xe8   :  { %v1820_v3 = vsub.f32 %v121_v49, %v705_v1  ;;  %v1821_v4 = vsub.f32 %v194_v50, %v778_v2  ;;  %v1985_v5 = vpop.f32.mrb[9].mxu0  ;;  %v1990_v6 = vpop.f32.mrb[9].mxu1 }
  0xea   :  { %1829 = vst.msk [vmem:[%s2443_s4] sm:$0x3] %vm1828_vm2, %v1820_v3  ;;  %1830 = vst.msk [vmem:[%s2443_s4 + $0x2] sm:$0x3] %vm1828_vm2, %v1821_v4 }
  0xeb   :  { %v851_v7 = vpop.f32.mrb[10].mxu0  ;;  %v924_v8 = vpop.f32.mrb[10].mxu1 }
  0xec   :  { %v1822_v9 = vsub.f32 %v2351_v53, %v851_v7  ;;  %v1823_v10 = vsub.f32 %v2353_v54, %v924_v8  ;;  %v1995_v11 = vpop.f32.mrb[11].mxu0  ;;  %v2000_v12 = vpop.f32.mrb[11].mxu1 }
  0xee   :  { %1831 = vst.msk [vmem:[%s2443_s4 + $0x4] sm:$0x3] %vm1828_vm2, %v1822_v9  ;;  %1832 = vst.msk [vmem:[%s2443_s4 + $0x6] sm:$0x3] %vm1828_vm2, %v1823_v10 }
  0xef   :  { %v997_v13 = vpop.f32.mrb[12].mxu0  ;;  %v1070_v14 = vpop.f32.mrb[12].mxu1 }
  0xf0   :  { %v1824_v15 = vsub.f32 %v2355_v57, %v997_v13  ;;  %v1825_v16 = vsub.f32 %v2357_v58, %v1070_v14  ;;  %v2005_v17 = vpop.f32.mrb[13].mxu0  ;;  %v2010_v18 = vpop.f32.mrb[13].mxu1 }
  0xf2   :  { %1833 = vst.msk [vmem:[%s2443_s4 + $0x8] sm:$0x3] %vm1828_vm2, %v1824_v15  ;;  %1834 = vst.msk [vmem:[%s2443_s4 + $0xa] sm:$0x3] %vm1828_vm2, %v1825_v16 }
  0xf3   :  { %v1143_v19 = vpop.f32.mrb[14].mxu0  ;;  %v1216_v20 = vpop.f32.mrb[14].mxu1 }
  0xf4   :  { %v1826_v21 = vsub.f32 %v2359_v61, %v1143_v19  ;;  %v1827_v22 = vsub.f32 %v2361_v62, %v1216_v20  ;;  %v2015_v23 = vpop.f32.mrb[15].mxu0  ;;  %v2020_v24 = vpop.f32.mrb[15].mxu1 }
  0xf6   :  { %1835 = vst.msk [vmem:[%s2443_s4 + $0xc] sm:$0x3] %vm1828_vm2, %v1826_v21  ;;  %1836 = vst.msk [vmem:[%s2443_s4 + $0xe] sm:$0x3] %vm1828_vm2, %v1827_v22 }
  0xf7   :  { %v1305_v25 = vpop.f32.mrb[16].mxu0  ;;  %v1378_v26 = vpop.f32.mrb[16].mxu1 }
  0xf8   :  { %v1837_v27 = vsub.f32 %v1305_v25, %v121_v49  ;;  %v1838_v28 = vsub.f32 %v1378_v26, %v194_v50  ;;  %v2025_v29 = vpop.f32.mrb[17].mxu0  ;;  %v2030_v30 = vpop.f32.mrb[17].mxu1 }
  0xfa   :  { %v1845_v31 = vsub.f32 %v1837_v27, %v705_v1  ;;  %v1846_v32 = vsub.f32 %v1838_v28, %v778_v2 }
  0xfb   :  { %v1451_v33 = vpop.f32.mrb[18].mxu0  ;;  %v1524_v34 = vpop.f32.mrb[18].mxu1 }
  0xfc   :  { %1853 = vst.msk [vmem:[%s2444_s5] sm:$0x3] %vm1828_vm2, %v1845_v31  ;;  %1854 = vst.msk [vmem:[%s2444_s5 + $0x2] sm:$0x3] %vm1828_vm2, %v1846_v32  ;;  %v1839_v35 = vsub.f32 %v1451_v33, %v2351_v53  ;;  %v1840_v36 = vsub.f32 %v1524_v34, %v2353_v54  ;;  %v2035_v37 = vpop.f32.mrb[19].mxu0  ;;  %v2040_v38 = vpop.f32.mrb[19].mxu1 }
  0xfe   :  { %v1847_v39 = vsub.f32 %v1839_v35, %v851_v7  ;;  %v1848_v40 = vsub.f32 %v1840_v36, %v924_v8 }
  0xff   :  { %v1597_v41 = vpop.f32.mrb[20].mxu0  ;;  %v1670_v42 = vpop.f32.mrb[20].mxu1 }
 0x100   :  { %1855 = vst.msk [vmem:[%s2444_s5 + $0x4] sm:$0x3] %vm1828_vm2, %v1847_v39  ;;  %1856 = vst.msk [vmem:[%s2444_s5 + $0x6] sm:$0x3] %vm1828_vm2, %v1848_v40  ;;  %v1841_v43 = vsub.f32 %v1597_v41, %v2355_v57  ;;  %v1842_v44 = vsub.f32 %v1670_v42, %v2357_v58  ;;  %v2045_v45 = vpop.f32.mrb[21].mxu0  ;;  %v2050_v46 = vpop.f32.mrb[21].mxu1 }
 0x102   :  { %v1849_v47 = vsub.f32 %v1841_v43, %v997_v13  ;;  %v1850_v48 = vsub.f32 %v1842_v44, %v1070_v14 }
 0x103   :  { %v1743_v49 = vpop.f32.mrb[22].mxu0  ;;  %v1816_v50 = vpop.f32.mrb[22].mxu1 }
 0x104   :  { %1857 = vst.msk [vmem:[%s2444_s5 + $0x8] sm:$0x3] %vm1828_vm2, %v1849_v47  ;;  %1858 = vst.msk [vmem:[%s2444_s5 + $0xa] sm:$0x3] %vm1828_vm2, %v1850_v48  ;;  %v1843_v51 = vsub.f32 %v1743_v49, %v2359_v61  ;;  %v1844_v52 = vsub.f32 %v1816_v50, %v2361_v62  ;;  %v2055_v53 = vpop.f32.mrb[23].mxu0  ;;  %v2060_v54 = vpop.f32.mrb[23].mxu1 }
 0x106   :  { %v1851_v55 = vsub.f32 %v1843_v51, %v1143_v19  ;;  %v1852_v56 = vsub.f32 %v1844_v52, %v1216_v20 }
 0x108   :  { %1859 = vst.msk [vmem:[%s2444_s5 + $0xc] sm:$0x3] %vm1828_vm2, %v1851_v55  ;;  %1860 = vst.msk [vmem:[%s2444_s5 + $0xe] sm:$0x3] %vm1828_vm2, %v1852_v56 }

// kernel: reverse.6
= control target key start
LH: loop header
LB: loop body
LE: loop exit
PB: predicated region body
PF: predicated region fallthrough
CT: control target
= control target key end

     0   :  { %s80_s0 = inlined_call_operand.vmem [shape: f32[2,8,8,3], index: 0, kind: input, shape index: {}]   ;;  %s81_s1 = inlined_call_operand.vmem [shape: f32[2,8,8,3], index: 1, kind: output, shape index: {}]  }
   0x1   :  { %v24_v0 = vld [vmem:[%s80_s0 + $0x10] sm:$0xff]  ;;  %v25_v1 = vld [vmem:[%s80_s0 + $0x28] sm:$0xff]  ;;  %v29_v3 = vld [vmem:[%s80_s0 + $0x20] sm:$0xff] }
   0x2   :  { %v27_v2 = vld [vmem:[%s80_s0 + $0x8] sm:$0xff]  ;;  %4 = vst [vmem:[%s81_s1] sm:$0xff] %v24_v0  ;;  %26 = vst [vmem:[%s81_s1 + $0x18] sm:$0xff] %v25_v1  ;;  %v17_v4 = vld [vmem:[%s80_s0] sm:$0xff] }
   0x3   :  { %28 = vst [vmem:[%s81_s1 + $0x8] sm:$0xff] %v27_v2  ;;  %v32_v5 = vld [vmem:[%s80_s0 + $0x18] sm:$0xff]  ;;  %30 = vst [vmem:[%s81_s1 + $0x20] sm:$0xff] %v29_v3 }
   0x4   :  { %31 = vst [vmem:[%s81_s1 + $0x10] sm:$0xff] %v17_v4  ;;  %33 = vst [vmem:[%s81_s1 + $0x28] sm:$0xff] %v32_v5 }

// kernel: model_forward.30
= control target key start
LH: loop header
LB: loop body
LE: loop exit
PB: predicated region body
PF: predicated region fallthrough
CT: control target
= control target key end

     0   :  { %vm27_vm0 = vcmask 130048   ;;  %vm125_vm1 = vcmask 64512   ;;  %s214_s1 = inlined_call_operand.vmem [shape: f32[16,8], index: 1, kind: input, shape index: {}]   ;;  %s215_s0 = inlined_call_operand.vmem [shape: f32[32,16], index: 0, kind: input, shape index: {}]   ;;  %s216_s2 = inlined_call_operand.vmem [shape: f32[1,8], index: 2, kind: input, shape index: {}]   ;;  %s217_s3 = inlined_call_operand.vmem [shape: f32[32,8], index: 3, kind: output, shape index: {}]  }
   0x1   :  { %v18_v0 = vld [vmem:[%s214_s1] sm:$0xff]  ;;  %v19_v1 = vld [vmem:[%s214_s1 + $0x8] sm:$0xff]  ;;  %v16_v4 = vld [vmem:[%s215_s0 + $0x10] sm:$0xff] }
   0x2   :  { %v14_v2 = vld [vmem:[%s215_s0] sm:$0xff]  ;;  %v155_v3 = vpack.c.bf16 %v19_v1, %v18_v0  ;;  %152 = vmatprep.mubr.msk.f32.mxu1 %vm27_vm0, %v16_v4  ;;  %v15_v5 = vld [vmem:[%s215_s0 + $0x8] sm:$0xff]  ;;  %v17_v6 = vld [vmem:[%s215_s0 + $0x18] sm:$0xff] }
   0x3   :  { %149 = vmatprep.mubr.msk.f32.mxu0 %vm27_vm0, %v14_v2  ;;  %v134_v7 = vld [vmem:[%s216_s2] ss:$0 sm:$0xff] }
   0x4   :  { %156 = vmatprep.subr.bf16.mxu0 %v155_v3  ;;  %159 = vmatprep.subr.bf16.mxu1 %v155_v3 }
   0x5   :  { %158 = vmatpush3.bf16.msra.mxu0 %v155_v3  ;;  %160 = vmatpush3.bf16.msra.mxu1 %v155_v3 }
   0x8   :  { %150 = vmatmul.mubr.msk.f32.vlgmr.msra.gmra.mrb[0].mxu0 %vm27_vm0, %v15_v5  ;;  %153 = vmatmul.mubr.msk.f32.vlgmr.msra.gmra.mrb[0].mxu1 %vm27_vm0, %v17_v6 }
  0xdb   :  { %v151_v8 = vpop.f32.mrb[0].mxu0  ;;  %v154_v9 = vpop.f32.mrb[0].mxu1 }
  0xdc   :  { %v112_v10 = vadd.f32 %v151_v8, %v134_v7  ;;  %v122_v11 = vadd.f32 %v154_v9, %v134_v7  ;;  %v106_v12 = vpop.f32.mrb[1].mxu0  ;;  %v116_v13 = vpop.f32.mrb[1].mxu1 }
  0xdd   :  { %v107_v14 = vadd.f32 %v134_v7, %v106_v12  ;;  %v117_v15 = vadd.f32 %v134_v7, %v116_v13 }
  0xde   :  { %127 = vst.msk [vmem:[%s217_s3 + $0x8] sm:$0xff] %vm125_vm1, %v112_v10  ;;  %129 = vst.msk [vmem:[%s217_s3 + $0x18] sm:$0xff] %vm125_vm1, %v122_v11 }
  0xdf   :  { %126 = vst.msk [vmem:[%s217_s3] sm:$0xff] %vm125_vm1, %v107_v14  ;;  %128 = vst.msk [vmem:[%s217_s3 + $0x10] sm:$0xff] %vm125_vm1, %v117_v15 }

// kernel: model_forward.31
= control target key start
LH: loop header
LB: loop body
LE: loop exit
PB: predicated region body
PF: predicated region fallthrough
CT: control target
= control target key end

     0   :  { %v122_v0 = vmov 0.0|0.0   ;;  %vm123_vm0 = vmmov 0   ;;  %v124_v3 = vmov 0.0   ;;  %vm24_vm1 = vcmask 130048   ;;  %s160_s1 = inlined_call_operand.vmem [shape: f32[16,8], index: 1, kind: input, shape index: {}]   ;;  %s161_s0 = inlined_call_operand.vmem [shape: f32[8,16], index: 0, kind: input, shape index: {}]   ;;  %s162_s2 = inlined_call_operand.vmem [shape: f32[1,8], index: 2, kind: input, shape index: {}]   ;;  %s163_s3 = inlined_call_operand.vmem [shape: f32[8,8], index: 3, kind: output, shape index: {}]  }
   0x1   :  { %116 = vmatprep.subr.bf16.mxu0 %v122_v0  ;;  %v15_v1 = vld [vmem:[%s160_s1] sm:$0xff]  ;;  %v16_v2 = vld [vmem:[%s160_s1 + $0x8] sm:$0xff]  ;;  %113 = vmatprep.mubr.msk.f32.mxu0 %vm123_vm0, %v124_v3  ;;  %vm98_vm2 = vcmask 64512  }
   0x2   :  { %v117_v4 = vpack.c.bf16 %v16_v2, %v15_v1  ;;  %v14_v5 = vld [vmem:[%s161_s0] sm:$0xff] }
   0x3   :  { %v104_v6 = vld [vmem:[%s162_s2] ss:$0 sm:$0xff] }
   0x4   :  { %118 = vmatpush3.bf16.msra.mxu0 %v117_v4 }
   0x7   :  { %114 = vmatmul.mubr.msk.f32.vlgmr.msra.gmra.mrb[0].mxu0 %vm24_vm1, %v14_v5 }
  0xda   :  { %v94_v7 = vpop.f32.mrb[0].mxu0 }
  0xdb   :  { %v95_v8 = vadd.f32 %v104_v6, %v94_v7  ;;  %v115_v9 = vpop.f32.mrb[1].mxu0 }
  0xdd   :  { %99 = vst.msk [vmem:[%s163_s3] sm:$0xff] %vm98_vm2, %v95_v8 }

// kernel: model_forward.33
= control target key start
LH: loop header
LB: loop body
LE: loop exit
PB: predicated region body
PF: predicated region fallthrough
CT: control target
= control target key end

     0   :  { %vm27_vm0 = vcmask 1043456   ;;  %vm23_vm1 = vcmask 31744   ;;  %v119_v0 = vmov 0.0   ;;  %vm120_vm2 = vmmov 0   ;;  %s153_s1 = inlined_call_operand.vmem [shape: f32[4,4], index: 1, kind: input, shape index: {}]   ;;  %s154_s0 = inlined_call_operand.vmem [shape: f32[2,4], index: 0, kind: input, shape index: {}]   ;;  %s155_s2 = inlined_call_operand.vmem [shape: f32[1,4], index: 2, kind: input, shape index: {}]   ;;  %s156_s3 = inlined_call_operand.vmem [shape: f32[2,4], index: 3, kind: output, shape index: {}]  }
   0x1   :  { %112 = vmatprep.subr.mxu0 %v119_v0  ;;  %v15_v1 = vld [vmem:[%s153_s1] sm:$0xf]  ;;  %114 = vmatprep.mubr.msk.f32.mxu0 %vm120_vm2, %v119_v0  ;;  %vm101_vm3 = vcmask 25600  }
   0x2   :  { %v14_v2 = vld [vmem:[%s154_s0] sm:$0x3]  ;;  %113 = vmatpush3.msk.msra.mxu0 %vm27_vm0, %v15_v1 }
   0x3   :  { %115 = vmatmul.mubr.msk.f32.vlgmr.msra.gmra.mrb[0].mxu0 %vm23_vm1, %v14_v2  ;;  %v107_v3 = vld [vmem:[%s155_s2] ss:$0 sm:$0xff] }
  0xd6   :  { %v97_v4 = vpop.f32.mrb[0].mxu0 }
  0xd7   :  { %v98_v5 = vadd.f32 %v107_v3, %v97_v4  ;;  %v116_v6 = vpop.f32.mrb[1].mxu0 }
  0xd9   :  { %102 = vst.msk [vmem:[%s156_s3] sm:$0x3] %vm101_vm3, %v98_v5 }

// kernel: model_forward.32
= control target key start
LH: loop header
LB: loop body
LE: loop exit
PB: predicated region body
PF: predicated region fallthrough
CT: control target
= control target key end

     0   :  { %v122_v0 = vmov 0.0|0.0   ;;  %vm123_vm0 = vmmov 0   ;;  %v124_v3 = vmov 0.0   ;;  %vm24_vm1 = vcmask 130048   ;;  %s160_s1 = inlined_call_operand.vmem [shape: f32[16,8], index: 1, kind: input, shape index: {}]   ;;  %s161_s0 = inlined_call_operand.vmem [shape: f32[2,16], index: 0, kind: input, shape index: {}]   ;;  %s162_s2 = inlined_call_operand.vmem [shape: f32[1,8], index: 2, kind: input, shape index: {}]   ;;  %s163_s3 = inlined_call_operand.vmem [shape: f32[2,8], index: 3, kind: output, shape index: {}]  }
   0x1   :  { %116 = vmatprep.subr.bf16.mxu0 %v122_v0  ;;  %v15_v1 = vld [vmem:[%s160_s1] sm:$0xff]  ;;  %v16_v2 = vld [vmem:[%s160_s1 + $0x8] sm:$0xff]  ;;  %113 = vmatprep.mubr.msk.f32.mxu0 %vm123_vm0, %v124_v3  ;;  %vm98_vm2 = vcmask 58368  }
   0x2   :  { %v117_v4 = vpack.c.bf16 %v16_v2, %v15_v1  ;;  %v14_v5 = vld [vmem:[%s161_s0] sm:$0x3] }
   0x3   :  { %v104_v6 = vld [vmem:[%s162_s2] ss:$0 sm:$0xff] }
   0x4   :  { %118 = vmatpush3.bf16.msra.mxu0 %v117_v4 }
   0x7   :  { %114 = vmatmul.mubr.msk.f32.vlgmr.msra.gmra.mrb[0].mxu0 %vm24_vm1, %v14_v5 }
  0xda   :  { %v94_v7 = vpop.f32.mrb[0].mxu0 }
  0xdb   :  { %v95_v8 = vadd.f32 %v104_v6, %v94_v7  ;;  %v115_v9 = vpop.f32.mrb[1].mxu0 }
  0xdd   :  { %99 = vst.msk [vmem:[%s163_s3] sm:$0x3] %vm98_vm2, %v95_v8 }

// kernel: model_forward.34
= control target key start
LH: loop header
LB: loop body
LE: loop exit
PB: predicated region body
PF: predicated region fallthrough
CT: control target
= control target key end

     0   :  { %v539_v0 = vmov 0.0   ;;  %vm27_vm0 = vcmask 64512   ;;  %vm540_vm1 = vmmov 0   ;;  %vm472_vm2 = vcmask 58368   ;;  %s623_s2 = inlined_call_operand.vmem [shape: f32[2,8,8], index: 2, kind: input, shape index: {}]   ;;  %s624_s3 = inlined_call_operand.vmem [shape: f32[2,8,8], index: 3, kind: input, shape index: {}]   ;;  %s625_s0 = inlined_call_operand.vmem [shape: f32[2,2,8], index: 0, kind: input, shape index: {}]   ;;  %s626_s1 = inlined_call_operand.vmem [shape: f32[2,2,8], index: 1, kind: input, shape index: {}]   ;;  %s627_s4 = inlined_call_operand.vmem [shape: f32[2,2,8], index: 4, kind: output, shape index: {0}]   ;;  %s628_s5 = inlined_call_operand.vmem [shape: f32[2,2,8], index: 5, kind: output, shape index: {1}]  }
   0x1   :  { %507 = vmatprep.subr.mxu0 %v539_v0  ;;  %512 = vmatprep.subr.mxu1 %v539_v0  ;;  %v23_v1 = vld [vmem:[%s623_s2] sm:$0xff]  ;;  %v24_v2 = vld [vmem:[%s623_s2 + $0x8] sm:$0xff] }
   0x2   :  { %508 = vmatpush3.msra.mxu0 %v23_v1  ;;  %509 = vmatprep.mubr.msk.f32.mxu0 %vm540_vm1, %v539_v0  ;;  %v19_v3 = vld [vmem:[%s625_s0] sm:$0x3]  ;;  %v26_v5 = vld [vmem:[%s624_s3 + $0x8] sm:$0xff]  ;;  %v20_v6 = vld [vmem:[%s625_s0 + $0x2] sm:$0x3] }
   0x3   :  { %v25_v4 = vld [vmem:[%s624_s3] sm:$0xff]  ;;  %513 = vmatpush3.msra.mxu1 %v24_v2  ;;  %514 = vmatprep.mubr.msk.f32.mxu1 %vm540_vm1, %v539_v0  ;;  %v323_v10 = vadd.f32 %v26_v5, %v24_v2 }
   0x4   :  { %510 = vmatmul.mubr.msk.f32.vlgmr.msra.gmra.mrb[0].mxu0 %vm27_vm0, %v19_v3  ;;  %515 = vmatmul.mubr.msk.f32.vlgmr.msra.gmra.mrb[0].mxu1 %vm27_vm0, %v20_v6  ;;  %v21_v7 = vld [vmem:[%s626_s1] sm:$0x3]  ;;  %v22_v8 = vld [vmem:[%s626_s1 + $0x2] sm:$0x3]  ;;  %v322_v9 = vadd.f32 %v25_v4, %v23_v1 }
   0x5   :  { %517 = vmatprep.subr.mxu0 %v539_v0  ;;  %522 = vmatprep.subr.mxu1 %v539_v0  ;;  %v320_v11 = vadd.f32 %v21_v7, %v19_v3  ;;  %v321_v12 = vadd.f32 %v22_v8, %v20_v6 }
   0x6   :  { %518 = vmatpush3.msra.mxu0 %v25_v4  ;;  %523 = vmatpush3.msra.mxu1 %v26_v5 }
   0x7   :  { %519 = vmatprep.mubr.msk.f32.mxu0 %vm540_vm1, %v539_v0  ;;  %524 = vmatprep.mubr.msk.f32.mxu1 %vm540_vm1, %v539_v0 }
   0x8   :  { %520 = vmatmul.mubr.msk.f32.vlgmr.msra.gmra.mrb[2].mxu0 %vm27_vm0, %v21_v7  ;;  %525 = vmatmul.mubr.msk.f32.vlgmr.msra.gmra.mrb[2].mxu1 %vm27_vm0, %v22_v8 }
   0x9   :  { %527 = vmatprep.subr.mxu0 %v539_v0  ;;  %532 = vmatprep.subr.mxu1 %v539_v0 }
   0xa   :  { %528 = vmatpush3.msra.mxu0 %v322_v9  ;;  %533 = vmatpush3.msra.mxu1 %v323_v10 }
   0xb   :  { %529 = vmatprep.mubr.msk.f32.mxu0 %vm540_vm1, %v539_v0  ;;  %534 = vmatprep.mubr.msk.f32.mxu1 %vm540_vm1, %v539_v0 }
   0xc   :  { %530 = vmatmul.mubr.msk.f32.vlgmr.msra.gmra.mrb[4].mxu0 %vm27_vm0, %v320_v11  ;;  %535 = vmatmul.mubr.msk.f32.vlgmr.msra.gmra.mrb[4].mxu1 %vm27_vm0, %v321_v12 }
  0xd7   :  { %v97_v13 = vpop.f32.mrb[0].mxu0  ;;  %v170_v14 = vpop.f32.mrb[0].mxu1 }
  0xd8   :  { %v511_v15 = vpop.f32.mrb[1].mxu0  ;;  %v516_v16 = vpop.f32.mrb[1].mxu1 }
  0xdb   :  { %v243_v17 = vpop.f32.mrb[2].mxu0  ;;  %v316_v18 = vpop.f32.mrb[2].mxu1 }
  0xdc   :  { %v470_v19 = vsub.f32 %v97_v13, %v243_v17  ;;  %v471_v20 = vsub.f32 %v170_v14, %v316_v18  ;;  %v521_v21 = vpop.f32.mrb[3].mxu0  ;;  %v526_v22 = vpop.f32.mrb[3].mxu1 }
  0xde   :  { %473 = vst.msk [vmem:[%s627_s4] sm:$0x3] %vm472_vm2, %v470_v19  ;;  %474 = vst.msk [vmem:[%s627_s4 + $0x2] sm:$0x3] %vm472_vm2, %v471_v20 }
  0xdf   :  { %v393_v23 = vpop.f32.mrb[4].mxu0  ;;  %v466_v24 = vpop.f32.mrb[4].mxu1 }
  0xe0   :  { %v475_v25 = vsub.f32 %v393_v23, %v97_v13  ;;  %v476_v26 = vsub.f32 %v466_v24, %v170_v14  ;;  %v531_v27 = vpop.f32.mrb[5].mxu0  ;;  %v536_v28 = vpop.f32.mrb[5].mxu1 }
  0xe2   :  { %v477_v29 = vsub.f32 %v475_v25, %v243_v17  ;;  %v478_v30 = vsub.f32 %v476_v26, %v316_v18 }
  0xe4   :  { %479 = vst.msk [vmem:[%s628_s5] sm:$0x3] %vm472_vm2, %v477_v29  ;;  %480 = vst.msk [vmem:[%s628_s5 + $0x2] sm:$0x3] %vm472_vm2, %v478_v30 }

// kernel: model_forward.35
= control target key start
LH: loop header
LB: loop body
LE: loop exit
PB: predicated region body
PF: predicated region fallthrough
CT: control target
= control target key end

     0   :  { %vm23_vm0 = vcmask 64512   ;;  %v114_v0 = vmov 0.0   ;;  %vm115_vm1 = vmmov 0   ;;  %vm97_vm2 = vcmask 123904   ;;  %s148_s1 = inlined_call_operand.vmem [shape: f32[8,16], index: 1, kind: input, shape index: {}]   ;;  %s149_s0 = inlined_call_operand.vmem [shape: f32[2,8], index: 0, kind: input, shape index: {}]   ;;  %s150_s2 = inlined_call_operand.vmem [shape: f32[1,16], index: 2, kind: input, shape index: {}]   ;;  %s151_s3 = inlined_call_operand.vmem [shape: f32[2,16], index: 3, kind: output, shape index: {}]  }
   0x1   :  { %107 = vmatprep.subr.mxu0 %v114_v0  ;;  %v15_v1 = vld [vmem:[%s148_s1] sm:$0xff]  ;;  %109 = vmatprep.mubr.msk.f32.mxu0 %vm115_vm1, %v114_v0 }
   0x2   :  { %v14_v2 = vld [vmem:[%s149_s0] sm:$0x3]  ;;  %108 = vmatpush3.msra.mxu0 %v15_v1 }
   0x3   :  { %110 = vmatmul.mubr.msk.f32.vlgmr.msra.gmra.mrb[0].mxu0 %vm23_vm0, %v14_v2  ;;  %v103_v3 = vld [vmem:[%s150_s2] ss:$0 sm:$0xff] }
  0xd6   :  { %v93_v4 = vpop.f32.mrb[0].mxu0 }
  0xd7   :  { %v94_v5 = vadd.f32 %v103_v3, %v93_v4  ;;  %v111_v6 = vpop.f32.mrb[1].mxu0 }
  0xd9   :  { %98 = vst.msk [vmem:[%s151_s3] sm:$0x3] %vm97_vm2, %v94_v5 }

// kernel: model_forward.37
= control target key start
LH: loop header
LB: loop body
LE: loop exit
PB: predicated region body
PF: predicated region fallthrough
CT: control target
= control target key end

     0   :  { %vm23_vm0 = vcmask 64512   ;;  %v114_v0 = vmov 0.0   ;;  %vm115_vm1 = vmmov 0   ;;  %vm97_vm2 = vcmask 130048   ;;  %s148_s1 = inlined_call_operand.vmem [shape: f32[8,16], index: 1, kind: input, shape index: {}]   ;;  %s149_s0 = inlined_call_operand.vmem [shape: f32[8,8], index: 0, kind: input, shape index: {}]   ;;  %s150_s2 = inlined_call_operand.vmem [shape: f32[1,16], index: 2, kind: input, shape index: {}]   ;;  %s151_s3 = inlined_call_operand.vmem [shape: f32[8,16], index: 3, kind: output, shape index: {}]  }
   0x1   :  { %107 = vmatprep.subr.mxu0 %v114_v0  ;;  %v15_v1 = vld [vmem:[%s148_s1] sm:$0xff]  ;;  %109 = vmatprep.mubr.msk.f32.mxu0 %vm115_vm1, %v114_v0 }
   0x2   :  { %v14_v2 = vld [vmem:[%s149_s0] sm:$0xff]  ;;  %108 = vmatpush3.msra.mxu0 %v15_v1 }
   0x3   :  { %110 = vmatmul.mubr.msk.f32.vlgmr.msra.gmra.mrb[0].mxu0 %vm23_vm0, %v14_v2  ;;  %v103_v3 = vld [vmem:[%s150_s2] ss:$0 sm:$0xff] }
  0xd6   :  { %v93_v4 = vpop.f32.mrb[0].mxu0 }
  0xd7   :  { %v94_v5 = vadd.f32 %v103_v3, %v93_v4  ;;  %v111_v6 = vpop.f32.mrb[1].mxu0 }
  0xd9   :  { %98 = vst.msk [vmem:[%s151_s3] sm:$0xff] %vm97_vm2, %v94_v5 }

// kernel: model_forward.39
= control target key start
LH: loop header
LB: loop body
LE: loop exit
PB: predicated region body
PF: predicated region fallthrough
CT: control target
= control target key end

     0   :  { %vm26_vm0 = vcmask 64512   ;;  %vm124_vm1 = vcmask 130048   ;;  %s203_s1 = inlined_call_operand.vmem [shape: f32[8,16], index: 1, kind: input, shape index: {}]   ;;  %s204_s0 = inlined_call_operand.vmem [shape: f32[32,8], index: 0, kind: input, shape index: {}]   ;;  %s205_s2 = inlined_call_operand.vmem [shape: f32[1,16], index: 2, kind: input, shape index: {}]   ;;  %s206_s3 = inlined_call_operand.vmem [shape: f32[32,16], index: 3, kind: output, shape index: {}]  }
   0x1   :  { %v18_v0 = vld [vmem:[%s203_s1] sm:$0xff]  ;;  %v16_v2 = vld [vmem:[%s204_s0 + $0x10] sm:$0xff]  ;;  %v15_v3 = vld [vmem:[%s204_s0 + $0x8] sm:$0xff] }
   0x2   :  { %v14_v1 = vld [vmem:[%s204_s0] sm:$0xff]  ;;  %143 = vmatprep.subr.mxu0 %v18_v0  ;;  %151 = vmatprep.subr.mxu1 %v18_v0  ;;  %v17_v4 = vld [vmem:[%s204_s0 + $0x18] sm:$0xff] }
   0x3   :  { %144 = vmatpush3.msra.mxu0 %v18_v0  ;;  %152 = vmatpush3.msra.mxu1 %v18_v0  ;;  %v133_v5 = vld [vmem:[%s205_s2] ss:$0 sm:$0xff] }
   0x4   :  { %145 = vmatprep.mubr.msk.f32.mxu0 %vm26_vm0, %v14_v1  ;;  %148 = vmatprep.mubr.msk.f32.mxu1 %vm26_vm0, %v16_v2 }
   0x5   :  { %146 = vmatmul.mubr.msk.f32.vlgmr.msra.gmra.mrb[0].mxu0 %vm26_vm0, %v15_v3  ;;  %149 = vmatmul.mubr.msk.f32.vlgmr.msra.gmra.mrb[0].mxu1 %vm26_vm0, %v17_v4 }
  0xd8   :  { %v147_v6 = vpop.f32.mrb[0].mxu0  ;;  %v150_v7 = vpop.f32.mrb[0].mxu1 }
  0xd9   :  { %v111_v8 = vadd.f32 %v147_v6, %v133_v5  ;;  %v121_v9 = vadd.f32 %v150_v7, %v133_v5  ;;  %v105_v10 = vpop.f32.mrb[1].mxu0  ;;  %v115_v11 = vpop.f32.mrb[1].mxu1 }
  0xda   :  { %v106_v12 = vadd.f32 %v133_v5, %v105_v10  ;;  %v116_v13 = vadd.f32 %v133_v5, %v115_v11 }
  0xdb   :  { %126 = vst.msk [vmem:[%s206_s3 + $0x8] sm:$0xff] %vm124_vm1, %v111_v8  ;;  %128 = vst.msk [vmem:[%s206_s3 + $0x18] sm:$0xff] %vm124_vm1, %v121_v9 }
  0xdc   :  { %125 = vst.msk [vmem:[%s206_s3] sm:$0xff] %vm124_vm1, %v106_v12  ;;  %127 = vst.msk [vmem:[%s206_s3 + $0x10] sm:$0xff] %vm124_vm1, %v116_v13 }

// kernel: model_forward.41
= control target key start
LH: loop header
LB: loop body
LE: loop exit
PB: predicated region body
PF: predicated region fallthrough
CT: control target
= control target key end

     0   :  { %vm38_vm0 = vcmask 64512   ;;  %vm232_vm1 = vcmask 130048   ;;  %s469_s1 = inlined_call_operand.vmem [shape: f32[8,16], index: 1, kind: input, shape index: {}]   ;;  %s470_s0 = inlined_call_operand.vmem [shape: f32[128,8], index: 0, kind: input, shape index: {}]   ;;  %s471_s2 = inlined_call_operand.vmem [shape: f32[1,16], index: 2, kind: input, shape index: {}]   ;;  %s472_s3 = inlined_call_operand.vmem [shape: f32[128,16], index: 3, kind: output, shape index: {}]  }
   0x1   :  { %v30_v0 = vld [vmem:[%s469_s1] sm:$0xff]  ;;  %v15_v3 = vld [vmem:[%s470_s0 + $0x8] sm:$0xff]  ;;  %v16_v5 = vld [vmem:[%s470_s0 + $0x10] sm:$0xff] }
   0x2   :  { %v14_v1 = vld [vmem:[%s470_s0] sm:$0xff]  ;;  %287 = vmatprep.subr.mxu0 %v30_v0  ;;  %313 = vmatprep.subr.mxu1 %v30_v0  ;;  %v23_v4 = vld [vmem:[%s470_s0 + $0x48] sm:$0xff]  ;;  %v24_v6 = vld [vmem:[%s470_s0 + $0x50] sm:$0xff] }
   0x3   :  { %v22_v2 = vld [vmem:[%s470_s0 + $0x40] sm:$0xff]  ;;  %288 = vmatpush3.msra.mxu0 %v30_v0  ;;  %314 = vmatpush3.msra.mxu1 %v30_v0  ;;  %v17_v7 = vld [vmem:[%s470_s0 + $0x18] sm:$0xff]  ;;  %v19_v11 = vld [vmem:[%s470_s0 + $0x28] sm:$0xff] }
   0x4   :  { %289 = vmatprep.mubr.msk.f32.mxu0 %vm38_vm0, %v14_v1  ;;  %301 = vmatprep.mubr.msk.f32.mxu1 %vm38_vm0, %v22_v2  ;;  %v25_v8 = vld [vmem:[%s470_s0 + $0x58] sm:$0xff]  ;;  %v18_v9 = vld [vmem:[%s470_s0 + $0x20] sm:$0xff]  ;;  %v27_v12 = vld [vmem:[%s470_s0 + $0x68] sm:$0xff] }
   0x5   :  { %290 = vmatmul.mubr.msk.f32.vlgmr.msra.gmra.mrb[0].mxu0 %vm38_vm0, %v15_v3  ;;  %302 = vmatmul.mubr.msk.f32.vlgmr.msra.gmra.mrb[0].mxu1 %vm38_vm0, %v23_v4  ;;  %v26_v10 = vld [vmem:[%s470_s0 + $0x60] sm:$0xff]  ;;  %v20_v13 = vld [vmem:[%s470_s0 + $0x30] sm:$0xff]  ;;  %v21_v15 = vld [vmem:[%s470_s0 + $0x38] sm:$0xff] }
   0x6   :  { %292 = vmatprep.mubr.msk.f32.mxu0 %vm38_vm0, %v16_v5  ;;  %304 = vmatprep.mubr.msk.f32.mxu1 %vm38_vm0, %v24_v6  ;;  %v28_v14 = vld [vmem:[%s470_s0 + $0x70] sm:$0xff]  ;;  %v29_v16 = vld [vmem:[%s470_s0 + $0x78] sm:$0xff]  ;;  %v253_v17 = vld [vmem:[%s471_s2] ss:$0 sm:$0xff] }
   0x9   :  { %293 = vmatmul.mubr.msk.f32.gmra.mrb[2].mxu0 %vm38_vm0, %v17_v7  ;;  %305 = vmatmul.mubr.msk.f32.gmra.mrb[2].mxu1 %vm38_vm0, %v25_v8 }
   0xa   :  { %295 = vmatprep.mubr.msk.f32.mxu0 %vm38_vm0, %v18_v9  ;;  %307 = vmatprep.mubr.msk.f32.mxu1 %vm38_vm0, %v26_v10 }
   0xd   :  { %296 = vmatmul.mubr.msk.f32.gmra.mrb[4].mxu0 %vm38_vm0, %v19_v11  ;;  %308 = vmatmul.mubr.msk.f32.gmra.mrb[4].mxu1 %vm38_vm0, %v27_v12 }
   0xe   :  { %298 = vmatprep.mubr.msk.f32.mxu0 %vm38_vm0, %v20_v13  ;;  %310 = vmatprep.mubr.msk.f32.mxu1 %vm38_vm0, %v28_v14 }
  0x11   :  { %299 = vmatmul.mubr.msk.f32.gmra.mrb[6].mxu0 %vm38_vm0, %v21_v15  ;;  %311 = vmatmul.mubr.msk.f32.gmra.mrb[6].mxu1 %vm38_vm0, %v29_v16 }
  0xd8   :  { %v291_v18 = vpop.f32.mrb[0].mxu0  ;;  %v303_v19 = vpop.f32.mrb[0].mxu1 }
  0xd9   :  { %v159_v20 = vadd.f32 %v291_v18, %v253_v17  ;;  %v199_v21 = vadd.f32 %v303_v19, %v253_v17  ;;  %v153_v22 = vpop.f32.mrb[1].mxu0  ;;  %v193_v23 = vpop.f32.mrb[1].mxu1 }
  0xda   :  { %v154_v24 = vadd.f32 %v253_v17, %v153_v22  ;;  %v194_v25 = vadd.f32 %v253_v17, %v193_v23 }
  0xdb   :  { %234 = vst.msk [vmem:[%s472_s3 + $0x8] sm:$0xff] %vm232_vm1, %v159_v20  ;;  %242 = vst.msk [vmem:[%s472_s3 + $0x48] sm:$0xff] %vm232_vm1, %v199_v21 }
  0xdc   :  { %233 = vst.msk [vmem:[%s472_s3] sm:$0xff] %vm232_vm1, %v154_v24  ;;  %241 = vst.msk [vmem:[%s472_s3 + $0x40] sm:$0xff] %vm232_vm1, %v194_v25  ;;  %v294_v26 = vpop.f32.mrb[2].mxu0  ;;  %v306_v27 = vpop.f32.mrb[2].mxu1 }
  0xdd   :  { %v169_v28 = vadd.f32 %v294_v26, %v253_v17  ;;  %v209_v29 = vadd.f32 %v306_v27, %v253_v17  ;;  %v163_v30 = vpop.f32.mrb[3].mxu0  ;;  %v203_v31 = vpop.f32.mrb[3].mxu1 }
  0xde   :  { %v164_v32 = vadd.f32 %v253_v17, %v163_v30  ;;  %v204_v33 = vadd.f32 %v253_v17, %v203_v31 }
  0xdf   :  { %236 = vst.msk [vmem:[%s472_s3 + $0x18] sm:$0xff] %vm232_vm1, %v169_v28  ;;  %244 = vst.msk [vmem:[%s472_s3 + $0x58] sm:$0xff] %vm232_vm1, %v209_v29 }
  0xe0   :  { %235 = vst.msk [vmem:[%s472_s3 + $0x10] sm:$0xff] %vm232_vm1, %v164_v32  ;;  %243 = vst.msk [vmem:[%s472_s3 + $0x50] sm:$0xff] %vm232_vm1, %v204_v33  ;;  %v297_v34 = vpop.f32.mrb[4].mxu0  ;;  %v309_v35 = vpop.f32.mrb[4].mxu1 }
  0xe1   :  { %v179_v36 = vadd.f32 %v297_v34, %v253_v17  ;;  %v219_v37 = vadd.f32 %v309_v35, %v253_v17  ;;  %v173_v38 = vpop.f32.mrb[5].mxu0  ;;  %v213_v39 = vpop.f32.mrb[5].mxu1 }
  0xe2   :  { %v174_v40 = vadd.f32 %v253_v17, %v173_v38  ;;  %v214_v41 = vadd.f32 %v253_v17, %v213_v39 }
  0xe3   :  { %238 = vst.msk [vmem:[%s472_s3 + $0x28] sm:$0xff] %vm232_vm1, %v179_v36  ;;  %246 = vst.msk [vmem:[%s472_s3 + $0x68] sm:$0xff] %vm232_vm1, %v219_v37 }
  0xe4   :  { %237 = vst.msk [vmem:[%s472_s3 + $0x20] sm:$0xff] %vm232_vm1, %v174_v40  ;;  %245 = vst.msk [vmem:[%s472_s3 + $0x60] sm:$0xff] %vm232_vm1, %v214_v41  ;;  %v300_v42 = vpop.f32.mrb[6].mxu0  ;;  %v312_v43 = vpop.f32.mrb[6].mxu1 }
  0xe5   :  { %v189_v44 = vadd.f32 %v300_v42, %v253_v17  ;;  %v229_v45 = vadd.f32 %v312_v43, %v253_v17  ;;  %v183_v46 = vpop.f32.mrb[7].mxu0  ;;  %v223_v47 = vpop.f32.mrb[7].mxu1 }
  0xe6   :  { %v184_v48 = vadd.f32 %v253_v17, %v183_v46  ;;  %v224_v49 = vadd.f32 %v253_v17, %v223_v47 }
  0xe7   :  { %240 = vst.msk [vmem:[%s472_s3 + $0x38] sm:$0xff] %vm232_vm1, %v189_v44  ;;  %248 = vst.msk [vmem:[%s472_s3 + $0x78] sm:$0xff] %vm232_vm1, %v229_v45 }
  0xe8   :  { %239 = vst.msk [vmem:[%s472_s3 + $0x30] sm:$0xff] %vm232_vm1, %v184_v48  ;;  %247 = vst.msk [vmem:[%s472_s3 + $0x70] sm:$0xff] %vm232_vm1, %v224_v49 }

// kernel: model_forward.55
= control target key start
LH: loop header
LB: loop body
LE: loop exit
PB: predicated region body
PF: predicated region fallthrough
CT: control target
= control target key end

     0   :  { %vm287_vm0 = vcmask 1043456   ;;  %vm94_vm1 = vcmask 31744   ;;  %s6276_s1 = inlined_call_operand.vmem [shape: f32[4,32], index: 1, kind: input, shape index: {}]   ;;  %s6277_s0 = inlined_call_operand.vmem [shape: f32[512,4], index: 0, kind: input, shape index: {}]   ;;  %s6278_s2 = inlined_call_operand.vmem [shape: f32[1,32], index: 2, kind: input, shape index: {}]   ;;  %s6279_s3 = inlined_call_operand.vmem [shape: f32[32,1], index: 3, kind: input, shape index: {}]   ;;  %s6280_s4 = inlined_call_operand.<no memory space> [shape: f32[1,1], index: 4, kind: input, shape index: {}]   ;;  %s6281_s5 = inlined_call_operand.vmem [shape: f32[512,1], index: 5, kind: output, shape index: {}]  }
   0x1   :  { %v86_v0 = vld [vmem:[%s6276_s1] sm:$0xf]  ;;  %v23_v2 = vld [vmem:[%s6277_s0 + $0x8] sm:$0xff]  ;;  %v24_v3 = vld [vmem:[%s6277_s0 + $0x10] sm:$0xff] }
   0x2   :  { %v22_v1 = vld [vmem:[%s6277_s0] sm:$0xff]  ;;  %3326 = vmatprep.subr.msk.mxu0 %vm287_vm0, %v86_v0  ;;  %v25_v4 = vld [vmem:[%s6277_s0 + $0x18] sm:$0xff]  ;;  %v27_v6 = vld [vmem:[%s6277_s0 + $0x28] sm:$0xff] }
   0x3   :  { %3328 = vmatprep.mubr.msk.f32.mxu0 %vm94_vm1, %v22_v1  ;;  %3327 = vmatpush3.msk.msra.mxu0 %vm287_vm0, %v86_v0  ;;  %v26_v5 = vld [vmem:[%s6277_s0 + $0x20] sm:$0xff]  ;;  %v28_v7 = vld [vmem:[%s6277_s0 + $0x30] sm:$0xff]  ;;  %v29_v8 = vld [vmem:[%s6277_s0 + $0x38] sm:$0xff] }
   0x4   :  { %3329 = vmatmul.mubr.msk.f32.vlgmr.msra.gmra.mrb[0].mxu0 %vm94_vm1, %v23_v2  ;;  %v30_v9 = vld [vmem:[%s6277_s0 + $0x40] sm:$0xff]  ;;  %v31_v10 = vld [vmem:[%s6277_s0 + $0x48] sm:$0xff]  ;;  %v32_v11 = vld [vmem:[%s6277_s0 + $0x50] sm:$0xff] }
   0x5   :  { %3331 = vmatprep.mubr.msk.f32.mxu0 %vm94_vm1, %v24_v3  ;;  %v33_v12 = vld [vmem:[%s6277_s0 + $0x58] sm:$0xff]  ;;  %v34_v13 = vld [vmem:[%s6277_s0 + $0x60] sm:$0xff]  ;;  %v35_v14 = vld [vmem:[%s6277_s0 + $0x68] sm:$0xff] }
   0x6   :  { %v36_v15 = vld [vmem:[%s6277_s0 + $0x70] sm:$0xff]  ;;  %v37_v16 = vld [vmem:[%s6277_s0 + $0x78] sm:$0xff]  ;;  %v38_v17 = vld [vmem:[%s6277_s0 + $0x80] sm:$0xff] }
   0x7   :  { %v39_v18 = vld [vmem:[%s6277_s0 + $0x88] sm:$0xff]  ;;  %v40_v19 = vld [vmem:[%s6277_s0 + $0x90] sm:$0xff]  ;;  %v41_v20 = vld [vmem:[%s6277_s0 + $0x98] sm:$0xff] }
   0x8   :  { %3332 = vmatmul.mubr.msk.f32.gmra.mrb[2].mxu0 %vm94_vm1, %v25_v4  ;;  %v42_v21 = vld [vmem:[%s6277_s0 + $0xa0] sm:$0xff]  ;;  %v43_v22 = vld [vmem:[%s6277_s0 + $0xa8] sm:$0xff]  ;;  %v44_v23 = vld [vmem:[%s6277_s0 + $0xb0] sm:$0xff] }
   0x9   :  { %3334 = vmatprep.mubr.msk.f32.mxu0 %vm94_vm1, %v26_v5  ;;  %v45_v24 = vld [vmem:[%s6277_s0 + $0xb8] sm:$0xff]  ;;  %v46_v25 = vld [vmem:[%s6277_s0 + $0xc0] sm:$0xff]  ;;  %v47_v26 = vld [vmem:[%s6277_s0 + $0xc8] sm:$0xff] }
   0xa   :  { %v48_v27 = vld [vmem:[%s6277_s0 + $0xd0] sm:$0xff]  ;;  %v49_v28 = vld [vmem:[%s6277_s0 + $0xd8] sm:$0xff]  ;;  %v50_v29 = vld [vmem:[%s6277_s0 + $0xe0] sm:$0xff] }
   0xb   :  { %v51_v30 = vld [vmem:[%s6277_s0 + $0xe8] sm:$0xff]  ;;  %v52_v31 = vld [vmem:[%s6277_s0 + $0xf0] sm:$0xff]  ;;  %v53_v32 = vld [vmem:[%s6277_s0 + $0xf8] sm:$0xff] }
   0xc   :  { %3335 = vmatmul.mubr.msk.f32.gmra.mrb[4].mxu0 %vm94_vm1, %v27_v6  ;;  %v54_v33 = vld [vmem:[%s6277_s0 + $0x100] sm:$0xff]  ;;  %v55_v34 = vld [vmem:[%s6277_s0 + $0x108] sm:$0xff]  ;;  %v56_v35 = vld [vmem:[%s6277_s0 + $0x110] sm:$0xff] }
   0xd   :  { %3337 = vmatprep.mubr.msk.f32.mxu0 %vm94_vm1, %v28_v7  ;;  %v57_v36 = vld [vmem:[%s6277_s0 + $0x118] sm:$0xff]  ;;  %v58_v37 = vld [vmem:[%s6277_s0 + $0x120] sm:$0xff]  ;;  %v59_v38 = vld [vmem:[%s6277_s0 + $0x128] sm:$0xff] }
   0xe   :  { %v60_v39 = vld [vmem:[%s6277_s0 + $0x130] sm:$0xff]  ;;  %v61_v40 = vld [vmem:[%s6277_s0 + $0x138] sm:$0xff]  ;;  %v62_v41 = vld [vmem:[%s6277_s0 + $0x140] sm:$0xff] }
   0xf   :  { %v63_v42 = vld [vmem:[%s6277_s0 + $0x148] sm:$0xff]  ;;  %v64_v43 = vld [vmem:[%s6277_s0 + $0x150] sm:$0xff]  ;;  %v65_v44 = vld [vmem:[%s6277_s0 + $0x158] sm:$0xff] }
  0x10   :  { %3338 = vmatmul.mubr.msk.f32.gmra.mrb[6].mxu0 %vm94_vm1, %v29_v8  ;;  %v66_v45 = vld [vmem:[%s6277_s0 + $0x160] sm:$0xff]  ;;  %v67_v46 = vld [vmem:[%s6277_s0 + $0x168] sm:$0xff]  ;;  %v68_v47 = vld [vmem:[%s6277_s0 + $0x170] sm:$0xff] }
  0x11   :  { %3340 = vmatprep.mubr.msk.f32.mxu0 %vm94_vm1, %v30_v9  ;;  %v69_v48 = vld [vmem:[%s6277_s0 + $0x178] sm:$0xff]  ;;  %v70_v49 = vld [vmem:[%s6277_s0 + $0x180] sm:$0xff]  ;;  %v71_v50 = vld [vmem:[%s6277_s0 + $0x188] sm:$0xff] }
  0x12   :  { %v72_v51 = vld [vmem:[%s6277_s0 + $0x190] sm:$0xff]  ;;  %v73_v52 = vld [vmem:[%s6277_s0 + $0x198] sm:$0xff]  ;;  %v74_v53 = vld [vmem:[%s6277_s0 + $0x1a0] sm:$0xff] }
  0x13   :  { %v75_v54 = vld [vmem:[%s6277_s0 + $0x1a8] sm:$0xff]  ;;  %v76_v55 = vld [vmem:[%s6277_s0 + $0x1b0] sm:$0xff]  ;;  %v77_v56 = vld [vmem:[%s6277_s0 + $0x1b8] sm:$0xff] }
  0x14   :  { %3341 = vmatmul.mubr.msk.f32.gmra.mrb[8].mxu0 %vm94_vm1, %v31_v10  ;;  %v78_v57 = vld [vmem:[%s6277_s0 + $0x1c0] sm:$0xff]  ;;  %v79_v58 = vld [vmem:[%s6277_s0 + $0x1c8] sm:$0xff]  ;;  %v80_v59 = vld [vmem:[%s6277_s0 + $0x1d0] sm:$0xff] }
  0x15   :  { %3343 = vmatprep.mubr.msk.f32.mxu0 %vm94_vm1, %v32_v11  ;;  %v81_v60 = vld [vmem:[%s6277_s0 + $0x1d8] sm:$0xff]  ;;  %v82_v61 = vld [vmem:[%s6277_s0 + $0x1e0] sm:$0xff]  ;;  %v83_v62 = vld [vmem:[%s6277_s0 + $0x1e8] sm:$0xff] }
  0x16   :  { %v84_v63 = vld [vmem:[%s6277_s0 + $0x1f0] sm:$0xff]  ;;  %v85_v0 = vld [vmem:[%s6277_s0 + $0x1f8] sm:$0xff]  ;;  %v4087_v1 = vld [vmem:[%s6278_s2] ss:$0 sm:$0xff] }
  0x17   :  { %v2404_v6 = vld [vmem:[%s6279_s3] sm:$0xff]  ;;  %v2405_v7 = vld [vmem:[%s6279_s3 + $0x8] sm:$0xff] }
  0x18   :  { %3344 = vmatmul.mubr.msk.f32.gmra.mrb[10].mxu0 %vm94_vm1, %v33_v12  ;;  %v3528_v9 = vpack.c.bf16 %v2405_v7, %v2404_v6 }
  0x19   :  { %3346 = vmatprep.mubr.msk.f32.mxu0 %vm94_vm1, %v34_v13 }
  0x1a   :  { %3529 = vmatprep.subr.bf16.mxu1 %v3528_v9 }
  0x1b   :  { %3531 = vmatpush3.bf16.msra.mxu1 %v3528_v9 }
  0x1c   :  { %3347 = vmatmul.mubr.msk.f32.gmra.mrb[12].mxu0 %vm94_vm1, %v35_v14 }
  0x1d   :  { %3349 = vmatprep.mubr.msk.f32.mxu0 %vm94_vm1, %v36_v15 }
  0x20   :  { %3350 = vmatmul.mubr.msk.f32.gmra.mrb[14].mxu0 %vm94_vm1, %v37_v16 }
  0x21   :  { %3352 = vmatprep.mubr.msk.f32.mxu0 %vm94_vm1, %v38_v17 }
  0x24   :  { %3353 = vmatmul.mubr.msk.f32.gmra.mrb[16].mxu0 %vm94_vm1, %v39_v18 }
  0x25   :  { %3355 = vmatprep.mubr.msk.f32.mxu0 %vm94_vm1, %v40_v19 }
  0x28   :  { %3356 = vmatmul.mubr.msk.f32.gmra.mrb[18].mxu0 %vm94_vm1, %v41_v20 }
  0x29   :  { %3358 = vmatprep.mubr.msk.f32.mxu0 %vm94_vm1, %v42_v21 }
  0x2c   :  { %3359 = vmatmul.mubr.msk.f32.gmra.mrb[20].mxu0 %vm94_vm1, %v43_v22 }
  0x2d   :  { %3361 = vmatprep.mubr.msk.f32.mxu0 %vm94_vm1, %v44_v23 }
  0x30   :  { %3362 = vmatmul.mubr.msk.f32.gmra.mrb[22].mxu0 %vm94_vm1, %v45_v24 }
  0x31   :  { %3364 = vmatprep.mubr.msk.f32.mxu0 %vm94_vm1, %v46_v25 }
  0x34   :  { %3365 = vmatmul.mubr.msk.f32.gmra.mrb[24].mxu0 %vm94_vm1, %v47_v26 }
  0x35   :  { %3367 = vmatprep.mubr.msk.f32.mxu0 %vm94_vm1, %v48_v27 }
  0x38   :  { %3368 = vmatmul.mubr.msk.f32.gmra.mrb[26].mxu0 %vm94_vm1, %v49_v28 }
  0x39   :  { %3370 = vmatprep.mubr.msk.f32.mxu0 %vm94_vm1, %v50_v29 }
  0x3c   :  { %3371 = vmatmul.mubr.msk.f32.gmra.mrb[28].mxu0 %vm94_vm1, %v51_v30 }
  0x3d   :  { %3373 = vmatprep.mubr.msk.f32.mxu0 %vm94_vm1, %v52_v31 }
  0x40   :  { %3374 = vmatmul.mubr.msk.f32.gmra.mrb[30].mxu0 %vm94_vm1, %v53_v32 }
  0x41   :  { %3376 = vmatprep.mubr.msk.f32.mxu0 %vm94_vm1, %v54_v33 }
  0x44   :  { %3377 = vmatmul.mubr.msk.f32.gmra.mrb[32].mxu0 %vm94_vm1, %v55_v34 }
  0x45   :  { %3379 = vmatprep.mubr.msk.f32.mxu0 %vm94_vm1, %v56_v35 }
  0x48   :  { %3380 = vmatmul.mubr.msk.f32.gmra.mrb[34].mxu0 %vm94_vm1, %v57_v36 }
  0x49   :  { %3382 = vmatprep.mubr.msk.f32.mxu0 %vm94_vm1, %v58_v37 }
  0x4c   :  { %3383 = vmatmul.mubr.msk.f32.gmra.mrb[36].mxu0 %vm94_vm1, %v59_v38 }
  0x4d   :  { %3385 = vmatprep.mubr.msk.f32.mxu0 %vm94_vm1, %v60_v39 }
  0x50   :  { %3386 = vmatmul.mubr.msk.f32.gmra.mrb[38].mxu0 %vm94_vm1, %v61_v40 }
  0x51   :  { %3388 = vmatprep.mubr.msk.f32.mxu0 %vm94_vm1, %v62_v41 }
  0x54   :  { %3389 = vmatmul.mubr.msk.f32.gmra.mrb[40].mxu0 %vm94_vm1, %v63_v42 }
  0x55   :  { %3391 = vmatprep.mubr.msk.f32.mxu0 %vm94_vm1, %v64_v43 }
  0x58   :  { %3392 = vmatmul.mubr.msk.f32.gmra.mrb[42].mxu0 %vm94_vm1, %v65_v44 }
  0x59   :  { %3394 = vmatprep.mubr.msk.f32.mxu0 %vm94_vm1, %v66_v45 }
  0x5c   :  { %3395 = vmatmul.mubr.msk.f32.gmra.mrb[44].mxu0 %vm94_vm1, %v67_v46 }
  0x5d   :  { %3397 = vmatprep.mubr.msk.f32.mxu0 %vm94_vm1, %v68_v47 }
  0x60   :  { %3398 = vmatmul.mubr.msk.f32.gmra.mrb[46].mxu0 %vm94_vm1, %v69_v48 }
  0x61   :  { %3400 = vmatprep.mubr.msk.f32.mxu0 %vm94_vm1, %v70_v49 }
  0x64   :  { %3401 = vmatmul.mubr.msk.f32.gmra.mrb[48].mxu0 %vm94_vm1, %v71_v50 }
  0x65   :  { %3403 = vmatprep.mubr.msk.f32.mxu0 %vm94_vm1, %v72_v51 }
  0x68   :  { %3404 = vmatmul.mubr.msk.f32.gmra.mrb[50].mxu0 %vm94_vm1, %v73_v52 }
  0x69   :  { %3406 = vmatprep.mubr.msk.f32.mxu0 %vm94_vm1, %v74_v53 }
  0x6c   :  { %3407 = vmatmul.mubr.msk.f32.gmra.mrb[52].mxu0 %vm94_vm1, %v75_v54 }
  0x6d   :  { %3409 = vmatprep.mubr.msk.f32.mxu0 %vm94_vm1, %v76_v55 }
  0x70   :  { %3410 = vmatmul.mubr.msk.f32.gmra.mrb[54].mxu0 %vm94_vm1, %v77_v56 }
  0x71   :  { %3412 = vmatprep.mubr.msk.f32.mxu0 %vm94_vm1, %v78_v57 }
  0x74   :  { %3413 = vmatmul.mubr.msk.f32.gmra.mrb[56].mxu0 %vm94_vm1, %v79_v58 }
  0x75   :  { %3415 = vmatprep.mubr.msk.f32.mxu0 %vm94_vm1, %v80_v59 }
  0x78   :  { %3416 = vmatmul.mubr.msk.f32.gmra.mrb[58].mxu0 %vm94_vm1, %v81_v60 }
  0x79   :  { %3418 = vmatprep.mubr.msk.f32.mxu0 %vm94_vm1, %v82_v61 }
  0x7c   :  { %3419 = vmatmul.mubr.msk.f32.gmra.mrb[60].mxu0 %vm94_vm1, %v83_v62 }
  0x7d   :  { %3421 = vmatprep.mubr.msk.f32.mxu0 %vm94_vm1, %v84_v63 }
  0x80   :  { %3422 = vmatmul.mubr.msk.f32.gmra.mrb[62].mxu0 %vm94_vm1, %v85_v0 }
  0xd7   :  { %v3330_v2 = vpop.f32.mrb[0].mxu0 }
  0xd8   :  { %v4090_v3 = vadd.f32 %v3330_v2, %v4087_v1  ;;  %v357_v4 = vpop.f32.mrb[1].mxu0 }
  0xd9   :  { %v358_v47 = vadd.f32 %v4087_v1, %v357_v4 }
  0xda   :  { %v4093_v5 = vmul.f32 0.70710677, %v4090_v3 }
  0xdb   :  { %v3333_v8 = vpop.f32.mrb[2].mxu0  ;;  %v4182_v59 = vmul.f32 0.70710677, %v358_v47 }
  0xdc   :  { %v4102_v10 = vand.u32 2147483647, %v4093_v5  ;;  %v4105_v11 = vadd.f32 %v3333_v8, %v4087_v1  ;;  %v367_v12 = vpop.f32.mrb[3].mxu0  ;;  %vm2085_vm2 = vcmp.ge.f32.partialorder %v4093_v5, 0.0 }
  0xdd   :  { %v4108_v13 = vadd.f32 %v4087_v1, %v367_v12  ;;  %6287 = vst [vmem:[#allocation3_spill] sm:$0xff] %v4182_v59 }
  0xde   :  { %v869_v14 = vmul.f32 0.3275911, %v4102_v10  ;;  %v4112_v15 = vmul.f32 0.70710677, %v4105_v11  ;;  %v1701_v63 = vsub.f32 0.0, %v4102_v10 }
  0xdf   :  { %v4115_v16 = vmul.f32 0.70710677, %v4108_v13  ;;  %v3336_v19 = vpop.f32.mrb[4].mxu0 }
  0xe0   :  { %v933_v17 = vadd.f32 1.0, %v869_v14  ;;  %v4118_v18 = vand.u32 2147483647, %v4112_v15  ;;  %v377_v21 = vpop.f32.mrb[5].mxu0  ;;  %v4126_v26 = vadd.f32 %v3336_v19, %v4087_v1  ;;  %v4198_v14 = vand.u32 2147483647, %v4182_v59 }
  0xe1   :  { %v4121_v20 = vand.u32 2147483647, %v4115_v16  ;;  %v4129_v29 = vadd.f32 %v4087_v1, %v377_v21  ;;  %v4202_v19 = vmul.f32 0.5, %v4090_v3  ;;  %v1765_v21 = vmul.f32 %v1701_v63, %v4102_v10 }
  0xe2   :  { %3536 = vrcp.f32 %v933_v17  ;;  %v871_v22 = vmul.f32 0.3275911, %v4118_v18  ;;  %v4132_v30 = vmul.f32 0.70710677, %v4126_v26  ;;  %v1703_v4 = vsub.f32 0.0, %v4118_v18 }
  0xe3   :  { %v870_v23 = vmul.f32 0.3275911, %v4121_v20  ;;  %v3339_v24 = vpop.f32.mrb[6].mxu0  ;;  %v4135_v31 = vmul.f32 0.70710677, %v4129_v29  ;;  %v4217_v3 = vmul.f32 0.5, %v4105_v11 }
  0xe4   :  { %v935_v25 = vadd.f32 1.0, %v871_v22  ;;  %v387_v27 = vpop.f32.mrb[7].mxu0  ;;  %v4138_v33 = vand.u32 2147483647, %v4132_v30  ;;  %v4141_v34 = vadd.f32 %v3339_v24, %v4087_v1  ;;  %v4209_v24 = vmul.f32 0.5, %v358_v47 }
  0xe5   :  { %v934_v28 = vadd.f32 1.0, %v870_v23  ;;  %v4146_v36 = vand.u32 2147483647, %v4135_v31  ;;  %v4149_v37 = vadd.f32 %v4087_v1, %v387_v27  ;;  %v1767_v27 = vmul.f32 %v1703_v4, %v4118_v18 }
  0xe6   :  { %3538 = vrcp.f32 %v935_v25  ;;  %v873_v38 = vmul.f32 0.3275911, %v4138_v33  ;;  %v4153_v39 = vmul.f32 0.70710677, %v4141_v34  ;;  %6288 = vst [vmem:[#allocation4_spill] sm:$0xff] %v4209_v24  ;;  %v1700_v18 = vsub.f32 0.0, %v4198_v14 }
  0xe7   :  { %3540 = vrcp.f32 %v934_v28  ;;  %v3342_v32 = vpop.f32.mrb[8].mxu0  ;;  %v872_v40 = vmul.f32 0.3275911, %v4146_v36  ;;  %v4157_v41 = vmul.f32 0.70710677, %v4149_v37  ;;  %v1702_v28 = vsub.f32 0.0, %v4121_v20 }
  0xe8   :  { %v4143_v35 = vpop.f32.mrb[9].mxu0  ;;  %v937_v43 = vadd.f32 1.0, %v873_v38  ;;  %v4162_v44 = vand.u32 2147483647, %v4153_v39  ;;  %v4193_v9 = vadd.f32 %v3342_v32, %v4087_v1  ;;  %v868_v47 = vmul.f32 0.3275911, %v4198_v14 }
  0xe9   :  { %v936_v48 = vadd.f32 1.0, %v872_v40  ;;  %v4169_v49 = vand.u32 2147483647, %v4157_v41  ;;  %v1830_v11 = vmul.f32 1.442695, %v1765_v21  ;;  %vm2087_vm3 = vcmp.ge.f32.partialorder %v4112_v15, 0.0 }
  0xea   :  { %3542 = vrcp.f32 %v937_v43  ;;  %v875_v51 = vmul.f32 0.3275911, %v4162_v44  ;;  %v4207_v23 = vmul.f32 0.70710677, %v4193_v9  ;;  %vm2086_vm4 = vcmp.ge.f32.partialorder %v4115_v16, 0.0 }
  0xeb   :  { %v4164_v45 = vpop.f32.mrb[10].mxu0  ;;  %3544 = vrcp.f32 %v936_v48  ;;  %v874_v53 = vmul.f32 0.3275911, %v4169_v49  ;;  %vm2089_vm5 = vcmp.ge.f32.partialorder %v4132_v30, 0.0  ;;  %vm2088_vm6 = vcmp.ge.f32.partialorder %v4135_v31, 0.0 }
  0xec   :  { %v4159_v42 = vpop.eup %3536  ;;  %v4171_v50 = vpop.f32.mrb[11].mxu0  ;;  %v939_v55 = vadd.f32 1.0, %v875_v51  ;;  %v4220_v40 = vand.u32 2147483647, %v4207_v23  ;;  %vm2091_vm7 = vcmp.ge.f32.partialorder %v4153_v39, 0.0  ;;  %vm2090_vm8 = vcmp.ge.f32.partialorder %v4157_v41, 0.0 }
  0xed   :  { %v1125_v46 = vmul.f32 1.0614054, %v4159_v42  ;;  %v938_v61 = vadd.f32 1.0, %v874_v53  ;;  %vm2093_vm9 = vcmp.ge.f32.partialorder %v4207_v23, 0.0 }
  0xee   :  { %3546 = vrcp.f32 %v939_v55 }
  0xef   :  { %v1189_v52 = vadd.f32 -1.4531521, %v1125_v46  ;;  %v4177_v56 = vpop.f32.mrb[12].mxu0  ;;  %3548 = vrcp.f32 %v938_v61  ;;  %v1766_v61 = vmul.f32 %v1702_v28, %v4121_v20 }
  0xf0   :  { %v4175_v54 = vpop.eup %3538  ;;  %v4185_v62 = vpop.f32.mrb[13].mxu0 }
  0xf1   :  { %v4179_v57 = vpop.eup %3540  ;;  %v1253_v58 = vmul.f32 %v4159_v42, %v1189_v52  ;;  %v1127_v60 = vmul.f32 1.0614054, %v4175_v54 }
  0xf2   :  { %v1126_v0 = vmul.f32 1.0614054, %v4179_v57 }
  0xf3   :  { %v1191_v2 = vadd.f32 -1.4531521, %v1127_v60  ;;  %v4190_v6 = vpop.f32.mrb[14].mxu0  ;;  %v1317_v7 = vadd.f32 1.4214138, %v1253_v58 }
  0xf4   :  { %v1190_v8 = vadd.f32 -1.4531521, %v1126_v0  ;;  %v4195_v12 = vpop.f32.mrb[15].mxu0  ;;  %v4213_v32 = vpop.eup %3542  ;;  %v877_v58 = vmul.f32 0.3275911, %v4220_v40  ;;  %v1705_v0 = vsub.f32 0.0, %v4138_v33 }
  0xf5   :  { %v1255_v17 = vmul.f32 %v4175_v54, %v1191_v2  ;;  %v1381_v38 = vmul.f32 %v4159_v42, %v1317_v7  ;;  %v4224_v46 = vpop.eup %3544  ;;  %v1129_v51 = vmul.f32 1.0614054, %v4213_v32  ;;  %v1834_v60 = vmul.f32 1.442695, %v1767_v27 }
  0xf6   :  { %v1254_v22 = vmul.f32 %v4179_v57, %v1190_v8  ;;  %v1128_v55 = vmul.f32 1.0614054, %v4224_v46  ;;  %v941_v8 = vadd.f32 1.0, %v877_v58 }
  0xf7   :  { %v1319_v25 = vadd.f32 1.4214138, %v1255_v17  ;;  %v4222_v43 = vpop.f32.mrb[16].mxu0  ;;  %v1193_v63 = vadd.f32 -1.4531521, %v1129_v51 }
  0xf8   :  { %v1318_v10 = vadd.f32 1.4214138, %v1254_v22  ;;  %v4230_v52 = vpop.f32.mrb[17].mxu0  ;;  %v4237_v2 = vpop.eup %3546  ;;  %v1445_v4 = vadd.f32 -0.28449672, %v1381_v38  ;;  %3550 = vrcp.f32 %v941_v8 }
  0xf9   :  { %v1383_v48 = vmul.f32 %v4175_v54, %v1319_v25  ;;  %6289 = vst [vmem:[#allocation5_spill] sm:$0xff] %v4230_v52  ;;  %v1192_v7 = vadd.f32 -1.4531521, %v1128_v55  ;;  %v4241_v21 = vpop.eup %3548  ;;  %v1257_v25 = vmul.f32 %v4213_v32, %v1193_v63  ;;  %v1131_v27 = vmul.f32 1.0614054, %v4237_v2 }
  0xfa   :  { %v1382_v53 = vmul.f32 %v4179_v57, %v1318_v10  ;;  %v1704_v10 = vsub.f32 0.0, %v4146_v36  ;;  %v1130_v38 = vmul.f32 1.0614054, %v4241_v21  ;;  %v1832_v55 = vmul.f32 1.442695, %v1766_v61 }
  0xfb   :  { %v4239_v17 = vpop.f32.mrb[18].mxu0  ;;  %v1447_v22 = vadd.f32 -0.28449672, %v1383_v48  ;;  %v1256_v51 = vmul.f32 %v4224_v46, %v1192_v7  ;;  %v1321_v58 = vadd.f32 1.4214138, %v1257_v25  ;;  %3552 = vpow2.f32 %v1830_v11 }
  0xfc   :  { %6290 = vst [vmem:[#allocation6_spill] sm:$0xff] %v4239_v17  ;;  %v4246_v20 = vpop.f32.mrb[19].mxu0  ;;  %v1446_v28 = vadd.f32 -0.28449672, %v1382_v53  ;;  %v1195_v24 = vadd.f32 -1.4531521, %v1131_v27  ;;  %v1769_v48 = vmul.f32 %v1705_v0, %v4138_v33  ;;  %v1509_v17 = vmul.f32 %v4159_v42, %v1445_v4 }
  0xfd   :  { %6291 = vst [vmem:[#allocation7_spill] sm:$0xff] %v4246_v20  ;;  %v1320_v59 = vadd.f32 1.4214138, %v1256_v51  ;;  %v1194_v63 = vadd.f32 -1.4531521, %v1130_v38  ;;  %v1511_v52 = vmul.f32 %v4175_v54, %v1447_v22  ;;  %v1768_v20 = vmul.f32 %v1704_v10, %v4146_v36 }
  0xfe   :  { %v1259_v53 = vmul.f32 %v4237_v2, %v1195_v24  ;;  %3554 = vpow2.f32 %v1834_v60  ;;  %v1510_v61 = vmul.f32 %v4179_v57, %v1446_v28  ;;  %v1385_v8 = vmul.f32 %v4213_v32, %v1321_v58 }
  0xff   :  { %v4255_v7 = vpop.f32.mrb[20].mxu0  ;;  %v1384_v11 = vmul.f32 %v4224_v46, %v1320_v59  ;;  %v932_v0 = vadd.f32 1.0, %v868_v47  ;;  %3556 = vpow2.f32 %v1832_v55  ;;  %v1258_v22 = vmul.f32 %v4241_v21, %v1194_v63 }
 0x100   :  { %v4260_v33 = vpop.f32.mrb[21].mxu0  ;;  %v1323_v4 = vadd.f32 1.4214138, %v1259_v53  ;;  %v1764_v36 = vmul.f32 %v1700_v18, %v4198_v14  ;;  %v1838_v24 = vmul.f32 1.442695, %v1769_v48  ;;  %v1707_v60 = vsub.f32 0.0, %v4162_v44 }
 0x101   :  { %v4269_v10 = vadd.f32 %v4087_v1, %v4143_v35  ;;  %v1573_v59 = vadd.f32 0.2548296, %v1509_v17  ;;  %v1575_v28 = vadd.f32 0.2548296, %v1511_v52  ;;  %v1836_v47 = vmul.f32 1.442695, %v1768_v20 }
 0x102   :  { %v1574_v51 = vadd.f32 0.2548296, %v1510_v61  ;;  %v1449_v38 = vadd.f32 -0.28449672, %v1385_v8  ;;  %v1448_v55 = vadd.f32 -0.28449672, %v1384_v11  ;;  %v1387_v14 = vmul.f32 %v4237_v2, %v1323_v4  ;;  %v4278_v63 = vpop.eup %3550 }
 0x103   :  { %v4263_v25 = vpop.f32.mrb[22].mxu0  ;;  %v4274_v58 = vmul.f32 0.5, %v4108_v13  ;;  %v1322_v18 = vadd.f32 1.4214138, %v1258_v22  ;;  %v1706_v48 = vsub.f32 0.0, %v4169_v49  ;;  %3558 = vrcp.f32 %v932_v0 }
 0x104   :  { %v4271_v27 = vpop.f32.mrb[23].mxu0  ;;  %v1828_v35 = vmul.f32 1.442695, %v1764_v36  ;;  %v1771_v53 = vmul.f32 %v1707_v60, %v4162_v44  ;;  %v4282_v52 = vmul.f32 0.70710677, %v4269_v10  ;;  %v1637_v20 = vmul.f32 %v4159_v42, %v1573_v59 }
 0x105   :  { %v1639_v13 = vmul.f32 %v4175_v54, %v1575_v28  ;;  %3560 = vpow2.f32 %v1838_v24  ;;  %v1133_v61 = vmul.f32 1.0614054, %v4278_v63  ;;  %v3553_v11 = vpop.eup %3552  ;;  %v1638_v0 = vmul.f32 %v4179_v57, %v1574_v51 }
 0x106   :  { %v1513_v4 = vmul.f32 %v4213_v32, %v1449_v38  ;;  %v1512_v44 = vmul.f32 %v4224_v46, %v1448_v55  ;;  %3562 = vpow2.f32 %v1836_v47  ;;  %v1451_v22 = vadd.f32 -0.28449672, %v1387_v14 }
 0x107   :  { %v4284_v17 = vpop.f32.mrb[24].mxu0  ;;  %v1386_v36 = vmul.f32 %v4241_v21, %v1322_v18  ;;  %v1770_v42 = vmul.f32 %v1706_v48, %v4169_v49  ;;  %v4298_v54 = vadd.f32 %v4164_v45, %v4087_v1  ;;  %3564 = vpow2.f32 %v1828_v35 }
 0x108   :  { %v4289_v8 = vpop.f32.mrb[25].mxu0  ;;  %v3555_v60 = vpop.eup %3554  ;;  %v1842_v59 = vmul.f32 1.442695, %v1771_v53  ;;  %v1197_v57 = vadd.f32 -1.4531521, %v1133_v61  ;;  %v1957_v47 = vmul.f32 %v3553_v11, %v1637_v20  ;;  %v4306_v55 = vmul.f32 0.5, %v4126_v26 }
 0x109   :  { %6292 = vst [vmem:[#allocation8_spill] sm:$0xff] %v4289_v8  ;;  %v4303_v28 = vand.u32 2147483647, %v4282_v52  ;;  %v3557_v51 = vpop.eup %3556  ;;  %v1959_v38 = vmul.f32 %v3555_v60, %v1639_v13  ;;  %v4309_v49 = vmul.f32 0.5, %v4129_v29  ;;  %v1577_v14 = vadd.f32 0.2548296, %v1513_v4 }
 0x10a   :  { %v1958_v45 = vmul.f32 %v3557_v51, %v1638_v0  ;;  %v1576_v18 = vadd.f32 0.2548296, %v1512_v44  ;;  %v1515_v35 = vmul.f32 %v4237_v2, %v1451_v22  ;;  %v1450_v53 = vadd.f32 -0.28449672, %v1386_v36 }
 0x10b   :  { %v4300_v24 = vpop.f32.mrb[26].mxu0  ;;  %v876_v48 = vmul.f32 0.3275911, %v4303_v28  ;;  %v1840_v61 = vmul.f32 1.442695, %v1770_v42  ;;  %3566 = vpow2.f32 %v1842_v59  ;;  %v1261_v26 = vmul.f32 %v4278_v63, %v1197_v57 }
 0x10c   :  { %6293 = vst [vmem:[#allocation9_spill] sm:$0xff] %v4300_v24  ;;  %v4314_v24 = vmul.f32 0.70710677, %v4298_v54  ;;  %v1709_v29 = vsub.f32 0.0, %v4220_v40  ;;  %v2021_v13 = vsub.f32 1.0, %v1957_v47  ;;  %v2023_v11 = vsub.f32 1.0, %v1959_v38 }
 0x10d   :  { %v940_v20 = vadd.f32 1.0, %v876_v48  ;;  %v4322_v0 = vmul.f32 0.5, %v4141_v34  ;;  %v4327_v44 = vpop.eup %3558  ;;  %v2022_v22 = vsub.f32 1.0, %v1958_v45  ;;  %v1641_v36 = vmul.f32 %v4213_v32, %v1577_v14  ;;  %v4391_v16 = vpop.f32.mrb[27].mxu0 }
 0x10e   :  { %v4325_v4 = vand.u32 2147483647, %v4314_v24  ;;  %6294 = vst [vmem:[#allocation10_spill] sm:$0xff] %v4327_v44  ;;  %v1640_v42 = vmul.f32 %v4224_v46, %v1576_v18  ;;  %v1579_v59 = vadd.f32 0.2548296, %v1515_v35  ;;  %v4332_v57 = vmul.f32 0.5, %v4149_v37 }
 0x10f   :  { %3568 = vrcp.f32 %v940_v20  ;;  %v3561_v60 = vpop.eup %3560  ;;  %v1514_v51 = vmul.f32 %v4241_v21, %v1450_v53  ;;  %v1325_v47 = vadd.f32 1.4214138, %v1261_v26  ;;  %v1773_v38 = vmul.f32 %v1709_v29, %v4220_v40  ;;  %6296 = vst [vmem:[#allocation12_spill] sm:$0xff] %v4391_v16 }
 0x110   :  { %3570 = vpow2.f32 %v1840_v61  ;;  %v3563_v34 = vpop.eup %3562  ;;  %v879_v48 = vmul.f32 0.3275911, %v4325_v4  ;;  %v4339_v32 = vadd.f32 %v4087_v1, %v4171_v50  ;;  %v2149_v46 = vsub.f32 0.0, %v2021_v13 }
 0x111   :  { %v2151_v45 = vsub.f32 0.0, %v2023_v11  ;;  %v4342_v14 = vmul.f32 0.5, %v4193_v9  ;;  %v4346_v37 = vadd.f32 %v4177_v56, %v4087_v1  ;;  %v4348_v18 = vpop.eup %3564  ;;  %v2150_v35 = vsub.f32 0.0, %v2022_v22 }
 0x112   :  { %6295 = vst [vmem:[#allocation11_spill] sm:$0xff] %v4348_v18  ;;  %v1961_v53 = vmul.f32 %v3561_v60, %v1641_v36  ;;  %v4350_v40 = vmul.f32 %v3563_v34, %v1640_v42  ;;  %v943_v61 = vadd.f32 1.0, %v879_v48  ;;  %v1643_v26 = vmul.f32 %v4237_v2, %v1579_v59 }
 0x113   :  { %v1578_v50 = vadd.f32 0.2548296, %v1514_v51  ;;  %v4354_v29 = vmul.f32 0.5, %v4269_v10  ;;  %v4358_v9 = vadd.f32 %v4087_v1, %v4185_v62  ;;  %v1389_v56 = vmul.f32 %v4278_v63, %v1325_v47 }
 0x114   :  { %v1846_v20 = vmul.f32 1.442695, %v1773_v38  ;;  %3572 = vrcp.f32 %v943_v61  ;;  %v4362_v18 = vmul.f32 0.70710677, %v4339_v32  ;;  %v2213_v36 = vsel %vm2085_vm2, %v2021_v13, %v2149_v46 }
 0x115   :  { %v2215_v2 = vsel %vm2087_vm3, %v2023_v11, %v2151_v45  ;;  %v4370_v10 = vmul.f32 0.5, %v4298_v54  ;;  %v4373_v62 = vmul.f32 0.70710677, %v4346_v37  ;;  %v3567_v42 = vpop.eup %3566  ;;  %v2214_v60 = vsel %vm2086_vm4, %v2022_v22, %v2150_v35 }
 0x116   :  { %v2025_v59 = vsub.f32 1.0, %v1961_v53  ;;  %v2024_v51 = vsub.f32 1.0, %v4350_v40  ;;  %v4380_v5 = vand.u32 2147483647, %v4362_v18  ;;  %v4382_v15 = vmul.f32 %v3567_v42, %v1643_v26 }
 0x117   :  { %v1642_v54 = vmul.f32 %v4241_v21, %v1578_v50  ;;  %v4386_v13 = vand.u32 2147483647, %v4373_v62  ;;  %v4389_v11 = vmul.f32 0.70710677, %v4358_v9  ;;  %v2277_v34 = vadd.f32 1.0, %v2213_v36  ;;  %v4401_v50 = vpop.f32.mrb[28].mxu0 }
 0x118   :  { %v1453_v47 = vadd.f32 -0.28449672, %v1389_v56  ;;  %3574 = vpow2.f32 %v1846_v20  ;;  %v878_v38 = vmul.f32 0.3275911, %v4380_v5  ;;  %v2279_v46 = vadd.f32 1.0, %v2215_v2  ;;  %6297 = vst [vmem:[#allocation13_spill] sm:$0xff] %v4401_v50 }
 0x119   :  { %v4393_v22 = vpop.eup %3568  ;;  %v2278_v45 = vadd.f32 1.0, %v2214_v60  ;;  %v881_v35 = vmul.f32 0.3275911, %v4386_v13  ;;  %v2153_v53 = vsub.f32 0.0, %v2025_v59  ;;  %v2152_v40 = vsub.f32 0.0, %v2024_v51  ;;  %v4405_v42 = vpop.f32.mrb[29].mxu0 }
 0x11a   :  { %v3571_v48 = vpop.eup %3570  ;;  %v1132_v21 = vmul.f32 1.0614054, %v4393_v22  ;;  %v942_v61 = vadd.f32 1.0, %v878_v38  ;;  %v4399_v26 = vand.u32 2147483647, %v4389_v11  ;;  %v2027_v56 = vsub.f32 1.0, %v4382_v15 }
 0x11b   :  { %v1962_v20 = vmul.f32 %v3571_v48, %v1642_v54  ;;  %v945_v2 = vadd.f32 1.0, %v881_v35  ;;  %6298 = vst [vmem:[#allocation14_spill] sm:$0xff] %v4405_v42  ;;  %v1517_v60 = vmul.f32 %v4278_v63, %v1453_v47  ;;  %v4411_v38 = vadd.f32 %v4190_v6, %v4087_v1 }
 0x11c   :  { %v1196_v36 = vadd.f32 -1.4531521, %v1132_v21  ;;  %3576 = vrcp.f32 %v942_v61  ;;  %v880_v16 = vmul.f32 0.3275911, %v4399_v26  ;;  %v4414_v50 = vmul.f32 %v2277_v34, %v4202_v19  ;;  %v4430_v34 = vpop.f32.mrb[30].mxu0 }
 0x11d   :  { %v1708_v15 = vsub.f32 0.0, %v4303_v28  ;;  %3578 = vrcp.f32 %v945_v2  ;;  %v4419_v54 = vadd.f32 %v4087_v1, %v4195_v12  ;;  %v4424_v47 = vmul.f32 %v2279_v46, %v4217_v3  ;;  %6301 = vst [vmem:[#allocation17_spill] sm:$0xff] %v4430_v34  ;;  %v4438_v46 = vpop.f32.mrb[31].mxu0 }
 0x11e   :  { %6299 = vst [vmem:[#allocation15_spill] sm:$0xff] %v4414_v50  ;;  %v4421_v48 = vpop.eup %3572  ;;  %v2217_v21 = vsel %vm2089_vm5, %v2025_v59, %v2153_v53  ;;  %v1260_v6 = vmul.f32 %v4393_v22, %v1196_v36  ;;  %v944_v19 = vadd.f32 1.0, %v880_v16  ;;  %v4433_v35 = vmul.f32 %v2278_v45, %v4274_v58  ;;  %6303 = vst [vmem:[#allocation19_spill] sm:$0xff] %v4438_v46 }
 0x11f   :  { %6300 = vst [vmem:[#allocation16_spill] sm:$0xff] %v4424_v47  ;;  %v2216_v12 = vsel %vm2088_vm6, %v2024_v51, %v2152_v40  ;;  %v2026_v61 = vsub.f32 1.0, %v1962_v20  ;;  %v1135_v3 = vmul.f32 1.0614054, %v4421_v48  ;;  %v2155_v30 = vsub.f32 0.0, %v2027_v56 }
 0x120   :  { %6302 = vst [vmem:[#allocation18_spill] sm:$0xff] %v4433_v35  ;;  %v1581_v59 = vadd.f32 0.2548296, %v1517_v60  ;;  %3580 = vrcp.f32 %v944_v19  ;;  %v4441_v53 = vmul.f32 0.70710677, %v4411_v38  ;;  %v2281_v16 = vadd.f32 1.0, %v2217_v21 }
 0x121   :  { %v1772_v36 = vmul.f32 %v1708_v15, %v4303_v28  ;;  %v1199_v2 = vadd.f32 -1.4531521, %v1135_v3  ;;  %v4445_v58 = vmul.f32 0.70710677, %v4419_v54  ;;  %v2280_v51 = vadd.f32 1.0, %v2216_v12  ;;  %v4454_v60 = vpop.f32.mrb[32].mxu0 }
 0x122   :  { %v3575_v31 = vpop.eup %3574  ;;  %v1324_v45 = vadd.f32 1.4214138, %v1260_v6  ;;  %v4448_v40 = vand.u32 2147483647, %v4441_v53  ;;  %v4452_v20 = vadd.f32 %v4222_v43, %v4087_v1  ;;  %6304 = vst [vmem:[#allocation20_spill] sm:$0xff] %v4454_v60  ;;  %v2154_v19 = vsub.f32 0.0, %v2026_v61 }
 0x123   :  { %v1263_v21 = vmul.f32 %v4421_v48, %v1199_v2  ;;  %v1711_v28 = vsub.f32 0.0, %v4325_v4  ;;  %v4459_v15 = vand.u32 2147483647, %v4445_v58  ;;  %v4461_v3 = vpop.f32.mrb[33].mxu0  ;;  %v2219_v6 = vsel %vm2091_vm7, %v2027_v56, %v2155_v30 }
 0x124   :  { %6305 = vst [vmem:[#allocation21_spill] sm:$0xff] %v4461_v3  ;;  %v1645_v12 = vmul.f32 %v4278_v63, %v1581_v59  ;;  %v883_v43 = vmul.f32 0.3275911, %v4448_v40  ;;  %v4468_v47 = vmul.f32 0.70710677, %v4452_v20  ;;  %v4471_v35 = vmul.f32 %v2281_v16, %v4306_v55  ;;  %v4483_v30 = vpop.f32.mrb[34].mxu0 }
 0x125   :  { %v1844_v2 = vmul.f32 1.442695, %v1772_v36  ;;  %v1327_v50 = vadd.f32 1.4214138, %v1263_v21  ;;  %v882_v60 = vmul.f32 0.3275911, %v4459_v15  ;;  %v4477_v3 = vmul.f32 %v2280_v51, %v4309_v49 }
 0x126   :  { %6306 = vst [vmem:[#allocation22_spill] sm:$0xff] %v4471_v35  ;;  %v4474_v46 = vpop.eup %3576  ;;  %v1388_v39 = vmul.f32 %v4393_v22, %v1324_v45  ;;  %v947_v63 = vadd.f32 1.0, %v883_v43  ;;  %v4481_v56 = vand.u32 2147483647, %v4468_v47  ;;  %6308 = vst [vmem:[#allocation24_spill] sm:$0xff] %v4483_v30  ;;  %v2283_v55 = vadd.f32 1.0, %v2219_v6 }
 0x127   :  { %6307 = vst [vmem:[#allocation23_spill] sm:$0xff] %v4477_v3  ;;  %v4485_v59 = vpop.eup %3578  ;;  %v2218_v16 = vsel %vm2090_vm8, %v2026_v61, %v2154_v19  ;;  %v1134_v36 = vmul.f32 1.0614054, %v4474_v46  ;;  %v946_v21 = vadd.f32 1.0, %v882_v60  ;;  %v1965_v35 = vmul.f32 %v3575_v31, %v1645_v12  ;;  %v4494_v3 = vpop.f32.mrb[35].mxu0 }
 0x128   :  { %v1775_v49 = vmul.f32 %v1711_v28, %v4325_v4  ;;  %v1137_v51 = vmul.f32 1.0614054, %v4485_v59  ;;  %3582 = vrcp.f32 %v947_v63  ;;  %v1391_v45 = vmul.f32 %v4421_v48, %v1327_v50  ;;  %6309 = vst [vmem:[#allocation25_spill] sm:$0xff] %v4494_v3 }
 0x129   :  { %v1198_v43 = vadd.f32 -1.4531521, %v1134_v36  ;;  %v1710_v30 = vsub.f32 0.0, %v4380_v5  ;;  %3584 = vrcp.f32 %v946_v21  ;;  %v1452_v41 = vadd.f32 -0.28449672, %v1388_v39 }
 0x12a   :  { %v4496_v6 = vpop.eup %3580  ;;  %3586 = vpow2.f32 %v1844_v2  ;;  %v1201_v61 = vadd.f32 -1.4531521, %v1137_v51  ;;  %v885_v31 = vmul.f32 0.3275911, %v4481_v56  ;;  %v4499_v60 = vadd.f32 1.0, %v2218_v16  ;;  %v6310_v51 = vld [vmem:[#allocation5_spill] sm:$0xff] }
 0x12b   :  { %v1262_v4 = vmul.f32 %v4474_v46, %v1198_v43  ;;  %v1713_v19 = vsub.f32 0.0, %v4386_v13  ;;  %v1136_v50 = vmul.f32 1.0614054, %v4496_v6  ;;  %v2029_v28 = vsub.f32 1.0, %v1965_v35 }
 0x12c   :  { %v1850_v12 = vmul.f32 1.442695, %v1775_v49  ;;  %v1265_v63 = vmul.f32 %v4485_v59, %v1201_v61  ;;  %v949_v36 = vadd.f32 1.0, %v885_v31  ;;  %v1455_v39 = vadd.f32 -0.28449672, %v1391_v45 }
 0x12d   :  { %v1326_v2 = vadd.f32 1.4214138, %v1262_v4  ;;  %v1774_v21 = vmul.f32 %v1710_v30, %v4380_v5  ;;  %v4509_v16 = vadd.f32 %v4087_v1, %v6310_v51  ;;  %v1516_v43 = vmul.f32 %v4393_v22, %v1452_v41 }
 0x12e   :  { %v1329_v3 = vadd.f32 1.4214138, %v1265_v63  ;;  %v1200_v34 = vadd.f32 -1.4531521, %v1136_v50  ;;  %3588 = vrcp.f32 %v949_v36  ;;  %v4513_v35 = vmul.f32 0.5, %v4339_v32 }
 0x12f   :  { %v1390_v49 = vmul.f32 %v4474_v46, %v1326_v2  ;;  %v4517_v61 = vmul.f32 0.5, %v4346_v37  ;;  %v1777_v45 = vmul.f32 %v1713_v19, %v4386_v13  ;;  %3590 = vpow2.f32 %v1850_v12 }
 0x130   :  { %v1393_v5 = vmul.f32 %v4485_v59, %v1329_v3  ;;  %v1264_v30 = vmul.f32 %v4496_v6, %v1200_v34  ;;  %v4523_v41 = vmul.f32 0.70710677, %v4509_v16  ;;  %v2157_v31 = vsub.f32 0.0, %v2029_v28 }
 0x131   :  { %v1519_v4 = vmul.f32 %v4421_v48, %v1455_v39  ;;  %v1454_v32 = vadd.f32 -0.28449672, %v1390_v49  ;;  %v1848_v50 = vmul.f32 1.442695, %v1774_v21  ;;  %v1580_v36 = vadd.f32 0.2548296, %v1516_v43 }
 0x132   :  { %6311 = vst [vmem:[#allocation5_spill] sm:$0xff] %v4523_v41  ;;  %v4526_v63 = vpop.eup %3582  ;;  %v4529_v37 = vmul.f32 0.5, %v4358_v9  ;;  %v1328_v13 = vadd.f32 1.4214138, %v1264_v30  ;;  %v1712_v19 = vsub.f32 0.0, %v4399_v26  ;;  %v4535_v34 = vmul.f32 %v2283_v55, %v4322_v0  ;;  %v4544_v30 = vpop.f32.mrb[36].mxu0 }
 0x133   :  { %v4532_v3 = vpop.eup %3584  ;;  %v1854_v12 = vmul.f32 1.442695, %v1777_v45  ;;  %v1139_v2 = vmul.f32 1.0614054, %v4526_v63  ;;  %v4539_v39 = vand.u32 2147483647, %v4523_v41  ;;  %v1518_v51 = vmul.f32 %v4474_v46, %v1454_v32 }
 0x134   :  { %6312 = vst [vmem:[#allocation26_spill] sm:$0xff] %v4535_v34  ;;  %v3587_v21 = vpop.eup %3586  ;;  %v1457_v43 = vadd.f32 -0.28449672, %v1393_v5  ;;  %v1392_v9 = vmul.f32 %v4496_v6, %v1328_v13  ;;  %v1138_v49 = vmul.f32 1.0614054, %v4532_v3  ;;  %6313 = vst [vmem:[#allocation27_spill] sm:$0xff] %v4544_v30  ;;  %v2221_v0 = vsel %vm2093_vm9, %v2029_v28, %v2157_v31 }
 0x135   :  { %v1583_v55 = vadd.f32 0.2548296, %v1519_v4  ;;  %3592 = vpow2.f32 %v1848_v50  ;;  %v1203_v45 = vadd.f32 -1.4531521, %v1139_v2  ;;  %v1644_v34 = vmul.f32 %v4393_v22, %v1580_v36 }
 0x136   :  { %v1776_v42 = vmul.f32 %v1712_v19, %v4399_v26  ;;  %v1715_v44 = vsub.f32 0.0, %v4448_v40  ;;  %v1202_v32 = vadd.f32 -1.4531521, %v1138_v49  ;;  %3594 = vpow2.f32 %v1854_v12 }
 0x137   :  { %v1267_v5 = vmul.f32 %v4526_v63, %v1203_v45  ;;  %v1714_v13 = vsub.f32 0.0, %v4459_v15  ;;  %v884_v30 = vmul.f32 0.3275911, %v4539_v39  ;;  %v1582_v23 = vadd.f32 0.2548296, %v1518_v51 }
 0x138   :  { %v4554_v41 = vpop.eup %3588  ;;  %v1521_v28 = vmul.f32 %v4485_v59, %v1457_v43  ;;  %v1456_v31 = vadd.f32 -0.28449672, %v1392_v9  ;;  %v1266_v22 = vmul.f32 %v4532_v3, %v1202_v32  ;;  %v1647_v26 = vmul.f32 %v4421_v48, %v1583_v55  ;;  %v4563_v9 = vpop.f32.mrb[37].mxu0 }
 0x139   :  { %v1331_v4 = vadd.f32 1.4214138, %v1267_v5  ;;  %v1141_v50 = vmul.f32 1.0614054, %v4554_v41  ;;  %v948_v36 = vadd.f32 1.0, %v884_v30  ;;  %v3591_v19 = vpop.eup %3590  ;;  %v1964_v12 = vmul.f32 %v3587_v21, %v1644_v34  ;;  %6314 = vst [vmem:[#allocation28_spill] sm:$0xff] %v4563_v9 }
 0x13a   :  { %v1852_v2 = vmul.f32 1.442695, %v1776_v42  ;;  %v1779_v49 = vmul.f32 %v1715_v44, %v4448_v40  ;;  %v1330_v45 = vadd.f32 1.4214138, %v1266_v22  ;;  %v1778_v51 = vmul.f32 %v1714_v13, %v4459_v15  ;;  %v6315_v5 = vld [vmem:[#allocation6_spill] sm:$0xff] }
 0x13b   :  { %v1395_v8 = vmul.f32 %v4526_v63, %v1331_v4  ;;  %v1205_v43 = vadd.f32 -1.4531521, %v1141_v50  ;;  %3596 = vrcp.f32 %v948_v36  ;;  %v1646_v48 = vmul.f32 %v4474_v46, %v1582_v23 }
 0x13c   :  { %v1585_v55 = vadd.f32 0.2548296, %v1521_v28  ;;  %v1394_v32 = vmul.f32 %v4532_v3, %v1330_v45  ;;  %v1717_v30 = vsub.f32 0.0, %v4481_v56  ;;  %vm2092_vm10 = vcmp.ge.f32.partialorder %v4282_v52, 0.0 }
 0x13d   :  { %v1967_v42 = vmul.f32 %v3591_v19, %v1647_v26  ;;  %v1520_v44 = vmul.f32 %v4496_v6, %v1456_v31  ;;  %v1459_v40 = vadd.f32 -0.28449672, %v1395_v8  ;;  %v1269_v34 = vmul.f32 %v4554_v41, %v1205_v43 }
 0x13e   :  { %v2028_v15 = vsub.f32 1.0, %v1964_v12  ;;  %3598 = vpow2.f32 %v1852_v2  ;;  %v1858_v21 = vmul.f32 1.442695, %v1779_v49  ;;  %v4573_v13 = vadd.f32 %v6315_v5, %v4087_v1  ;;  %v6316_v49 = vld [vmem:[#allocation7_spill] sm:$0xff] }
 0x13f   :  { %v3593_v46 = vpop.eup %3592  ;;  %v4577_v23 = vmul.f32 %v4499_v60, %v4332_v57  ;;  %v1458_v28 = vadd.f32 -0.28449672, %v1394_v32  ;;  %v1856_v22 = vmul.f32 1.442695, %v1778_v51  ;;  %v1333_v26 = vadd.f32 1.4214138, %v1269_v34 }
 0x140   :  { %v2285_v4 = vadd.f32 1.0, %v2221_v0  ;;  %vm2095_vm11 = vcmp.ge.f32.partialorder %v4314_v24, 0.0  ;;  %v1966_v8 = vmul.f32 %v3593_v46, %v1646_v48  ;;  %v1649_v31 = vmul.f32 %v4485_v59, %v1585_v55  ;;  %v3595_v36 = vpop.eup %3594 }
 0x141   :  { %v1781_v50 = vmul.f32 %v1717_v30, %v4481_v56  ;;  %v2031_v19 = vsub.f32 1.0, %v1967_v42  ;;  %v1584_v12 = vadd.f32 0.2548296, %v1520_v44  ;;  %v1523_v2 = vmul.f32 %v4526_v63, %v1459_v40 }
 0x142   :  { %v4585_v57 = vadd.f32 %v4087_v1, %v6316_v49  ;;  %v2156_v60 = vsub.f32 0.0, %v2028_v15  ;;  %3600 = vpow2.f32 %v1858_v21  ;;  %v1397_v0 = vmul.f32 %v4554_v41, %v1333_v26 }
 0x143   :  { %v4589_v45 = vmul.f32 0.70710677, %v4573_v13  ;;  %vm2094_vm12 = vcmp.ge.f32.partialorder %v4362_v18, 0.0  ;;  %v4593_v56 = vmul.f32 0.5, %v4411_v38  ;;  %v4596_v59 = vmul.f32 0.5, %v4419_v54  ;;  %v4608_v54 = vpop.f32.mrb[38].mxu0 }
 0x144   :  { %v1522_v51 = vmul.f32 %v4532_v3, %v1458_v28  ;;  %3602 = vpow2.f32 %v1856_v22  ;;  %v2030_v1 = vsub.f32 1.0, %v1966_v8  ;;  %v1969_v43 = vmul.f32 %v3595_v36, %v1649_v31  ;;  %6317 = vst [vmem:[#allocation6_spill] sm:$0xff] %v4608_v54  ;;  %v4622_v26 = vpop.f32.mrb[39].mxu0 }
 0x145   :  { %v1862_v48 = vmul.f32 1.442695, %v1781_v50  ;;  %v4600_v55 = vand.u32 2147483647, %v4589_v45  ;;  %v4602_v32 = vpop.eup %3596  ;;  %v2159_v30 = vsub.f32 0.0, %v2031_v19  ;;  %v1648_v42 = vmul.f32 %v4496_v6, %v1584_v12  ;;  %6318 = vst [vmem:[#allocation7_spill] sm:$0xff] %v4622_v26 }
 0x146   :  { %v1587_v44 = vadd.f32 0.2548296, %v1523_v2  ;;  %v4606_v38 = vmul.f32 0.70710677, %v4585_v57  ;;  %v2220_v40 = vsel %vm2092_vm10, %v2028_v15, %v2156_v60  ;;  %v1461_v34 = vadd.f32 -0.28449672, %v1397_v0 }
 0x147   :  { %v1140_v21 = vmul.f32 1.0614054, %v4602_v32  ;;  %v887_v5 = vmul.f32 0.3275911, %v4600_v55  ;;  %v4615_v46 = vmul.f32 %v2285_v4, %v4342_v14  ;;  %vm2097_vm13 = vcmp.ge.f32.partialorder %v4373_v62, 0.0 }
 0x148   :  { %v1586_v6 = vadd.f32 0.2548296, %v1522_v51  ;;  %v1716_v28 = vsub.f32 0.0, %v4539_v39  ;;  %v4620_v22 = vand.u32 2147483647, %v4606_v38  ;;  %v3599_v52 = vpop.eup %3598  ;;  %v2158_v15 = vsub.f32 0.0, %v2030_v1 }
 0x149   :  { %v2033_v8 = vsub.f32 1.0, %v1969_v43  ;;  %v1204_v31 = vadd.f32 -1.4531521, %v1140_v21  ;;  %v951_v50 = vadd.f32 1.0, %v887_v5  ;;  %v2284_v36 = vadd.f32 1.0, %v2220_v40 }
 0x14a   :  { %v2223_v14 = vsel %vm2095_vm11, %v2031_v19, %v2159_v30  ;;  %v1968_v4 = vmul.f32 %v3599_v52, %v1648_v42  ;;  %v886_v12 = vmul.f32 0.3275911, %v4620_v22  ;;  %v1651_v2 = vmul.f32 %v4526_v63, %v1587_v44 }
 0x14b   :  { %v1525_v49 = vmul.f32 %v4554_v41, %v1461_v34  ;;  %v1268_v60 = vmul.f32 %v4602_v32, %v1204_v31  ;;  %3604 = vrcp.f32 %v951_v50  ;;  %v1650_v0 = vmul.f32 %v4532_v3, %v1586_v6 }
 0x14c   :  { %3606 = vpow2.f32 %v1862_v48  ;;  %v1780_v51 = vmul.f32 %v1716_v28, %v4539_v39  ;;  %v950_v43 = vadd.f32 1.0, %v886_v12  ;;  %v3601_v40 = vpop.eup %3600  ;;  %v2222_v24 = vsel %vm2094_vm12, %v2030_v1, %v2158_v15  ;;  %v4647_v1 = vld [vmem:[%s6278_s2] ss:$0 sm:$0xff] }
 0x14d   :  { %v2161_v19 = vsub.f32 0.0, %v2033_v8  ;;  %vm2096_vm14 = vcmp.ge.f32.partialorder %v4389_v11, 0.0  ;;  %v4636_v63 = vmul.f32 0.5, %v4452_v20  ;;  %v1332_v30 = vadd.f32 1.4214138, %v1268_v60 }
 0x14e   :  { %v3603_v42 = vpop.eup %3602  ;;  %v2287_v44 = vadd.f32 1.0, %v2223_v14  ;;  %v2032_v34 = vsub.f32 1.0, %v1968_v4  ;;  %v4639_v3 = vmul.f32 0.5, %v4509_v16  ;;  %3608 = vrcp.f32 %v950_v43 }
 0x14f   :  { %v4642_v39 = vmul.f32 %v2284_v36, %v4354_v29  ;;  %v1971_v48 = vmul.f32 %v3601_v40, %v1651_v2  ;;  %v1589_v18 = vadd.f32 0.2548296, %v1525_v49  ;;  %v4651_v20 = vadd.f32 %v4647_v1, %v4255_v7  ;;  %v4667_v7 = vpop.f32.mrb[40].mxu0 }
 0x150   :  { %v2286_v21 = vadd.f32 1.0, %v2222_v24  ;;  %v1970_v5 = vmul.f32 %v3603_v42, %v1650_v0  ;;  %v1860_v6 = vmul.f32 1.442695, %v1780_v51  ;;  %v4655_v16 = vadd.f32 %v4647_v1, %v4260_v33  ;;  %6319 = vst [vmem:[#allocation29_spill] sm:$0xff] %v4667_v7  ;;  %v4697_v0 = vpop.f32.mrb[41].mxu0 }
 0x151   :  { %v2225_v29 = vsel %vm2097_vm13, %v2033_v8, %v2161_v19  ;;  %v1396_v28 = vmul.f32 %v4602_v32, %v1332_v30  ;;  %v4661_v52 = vmul.f32 0.70710677, %v4651_v20  ;;  %v4665_v15 = vadd.f32 %v4647_v1, %v4263_v25  ;;  %6320 = vst [vmem:[#allocation30_spill] sm:$0xff] %v4697_v0 }
 0x152   :  { %v4670_v31 = vmul.f32 %v2287_v44, %v4370_v10  ;;  %v2160_v50 = vsub.f32 0.0, %v2032_v34  ;;  %vm2099_vm15 = vcmp.ge.f32.partialorder %v4441_v53, 0.0  ;;  %v1719_v33 = vsub.f32 0.0, %v4600_v55 }
 0x153   :  { %v4675_v62 = vmul.f32 0.70710677, %v4655_v16  ;;  %v2035_v8 = vsub.f32 1.0, %v1971_v48  ;;  %vm2098_vm0 = vcmp.ge.f32.partialorder %v4445_v58, 0.0  ;;  %v1653_v36 = vmul.f32 %v4554_v41, %v1589_v18 }
 0x154   :  { %v4680_v25 = vmul.f32 0.5, %v4573_v13  ;;  %v4683_v14 = vand.u32 2147483647, %v4661_v52  ;;  %v2289_v10 = vadd.f32 1.0, %v2225_v29  ;;  %v2034_v4 = vsub.f32 1.0, %v1970_v5 }
 0x155   :  { %v4686_v12 = vand.u32 2147483647, %v4675_v62  ;;  %v4689_v2 = vmul.f32 0.70710677, %v4665_v15  ;;  %v4691_v49 = vpop.eup %3604  ;;  %v4694_v60 = vmul.f32 %v2286_v21, %v4513_v35  ;;  %v1460_v41 = vadd.f32 -0.28449672, %v1396_v28 }
 0x156   :  { %3610 = vpow2.f32 %v1860_v6  ;;  %v889_v13 = vmul.f32 0.3275911, %v4683_v14  ;;  %v3607_v51 = vpop.eup %3606  ;;  %v2224_v43 = vsel %vm2096_vm14, %v2032_v34, %v2160_v50  ;;  %v1143_v40 = vmul.f32 1.0614054, %v4691_v49 }
 0x157   :  { %v1783_v24 = vmul.f32 %v1719_v33, %v4600_v55  ;;  %v888_v19 = vmul.f32 0.3275911, %v4686_v12  ;;  %v2163_v30 = vsub.f32 0.0, %v2035_v8  ;;  %v1973_v42 = vmul.f32 %v3607_v51, %v1653_v36 }
 0x158   :  { %v953_v35 = vadd.f32 1.0, %v889_v13  ;;  %v4705_v44 = vand.u32 2147483647, %v4689_v2  ;;  %v4707_v48 = vpop.eup %3608  ;;  %v2162_v18 = vsub.f32 0.0, %v2034_v4  ;;  %v1207_v21 = vadd.f32 -1.4531521, %v1143_v40 }
 0x159   :  { %v952_v5 = vadd.f32 1.0, %v888_v19  ;;  %v4711_v11 = vadd.f32 %v4647_v1, %v4271_v27  ;;  %v1524_v34 = vmul.f32 %v4602_v32, %v1460_v41  ;;  %v1142_v55 = vmul.f32 1.0614054, %v4707_v48  ;;  %v4721_v41 = vpop.f32.mrb[42].mxu0 }
 0x15a   :  { %v1718_v6 = vsub.f32 0.0, %v4620_v22  ;;  %3612 = vrcp.f32 %v953_v35  ;;  %v2288_v29 = vadd.f32 1.0, %v2224_v43  ;;  %vm2101_vm1 = vcmp.ge.f32.partialorder %v4468_v47, 0.0  ;;  %6321 = vst [vmem:[#allocation31_spill] sm:$0xff] %v4721_v41 }
 0x15b   :  { %v1271_v28 = vmul.f32 %v4691_v49, %v1207_v21  ;;  %3614 = vrcp.f32 %v952_v5  ;;  %v891_v50 = vmul.f32 0.3275911, %v4705_v44  ;;  %v2227_v33 = vsel %vm2099_vm15, %v2035_v8, %v2163_v30 }
 0x15c   :  { %v2037_v27 = vsub.f32 1.0, %v1973_v42  ;;  %v1866_v36 = vmul.f32 1.442695, %v1783_v24  ;;  %v1206_v13 = vadd.f32 -1.4531521, %v1142_v55  ;;  %v2226_v51 = vsel %vm2098_vm0, %v2034_v4, %v2162_v18  ;;  %v4741_v55 = vpop.f32.mrb[43].mxu0 }
 0x15d   :  { %v1335_v40 = vadd.f32 1.4214138, %v1271_v28  ;;  %v955_v43 = vadd.f32 1.0, %v891_v50  ;;  %v4726_v19 = vmul.f32 0.70710677, %v4711_v11  ;;  %v1782_v5 = vmul.f32 %v1718_v6, %v4620_v22  ;;  %6322 = vst [vmem:[#allocation32_spill] sm:$0xff] %v4741_v55 }
 0x15e   :  { %v1588_v35 = vadd.f32 0.2548296, %v1524_v34  ;;  %v1270_v21 = vmul.f32 %v4707_v48, %v1206_v13  ;;  %v4732_v53 = vadd.f32 %v4647_v1, %v4284_v17  ;;  %v4735_v8 = vmul.f32 %v2289_v10, %v4517_v61 }
 0x15f   :  { %v1399_v58 = vmul.f32 %v4691_v49, %v1335_v40  ;;  %3616 = vrcp.f32 %v955_v43  ;;  %v4739_v4 = vand.u32 2147483647, %v4726_v19  ;;  %v2291_v30 = vadd.f32 1.0, %v2227_v33 }
 0x160   :  { %v3611_v24 = vpop.eup %3610  ;;  %v2290_v42 = vadd.f32 1.0, %v2226_v51  ;;  %v2165_v18 = vsub.f32 0.0, %v2037_v27  ;;  %v1334_v34 = vadd.f32 1.4214138, %v1270_v21  ;;  %v4744_v22 = vmul.f32 %v2288_v29, %v4529_v37  ;;  %v6323_v37 = vld [vmem:[#allocation8_spill] sm:$0xff] }
 0x161   :  { %v4747_v17 = vmul.f32 0.5, %v4585_v57  ;;  %v1721_v61 = vsub.f32 0.0, %v4683_v14  ;;  %v890_v10 = vmul.f32 0.3275911, %v4739_v4  ;;  %v1652_v6 = vmul.f32 %v4602_v32, %v1588_v35 }
 0x162   :  { %3618 = vpow2.f32 %v1866_v36  ;;  %v1864_v28 = vmul.f32 1.442695, %v1782_v5  ;;  %v4753_v50 = vmul.f32 0.70710677, %v4732_v53  ;;  %v1463_v33 = vadd.f32 -0.28449672, %v1399_v58 }
 0x163   :  { %v1398_v13 = vmul.f32 %v4707_v48, %v1334_v34  ;;  %v954_v51 = vadd.f32 1.0, %v890_v10  ;;  %v4758_v29 = vadd.f32 %v4647_v1, %v6323_v37  ;;  %v4763_v40 = vmul.f32 %v2291_v30, %v4593_v56 }
 0x164   :  { %v4760_v57 = vpop.eup %3612  ;;  %v4766_v32 = vmul.f32 %v2290_v42, %v4596_v59  ;;  %v2229_v36 = vsel %vm2101_vm1, %v2037_v27, %v2165_v18  ;;  %v4771_v43 = vand.u32 2147483647, %v4753_v50  ;;  %v1785_v5 = vmul.f32 %v1721_v61, %v4683_v14 }
 0x165   :  { %6324 = vst [vmem:[#allocation8_spill] sm:$0xff] %v4763_v40  ;;  %v4773_v35 = vpop.eup %3614  ;;  %v1145_v21 = vmul.f32 1.0614054, %v4760_v57  ;;  %v1720_v58 = vsub.f32 0.0, %v4686_v12  ;;  %3620 = vrcp.f32 %v954_v51  ;;  %v4778_v56 = vmul.f32 %v3611_v24, %v1652_v6 }
 0x166   :  { %6325 = vst [vmem:[#allocation33_spill] sm:$0xff] %v4766_v32  ;;  %v4781_v59 = vmul.f32 0.5, %v4651_v20  ;;  %v1144_v47 = vmul.f32 1.0614054, %v4773_v35  ;;  %v893_v27 = vmul.f32 0.3275911, %v4771_v43  ;;  %v1527_v30 = vmul.f32 %v4691_v49, %v1463_v33 }
 0x167   :  { %v1462_v42 = vadd.f32 -0.28449672, %v1398_v13  ;;  %v1209_v18 = vadd.f32 -1.4531521, %v1145_v21  ;;  %v4787_v34 = vmul.f32 0.70710677, %v4758_v29  ;;  %v1784_v37 = vmul.f32 %v1720_v58, %v4686_v12 }
 0x168   :  { %v2293_v14 = vadd.f32 1.0, %v2229_v36  ;;  %v4790_v61 = vmul.f32 0.5, %v4655_v16  ;;  %v1208_v24 = vadd.f32 -1.4531521, %v1144_v47  ;;  %v957_v10 = vadd.f32 1.0, %v893_v27  ;;  %v6326_v21 = vld [vmem:[#allocation5_spill] sm:$0xff] }
 0x169   :  { %v4792_v6 = vpop.eup %3616  ;;  %v1273_v20 = vmul.f32 %v4760_v57, %v1209_v18  ;;  %v1870_v51 = vmul.f32 1.442695, %v1785_v5  ;;  %v4797_v33 = vand.u32 2147483647, %v4787_v34  ;;  %v2036_v13 = vsub.f32 1.0, %v4778_v56  ;;  %v2406_v47 = vld [vmem:[%s6279_s3 + $0x10] sm:$0xff] }
 0x16a   :  { %vm2100_vm2 = vcmp.ge.f32.partialorder %v6326_v21, 0.0  ;;  %v1272_v36 = vmul.f32 %v4773_v35, %v1208_v24  ;;  %v1147_v16 = vmul.f32 1.0614054, %v4792_v6  ;;  %3622 = vrcp.f32 %v957_v10  ;;  %v2407_v56 = vld [vmem:[%s6279_s3 + $0x18] sm:$0xff] }
 0x16b   :  { %v1591_v27 = vadd.f32 0.2548296, %v1527_v30  ;;  %v1526_v5 = vmul.f32 %v4707_v48, %v1462_v42  ;;  %v1337_v12 = vadd.f32 1.4214138, %v1273_v20  ;;  %v1723_v58 = vsub.f32 0.0, %v4705_v44  ;;  %v4819_v20 = vpop.f32.mrb[44].mxu0 }
 0x16c   :  { %v3619_v18 = vpop.eup %3618  ;;  %3624 = vpow2.f32 %v1864_v28  ;;  %v1336_v24 = vadd.f32 1.4214138, %v1272_v36  ;;  %v1211_v55 = vadd.f32 -1.4531521, %v1147_v16  ;;  %v892_v10 = vmul.f32 0.3275911, %v4797_v33 }
 0x16d   :  { %v4813_v41 = vmul.f32 %v2293_v14, %v4636_v63  ;;  %v1401_v30 = vmul.f32 %v4760_v57, %v1337_v12  ;;  %v1868_v0 = vmul.f32 1.442695, %v1784_v37  ;;  %v4817_v42 = vmul.f32 0.5, %v4665_v15  ;;  %6328 = vst [vmem:[#allocation34_spill] sm:$0xff] %v4819_v20 }
 0x16e   :  { %v2164_v7 = vsub.f32 0.0, %v2036_v13  ;;  %v1400_v26 = vmul.f32 %v4773_v35, %v1336_v24  ;;  %v1275_v28 = vmul.f32 %v4792_v6, %v1211_v55  ;;  %v956_v36 = vadd.f32 1.0, %v892_v10  ;;  %v4832_v24 = vpop.f32.mrb[45].mxu0 }
 0x16f   :  { %6327 = vst [vmem:[#allocation5_spill] sm:$0xff] %v4813_v41  ;;  %v4823_v16 = vpop.eup %3620  ;;  %v1655_v54 = vmul.f32 %v4691_v49, %v1591_v27  ;;  %v1590_v63 = vadd.f32 0.2548296, %v1526_v5  ;;  %v1465_v14 = vadd.f32 -0.28449672, %v1401_v30  ;;  %v3532_v9 = vpack.c.bf16 %v2407_v56, %v2406_v47  ;;  %6329 = vst [vmem:[#allocation35_spill] sm:$0xff] %v4832_v24 }
 0x170   :  { %3626 = vpow2.f32 %v1870_v51  ;;  %v1464_v37 = vadd.f32 -0.28449672, %v1400_v26  ;;  %v1339_v12 = vadd.f32 1.4214138, %v1275_v28  ;;  %v1787_v15 = vmul.f32 %v1723_v58, %v4705_v44  ;;  %v6330_v26 = vld [vmem:[#allocation9_spill] sm:$0xff] }
 0x171   :  { %v1529_v20 = vmul.f32 %v4760_v57, %v1465_v14  ;;  %v4829_v41 = vmul.f32 0.5, %v4711_v11  ;;  %v1146_v55 = vmul.f32 1.0614054, %v4823_v16  ;;  %3628 = vrcp.f32 %v956_v36  ;;  %3533 = vmatprep.subr.bf16.mxu1 %v3532_v9 }
 0x172   :  { %3630 = vpow2.f32 %v1868_v0  ;;  %v1403_v49 = vmul.f32 %v4792_v6, %v1339_v12  ;;  %v1722_v51 = vsub.f32 0.0, %v4739_v4  ;;  %3535 = vmatpush3.bf16.msra.mxu1 %v3532_v9  ;;  %v4838_v44 = vadd.f32 %v4647_v1, %v6330_v26 }
 0x173   :  { %v2228_v11 = vsel %vm2100_vm2, %v2036_v13, %v2164_v7  ;;  %v1975_v47 = vmul.f32 %v3619_v18, %v1655_v54  ;;  %v1654_v27 = vmul.f32 %v4707_v48, %v1590_v63  ;;  %v1210_v5 = vadd.f32 -1.4531521, %v1146_v55  ;;  %v6331_v18 = vld [vmem:[#allocation10_spill] sm:$0xff] }
 0x174   :  { %v4843_v58 = vpop.eup %3622  ;;  %v1593_v56 = vadd.f32 0.2548296, %v1529_v20  ;;  %v1528_v0 = vmul.f32 %v4773_v35, %v1464_v37  ;;  %v1874_v10 = vmul.f32 1.442695, %v1787_v15  ;;  %v1725_v30 = vsub.f32 0.0, %v4771_v43 }
 0x175   :  { %v1467_v9 = vadd.f32 -0.28449672, %v1403_v49  ;;  %v1274_v28 = vmul.f32 %v4823_v16, %v1210_v5  ;;  %v4849_v36 = vmul.f32 0.5, %v4732_v53  ;;  %v1149_v7 = vmul.f32 1.0614054, %v4843_v58 }
 0x176   :  { %v3625_v54 = vpop.eup %3624  ;;  %v2292_v13 = vadd.f32 1.0, %v2228_v11  ;;  %vm2103_vm3 = vcmp.ge.f32.partialorder %v4589_v45, 0.0  ;;  %v1786_v48 = vmul.f32 %v1722_v51, %v4739_v4  ;;  %v4855_v21 = vmul.f32 0.70710677, %v4838_v44 }
 0x177   :  { %v1124_v20 = vmul.f32 1.0614054, %v6331_v18  ;;  %v2039_v63 = vsub.f32 1.0, %v1975_v47  ;;  %v1974_v14 = vmul.f32 %v3625_v54, %v1654_v27  ;;  %v1338_v37 = vadd.f32 1.4214138, %v1274_v28 }
 0x178   :  { %v1213_v12 = vadd.f32 -1.4531521, %v1149_v7  ;;  %v1657_v53 = vmul.f32 %v4760_v57, %v1593_v56  ;;  %v1592_v15 = vadd.f32 0.2548296, %v1528_v0  ;;  %v1789_v55 = vmul.f32 %v1725_v30, %v4771_v43 }
 0x179   :  { %v4861_v49 = vand.u32 2147483647, %v4855_v21  ;;  %v1531_v26 = vmul.f32 %v4792_v6, %v1467_v9  ;;  %v1402_v4 = vmul.f32 %v4823_v16, %v1338_v37  ;;  %v1188_v11 = vadd.f32 -1.4531521, %v1124_v20 }
 0x17a   :  { %v1277_v51 = vmul.f32 %v4843_v58, %v1213_v12  ;;  %v3627_v5 = vpop.eup %3626  ;;  %vm2102_vm4 = vcmp.ge.f32.partialorder %v4606_v38, 0.0  ;;  %3632 = vpow2.f32 %v1874_v10  ;;  %v1872_v47 = vmul.f32 1.442695, %v1786_v48  ;;  %v4873_v12 = vpop.f32.mrb[46].mxu0 }
 0x17b   :  { %v1724_v57 = vsub.f32 0.0, %v4797_v33  ;;  %v895_v27 = vmul.f32 0.3275911, %v4861_v49  ;;  %v4869_v43 = vpop.eup %3628  ;;  %v2167_v56 = vsub.f32 0.0, %v2039_v63  ;;  %v2038_v0 = vsub.f32 1.0, %v1974_v14 }
 0x17c   :  { %v1466_v30 = vadd.f32 -0.28449672, %v1402_v4  ;;  %v1341_v9 = vadd.f32 1.4214138, %v1277_v51  ;;  %v3631_v28 = vpop.eup %3630  ;;  %v1656_v7 = vmul.f32 %v4773_v35, %v1592_v15  ;;  %v1878_v54 = vmul.f32 1.442695, %v1789_v55 }
 0x17d   :  { %v1148_v20 = vmul.f32 1.0614054, %v4869_v43  ;;  %v959_v37 = vadd.f32 1.0, %v895_v27  ;;  %v1977_v10 = vmul.f32 %v3627_v5, %v1657_v53  ;;  %v1595_v48 = vadd.f32 0.2548296, %v1531_v26  ;;  %v6332_v51 = vld [vmem:[#allocation12_spill] sm:$0xff] }
 0x17e   :  { %v1405_v24 = vmul.f32 %v4843_v58, %v1341_v9  ;;  %v1252_v40 = vmul.f32 %v6331_v18, %v1188_v11  ;;  %v1530_v32 = vmul.f32 %v4823_v16, %v1466_v30  ;;  %3634 = vpow2.f32 %v1872_v47  ;;  %v4889_v5 = vpop.f32.mrb[47].mxu0 }
 0x17f   :  { %v1212_v14 = vadd.f32 -1.4531521, %v1148_v20  ;;  %v1788_v4 = vmul.f32 %v1724_v57, %v4797_v33  ;;  %v2231_v35 = vsel %vm2103_vm3, %v2039_v63, %v2167_v56  ;;  %v2166_v15 = vsub.f32 0.0, %v2038_v0 }
 0x180   :  { %v1469_v55 = vadd.f32 -0.28449672, %v1405_v24  ;;  %3636 = vrcp.f32 %v959_v37  ;;  %vm2105_vm5 = vcmp.ge.f32.partialorder %v4661_v52, 0.0  ;;  %v4882_v53 = vmul.f32 %v3631_v28, %v1656_v7 }
 0x181   :  { %3638 = vpow2.f32 %v1878_v54  ;;  %v1276_v26 = vmul.f32 %v4869_v43, %v1212_v14  ;;  %v4887_v11 = vadd.f32 %v4647_v1, %v6332_v51  ;;  %v2041_v33 = vsub.f32 1.0, %v1977_v10 }
 0x182   :  { %v1659_v45 = vmul.f32 %v4792_v6, %v1595_v48  ;;  %v1533_v63 = vmul.f32 %v4843_v58, %v1469_v55  ;;  %v1316_v24 = vadd.f32 1.4214138, %v1252_v40  ;;  %v4894_v47 = vmul.f32 %v2292_v13, %v4639_v3  ;;  %v6333_v6 = vld [vmem:[#allocation13_spill] sm:$0xff] }
 0x183   :  { %v2295_v57 = vadd.f32 1.0, %v2231_v35  ;;  %v1594_v27 = vadd.f32 0.2548296, %v1530_v32  ;;  %v1340_v56 = vadd.f32 1.4214138, %v1276_v26  ;;  %v2230_v30 = vsel %vm2102_vm4, %v2038_v0, %v2166_v15 }
 0x184   :  { %v1597_v9 = vadd.f32 0.2548296, %v1533_v63  ;;  %v1876_v28 = vmul.f32 1.442695, %v1788_v4  ;;  %v1380_v7 = vmul.f32 %v6331_v18, %v1316_v24  ;;  %v3633_v54 = vpop.eup %3632  ;;  %v2040_v20 = vsub.f32 1.0, %v4882_v53 }
 0x185   :  { %vm2104_vm6 = vcmp.ge.f32.partialorder %v4675_v62, 0.0  ;;  %v1404_v40 = vmul.f32 %v4869_v43, %v1340_v56  ;;  %v4903_v3 = vmul.f32 0.70710677, %v4887_v11  ;;  %v4907_v32 = vadd.f32 %v4647_v1, %v6333_v6  ;;  %v6334_v56 = vld [vmem:[#allocation3_spill] sm:$0xff] }
 0x186   :  { %v2169_v38 = vsub.f32 0.0, %v2041_v33  ;;  %v4909_v13 = vmul.f32 %v3633_v54, %v1659_v45  ;;  %v4912_v0 = vmul.f32 0.5, %v4758_v29  ;;  %v1444_v37 = vadd.f32 -0.28449672, %v1380_v7  ;;  %v6335_v7 = vld [vmem:[#allocation14_spill] sm:$0xff] }
 0x187   :  { %v4915_v10 = vmul.f32 %v2295_v57, %v4680_v25  ;;  %v2294_v48 = vadd.f32 1.0, %v2230_v30  ;;  %v1658_v14 = vmul.f32 %v4823_v16, %v1594_v27  ;;  %v4919_v4 = vand.u32 2147483647, %v4903_v3  ;;  %v4937_v57 = vpop.f32.mrb[48].mxu0 }
 0x188   :  { %v1661_v35 = vmul.f32 %v4843_v58, %v1597_v9  ;;  %v1468_v15 = vadd.f32 -0.28449672, %v1404_v40  ;;  %v1508_v55 = vmul.f32 %v6331_v18, %v1444_v37  ;;  %v4924_v53 = vmul.f32 0.70710677, %v4907_v32  ;;  %v3635_v29 = vpop.eup %3634 }
 0x189   :  { %v2168_v26 = vsub.f32 0.0, %v2040_v20  ;;  %3640 = vpow2.f32 %v1876_v28  ;;  %v1727_v25 = vsub.f32 0.0, %v4861_v49  ;;  %v894_v51 = vmul.f32 0.3275911, %v4919_v4 }
 0x18a   :  { %v4928_v45 = vpop.eup %3636  ;;  %v2233_v16 = vsel %vm2105_vm5, %v2041_v33, %v2169_v38  ;;  %v2043_v58 = vsub.f32 1.0, %v4909_v13  ;;  %vm2107_vm7 = vcmp.ge.f32.partialorder %v4689_v2, 0.0  ;;  %v1572_v63 = vadd.f32 0.2548296, %v1508_v55  ;;  %v4948_v38 = vpop.f32.mrb[49].mxu0 }
 0x18b   :  { %v4935_v24 = vand.u32 2147483647, %v4924_v53  ;;  %v3639_v27 = vpop.eup %3638  ;;  %vm2084_vm8 = vcmp.ge.f32.partialorder %v6334_v56, 0.0  ;;  %v1978_v30 = vmul.f32 %v3635_v29, %v1658_v14  ;;  %v1151_v9 = vmul.f32 1.0614054, %v4928_v45  ;;  %6336 = vst [vmem:[#allocation9_spill] sm:$0xff] %v4948_v38 }
 0x18c   :  { %v958_v28 = vadd.f32 1.0, %v894_v51  ;;  %v4943_v52 = vadd.f32 %v4647_v1, %v6335_v7  ;;  %v1981_v33 = vmul.f32 %v3639_v27, %v1661_v35  ;;  %v1532_v54 = vmul.f32 %v4869_v43, %v1468_v15  ;;  %v6337_v35 = vld [vmem:[#allocation11_spill] sm:$0xff] }
 0x18d   :  { %v1636_v40 = vmul.f32 %v6331_v18, %v1572_v63  ;;  %v897_v6 = vmul.f32 0.3275911, %v4935_v24  ;;  %v4951_v13 = vmul.f32 0.5, %v4838_v44  ;;  %v1215_v37 = vadd.f32 -1.4531521, %v1151_v9 }
 0x18e   :  { %v1791_v14 = vmul.f32 %v1727_v25, %v4861_v49  ;;  %3642 = vrcp.f32 %v958_v28  ;;  %v2297_v55 = vadd.f32 1.0, %v2233_v16  ;;  %v2232_v29 = vsel %vm2104_vm6, %v2040_v20, %v2168_v26 }
 0x18f   :  { %vm2106_vm9 = vcmp.ge.f32.partialorder %v4726_v19, 0.0  ;;  %v1956_v15 = vmul.f32 %v6337_v35, %v1636_v40  ;;  %vm2415_vm10 = vcmask 261120   ;;  %v961_v18 = vadd.f32 1.0, %v897_v6  ;;  %v6338_v6 = vld [vmem:[#allocation17_spill] sm:$0xff]  ;;  %v4984_v35 = vpop.f32.mrb[50].mxu0 }
 0x190   :  { %v4959_v51 = vmul.f32 %v2294_v48, %v4747_v17  ;;  %v2171_v63 = vsub.f32 0.0, %v2043_v58  ;;  %v2042_v44 = vsub.f32 1.0, %v1978_v30  ;;  %vm2109_vm11 = vcmp.ge.f32.partialorder %v4753_v50, 0.0  ;;  %6339 = vst [vmem:[#allocation10_spill] sm:$0xff] %v4984_v35  ;;  %v5022_v50 = vpop.f32.mrb[51].mxu0 }
 0x191   :  { %v1279_v49 = vmul.f32 %v4928_v45, %v1215_v37  ;;  %v2045_v25 = vsub.f32 1.0, %v1981_v33  ;;  %v1596_v16 = vadd.f32 0.2548296, %v1532_v54  ;;  %v2020_v27 = vsub.f32 1.0, %v1956_v15  ;;  %6343 = vst [vmem:[#allocation12_spill] sm:$0xff] %v5022_v50 }
 0x192   :  { %v4964_v62 = vmul.f32 0.70710677, %v4943_v52  ;;  %v2296_v20 = vadd.f32 1.0, %v2232_v29  ;;  %v1882_v9 = vmul.f32 1.442695, %v1791_v14  ;;  %3644 = vrcp.f32 %v961_v18 }
 0x193   :  { %v1343_v26 = vadd.f32 1.4214138, %v1279_v49  ;;  %v4967_v28 = vmul.f32 %v2297_v55, %v4781_v59  ;;  %v2148_v17 = vsub.f32 0.0, %v2020_v27  ;;  %v1726_v48 = vsub.f32 0.0, %v4919_v4  ;;  %v3641_v7 = vpop.eup %3640 }
 0x194   :  { %v4971_v30 = vand.u32 2147483647, %v4964_v62  ;;  %v2235_v33 = vsel %vm2107_vm7, %v2043_v58, %v2171_v63  ;;  %v2170_v54 = vsub.f32 0.0, %v2042_v44  ;;  %v4978_v37 = vadd.f32 %v4647_v1, %v6338_v6  ;;  %v6344_v6 = vld [vmem:[#allocation15_spill] sm:$0xff] }
 0x195   :  { %v1407_v40 = vmul.f32 %v4928_v45, %v1343_v26  ;;  %v2173_v14 = vsub.f32 0.0, %v2045_v25  ;;  %v1660_v59 = vmul.f32 %v4869_v43, %v1596_v16  ;;  %v2212_v55 = vsel %vm2084_vm8, %v2020_v27, %v2148_v17  ;;  %v6340_v26 = vld [vmem:[#allocation19_spill] sm:$0xff]  ;;  %v6341_v27 = vld [vmem:[#allocation4_spill] sm:$0xff] }
 0x196   :  { %v896_v29 = vmul.f32 0.3275911, %v4971_v30  ;;  %v4987_v2 = vmul.f32 %v2296_v20, %v4790_v61  ;;  %3646 = vpow2.f32 %v1882_v9  ;;  %v2276_v15 = vadd.f32 1.0, %v2212_v55 }
 0x197   :  { %v1471_v58 = vadd.f32 -0.28449672, %v1407_v40  ;;  %v2299_v18 = vadd.f32 1.0, %v2235_v33  ;;  %v1790_v63 = vmul.f32 %v1726_v48, %v4919_v4  ;;  %v4992_v43 = vadd.f32 %v4647_v1, %v6340_v26 }
 0x198   :  { %v960_v49 = vadd.f32 1.0, %v896_v29  ;;  %v4994_v56 = vpop.eup %3642  ;;  %v2234_v16 = vsel %vm2106_vm9, %v2042_v44, %v2170_v54  ;;  %v2340_v17 = vmul.f32 %v2276_v15, %v6341_v27  ;;  %v5000_v61 = vmul.f32 0.5, %v4887_v11  ;;  %v6342_v44 = vld [vmem:[#allocation20_spill] sm:$0xff] }
 0x199   :  { %v5003_v20 = vmul.f32 0.70710677, %v4978_v37  ;;  %v2237_v4 = vsel %vm2109_vm11, %v2045_v25, %v2173_v14  ;;  %v5007_v9 = vmul.f32 %v3641_v7, %v1660_v59  ;;  %v1150_v48 = vmul.f32 1.0614054, %v4994_v56 }
 0x19a   :  { %3648 = vrcp.f32 %v960_v49  ;;  %v1535_v33 = vmul.f32 %v4928_v45, %v1471_v58  ;;  %3432 = vmatprep.mubr.msk.f32.mxu1 %vm2415_vm10, %v2340_v17  ;;  %v5013_v19 = vmul.f32 0.5, %v4907_v32  ;;  %v5020_v54 = vadd.f32 %v4647_v1, %v6342_v44  ;;  %v6345_v58 = vld [vmem:[#allocation18_spill] sm:$0xff] }
 0x19b   :  { %v5016_v11 = vand.u32 2147483647, %v5003_v20  ;;  %v5025_v25 = vmul.f32 %v2299_v18, %v4817_v42  ;;  %v1214_v7 = vadd.f32 -1.4531521, %v1150_v48  ;;  %v1880_v40 = vmul.f32 1.442695, %v1790_v63  ;;  %3433 = vmatmul.mubr.msk.f32.vlgmr.msra.gmra.mrb[0].mxu1 %vm2415_vm10, %v6344_v6 }
 0x19c   :  { %v5030_v32 = vmul.f32 0.70710677, %v4992_v43  ;;  %v5032_v14 = vpop.eup %3644  ;;  %v2298_v59 = vadd.f32 1.0, %v2234_v16  ;;  %v2301_v55 = vadd.f32 1.0, %v2237_v4  ;;  %v1729_v29 = vsub.f32 0.0, %v4935_v24  ;;  %3435 = vmatprep.mubr.msk.f32.mxu1 %vm2415_vm10, %v6345_v58 }
 0x19d   :  { %v899_v42 = vmul.f32 0.3275911, %v5016_v11  ;;  %v2044_v15 = vsub.f32 1.0, %v5007_v9  ;;  %vm2108_vm12 = vcmp.ge.f32.partialorder %v4787_v34, 0.0  ;;  %v1278_v18 = vmul.f32 %v4994_v56, %v1214_v7  ;;  %v6346_v9 = vld [vmem:[#allocation16_spill] sm:$0xff] }
 0x19e   :  { %v1153_v63 = vmul.f32 1.0614054, %v5032_v14  ;;  %v5043_v49 = vand.u32 2147483647, %v5030_v32  ;;  %v1599_v26 = vadd.f32 0.2548296, %v1535_v33  ;;  %3650 = vpow2.f32 %v1880_v40 }
 0x19f   :  { %v1728_v16 = vsub.f32 0.0, %v4971_v30  ;;  %v963_v27 = vadd.f32 1.0, %v899_v42  ;;  %v5047_v17 = vmul.f32 0.70710677, %v5020_v54  ;;  %v1342_v4 = vadd.f32 1.4214138, %v1278_v18  ;;  %3436 = vmatmul.mubr.msk.f32.gmra.mrb[2].mxu1 %vm2415_vm10, %v6346_v9 }
 0x1a0   :  { %v1217_v48 = vadd.f32 -1.4531521, %v1153_v63  ;;  %v898_v44 = vmul.f32 0.3275911, %v5043_v49  ;;  %v3647_v7 = vpop.eup %3646  ;;  %v5053_v6 = vmul.f32 %v2298_v59, %v4829_v41  ;;  %v1793_v33 = vmul.f32 %v1729_v29, %v4935_v24  ;;  %v6347_v42 = vld [vmem:[#allocation23_spill] sm:$0xff]  ;;  %v5071_v29 = vpop.f32.mrb[52].mxu0 }
 0x1a1   :  { %v5057_v58 = vmul.f32 0.5, %v4943_v52  ;;  %3652 = vrcp.f32 %v963_v27  ;;  %3438 = vmatprep.mubr.msk.f32.mxu1 %vm2415_vm10, %v6347_v42  ;;  %v1406_v40 = vmul.f32 %v4994_v56, %v1342_v4  ;;  %v5064_v9 = vand.u32 2147483647, %v5047_v17  ;;  %6348 = vst [vmem:[#allocation13_spill] sm:$0xff] %v5071_v29 }
 0x1a2   :  { %v1281_v18 = vmul.f32 %v5032_v14, %v1217_v48  ;;  %v962_v63 = vadd.f32 1.0, %v898_v44  ;;  %v5067_v41 = vmul.f32 %v2301_v55, %v4849_v36  ;;  %v2172_v59 = vsub.f32 0.0, %v2044_v15  ;;  %v6349_v48 = vld [vmem:[#allocation22_spill] sm:$0xff] }
 0x1a3   :  { %v1663_v24 = vmul.f32 %v4928_v45, %v1599_v26  ;;  %v1792_v52 = vmul.f32 %v1728_v16, %v4971_v30  ;;  %v1470_v42 = vadd.f32 -0.28449672, %v1406_v40  ;;  %3439 = vmatmul.mubr.msk.f32.gmra.mrb[4].mxu1 %vm2415_vm10, %v6349_v48  ;;  %v901_v44 = vmul.f32 0.3275911, %v5064_v9  ;;  %v6350_v45 = vld [vmem:[#allocation21_spill] sm:$0xff] }
 0x1a4   :  { %v5073_v27 = vpop.eup %3648  ;;  %v1345_v4 = vadd.f32 1.4214138, %v1281_v18  ;;  %3654 = vrcp.f32 %v962_v63  ;;  %v1886_v50 = vmul.f32 1.442695, %v1793_v33  ;;  %v1731_v55 = vsub.f32 0.0, %v5016_v11  ;;  %3441 = vmatprep.mubr.msk.f32.mxu1 %vm2415_vm10, %v4577_v23  ;;  %v6351_v18 = vld [vmem:[#allocation24_spill] sm:$0xff] }
 0x1a5   :  { %v1152_v36 = vmul.f32 1.0614054, %v5073_v27  ;;  %v5084_v30 = vadd.f32 %v4647_v1, %v6350_v45  ;;  %v1534_v26 = vmul.f32 %v4994_v56, %v1470_v42  ;;  %v965_v40 = vadd.f32 1.0, %v901_v44  ;;  %v6352_v42 = vld [vmem:[#allocation26_spill] sm:$0xff] }
 0x1a6   :  { %v1409_v16 = vmul.f32 %v5032_v14, %v1345_v4  ;;  %v5090_v63 = vadd.f32 %v4647_v1, %v6351_v18  ;;  %v2236_v33 = vsel %vm2108_vm12, %v2044_v15, %v2172_v59  ;;  %v1884_v29 = vmul.f32 1.442695, %v1792_v52 }
 0x1a7   :  { %v1216_v48 = vadd.f32 -1.4531521, %v1152_v36  ;;  %v5095_v23 = vmul.f32 0.5, %v4978_v37  ;;  %v5097_v35 = vmul.f32 %v3647_v7, %v1663_v24  ;;  %v1598_v45 = vadd.f32 0.2548296, %v1534_v26  ;;  %3442 = vmatmul.mubr.msk.f32.gmra.mrb[6].mxu1 %vm2415_vm10, %v6352_v42  ;;  %v5109_v37 = vpop.f32.mrb[53].mxu0 }
 0x1a8   :  { %v1473_v38 = vadd.f32 -0.28449672, %v1409_v16  ;;  %3656 = vrcp.f32 %v965_v40  ;;  %v1795_v44 = vmul.f32 %v1731_v55, %v5016_v11  ;;  %v1730_v34 = vsub.f32 0.0, %v5043_v49  ;;  %3444 = vmatprep.mubr.msk.f32.mxu1 %vm2415_vm10, %v4642_v39  ;;  %6353 = vst [vmem:[#allocation3_spill] sm:$0xff] %v5109_v37  ;;  %v3651_v7 = vpop.eup %3650 }
 0x1a9   :  { %v1280_v4 = vmul.f32 %v5073_v27, %v1216_v48  ;;  %v5105_v15 = vmul.f32 0.70710677, %v5084_v30  ;;  %v1662_v59 = vmul.f32 %v4994_v56, %v1598_v45  ;;  %3658 = vpow2.f32 %v1886_v50 }
 0x1aa   :  { %v1537_v24 = vmul.f32 %v5032_v14, %v1473_v38  ;;  %v5114_v52 = vmul.f32 0.70710677, %v5090_v63  ;;  %v5118_v36 = vadd.f32 1.0, %v2236_v33  ;;  %3660 = vpow2.f32 %v1884_v29 }
 0x1ab   :  { %v5116_v11 = vpop.eup %3652  ;;  %v1344_v55 = vadd.f32 1.4214138, %v1280_v4  ;;  %v836_v26 = vand.u32 2147483647, %v5105_v15  ;;  %v2047_v39 = vsub.f32 1.0, %v5097_v35  ;;  %vm2111_vm13 = vcmp.ge.f32.partialorder %v4855_v21, 0.0  ;;  %3445 = vmatmul.mubr.msk.f32.gmra.mrb[8].mxu1 %vm2415_vm10, %v4615_v46 }
 0x1ac   :  { %v1155_v56 = vmul.f32 1.0614054, %v5116_v11  ;;  %v1733_v38 = vsub.f32 0.0, %v5064_v9  ;;  %v5126_v50 = vand.u32 2147483647, %v5114_v52  ;;  %v1794_v29 = vmul.f32 %v1730_v34, %v5043_v49  ;;  %3447 = vmatprep.mubr.msk.f32.mxu1 %vm2415_vm10, %v4694_v60 }
 0x1ad   :  { %v1408_v16 = vmul.f32 %v5073_v27, %v1344_v55  ;;  %v1890_v40 = vmul.f32 1.442695, %v1795_v44  ;;  %v900_v18 = vmul.f32 0.3275911, %v836_v26  ;;  %v5136_v33 = vmul.f32 %v3651_v7, %v1662_v59 }
 0x1ae   :  { %v5134_v35 = vpop.eup %3654  ;;  %v1601_v48 = vadd.f32 0.2548296, %v1537_v24  ;;  %v1219_v45 = vadd.f32 -1.4531521, %v1155_v56  ;;  %v903_v42 = vmul.f32 0.3275911, %v5126_v50  ;;  %v1797_v60 = vmul.f32 %v1733_v38, %v5064_v9 }
 0x1af   :  { %v1472_v4 = vadd.f32 -0.28449672, %v1408_v16  ;;  %v5140_v46 = vmul.f32 0.5, %v4992_v43  ;;  %v1154_v44 = vmul.f32 1.0614054, %v5134_v35  ;;  %v964_v55 = vadd.f32 1.0, %v900_v18  ;;  %3448 = vmatmul.mubr.msk.f32.gmra.mrb[10].mxu1 %vm2415_vm10, %v4670_v31 }
 0x1b0   :  { %v2175_v49 = vsub.f32 0.0, %v2047_v39  ;;  %v1283_v34 = vmul.f32 %v5116_v11, %v1219_v45  ;;  %v967_v37 = vadd.f32 1.0, %v903_v42  ;;  %v1888_v24 = vmul.f32 1.442695, %v1794_v29  ;;  %3450 = vmatprep.mubr.msk.f32.mxu1 %vm2415_vm10, %v4744_v22 }
 0x1b1   :  { %v1536_v7 = vmul.f32 %v5073_v27, %v1472_v4  ;;  %v1218_v59 = vadd.f32 -1.4531521, %v1154_v44  ;;  %3662 = vrcp.f32 %v964_v55  ;;  %v2046_v56 = vsub.f32 1.0, %v5136_v33  ;;  %v6354_v4 = vld [vmem:[#allocation25_spill] sm:$0xff] }
 0x1b2   :  { %v5150_v43 = vpop.eup %3656  ;;  %vm2110_vm14 = vcmp.ge.f32.partialorder %v4903_v3, 0.0  ;;  %v1347_v16 = vadd.f32 1.4214138, %v1283_v34  ;;  %v1732_v9 = vsub.f32 0.0, %v836_v26  ;;  %3664 = vrcp.f32 %v967_v37  ;;  %v6355_v34 = vld [vmem:[#allocation33_spill] sm:$0xff] }
 0x1b3   :  { %v1665_v38 = vmul.f32 %v5032_v14, %v1601_v48  ;;  %v1600_v31 = vadd.f32 0.2548296, %v1536_v7  ;;  %v1282_v18 = vmul.f32 %v5134_v35, %v1218_v59  ;;  %v1157_v29 = vmul.f32 1.0614054, %v5150_v43  ;;  %v3659_v45 = vpop.eup %3658  ;;  %3451 = vmatmul.mubr.msk.f32.gmra.mrb[12].mxu1 %vm2415_vm10, %v4735_v8 }
 0x1b4   :  { %v1411_v42 = vmul.f32 %v5116_v11, %v1347_v16  ;;  %3666 = vpow2.f32 %v1890_v40  ;;  %v1894_v22 = vmul.f32 1.442695, %v1797_v60  ;;  %v5160_v33 = vadd.f32 %v4647_v1, %v6354_v4  ;;  %v3661_v37 = vpop.eup %3660  ;;  %3453 = vmatprep.mubr.msk.f32.mxu1 %vm2415_vm10, %v6355_v34  ;;  %v5169_v40 = vpop.f32.mrb[54].mxu0 }
 0x1b5   :  { %v2239_v14 = vsel %vm2111_vm13, %v2047_v39, %v2175_v49  ;;  %v1664_v48 = vmul.f32 %v5073_v27, %v1600_v31  ;;  %v1346_v44 = vadd.f32 1.4214138, %v1282_v18  ;;  %v1221_v55 = vadd.f32 -1.4531521, %v1157_v29 }
 0x1b6   :  { %v1475_v60 = vadd.f32 -0.28449672, %v1411_v42  ;;  %3668 = vpow2.f32 %v1888_v24  ;;  %v1796_v1 = vmul.f32 %v1732_v9, %v836_v26  ;;  %v1735_v7 = vsub.f32 0.0, %v5126_v50  ;;  %v6356_v26 = vld [vmem:[#allocation8_spill] sm:$0xff] }
 0x1b7   :  { %v2174_v59 = vsub.f32 0.0, %v2046_v56  ;;  %v5172_v8 = vmul.f32 %v3659_v45, %v1665_v38  ;;  %v1410_v21 = vmul.f32 %v5134_v35, %v1346_v44  ;;  %v1285_v39 = vmul.f32 %v5150_v43, %v1221_v55  ;;  %3454 = vmatmul.mubr.msk.f32.gmra.mrb[14].mxu1 %vm2415_vm10, %v6356_v26 }
 0x1b8   :  { %v5176_v27 = vmul.f32 %v3661_v37, %v1664_v48  ;;  %v1539_v49 = vmul.f32 %v5116_v11, %v1475_v60  ;;  %v5180_v16 = vmul.f32 0.5, %v5020_v54  ;;  %v5183_v31 = vmul.f32 0.70710677, %v5160_v33  ;;  %3456 = vmatprep.mubr.msk.f32.mxu1 %vm2415_vm10, %v4894_v47 }
 0x1b9   :  { %v5187_v24 = vadd.f32 1.0, %v2239_v14  ;;  %v1474_v9 = vadd.f32 -0.28449672, %v1410_v21  ;;  %v1349_v38 = vadd.f32 1.4214138, %v1285_v39  ;;  %3670 = vpow2.f32 %v1894_v22  ;;  %v5203_v14 = vpop.f32.mrb[55].mxu0 }
 0x1ba   :  { %v1603_v18 = vadd.f32 0.2548296, %v1539_v49  ;;  %v1892_v29 = vmul.f32 1.442695, %v1796_v1  ;;  %v1799_v45 = vmul.f32 %v1735_v7, %v5126_v50  ;;  %v5193_v54 = vand.u32 2147483647, %v5183_v31 }
 0x1bb   :  { %v5195_v42 = vpop.eup %3662  ;;  %v2238_v4 = vsel %vm2110_vm14, %v2046_v56, %v2174_v59  ;;  %v2049_v37 = vsub.f32 1.0, %v5172_v8  ;;  %vm2112_vm15 = vcmp.ge.f32.partialorder %v4964_v62, 0.0  ;;  %v1538_v22 = vmul.f32 %v5134_v35, %v1474_v9  ;;  %v6357_v56 = vld [vmem:[#allocation5_spill] sm:$0xff] }
 0x1bc   :  { %v1413_v47 = vmul.f32 %v5150_v43, %v1349_v38  ;;  %v5205_v48 = vpop.eup %3664  ;;  %v2048_v50 = vsub.f32 1.0, %v5176_v27  ;;  %v1667_v44 = vmul.f32 %v5116_v11, %v1603_v18  ;;  %v1156_v55 = vmul.f32 1.0614054, %v5195_v42  ;;  %3457 = vmatmul.mubr.msk.f32.gmra.mrb[16].mxu1 %vm2415_vm10, %v6357_v56  ;;  %v5224_v27 = vld [vmem:[%s6278_s2] ss:$0 sm:$0xff] }
 0x1bd   :  { %v902_v3 = vmul.f32 0.3275911, %v5193_v54  ;;  %v5215_v34 = vmul.f32 %v5118_v36, %v4912_v0  ;;  %v1602_v60 = vadd.f32 0.2548296, %v1538_v22  ;;  %v1159_v7 = vmul.f32 1.0614054, %v5205_v48  ;;  %3459 = vmatprep.mubr.msk.f32.mxu1 %vm2415_vm10, %v4959_v51 }
 0x1be   :  { %v1477_v1 = vadd.f32 -0.28449672, %v1413_v47  ;;  %v3667_v59 = vpop.eup %3666  ;;  %vm2113_vm0 = vcmp.ge.f32.partialorder %v4924_v53, 0.0  ;;  %v1220_v11 = vadd.f32 -1.4531521, %v1156_v55  ;;  %v6358_v0 = vld [vmem:[#allocation27_spill] sm:$0xff] }
 0x1bf   :  { %v1898_v21 = vmul.f32 1.442695, %v1799_v45  ;;  %v966_v39 = vadd.f32 1.0, %v902_v3  ;;  %v5228_v36 = vadd.f32 %v5224_v27, %v6358_v0  ;;  %v2302_v49 = vadd.f32 1.0, %v2238_v4 }
 0x1c0   :  { %v1666_v26 = vmul.f32 %v5134_v35, %v1602_v60  ;;  %v1541_v51 = vmul.f32 %v5150_v43, %v1477_v1  ;;  %v1223_v9 = vadd.f32 -1.4531521, %v1159_v7  ;;  %v3669_v38 = vpop.eup %3668  ;;  %v2176_v18 = vsub.f32 0.0, %v2048_v50  ;;  %3460 = vmatmul.mubr.msk.f32.gmra.mrb[18].mxu1 %vm2415_vm10, %v4915_v10  ;;  %v5248_v7 = vpop.f32.mrb[56].mxu0 }
 0x1c1   :  { %v5232_v22 = vmul.f32 %v3667_v59, %v1667_v44  ;;  %vm2114_vm1 = vcmp.ge.f32.partialorder %v5030_v32, 0.0  ;;  %v1284_v45 = vmul.f32 %v5195_v42, %v1220_v11  ;;  %3672 = vrcp.f32 %v966_v39  ;;  %3462 = vmatprep.mubr.msk.f32.mxu1 %vm2415_vm10, %v4987_v2 }
 0x1c2   :  { %v1986_v47 = vmul.f32 %v3669_v38, %v1666_v26  ;;  %v1605_v55 = vadd.f32 0.2548296, %v1541_v51  ;;  %3674 = vpow2.f32 %v1892_v29  ;;  %v1287_v35 = vmul.f32 %v5205_v48, %v1223_v9  ;;  %v6359_v26 = vld [vmem:[#allocation28_spill] sm:$0xff] }
 0x1c3   :  { %v2177_v4 = vsub.f32 0.0, %v2049_v37  ;;  %v1348_v44 = vadd.f32 1.4214138, %v1284_v45  ;;  %3676 = vpow2.f32 %v1898_v21  ;;  %v5244_v3 = vmul.f32 0.70710677, %v5228_v36  ;;  %v3671_v56 = vpop.eup %3670 }
 0x1c4   :  { %v2050_v60 = vsub.f32 1.0, %v1986_v47  ;;  %v1669_v10 = vmul.f32 %v5150_v43, %v1605_v55  ;;  %v1351_v1 = vadd.f32 1.4214138, %v1287_v35  ;;  %v1734_v29 = vsub.f32 0.0, %v5193_v54  ;;  %3463 = vmatmul.mubr.msk.f32.gmra.mrb[20].mxu1 %vm2415_vm10, %v4967_v28 }
 0x1c5   :  { %v2240_v2 = vsel %vm2112_vm15, %v2048_v50, %v2176_v18  ;;  %v2051_v59 = vsub.f32 1.0, %v5232_v22  ;;  %v1412_v11 = vmul.f32 %v5195_v42, %v1348_v44  ;;  %v841_v21 = vand.u32 2147483647, %v5244_v3  ;;  %3465 = vmatprep.mubr.msk.f32.mxu1 %vm2415_vm10, %v5053_v6  ;;  %v5268_v50 = vpop.f32.mrb[57].mxu0 }
 0x1c6   :  { %vm2115_vm2 = vcmp.ge.f32.partialorder %v5003_v20, 0.0  ;;  %v2178_v43 = vsub.f32 0.0, %v2050_v60  ;;  %v5259_v39 = vmul.f32 0.5, %v5084_v30  ;;  %v1415_v0 = vmul.f32 %v5205_v48, %v1351_v1 }
 0x1c7   :  { %v5264_v62 = vadd.f32 %v5224_v27, %v6359_v26  ;;  %v5270_v51 = vmul.f32 %v3671_v56, %v1669_v10  ;;  %v1476_v28 = vadd.f32 -0.28449672, %v1412_v11  ;;  %v5273_v9 = vmul.f32 0.5, %v5090_v63 }
 0x1c8   :  { %v905_v38 = vmul.f32 0.3275911, %v841_v21  ;;  %v2366_v30 = vmul.f32 %v2302_v49, %v5000_v61  ;;  %v2241_v18 = vsel %vm2113_vm0, %v2049_v37, %v2177_v4  ;;  %v2304_v22 = vadd.f32 1.0, %v2240_v2  ;;  %3466 = vmatmul.mubr.msk.f32.gmra.mrb[22].mxu1 %vm2415_vm10, %v5025_v25  ;;  %v6360_v25 = vld [vmem:[#allocation6_spill] sm:$0xff] }
 0x1c9   :  { %v1479_v45 = vadd.f32 -0.28449672, %v1415_v0  ;;  %v2179_v47 = vsub.f32 0.0, %v2051_v59  ;;  %v1540_v6 = vmul.f32 %v5195_v42, %v1476_v28  ;;  %v1798_v55 = vmul.f32 %v1734_v29, %v5193_v54  ;;  %3468 = vmatprep.mubr.msk.f32.mxu1 %vm2415_vm10, %v5215_v34 }
 0x1ca   :  { %v969_v35 = vadd.f32 1.0, %v905_v38  ;;  %v2242_v63 = vsel %vm2114_vm1, %v2050_v60, %v2178_v43  ;;  %v1737_v8 = vsub.f32 0.0, %v841_v21  ;;  %v5288_v53 = vmul.f32 0.70710677, %v5264_v62 }
 0x1cb   :  { %v1543_v61 = vmul.f32 %v5205_v48, %v1479_v45  ;;  %v5292_v37 = vpop.eup %3672  ;;  %v2053_v54 = vsub.f32 1.0, %v5270_v51  ;;  %vm2117_vm3 = vcmp.ge.f32.partialorder %v5047_v17, 0.0  ;;  %v1604_v49 = vadd.f32 0.2548296, %v1540_v6 }
 0x1cc   :  { %3678 = vrcp.f32 %v969_v35  ;;  %v5298_v32 = vadd.f32 %v5224_v27, %v6360_v25  ;;  %v3675_v4 = vpop.eup %3674  ;;  %v2367_v44 = vmul.f32 %v5187_v24, %v4951_v13  ;;  %vm2116_vm4 = vcmp.ge.f32.partialorder %v5105_v15, 0.0  ;;  %3469 = vmatmul.mubr.msk.f32.gmra.mrb[24].mxu1 %vm2415_vm10, %v5067_v41 }
 0x1cd   :  { %v1607_v56 = vadd.f32 0.2548296, %v1543_v61  ;;  %v1158_v34 = vmul.f32 1.0614054, %v5292_v37  ;;  %v840_v60 = vand.u32 2147483647, %v5288_v53  ;;  %v3677_v10 = vpop.eup %3676  ;;  %v2368_v29 = vmul.f32 %v2304_v22, %v5057_v58  ;;  %3471 = vmatprep.mubr.msk.f32.mxu1 %vm2415_vm10, %v2366_v30 }
 0x1ce   :  { %v2305_v1 = vadd.f32 1.0, %v2241_v18  ;;  %v1668_v2 = vmul.f32 %v5195_v42, %v1604_v49  ;;  %v1896_v11 = vmul.f32 1.442695, %v1798_v55  ;;  %v2306_v43 = vadd.f32 1.0, %v2242_v63  ;;  %v5317_v22 = vpop.f32.mrb[58].mxu0  ;;  %v6361_v30 = vld [vmem:[#allocation7_spill] sm:$0xff] }
 0x1cf   :  { %v1671_v13 = vmul.f32 %v5205_v48, %v1607_v56  ;;  %v1222_v24 = vadd.f32 -1.4531521, %v1158_v34  ;;  %v904_v0 = vmul.f32 0.3275911, %v840_v60  ;;  %v2243_v26 = vsel %vm2115_vm2, %v2051_v59, %v2179_v47 }
 0x1d0   :  { %v1988_v51 = vmul.f32 %v3675_v4, %v1668_v2  ;;  %v1801_v28 = vmul.f32 %v1737_v8, %v841_v21  ;;  %v5314_v58 = vmul.f32 0.70710677, %v5298_v32  ;;  %v2181_v42 = vsub.f32 0.0, %v2053_v54  ;;  %3472 = vmatmul.mubr.msk.f32.gmra.mrb[26].mxu1 %vm2415_vm10, %v2367_v44 }
 0x1d1   :  { %v1991_v38 = vmul.f32 %v3677_v10, %v1671_v13  ;;  %v1286_v18 = vmul.f32 %v5292_v37, %v1222_v24  ;;  %v968_v41 = vadd.f32 1.0, %v904_v0  ;;  %v1736_v45 = vsub.f32 0.0, %v840_v60  ;;  %3474 = vmatprep.mubr.msk.f32.mxu1 %vm2415_vm10, %v2368_v29 }
 0x1d2   :  { %v2052_v48 = vsub.f32 1.0, %v1988_v51  ;;  %v5320_v6 = vand.u32 2147483647, %v5314_v58  ;;  %v5324_v20 = vadd.f32 %v5224_v27, %v6361_v30  ;;  %v2369_v59 = vmul.f32 %v2305_v1, %v5013_v19  ;;  %v5337_v19 = vpop.f32.mrb[59].mxu0  ;;  %v6362_v1 = vld [vmem:[#allocation29_spill] sm:$0xff] }
 0x1d3   :  { %v2370_v21 = vmul.f32 %v2306_v43, %v5140_v46  ;;  %v1350_v47 = vadd.f32 1.4214138, %v1286_v18  ;;  %3680 = vrcp.f32 %v968_v41  ;;  %v2307_v55 = vadd.f32 1.0, %v2243_v26  ;;  %v6363_v18 = vld [vmem:[#allocation30_spill] sm:$0xff] }
 0x1d4   :  { %v2180_v35 = vsub.f32 0.0, %v2052_v48  ;;  %3682 = vpow2.f32 %v1896_v11  ;;  %v907_v63 = vmul.f32 0.3275911, %v5320_v6  ;;  %v2245_v61 = vsel %vm2117_vm3, %v2053_v54, %v2181_v42  ;;  %3475 = vmatmul.mubr.msk.f32.gmra.mrb[28].mxu1 %vm2415_vm10, %v2369_v59 }
 0x1d5   :  { %v2055_v8 = vsub.f32 1.0, %v1991_v38  ;;  %v1414_v49 = vmul.f32 %v5292_v37, %v1350_v47  ;;  %v5335_v25 = vmul.f32 0.70710677, %v5324_v20  ;;  %v1902_v44 = vmul.f32 1.442695, %v1801_v28  ;;  %3477 = vmatprep.mubr.msk.f32.mxu1 %vm2415_vm10, %v2370_v21 }
 0x1d6   :  { %v5339_v46 = vpop.eup %3678  ;;  %v2244_v4 = vsel %vm2116_vm4, %v2052_v48, %v2180_v35  ;;  %v1800_v56 = vmul.f32 %v1736_v45, %v840_v60  ;;  %v971_v34 = vadd.f32 1.0, %v907_v63  ;;  %v5347_v29 = vadd.f32 %v5224_v27, %v6362_v1  ;;  %v5371_v48 = vpop.f32.mrb[60].mxu0  ;;  %v6364_v63 = vld [vmem:[#allocation31_spill] sm:$0xff] }
 0x1d7   :  { %v2308_v17 = vadd.f32 1.0, %v2244_v4  ;;  %v1478_v54 = vadd.f32 -0.28449672, %v1414_v49  ;;  %v1161_v10 = vmul.f32 1.0614054, %v5339_v46  ;;  %v2371_v2 = vmul.f32 %v2307_v55, %v5095_v23 }
 0x1d8   :  { %v2309_v11 = vadd.f32 1.0, %v2245_v61  ;;  %3684 = vrcp.f32 %v971_v34  ;;  %v842_v15 = vand.u32 2147483647, %v5335_v25  ;;  %v2183_v43 = vsub.f32 0.0, %v2055_v8 }
 0x1d9   :  { %v2372_v60 = vmul.f32 %v2308_v17, %v5259_v39  ;;  %v1542_v13 = vmul.f32 %v5292_v37, %v1478_v54  ;;  %v1225_v24 = vadd.f32 -1.4531521, %v1161_v10  ;;  %vm2119_vm5 = vcmp.ge.f32.partialorder %v5114_v52, 0.0  ;;  %3478 = vmatmul.mubr.msk.f32.gmra.mrb[30].mxu1 %vm2415_vm10, %v2371_v2 }
 0x1da   :  { %v5356_v0 = vmul.f32 0.5, %v5160_v33  ;;  %3686 = vpow2.f32 %v1902_v44  ;;  %v906_v26 = vmul.f32 0.3275911, %v842_v15  ;;  %v1900_v28 = vmul.f32 1.442695, %v1800_v56 }
 0x1db   :  { %v1606_v23 = vadd.f32 0.2548296, %v1542_v13  ;;  %v1289_v51 = vmul.f32 %v5339_v46, %v1225_v24  ;;  %v5361_v42 = vmul.f32 0.70710677, %v5347_v29  ;;  %3480 = vmatprep.mubr.msk.f32.mxu1 %vm2415_vm10, %v2372_v60  ;;  %v2373_v39 = vmul.f32 %v2309_v11, %v5180_v16  ;;  %v5402_v24 = vpop.f32.mrb[61].mxu0 }
 0x1dc   :  { %vm2118_vm6 = vcmp.ge.f32.partialorder %v5183_v31, 0.0  ;;  %v1739_v33 = vsub.f32 0.0, %v5320_v6  ;;  %v970_v38 = vadd.f32 1.0, %v906_v26  ;;  %v5369_v41 = vadd.f32 %v5224_v27, %v6363_v18 }
 0x1dd   :  { %v5373_v45 = vpop.eup %3680  ;;  %v2247_v30 = vsel %vm2119_vm5, %v2055_v8, %v2183_v43  ;;  %v1670_v59 = vmul.f32 %v5292_v37, %v1606_v23  ;;  %v1353_v21 = vadd.f32 1.4214138, %v1289_v51  ;;  %v845_v16 = vand.u32 2147483647, %v5361_v42  ;;  %3481 = vmatmul.mubr.msk.f32.gmra.mrb[32].mxu1 %vm2415_vm10, %v2373_v39 }
 0x1de   :  { %v3683_v47 = vpop.eup %3682  ;;  %v5380_v55 = vmul.f32 0.5, %v5228_v36  ;;  %v1160_v35 = vmul.f32 1.0614054, %v5373_v45  ;;  %3688 = vrcp.f32 %v970_v38  ;;  %v5385_v61 = vadd.f32 %v5224_v27, %v6364_v63 }
 0x1df   :  { %v1990_v52 = vmul.f32 %v3683_v47, %v1670_v59  ;;  %v1417_v8 = vmul.f32 %v5339_v46, %v1353_v21  ;;  %3690 = vpow2.f32 %v1900_v28  ;;  %v909_v37 = vmul.f32 0.3275911, %v845_v16 }
 0x1e0   :  { %v2311_v49 = vadd.f32 1.0, %v2247_v30  ;;  %v1224_v4 = vadd.f32 -1.4531521, %v1160_v35  ;;  %v1803_v44 = vmul.f32 %v1739_v33, %v5320_v6  ;;  %v5391_v36 = vmul.f32 0.70710677, %v5369_v41 }
 0x1e1   :  { %v2054_v56 = vsub.f32 1.0, %v1990_v52  ;;  %v1481_v34 = vadd.f32 -0.28449672, %v1417_v8  ;;  %v1738_v17 = vsub.f32 0.0, %v842_v15  ;;  %v973_v54 = vadd.f32 1.0, %v909_v37 }
 0x1e2   :  { %v5393_v10 = vpop.eup %3684  ;;  %v1288_v1 = vmul.f32 %v5373_v45, %v1224_v4  ;;  %v1741_v2 = vsub.f32 0.0, %v845_v16  ;;  %v844_v11 = vand.u32 2147483647, %v5391_v36  ;;  %v5398_v60 = vmul.f32 0.70710677, %v5385_v61 }
 0x1e3   :  { %v2182_v43 = vsub.f32 0.0, %v2054_v56  ;;  %v1545_v6 = vmul.f32 %v5339_v46, %v1481_v34  ;;  %v1163_v13 = vmul.f32 1.0614054, %v5393_v10  ;;  %3692 = vrcp.f32 %v973_v54 }
 0x1e4   :  { %v3687_v26 = vpop.eup %3686  ;;  %v2375_v23 = vmul.f32 %v2311_v49, %v5273_v9  ;;  %v1352_v51 = vadd.f32 1.4214138, %v1288_v1  ;;  %v1906_v28 = vmul.f32 1.442695, %v1803_v44  ;;  %v908_v39 = vmul.f32 0.3275911, %v844_v11 }
 0x1e5   :  { %v2246_v33 = vsel %vm2118_vm6, %v2054_v56, %v2182_v43  ;;  %v1609_v38 = vadd.f32 0.2548296, %v1545_v6  ;;  %v1227_v18 = vadd.f32 -1.4531521, %v1163_v13  ;;  %v1802_v30 = vmul.f32 %v1738_v17, %v842_v15  ;;  %v6365_v49 = vld [vmem:[#allocation32_spill] sm:$0xff]  ;;  %v5427_v13 = vpop.f32.mrb[62].mxu0 }
 0x1e6   :  { %v2310_v59 = vadd.f32 1.0, %v2246_v33  ;;  %v1416_v21 = vmul.f32 %v5373_v45, %v1352_v51  ;;  %v972_v47 = vadd.f32 1.0, %v908_v39  ;;  %v1740_v35 = vsub.f32 0.0, %v844_v11 }
 0x1e7   :  { %v1673_v63 = vmul.f32 %v5339_v46, %v1609_v38  ;;  %v1291_v52 = vmul.f32 %v5393_v10, %v1227_v18  ;;  %v1805_v8 = vmul.f32 %v1741_v2, %v845_v16  ;;  %v5411_v9 = vand.u32 2147483647, %v5398_v60 }
 0x1e8   :  { %v5413_v37 = vpop.eup %3688  ;;  %v2374_v31 = vmul.f32 %v2310_v59, %v5356_v0  ;;  %vm2121_vm7 = vcmp.ge.f32.partialorder %v5244_v3, 0.0  ;;  %v1480_v15 = vadd.f32 -0.28449672, %v1416_v21  ;;  %3694 = vrcp.f32 %v972_v47 }
 0x1e9   :  { %v5419_v4 = vadd.f32 %v5224_v27, %v6365_v49  ;;  %v3691_v44 = vpop.eup %3690  ;;  %v1993_v46 = vmul.f32 %v3687_v26, %v1673_v63  ;;  %v1355_v56 = vadd.f32 1.4214138, %v1291_v52  ;;  %3696 = vpow2.f32 %v1906_v28 }
 0x1ea   :  { %v1162_v16 = vmul.f32 1.0614054, %v5413_v37  ;;  %v1544_v34 = vmul.f32 %v5373_v45, %v1480_v15  ;;  %v1904_v17 = vmul.f32 1.442695, %v1802_v30  ;;  %v1804_v54 = vmul.f32 %v1740_v35, %v844_v11  ;;  %3483 = vmatprep.mubr.msk.f32.mxu1 %vm2415_vm10, %v2374_v31 }
 0x1eb   :  { %v911_v0 = vmul.f32 0.3275911, %v5411_v9  ;;  %v2057_v1 = vsub.f32 1.0, %v1993_v46  ;;  %v1419_v2 = vmul.f32 %v5393_v10, %v1355_v56  ;;  %v1910_v6 = vmul.f32 1.442695, %v1805_v8  ;;  %3484 = vmatmul.mubr.msk.f32.gmra.mrb[34].mxu1 %vm2415_vm10, %v2375_v23  ;;  %v5442_v8 = vpop.f32.mrb[63].mxu0 }
 0x1ec   :  { %v1226_v43 = vadd.f32 -1.4531521, %v1162_v16  ;;  %v712_v26 = vmul.f32 0.5, %v5264_v62  ;;  %v1608_v51 = vadd.f32 0.2548296, %v1544_v34  ;;  %vm2120_vm8 = vcmp.ge.f32.partialorder %v5288_v53, 0.0 }
 0x1ed   :  { %v975_v28 = vadd.f32 1.0, %v911_v0  ;;  %v5431_v39 = vmul.f32 0.70710677, %v5419_v4  ;;  %v5433_v11 = vpop.eup %3692  ;;  %v2185_v33 = vsub.f32 0.0, %v2057_v1  ;;  %v1483_v38 = vadd.f32 -0.28449672, %v1419_v2 }
 0x1ee   :  { %v1290_v18 = vmul.f32 %v5413_v37, %v1226_v43  ;;  %v1672_v30 = vmul.f32 %v5373_v45, %v1608_v51  ;;  %v1165_v23 = vmul.f32 1.0614054, %v5433_v11  ;;  %v1908_v59 = vmul.f32 1.442695, %v1804_v54 }
 0x1ef   :  { %3698 = vrcp.f32 %v975_v28  ;;  %v1547_v62 = vmul.f32 %v5393_v10, %v1483_v38  ;;  %v846_v47 = vand.u32 2147483647, %v5431_v39  ;;  %v1743_v52 = vsub.f32 0.0, %v5411_v9 }
 0x1f0   :  { %v1354_v21 = vadd.f32 1.4214138, %v1290_v18  ;;  %3700 = vpow2.f32 %v1904_v17  ;;  %v1992_v35 = vmul.f32 %v3691_v44, %v1672_v30  ;;  %v1229_v63 = vadd.f32 -1.4531521, %v1165_v23  ;;  %v6366_v44 = vld [vmem:[#allocation34_spill] sm:$0xff] }
 0x1f1   :  { %3702 = vpow2.f32 %v1910_v6  ;;  %v2249_v45 = vsel %vm2121_vm7, %v2057_v1, %v2185_v33  ;;  %v1611_v31 = vadd.f32 0.2548296, %v1547_v62  ;;  %v910_v49 = vmul.f32 0.3275911, %v846_v47 }
 0x1f2   :  { %v1418_v15 = vmul.f32 %v5413_v37, %v1354_v21  ;;  %v5447_v46 = vpop.eup %3694  ;;  %v2056_v56 = vsub.f32 1.0, %v1992_v35  ;;  %v1293_v16 = vmul.f32 %v5433_v11, %v1229_v63  ;;  %3704 = vpow2.f32 %v1908_v59 }
 0x1f3   :  { %v5452_v34 = vadd.f32 %v5224_v27, %v6366_v44  ;;  %v3697_v17 = vpop.eup %3696  ;;  %v1675_v54 = vmul.f32 %v5393_v10, %v1611_v31  ;;  %v1164_v3 = vmul.f32 1.0614054, %v5447_v46  ;;  %v974_v1 = vadd.f32 1.0, %v910_v49 }
 0x1f4   :  { %v1482_v0 = vadd.f32 -0.28449672, %v1418_v15  ;;  %v2313_v2 = vadd.f32 1.0, %v2249_v45  ;;  %v2184_v43 = vsub.f32 0.0, %v2056_v56  ;;  %vm2123_vm9 = vcmp.ge.f32.partialorder %v5314_v58, 0.0 }
 0x1f5   :  { %v1357_v6 = vadd.f32 1.4214138, %v1293_v16  ;;  %v1807_v51 = vmul.f32 %v1743_v52, %v5411_v9  ;;  %v1995_v28 = vmul.f32 %v3697_v17, %v1675_v54  ;;  %v1228_v38 = vadd.f32 -1.4531521, %v1164_v3 }
 0x1f6   :  { %v1546_v33 = vmul.f32 %v5413_v37, %v1482_v0  ;;  %3706 = vrcp.f32 %v974_v1  ;;  %v2248_v18 = vsel %vm2120_vm8, %v2056_v56, %v2184_v43  ;;  %v1742_v30 = vsub.f32 0.0, %v846_v47  ;;  %v6367_v43 = vld [vmem:[#allocation35_spill] sm:$0xff] }
 0x1f7   :  { %v1421_v10 = vmul.f32 %v5433_v11, %v1357_v6  ;;  %v5463_v23 = vmul.f32 0.70710677, %v5452_v34  ;;  %v2312_v59 = vadd.f32 1.0, %v2248_v18  ;;  %v2059_v62 = vsub.f32 1.0, %v1995_v28 }
 0x1f8   :  { %v1610_v21 = vadd.f32 0.2548296, %v1546_v33  ;;  %v1292_v35 = vmul.f32 %v5447_v46, %v1228_v38  ;;  %v2377_v63 = vmul.f32 %v2313_v2, %v5380_v55  ;;  %v1914_v45 = vmul.f32 1.442695, %v1807_v51 }
 0x1f9   :  { %v5466_v9 = vpop.eup %3698  ;;  %v1485_v52 = vadd.f32 -0.28449672, %v1421_v10  ;;  %v849_v53 = vand.u32 2147483647, %v5463_v23  ;;  %v2376_v15 = vmul.f32 %v2312_v59, %v712_v26  ;;  %v2187_v49 = vsub.f32 0.0, %v2059_v62 }
 0x1fa   :  { %v3701_v31 = vpop.eup %3700  ;;  %v1674_v56 = vmul.f32 %v5413_v37, %v1610_v21  ;;  %v1356_v16 = vadd.f32 1.4214138, %v1292_v35  ;;  %v1167_v54 = vmul.f32 1.0614054, %v5466_v9  ;;  %v1806_v0 = vmul.f32 %v1742_v30, %v846_v47 }
 0x1fb   :  { %v3703_v44 = vpop.eup %3702  ;;  %v1549_v17 = vmul.f32 %v5433_v11, %v1485_v52  ;;  %v913_v3 = vmul.f32 0.3275911, %v849_v53  ;;  %v714_v1 = vmul.f32 0.5, %v5324_v20  ;;  %v5477_v6 = vadd.f32 %v5224_v27, %v6367_v43  ;;  %3486 = vmatprep.mubr.msk.f32.mxu1 %vm2415_vm10, %v2376_v15 }
 0x1fc   :  { %v1994_v55 = vmul.f32 %v3701_v31, %v1674_v56  ;;  %v1420_v2 = vmul.f32 %v5447_v46, %v1356_v16  ;;  %v3705_v37 = vpop.eup %3704  ;;  %vm2122_vm11 = vcmp.ge.f32.partialorder %v5335_v25, 0.0  ;;  %v1231_v51 = vadd.f32 -1.4531521, %v1167_v54  ;;  %3487 = vmatmul.mubr.msk.f32.gmra.mrb[36].mxu1 %vm2415_vm10, %v2377_v63 }
 0x1fd   :  { %v1613_v26 = vadd.f32 0.2548296, %v1549_v17  ;;  %v977_v28 = vadd.f32 1.0, %v913_v3  ;;  %v2251_v20 = vsel %vm2123_vm9, %v2059_v62, %v2187_v49  ;;  %3708 = vpow2.f32 %v1914_v45 }
 0x1fe   :  { %v2058_v47 = vsub.f32 1.0, %v1994_v55  ;;  %v1484_v33 = vadd.f32 -0.28449672, %v1420_v2  ;;  %v1295_v18 = vmul.f32 %v5466_v9, %v1231_v51  ;;  %v1912_v10 = vmul.f32 1.442695, %v1806_v0 }
 0x1ff   :  { %v1677_v38 = vmul.f32 %v5433_v11, %v1613_v26  ;;  %3710 = vrcp.f32 %v977_v28  ;;  %v1745_v35 = vsub.f32 0.0, %v849_v53  ;;  %v5490_v63 = vmul.f32 0.70710677, %v5477_v6 }
 0x200   :  { %v5486_v30 = vpop.eup %3706  ;;  %v2186_v59 = vsub.f32 0.0, %v2058_v47  ;;  %v1548_v21 = vmul.f32 %v5447_v46, %v1484_v33  ;;  %v2315_v58 = vadd.f32 1.0, %v2251_v20  ;;  %v1359_v52 = vadd.f32 1.4214138, %v1295_v18 }
 0x201   :  { %v1997_v62 = vmul.f32 %v3703_v44, %v1677_v38  ;;  %v1166_v45 = vmul.f32 1.0614054, %v5486_v30  ;;  %v848_v15 = vand.u32 2147483647, %v5490_v63  ;;  %v5498_v49 = vadd.f32 %v5224_v27, %v4873_v12 }
 0x202   :  { %v2250_v11 = vsel %vm2122_vm11, %v2058_v47, %v2186_v59  ;;  %v1612_v31 = vadd.f32 0.2548296, %v1548_v21  ;;  %v1423_v17 = vmul.f32 %v5466_v9, %v1359_v52  ;;  %v715_v44 = vmul.f32 0.5, %v5298_v32 }
 0x203   :  { %v2314_v56 = vadd.f32 1.0, %v2250_v11  ;;  %v2061_v16 = vsub.f32 1.0, %v1997_v62  ;;  %v1230_v54 = vadd.f32 -1.4531521, %v1166_v45  ;;  %v717_v0 = vmul.f32 0.5, %v5347_v29 }
 0x204   :  { %v1676_v3 = vmul.f32 %v5447_v46, %v1612_v31  ;;  %v912_v25 = vmul.f32 0.3275911, %v848_v15  ;;  %v1487_v43 = vadd.f32 -0.28449672, %v1423_v17  ;;  %v2379_v51 = vmul.f32 %v2315_v58, %v715_v44 }
 0x205   :  { %v2378_v55 = vmul.f32 %v2314_v56, %v714_v1  ;;  %v2189_v2 = vsub.f32 0.0, %v2061_v16  ;;  %v1294_v26 = vmul.f32 %v5486_v30, %v1230_v54  ;;  %3712 = vpow2.f32 %v1912_v10 }
 0x206   :  { %v1996_v12 = vmul.f32 %v3705_v37, %v1676_v3  ;;  %v976_v28 = vadd.f32 1.0, %v912_v25  ;;  %v1551_v20 = vmul.f32 %v5466_v9, %v1487_v43  ;;  %v1809_v33 = vmul.f32 %v1745_v35, %v849_v53 }
 0x207   :  { %v1358_v47 = vadd.f32 1.4214138, %v1294_v26  ;;  %v5507_v32 = vmul.f32 0.70710677, %v5498_v49  ;;  %3489 = vmatprep.mubr.msk.f32.mxu1 %vm2415_vm10, %v2378_v55  ;;  %v3709_v29 = vpop.eup %3708  ;;  %vm2125_vm12 = vcmp.ge.f32.partialorder %v5361_v42, 0.0  ;;  %v716_v46 = vmul.f32 0.5, %v5369_v41 }
 0x208   :  { %v2060_v1 = vsub.f32 1.0, %v1996_v12  ;;  %3714 = vrcp.f32 %v976_v28  ;;  %3490 = vmatmul.mubr.msk.f32.gmra.mrb[38].mxu1 %vm2415_vm10, %v2379_v51  ;;  %v2253_v38 = vsel %vm2125_vm12, %v2061_v16, %v2189_v2  ;;  %v1615_v18 = vadd.f32 0.2548296, %v1551_v20 }
 0x209   :  { %v5513_v37 = vpop.eup %3710  ;;  %v1422_v53 = vmul.f32 %v5486_v30, %v1358_v47  ;;  %v851_v10 = vand.u32 2147483647, %v5507_v32  ;;  %vm2124_vm13 = vcmp.ge.f32.partialorder %v5391_v36, 0.0  ;;  %v1744_v42 = vsub.f32 0.0, %v848_v15 }
 0x20a   :  { %v2188_v59 = vsub.f32 0.0, %v2060_v1  ;;  %v1169_v21 = vmul.f32 1.0614054, %v5513_v37  ;;  %v1679_v41 = vmul.f32 %v5466_v9, %v1615_v18  ;;  %v1918_v58 = vmul.f32 1.442695, %v1809_v33 }
 0x20b   :  { %v1486_v35 = vadd.f32 -0.28449672, %v1422_v53  ;;  %v915_v62 = vmul.f32 0.3275911, %v851_v10  ;;  %v2317_v52 = vadd.f32 1.0, %v2253_v38  ;;  %v5522_v31 = vadd.f32 %v5224_v27, %v4889_v5  ;;  %v6368_v53 = vld [vmem:[#allocation9_spill] sm:$0xff] }
 0x20c   :  { %v2252_v45 = vsel %vm2124_vm13, %v2060_v1, %v2188_v59  ;;  %v1233_v11 = vadd.f32 -1.4531521, %v1169_v21  ;;  %v1999_v16 = vmul.f32 %v3709_v29, %v1679_v41  ;;  %v1808_v44 = vmul.f32 %v1744_v42, %v848_v15 }
 0x20d   :  { %v2316_v56 = vadd.f32 1.0, %v2252_v45  ;;  %v1550_v36 = vmul.f32 %v5486_v30, %v1486_v35  ;;  %v979_v17 = vadd.f32 1.0, %v915_v62  ;;  %v5527_v9 = vmul.f32 0.70710677, %v5522_v31 }
 0x20e   :  { %v1297_v54 = vmul.f32 %v5513_v37, %v1233_v11  ;;  %v5531_v3 = vadd.f32 %v5224_v27, %v4937_v57  ;;  %v2063_v55 = vsub.f32 1.0, %v1999_v16  ;;  %v2381_v43 = vmul.f32 %v2317_v52, %v717_v0 }
 0x20f   :  { %v2380_v25 = vmul.f32 %v2316_v56, %v716_v46  ;;  %v1614_v2 = vadd.f32 0.2548296, %v1550_v36  ;;  %3716 = vrcp.f32 %v979_v17  ;;  %v3713_v5 = vpop.eup %3712  ;;  %v1747_v51 = vsub.f32 0.0, %v851_v10 }
 0x210   :  { %v1361_v26 = vadd.f32 1.4214138, %v1297_v54  ;;  %v850_v12 = vand.u32 2147483647, %v5527_v9  ;;  %v719_v28 = vmul.f32 0.5, %v5385_v61  ;;  %vm2127_vm14 = vcmp.ge.f32.partialorder %v5398_v60, 0.0 }
 0x211   :  { %v1678_v15 = vmul.f32 %v5486_v30, %v1614_v2  ;;  %3718 = vpow2.f32 %v1918_v58  ;;  %3492 = vmatprep.mubr.msk.f32.mxu1 %vm2415_vm10, %v2380_v25  ;;  %v2191_v20 = vsub.f32 0.0, %v2063_v55  ;;  %v718_v47 = vmul.f32 0.5, %v5419_v4 }
 0x212   :  { %v5538_v57 = vpop.eup %3714  ;;  %v1425_v0 = vmul.f32 %v5513_v37, %v1361_v26  ;;  %v914_v33 = vmul.f32 0.3275911, %v850_v12  ;;  %3493 = vmatmul.mubr.msk.f32.gmra.mrb[40].mxu1 %vm2415_vm10, %v2381_v43  ;;  %v1916_v46 = vmul.f32 1.442695, %v1808_v44  ;;  %v5545_v1 = vmul.f32 0.70710677, %v5531_v3 }
 0x213   :  { %v1998_v29 = vmul.f32 %v3713_v5, %v1678_v15  ;;  %v1168_v61 = vmul.f32 1.0614054, %v5538_v57  ;;  %v1811_v38 = vmul.f32 %v1747_v51, %v851_v10  ;;  %v5549_v59 = vadd.f32 %v5224_v27, %v6368_v53 }
 0x214   :  { %v1489_v30 = vadd.f32 -0.28449672, %v1425_v0  ;;  %v978_v18 = vadd.f32 1.0, %v914_v33  ;;  %vm2126_vm15 = vcmp.ge.f32.partialorder %v5431_v39, 0.0  ;;  %v853_v42 = vand.u32 2147483647, %v5545_v1 }
 0x215   :  { %v2062_v4 = vsub.f32 1.0, %v1998_v29  ;;  %v1232_v21 = vadd.f32 -1.4531521, %v1168_v61  ;;  %v2255_v41 = vsel %vm2127_vm14, %v2063_v55, %v2191_v20  ;;  %v5556_v35 = vmul.f32 0.5, %v5452_v34 }
 0x216   :  { %v1553_v58 = vmul.f32 %v5513_v37, %v1489_v30  ;;  %3720 = vrcp.f32 %v978_v18  ;;  %v1746_v52 = vsub.f32 0.0, %v850_v12  ;;  %v917_v45 = vmul.f32 0.3275911, %v853_v42 }
 0x217   :  { %v2190_v10 = vsub.f32 0.0, %v2062_v4  ;;  %v1296_v62 = vmul.f32 %v5538_v57, %v1232_v21  ;;  %3722 = vpow2.f32 %v1916_v46  ;;  %v1922_v56 = vmul.f32 1.442695, %v1811_v38  ;;  %v6369_v46 = vld [vmem:[#allocation10_spill] sm:$0xff] }
 0x218   :  { %v1617_v11 = vadd.f32 0.2548296, %v1553_v58  ;;  %v5561_v16 = vmul.f32 0.70710677, %v5549_v59  ;;  %v2319_v60 = vadd.f32 1.0, %v2255_v41  ;;  %v981_v54 = vadd.f32 1.0, %v917_v45 }
 0x219   :  { %v5563_v36 = vpop.eup %3716  ;;  %v2254_v34 = vsel %vm2126_vm15, %v2062_v4, %v2190_v10  ;;  %v1360_v17 = vadd.f32 1.4214138, %v1296_v62  ;;  %v1810_v26 = vmul.f32 %v1746_v52, %v850_v12  ;;  %v1749_v51 = vsub.f32 0.0, %v853_v42  ;;  %v6370_v52 = vld [vmem:[#allocation12_spill] sm:$0xff] }
 0x21a   :  { %v2318_v44 = vadd.f32 1.0, %v2254_v34  ;;  %v1681_v25 = vmul.f32 %v5513_v37, %v1617_v11  ;;  %v1171_v55 = vmul.f32 1.0614054, %v5563_v36  ;;  %v852_v2 = vand.u32 2147483647, %v5561_v16 }
 0x21b   :  { %v3719_v5 = vpop.eup %3718  ;;  %v1424_v43 = vmul.f32 %v5538_v57, %v1360_v17  ;;  %3724 = vrcp.f32 %v981_v54  ;;  %v2383_v33 = vmul.f32 %v2319_v60, %v719_v28  ;;  %v5573_v37 = vadd.f32 %v5224_v27, %v6369_v46 }
 0x21c   :  { %v2382_v15 = vmul.f32 %v2318_v44, %v718_v47  ;;  %v2001_v20 = vmul.f32 %v3719_v5, %v1681_v25  ;;  %v1235_v0 = vadd.f32 -1.4531521, %v1171_v55  ;;  %v916_v39 = vmul.f32 0.3275911, %v852_v2 }
 0x21d   :  { %v1488_v29 = vadd.f32 -0.28449672, %v1424_v43  ;;  %v1748_v61 = vsub.f32 0.0, %v852_v2  ;;  %vm2129_vm0 = vcmp.ge.f32.partialorder %v5463_v23, 0.0  ;;  %v1813_v47 = vmul.f32 %v1749_v51, %v853_v42  ;;  %v6371_v51 = vld [vmem:[#allocation13_spill] sm:$0xff] }
 0x21e   :  { %v2065_v30 = vsub.f32 1.0, %v2001_v20  ;;  %v1299_v38 = vmul.f32 %v5563_v36, %v1235_v0  ;;  %v980_v18 = vadd.f32 1.0, %v916_v39  ;;  %3495 = vmatprep.mubr.msk.f32.mxu1 %vm2415_vm10, %v2382_v15  ;;  %v5580_v28 = vmul.f32 0.70710677, %v5573_v37 }
 0x21f   :  { %v1552_v12 = vmul.f32 %v5538_v57, %v1488_v29  ;;  %v1812_v53 = vmul.f32 %v1748_v61, %v852_v2  ;;  %3496 = vmatmul.mubr.msk.f32.gmra.mrb[42].mxu1 %vm2415_vm10, %v2383_v33  ;;  %v720_v21 = vmul.f32 0.5, %v5477_v6  ;;  %v1920_v58 = vmul.f32 1.442695, %v1810_v26 }
 0x220   :  { %v5583_v4 = vpop.eup %3720  ;;  %v1363_v41 = vadd.f32 1.4214138, %v1299_v38  ;;  %3726 = vrcp.f32 %v980_v18  ;;  %v5589_v42 = vadd.f32 %v5224_v27, %v6370_v52  ;;  %v2193_v11 = vsub.f32 0.0, %v2065_v30 }
 0x221   :  { %v1616_v10 = vadd.f32 0.2548296, %v1552_v12  ;;  %3728 = vpow2.f32 %v1922_v56  ;;  %v1170_v62 = vmul.f32 1.0614054, %v5583_v4  ;;  %v3723_v45 = vpop.eup %3722  ;;  %vm2128_vm1 = vcmp.ge.f32.partialorder %v5490_v63, 0.0 }
 0x222   :  { %v1427_v60 = vmul.f32 %v5563_v36, %v1363_v41  ;;  %v855_v34 = vand.u32 2147483647, %v5580_v28  ;;  %v1926_v54 = vmul.f32 1.442695, %v1813_v47  ;;  %v1924_v44 = vmul.f32 1.442695, %v1812_v53 }
 0x223   :  { %v1680_v6 = vmul.f32 %v5538_v57, %v1616_v10  ;;  %v1234_v17 = vadd.f32 -1.4531521, %v1170_v62  ;;  %3730 = vpow2.f32 %v1920_v58  ;;  %v5599_v26 = vmul.f32 0.70710677, %v5589_v42 }
 0x224   :  { %v1491_v56 = vadd.f32 -0.28449672, %v1427_v60  ;;  %v919_v25 = vmul.f32 0.3275911, %v855_v34  ;;  %v1751_v55 = vsub.f32 0.0, %v855_v34  ;;  %v5603_v15 = vadd.f32 %v5224_v27, %v6371_v51 }
 0x225   :  { %v5595_v2 = vpop.eup %3724  ;;  %v2000_v5 = vmul.f32 %v3723_v45, %v1680_v6  ;;  %v1298_v43 = vmul.f32 %v5583_v4, %v1234_v17  ;;  %v2257_v57 = vsel %vm2129_vm0, %v2065_v30, %v2193_v11  ;;  %3732 = vpow2.f32 %v1926_v54 }
 0x226   :  { %v1555_v20 = vmul.f32 %v5563_v36, %v1491_v56  ;;  %v1173_v0 = vmul.f32 1.0614054, %v5595_v2  ;;  %v983_v39 = vadd.f32 1.0, %v919_v25  ;;  %v854_v61 = vand.u32 2147483647, %v5599_v26 }
 0x227   :  { %v2064_v33 = vsub.f32 1.0, %v2000_v5  ;;  %v1362_v29 = vadd.f32 1.4214138, %v1298_v43  ;;  %v1815_v18 = vmul.f32 %v1751_v55, %v855_v34  ;;  %v2321_v12 = vadd.f32 1.0, %v2257_v57 }
 0x228   :  { %v1619_v46 = vadd.f32 0.2548296, %v1555_v20  ;;  %v1237_v38 = vadd.f32 -1.4531521, %v1173_v0  ;;  %3734 = vrcp.f32 %v983_v39  ;;  %v918_v23 = vmul.f32 0.3275911, %v854_v61 }
 0x229   :  { %v2192_v27 = vsub.f32 0.0, %v2064_v33  ;;  %v1426_v47 = vmul.f32 %v5583_v4, %v1362_v29  ;;  %v1750_v58 = vsub.f32 0.0, %v854_v61  ;;  %v5616_v10 = vmul.f32 0.70710677, %v5603_v15 }
 0x22a   :  { %v5611_v30 = vpop.eup %3726  ;;  %v1683_v53 = vmul.f32 %v5563_v36, %v1619_v46  ;;  %v1301_v41 = vmul.f32 %v5595_v2, %v1237_v38  ;;  %v982_v60 = vadd.f32 1.0, %v918_v23  ;;  %v1930_v54 = vmul.f32 1.442695, %v1815_v18 }
 0x22b   :  { %v3729_v62 = vpop.eup %3728  ;;  %v2256_v52 = vsel %vm2128_vm1, %v2064_v33, %v2192_v27  ;;  %v1490_v45 = vadd.f32 -0.28449672, %v1426_v47  ;;  %v1172_v11 = vmul.f32 1.0614054, %v5611_v30  ;;  %v5623_v25 = vand.u32 2147483647, %v5616_v10 }
 0x22c   :  { %v2320_v34 = vadd.f32 1.0, %v2256_v52  ;;  %v2003_v6 = vmul.f32 %v3729_v62, %v1683_v53  ;;  %v1365_v17 = vadd.f32 1.4214138, %v1301_v41  ;;  %3736 = vrcp.f32 %v982_v60  ;;  %v6372_v27 = vld [vmem:[#allocation3_spill] sm:$0xff] }
 0x22d   :  { %v1554_v36 = vmul.f32 %v5583_v4, %v1490_v45  ;;  %v1236_v56 = vadd.f32 -1.4531521, %v1172_v11  ;;  %v3731_v55 = vpop.eup %3730  ;;  %v1814_v51 = vmul.f32 %v1750_v58, %v854_v61  ;;  %v2385_v57 = vmul.f32 %v2321_v12, %v5556_v35 }
 0x22e   :  { %v2384_v5 = vmul.f32 %v2320_v34, %v720_v21  ;;  %v2067_v43 = vsub.f32 1.0, %v2003_v6  ;;  %v1429_v63 = vmul.f32 %v5595_v2, %v1365_v17  ;;  %v921_v39 = vmul.f32 0.3275911, %v5623_v25 }
 0x22f   :  { %v1618_v20 = vadd.f32 0.2548296, %v1554_v36  ;;  %v1300_v0 = vmul.f32 %v5611_v30, %v1236_v56  ;;  %v723_v33 = vmul.f32 0.5, %v5498_v49  ;;  %vm2131_vm2 = vcmp.ge.f32.partialorder %v5507_v32, 0.0  ;;  %v3733_v21 = vpop.eup %3732 }
 0x230   :  { %v1493_v29 = vadd.f32 -0.28449672, %v1429_v63  ;;  %3738 = vpow2.f32 %v1924_v44  ;;  %3498 = vmatprep.mubr.msk.f32.mxu1 %vm2415_vm10, %v2384_v5  ;;  %v2195_v46 = vsub.f32 0.0, %v2067_v43  ;;  %v985_v18 = vadd.f32 1.0, %v921_v39  ;;  %v5640_v44 = vld [vmem:[%s6278_s2] ss:$0 sm:$0xff] }
 0x231   :  { %v1682_v38 = vmul.f32 %v5583_v4, %v1618_v20  ;;  %v1364_v61 = vadd.f32 1.4214138, %v1300_v0  ;;  %3499 = vmatmul.mubr.msk.f32.gmra.mrb[44].mxu1 %vm2415_vm10, %v2385_v57  ;;  %3740 = vpow2.f32 %v1930_v54  ;;  %v1928_v49 = vmul.f32 1.442695, %v1814_v51 }
 0x232   :  { %v5634_v35 = vpop.eup %3734  ;;  %v1557_v12 = vmul.f32 %v5595_v2, %v1493_v29  ;;  %v5644_v47 = vadd.f32 %v5640_v44, %v6372_v27  ;;  %v5650_v41 = vadd.f32 %v5640_v44, %v5169_v40  ;;  %v722_v58 = vmul.f32 0.5, %v5522_v31 }
 0x233   :  { %v2002_v4 = vmul.f32 %v3731_v55, %v1682_v38  ;;  %v1428_v23 = vmul.f32 %v5611_v30, %v1364_v61  ;;  %v1175_v53 = vmul.f32 1.0614054, %v5634_v35  ;;  %vm2130_vm3 = vcmp.ge.f32.partialorder %v5527_v9, 0.0 }
 0x234   :  { %v1621_v62 = vadd.f32 0.2548296, %v1557_v12  ;;  %3742 = vrcp.f32 %v985_v18  ;;  %v2259_v52 = vsel %vm2131_vm2, %v2067_v43, %v2195_v46  ;;  %v1753_v6 = vsub.f32 0.0, %v5623_v25 }
 0x235   :  { %v2066_v45 = vsub.f32 1.0, %v2002_v4  ;;  %v1492_v11 = vadd.f32 -0.28449672, %v1428_v23  ;;  %v1239_v60 = vadd.f32 -1.4531521, %v1175_v53  ;;  %3744 = vpow2.f32 %v1928_v49 }
 0x236   :  { %v1685_v34 = vmul.f32 %v5595_v2, %v1621_v62  ;;  %v5659_v40 = vmul.f32 0.70710677, %v5644_v47  ;;  %v5661_v17 = vpop.eup %3736  ;;  %v5666_v32 = vmul.f32 0.70710677, %v5650_v41  ;;  %v2323_v56 = vadd.f32 1.0, %v2259_v52 }
 0x237   :  { %v2194_v31 = vsub.f32 0.0, %v2066_v45  ;;  %v1556_v54 = vmul.f32 %v5611_v30, %v1492_v11  ;;  %v1303_v36 = vmul.f32 %v5634_v35, %v1239_v60  ;;  %v1174_v2 = vmul.f32 1.0614054, %v5661_v17 }
 0x238   :  { %v2005_v55 = vmul.f32 %v3733_v21, %v1685_v34  ;;  %v856_v5 = vand.u32 2147483647, %v5659_v40  ;;  %v5673_v57 = vand.u32 2147483647, %v5666_v32  ;;  %v1817_v61 = vmul.f32 %v1753_v6, %v5623_v25 }
 0x239   :  { %v2258_v43 = vsel %vm2130_vm3, %v2066_v45, %v2194_v31  ;;  %v1620_v63 = vadd.f32 0.2548296, %v1556_v54  ;;  %v1367_v51 = vadd.f32 1.4214138, %v1303_v36  ;;  %v1238_v29 = vadd.f32 -1.4531521, %v1174_v2 }
 0x23a   :  { %v3739_v20 = vpop.eup %3738  ;;  %v2322_v0 = vadd.f32 1.0, %v2258_v43  ;;  %v2069_v39 = vsub.f32 1.0, %v2005_v55  ;;  %v920_v46 = vmul.f32 0.3275911, %v856_v5  ;;  %v923_v18 = vmul.f32 0.3275911, %v5673_v57 }
 0x23b   :  { %v1684_v38 = vmul.f32 %v5611_v30, %v1620_v63  ;;  %v1431_v21 = vmul.f32 %v5634_v35, %v1367_v51  ;;  %v3741_v9 = vpop.eup %3740  ;;  %v1302_v27 = vmul.f32 %v5661_v17, %v1238_v29  ;;  %v2387_v23 = vmul.f32 %v2323_v56, %v723_v33 }
 0x23c   :  { %v2386_v12 = vmul.f32 %v2322_v0, %v722_v58  ;;  %v2197_v49 = vsub.f32 0.0, %v2069_v39  ;;  %v984_v4 = vadd.f32 1.0, %v920_v46  ;;  %v987_v52 = vadd.f32 1.0, %v923_v18 }
 0x23d   :  { %v2004_v53 = vmul.f32 %v3739_v20, %v1684_v38  ;;  %v1495_v62 = vadd.f32 -0.28449672, %v1431_v21  ;;  %vm2133_vm4 = vcmp.ge.f32.partialorder %v5545_v1, 0.0  ;;  %v1366_v30 = vadd.f32 1.4214138, %v1302_v27 }
 0x23e   :  { %v5680_v45 = vpop.eup %3742  ;;  %3746 = vrcp.f32 %v984_v4  ;;  %3501 = vmatprep.mubr.msk.f32.mxu1 %vm2415_vm10, %v2386_v12  ;;  %v2261_v25 = vsel %vm2133_vm4, %v2069_v39, %v2197_v49  ;;  %v1934_v6 = vmul.f32 1.442695, %v1817_v61  ;;  %v725_v31 = vmul.f32 0.5, %v5531_v3 }
 0x23f   :  { %v2068_v11 = vsub.f32 1.0, %v2004_v53  ;;  %v1559_v58 = vmul.f32 %v5634_v35, %v1495_v62  ;;  %v1177_v60 = vmul.f32 1.0614054, %v5680_v45  ;;  %3502 = vmatmul.mubr.msk.f32.gmra.mrb[46].mxu1 %vm2415_vm10, %v2387_v23  ;;  %v3745_v33 = vpop.eup %3744  ;;  %v1430_v34 = vmul.f32 %v5661_v17, %v1366_v30 }
 0x240   :  { %3748 = vrcp.f32 %v987_v52  ;;  %v2325_v56 = vadd.f32 1.0, %v2261_v25  ;;  %vm2132_vm5 = vcmp.ge.f32.partialorder %v5561_v16, 0.0  ;;  %v1752_v2 = vsub.f32 0.0, %v856_v5 }
 0x241   :  { %v2196_v1 = vsub.f32 0.0, %v2068_v11  ;;  %v1623_v54 = vadd.f32 0.2548296, %v1559_v58  ;;  %v1241_v36 = vadd.f32 -1.4531521, %v1177_v60  ;;  %v5694_v20 = vadd.f32 %v5640_v44, %v5203_v14 }
 0x242   :  { %v1494_v55 = vadd.f32 -0.28449672, %v1430_v34  ;;  %v724_v0 = vmul.f32 0.5, %v5549_v59  ;;  %v5700_v29 = vadd.f32 %v5640_v44, %v5248_v7  ;;  %3750 = vpow2.f32 %v1934_v6 }
 0x243   :  { %v2260_v43 = vsel %vm2132_vm5, %v2068_v11, %v2196_v1  ;;  %v1687_v63 = vmul.f32 %v5634_v35, %v1623_v54  ;;  %v1305_v51 = vmul.f32 %v5680_v45, %v1241_v36  ;;  %v5703_v35 = vmul.f32 0.70710677, %v5694_v20 }
 0x244   :  { %v2324_v3 = vadd.f32 1.0, %v2260_v43  ;;  %v1558_v39 = vmul.f32 %v5661_v17, %v1494_v55  ;;  %v1816_v61 = vmul.f32 %v1752_v2, %v856_v5  ;;  %v5706_v14 = vmul.f32 0.70710677, %v5700_v29 }
 0x245   :  { %v2007_v16 = vmul.f32 %v3741_v9, %v1687_v63  ;;  %v1369_v46 = vadd.f32 1.4214138, %v1305_v51  ;;  %v2389_v59 = vmul.f32 %v2325_v56, %v725_v31  ;;  %v858_v49 = vand.u32 2147483647, %v5703_v35 }
 0x246   :  { %v2388_v38 = vmul.f32 %v2324_v3, %v724_v0  ;;  %v1622_v21 = vadd.f32 0.2548296, %v1558_v39  ;;  %v1755_v27 = vsub.f32 0.0, %v5673_v57  ;;  %v5715_v4 = vand.u32 2147483647, %v5706_v14 }
 0x247   :  { %v2071_v18 = vsub.f32 1.0, %v2007_v16  ;;  %v1433_v12 = vmul.f32 %v5680_v45, %v1369_v46  ;;  %v726_v23 = vmul.f32 0.5, %v5589_v42  ;;  %vm2135_vm6 = vcmp.ge.f32.partialorder %v5580_v28, 0.0 }
 0x248   :  { %v5710_v7 = vpop.eup %3746  ;;  %v1686_v9 = vmul.f32 %v5661_v17, %v1622_v21  ;;  %3504 = vmatprep.mubr.msk.f32.mxu1 %vm2415_vm10, %v2388_v38  ;;  %v922_v30 = vmul.f32 0.3275911, %v858_v49  ;;  %v925_v25 = vmul.f32 0.3275911, %v5715_v4  ;;  %v1932_v60 = vmul.f32 1.442695, %v1816_v61 }
 0x249   :  { %v2199_v5 = vsub.f32 0.0, %v2071_v18  ;;  %v1497_v53 = vadd.f32 -0.28449672, %v1433_v12  ;;  %v1176_v62 = vmul.f32 1.0614054, %v5710_v7  ;;  %3505 = vmatmul.mubr.msk.f32.gmra.mrb[48].mxu1 %vm2415_vm10, %v2389_v59  ;;  %v1819_v31 = vmul.f32 %v1755_v27, %v5673_v57 }
 0x24a   :  { %v5721_v52 = vpop.eup %3748  ;;  %v2006_v17 = vmul.f32 %v3745_v33, %v1686_v9  ;;  %v986_v1 = vadd.f32 1.0, %v922_v30  ;;  %v989_v28 = vadd.f32 1.0, %v925_v25  ;;  %vm2134_vm7 = vcmp.ge.f32.partialorder %v5599_v26, 0.0 }
 0x24b   :  { %v1561_v11 = vmul.f32 %v5680_v45, %v1497_v53  ;;  %v1240_v58 = vadd.f32 -1.4531521, %v1176_v62  ;;  %v1179_v34 = vmul.f32 1.0614054, %v5721_v52  ;;  %v2263_v42 = vsel %vm2135_vm6, %v2071_v18, %v2199_v5 }
 0x24c   :  { %v2070_v6 = vsub.f32 1.0, %v2006_v17  ;;  %3752 = vrcp.f32 %v986_v1  ;;  %v5732_v55 = vadd.f32 %v5640_v44, %v5268_v50  ;;  %v3751_v2 = vpop.eup %3750  ;;  %v2327_v51 = vadd.f32 1.0, %v2263_v42 }
 0x24d   :  { %v1625_v54 = vadd.f32 0.2548296, %v1561_v11  ;;  %v1304_v36 = vmul.f32 %v5710_v7, %v1240_v58  ;;  %v1243_v56 = vadd.f32 -1.4531521, %v1179_v34  ;;  %3754 = vrcp.f32 %v989_v28 }
 0x24e   :  { %v2198_v33 = vsub.f32 0.0, %v2070_v6  ;;  %3756 = vpow2.f32 %v1932_v60  ;;  %v1938_v3 = vmul.f32 1.442695, %v1819_v31  ;;  %v727_v38 = vmul.f32 0.5, %v5573_v37 }
 0x24f   :  { %v1689_v43 = vmul.f32 %v5680_v45, %v1625_v54  ;;  %v1368_v63 = vadd.f32 1.4214138, %v1304_v36  ;;  %v1307_v57 = vmul.f32 %v5721_v52, %v1243_v56  ;;  %v1754_v50 = vsub.f32 0.0, %v858_v49 }
 0x250   :  { %v2262_v0 = vsel %vm2134_vm7, %v2070_v6, %v2198_v33  ;;  %v5739_v21 = vmul.f32 0.70710677, %v5732_v55  ;;  %v5743_v45 = vadd.f32 %v5640_v44, %v5317_v22  ;;  %v1757_v12 = vsub.f32 0.0, %v5715_v4 }
 0x251   :  { %v2326_v39 = vadd.f32 1.0, %v2262_v0  ;;  %v2009_v16 = vmul.f32 %v3751_v2, %v1689_v43  ;;  %v1432_v26 = vmul.f32 %v5710_v7, %v1368_v63  ;;  %v1371_v46 = vadd.f32 1.4214138, %v1307_v57 }
 0x252   :  { %v2391_v9 = vmul.f32 %v2327_v51, %v727_v38  ;;  %v860_v5 = vand.u32 2147483647, %v5739_v21  ;;  %v5750_v37 = vadd.f32 %v5640_v44, %v5337_v19  ;;  %3758 = vpow2.f32 %v1938_v3 }
 0x253   :  { %v2390_v61 = vmul.f32 %v2326_v39, %v726_v23  ;;  %v1496_v59 = vadd.f32 -0.28449672, %v1432_v26  ;;  %v1435_v18 = vmul.f32 %v5721_v52, %v1371_v46  ;;  %v2073_v27 = vsub.f32 1.0, %v2009_v16 }
 0x254   :  { %v5754_v22 = vmul.f32 0.70710677, %v5743_v45  ;;  %v1818_v23 = vmul.f32 %v1754_v50, %v858_v49  ;;  %v924_v17 = vmul.f32 0.3275911, %v860_v5  ;;  %v1821_v11 = vmul.f32 %v1757_v12, %v5715_v4 }
 0x255   :  { %v1560_v53 = vmul.f32 %v5710_v7, %v1496_v59  ;;  %v1499_v62 = vadd.f32 -0.28449672, %v1435_v18  ;;  %3507 = vmatprep.mubr.msk.f32.mxu1 %vm2415_vm10, %v2390_v61  ;;  %v729_v60 = vmul.f32 0.5, %v5603_v15  ;;  %v2201_v34 = vsub.f32 0.0, %v2073_v27 }
 0x256   :  { %3508 = vmatmul.mubr.msk.f32.gmra.mrb[50].mxu1 %vm2415_vm10, %v2391_v9  ;;  %v863_v19 = vand.u32 2147483647, %v5754_v22  ;;  %v5761_v58 = vpop.eup %3752  ;;  %v988_v42 = vadd.f32 1.0, %v924_v17  ;;  %v5765_v6 = vmul.f32 0.70710677, %v5750_v37  ;;  %vm2137_vm8 = vcmp.ge.f32.partialorder %v5616_v10, 0.0 }
 0x257   :  { %v1624_v30 = vadd.f32 0.2548296, %v1560_v53  ;;  %v1563_v25 = vmul.f32 %v5721_v52, %v1499_v62  ;;  %v5767_v49 = vpop.eup %3754  ;;  %v1178_v54 = vmul.f32 1.0614054, %v5761_v58  ;;  %v1936_v56 = vmul.f32 1.442695, %v1818_v23 }
 0x258   :  { %v927_v36 = vmul.f32 0.3275911, %v863_v19  ;;  %v3757_v4 = vpop.eup %3756  ;;  %v1181_v28 = vmul.f32 1.0614054, %v5767_v49  ;;  %3760 = vrcp.f32 %v988_v42  ;;  %v1942_v2 = vmul.f32 1.442695, %v1821_v11 }
 0x259   :  { %v1688_v31 = vmul.f32 %v5710_v7, %v1624_v30  ;;  %v1627_v1 = vadd.f32 0.2548296, %v1563_v25  ;;  %v1242_v33 = vadd.f32 -1.4531521, %v1178_v54  ;;  %v728_v63 = vmul.f32 0.5, %v5644_v47 }
 0x25a   :  { %v991_v43 = vadd.f32 1.0, %v927_v36  ;;  %v1245_v7 = vadd.f32 -1.4531521, %v1181_v28  ;;  %v5776_v51 = vand.u32 2147483647, %v5765_v6  ;;  %v2265_v0 = vsel %vm2137_vm8, %v2073_v27, %v2201_v34 }
 0x25b   :  { %v2008_v15 = vmul.f32 %v3757_v4, %v1688_v31  ;;  %v1691_v57 = vmul.f32 %v5721_v52, %v1627_v1  ;;  %v1306_v10 = vmul.f32 %v5761_v58, %v1242_v33  ;;  %v1756_v16 = vsub.f32 0.0, %v860_v5 }
 0x25c   :  { %3762 = vrcp.f32 %v991_v43  ;;  %v1309_v39 = vmul.f32 %v5767_v49, %v1245_v7  ;;  %v926_v26 = vmul.f32 0.3275911, %v5776_v51  ;;  %v3759_v46 = vpop.eup %3758  ;;  %vm2136_vm9 = vcmp.ge.f32.partialorder %v5659_v40, 0.0 }
 0x25d   :  { %v2072_v3 = vsub.f32 1.0, %v2008_v15  ;;  %3764 = vpow2.f32 %v1936_v56  ;;  %v1370_v52 = vadd.f32 1.4214138, %v1306_v10  ;;  %v2329_v38 = vadd.f32 1.0, %v2265_v0 }
 0x25e   :  { %3766 = vpow2.f32 %v1942_v2  ;;  %v2011_v50 = vmul.f32 %v3759_v46, %v1691_v57  ;;  %v1373_v61 = vadd.f32 1.4214138, %v1309_v39  ;;  %v990_v59 = vadd.f32 1.0, %v926_v26 }
 0x25f   :  { %v2200_v47 = vsub.f32 0.0, %v2072_v3  ;;  %v1434_v12 = vmul.f32 %v5761_v58, %v1370_v52  ;;  %v1759_v9 = vsub.f32 0.0, %v863_v19  ;;  %v5785_v27 = vadd.f32 %v5640_v44, %v5371_v48 }
 0x260   :  { %v5788_v62 = vmul.f32 0.5, %v5650_v41  ;;  %v1437_v40 = vmul.f32 %v5767_v49, %v1373_v61  ;;  %v1820_v23 = vmul.f32 %v1756_v16, %v860_v5  ;;  %vm2139_vm11 = vcmp.ge.f32.partialorder %v5666_v32, 0.0 }
 0x261   :  { %v2264_v18 = vsel %vm2136_vm9, %v2072_v3, %v2200_v47  ;;  %v5793_v17 = vmul.f32 0.5, %v5694_v20  ;;  %v1498_v30 = vadd.f32 -0.28449672, %v1434_v12  ;;  %v5796_v25 = vmul.f32 0.5, %v5700_v29 }
 0x262   :  { %v2328_v53 = vadd.f32 1.0, %v2264_v18  ;;  %3768 = vrcp.f32 %v990_v59  ;;  %v5798_v11 = vpop.eup %3760  ;;  %v2393_v48 = vmul.f32 %v2329_v38, %v729_v60  ;;  %v2075_v42 = vsub.f32 1.0, %v2011_v50 }
 0x263   :  { %v1501_v41 = vadd.f32 -0.28449672, %v1437_v40  ;;  %v1562_v31 = vmul.f32 %v5761_v58, %v1498_v30  ;;  %v1180_v5 = vmul.f32 1.0614054, %v5798_v11  ;;  %v1823_v1 = vmul.f32 %v1759_v9, %v863_v19 }
 0x264   :  { %v2392_v34 = vmul.f32 %v2328_v53, %v728_v63  ;;  %v5803_v54 = vmul.f32 0.70710677, %v5785_v27  ;;  %v1940_v36 = vmul.f32 1.442695, %v1820_v23  ;;  %v1758_v29 = vsub.f32 0.0, %v5776_v51 }
 0x265   :  { %v1565_v20 = vmul.f32 %v5767_v49, %v1501_v41  ;;  %v5809_v4 = vadd.f32 %v5640_v44, %v5402_v24  ;;  %v1626_v56 = vadd.f32 0.2548296, %v1562_v31  ;;  %v1244_v28 = vadd.f32 -1.4531521, %v1180_v5 }
 0x266   :  { %3510 = vmatprep.mubr.msk.f32.mxu1 %vm2415_vm10, %v2392_v34  ;;  %v5812_v60 = vpop.eup %3762  ;;  %v865_v19 = vand.u32 2147483647, %v5803_v54  ;;  %v10_v15 = vstv %s6280_s4  ;;  %v2203_v2 = vsub.f32 0.0, %v2075_v42  ;;  %vm2138_vm12 = vcmp.ge.f32.partialorder %v5703_v35, 0.0 }
 0x267   :  { %3511 = vmatmul.mubr.msk.f32.gmra.mrb[52].mxu1 %vm2415_vm10, %v2393_v48  ;;  %v3765_v33 = vpop.eup %3764  ;;  %v1629_v24 = vadd.f32 0.2548296, %v1565_v20  ;;  %v1183_v43 = vmul.f32 1.0614054, %v5812_v60  ;;  %11 = vst [vmem:[#allocation2] sm:$0x1] %v10_v15  ;;  %v1690_v57 = vmul.f32 %v5761_v58, %v1626_v56  ;;  %v1308_v7 = vmul.f32 %v5798_v11, %v1244_v28 }
 0x268   :  { %v3767_v63 = vpop.eup %3766  ;;  %v1946_v0 = vmul.f32 1.442695, %v1823_v1  ;;  %v929_v3 = vmul.f32 0.3275911, %v865_v19  ;;  %v1822_v16 = vmul.f32 %v1758_v29, %v5776_v51  ;;  %v5826_v26 = vmul.f32 0.70710677, %v5809_v4 }
 0x269   :  { %v1693_v10 = vmul.f32 %v5767_v49, %v1629_v24  ;;  %v1247_v39 = vadd.f32 -1.4531521, %v1183_v43  ;;  %v2010_v46 = vmul.f32 %v3765_v33, %v1690_v57  ;;  %v1372_v47 = vadd.f32 1.4214138, %v1308_v7 }
 0x26a   :  { %3770 = vpow2.f32 %v1940_v36  ;;  %v993_v52 = vadd.f32 1.0, %v929_v3  ;;  %v2267_v38 = vsel %vm2139_vm11, %v2075_v42, %v2203_v2  ;;  %v5834_v61 = vand.u32 2147483647, %v5826_v26 }
 0x26b   :  { %v5830_v58 = vmul.f32 %v3767_v63, %v1693_v10  ;;  %v1311_v50 = vmul.f32 %v5812_v60, %v1247_v39  ;;  %v2074_v51 = vsub.f32 1.0, %v2010_v46  ;;  %v1436_v59 = vmul.f32 %v5798_v11, %v1372_v47 }
 0x26c   :  { %v5836_v49 = vpop.eup %3768  ;;  %3772 = vrcp.f32 %v993_v52  ;;  %v5841_v18 = vadd.f32 %v5640_v44, %v5427_v13  ;;  %v1944_v9 = vmul.f32 1.442695, %v1822_v16  ;;  %v1761_v23 = vsub.f32 0.0, %v865_v19 }
 0x26d   :  { %v1375_v12 = vadd.f32 1.4214138, %v1311_v50  ;;  %3774 = vpow2.f32 %v1946_v0  ;;  %v1182_v32 = vmul.f32 1.0614054, %v5836_v49  ;;  %v2202_v53 = vsub.f32 0.0, %v2074_v51 }
 0x26e   :  { %v1500_v40 = vadd.f32 -0.28449672, %v1436_v59  ;;  %v928_v30 = vmul.f32 0.3275911, %v5834_v61  ;;  %v2331_v48 = vadd.f32 1.0, %v2267_v38  ;;  %v2077_v34 = vsub.f32 1.0, %v5830_v58 }
 0x26f   :  { %vm2141_vm13 = vcmp.ge.f32.partialorder %v5706_v14, 0.0  ;;  %v1439_v42 = vmul.f32 %v5812_v60, %v1375_v12  ;;  %v1246_v41 = vadd.f32 -1.4531521, %v1182_v32  ;;  %v2266_v13 = vsel %vm2138_vm12, %v2074_v51, %v2202_v53  ;;  %v3434_v28 = vpop.f32.mrb[0].mxu1 }
 0x270   :  { %v1564_v31 = vmul.f32 %v5798_v11, %v1500_v40  ;;  %v992_v5 = vadd.f32 1.0, %v928_v30  ;;  %v5852_v1 = vmul.f32 0.70710677, %v5841_v18  ;;  %v2330_v20 = vadd.f32 1.0, %v2266_v13  ;;  %v5862_v2 = vpop.f32.mrb[1].mxu1 }
 0x271   :  { %v5855_v36 = vmul.f32 0.5, %v5732_v55  ;;  %v1503_v29 = vadd.f32 -0.28449672, %v1439_v42  ;;  %v1310_v56 = vmul.f32 %v5836_v49, %v1246_v41  ;;  %v1825_v33 = vmul.f32 %v1761_v23, %v865_v19 }
 0x272   :  { %v1628_v15 = vadd.f32 0.2548296, %v1564_v31  ;;  %3776 = vrcp.f32 %v992_v5  ;;  %v5860_v35 = vadd.f32 %v5640_v44, %v5442_v8  ;;  %v2394_v24 = vmul.f32 %v2330_v20, %v5793_v17  ;;  %v5872_v8 = vld [vmem:[#allocation2] ss:$0 sm:$0xff]  ;;  %v3437_v39 = vpop.f32.mrb[2].mxu1 }
 0x273   :  { %vm2140_vm14 = vcmp.ge.f32.partialorder %v5739_v21, 0.0  ;;  %v1567_v55 = vmul.f32 %v5812_v60, %v1503_v29  ;;  %v1374_v43 = vadd.f32 1.4214138, %v1310_v56  ;;  %v5868_v63 = vand.u32 2147483647, %v5852_v1 }
 0x274   :  { %v3771_v57 = vpop.eup %3770  ;;  %v2395_v19 = vmul.f32 %v2331_v48, %v5788_v62  ;;  %v2205_v7 = vsub.f32 0.0, %v2077_v34  ;;  %v1692_v0 = vmul.f32 %v5798_v11, %v1628_v15  ;;  %3778 = vpow2.f32 %v1944_v9  ;;  %3513 = vmatprep.mubr.msk.f32.mxu1 %vm2415_vm10, %v2394_v24 }
 0x275   :  { %v1631_v44 = vadd.f32 0.2548296, %v1567_v55  ;;  %v5875_v17 = vmul.f32 0.5, %v5750_v37  ;;  %v1438_v3 = vmul.f32 %v5836_v49, %v1374_v43  ;;  %v931_v10 = vmul.f32 0.3275911, %v5868_v63  ;;  %v2684_v37 = vpop.f32.mrb[3].mxu1 }
 0x276   :  { %v5880_v16 = vpop.eup %3772  ;;  %v2012_v62 = vmul.f32 %v3771_v57, %v1692_v0  ;;  %v1950_v46 = vmul.f32 1.442695, %v1825_v33  ;;  %v1760_v11 = vsub.f32 0.0, %v5834_v61  ;;  %v5884_v47 = vmul.f32 0.70710677, %v5860_v35  ;;  %3514 = vmatmul.mubr.msk.f32.gmra.mrb[54].mxu1 %vm2415_vm10, %v2395_v19  ;;  %v3440_v30 = vpop.f32.mrb[4].mxu1 }
 0x277   :  { %v3775_v52 = vpop.eup %3774  ;;  %v1695_v38 = vmul.f32 %v5812_v60, %v1631_v44  ;;  %v1502_v58 = vadd.f32 -0.28449672, %v1438_v3  ;;  %v1185_v50 = vmul.f32 1.0614054, %v5880_v16  ;;  %v995_v51 = vadd.f32 1.0, %v931_v10  ;;  %v2694_v13 = vpop.f32.mrb[5].mxu1 }
 0x278   :  { %v2269_v59 = vsel %vm2141_vm13, %v2077_v34, %v2205_v7  ;;  %v2076_v12 = vsub.f32 1.0, %v2012_v62  ;;  %v5892_v32 = vand.u32 2147483647, %v5884_v47  ;;  %v2680_v9 = vadd.f32 %v3434_v28, %v5872_v8 }
 0x279   :  { %v2015_v53 = vmul.f32 %v3775_v52, %v1695_v38  ;;  %v1566_v40 = vmul.f32 %v5836_v49, %v1502_v58  ;;  %v1249_v23 = vadd.f32 -1.4531521, %v1185_v50  ;;  %3780 = vrcp.f32 %v995_v51 }
 0x27a   :  { %v2204_v60 = vsub.f32 0.0, %v2076_v12  ;;  %vm2143_vm15 = vcmp.ge.f32.partialorder %v5754_v22, 0.0  ;;  %v1824_v48 = vmul.f32 %v1760_v11, %v5834_v61  ;;  %v930_v14 = vmul.f32 0.3275911, %v5892_v32  ;;  %v3443_v33 = vpop.f32.mrb[6].mxu1 }
 0x27b   :  { %v2079_v34 = vsub.f32 1.0, %v2015_v53  ;;  %v1630_v42 = vadd.f32 0.2548296, %v1566_v40  ;;  %v1313_v41 = vmul.f32 %v5880_v16, %v1249_v23  ;;  %vm2993_vm0 = vcmask 7168   ;;  %v2704_v57 = vpop.f32.mrb[7].mxu1 }
 0x27c   :  { %v5900_v31 = vpop.eup %3776  ;;  %v2333_v5 = vadd.f32 1.0, %v2269_v59  ;;  %v2268_v20 = vsel %vm2140_vm14, %v2076_v12, %v2204_v60  ;;  %vm2142_vm1 = vcmp.ge.f32.partialorder %v5765_v6, 0.0  ;;  %v1763_v29 = vsub.f32 0.0, %v5868_v63  ;;  %2995 = vst.msk [vmem:[%s6281_s5 + $0x8] sm:$0xff] %vm2993_vm0, %v2680_v9 }
 0x27d   :  { %v994_v56 = vadd.f32 1.0, %v930_v14  ;;  %v2332_v61 = vadd.f32 1.0, %v2268_v20  ;;  %v1694_v28 = vmul.f32 %v5836_v49, %v1630_v42  ;;  %v1377_v15 = vadd.f32 1.4214138, %v1313_v41 }
 0x27e   :  { %3782 = vpow2.f32 %v1950_v46  ;;  %v3779_v24 = vpop.eup %3778  ;;  %v2207_v55 = vsub.f32 0.0, %v2079_v34  ;;  %v1184_v21 = vmul.f32 1.0614054, %v5900_v31  ;;  %v2675_v43 = vadd.f32 %v5872_v8, %v5862_v2  ;;  %v3446_v52 = vpop.f32.mrb[8].mxu1 }
 0x27f   :  { %3784 = vrcp.f32 %v994_v56  ;;  %v2396_v19 = vmul.f32 %v2332_v61, %v5855_v36  ;;  %v2014_v7 = vmul.f32 %v3779_v24, %v1694_v28  ;;  %v1441_v0 = vmul.f32 %v5880_v16, %v1377_v15 }
 0x280   :  { %v1948_v44 = vmul.f32 1.442695, %v1824_v48  ;;  %v2397_v49 = vmul.f32 %v2333_v5, %v5796_v25  ;;  %v1248_v3 = vadd.f32 -1.4531521, %v1184_v21  ;;  %v1827_v10 = vmul.f32 %v1763_v29, %v5868_v63  ;;  %2994 = vst.msk [vmem:[%s6281_s5] sm:$0xff] %vm2993_vm0, %v2675_v43 }
 0x281   :  { %v2690_v62 = vadd.f32 %v3437_v39, %v5872_v8  ;;  %v2078_v2 = vsub.f32 1.0, %v2014_v7  ;;  %v1505_v46 = vadd.f32 -0.28449672, %v1441_v0  ;;  %3516 = vmatprep.mubr.msk.f32.mxu1 %vm2415_vm10, %v2396_v19  ;;  %v2685_v36 = vadd.f32 %v5872_v8, %v2684_v37  ;;  %v2714_v37 = vpop.f32.mrb[9].mxu1 }
 0x282   :  { %v2700_v11 = vadd.f32 %v3440_v30, %v5872_v8  ;;  %v2271_v25 = vsel %vm2143_vm15, %v2079_v34, %v2207_v55  ;;  %v1312_v63 = vmul.f32 %v5900_v31, %v1248_v3  ;;  %3517 = vmatmul.mubr.msk.f32.gmra.mrb[56].mxu1 %vm2415_vm10, %v2397_v49  ;;  %v2695_v39 = vadd.f32 %v5872_v8, %v2694_v13  ;;  %v3449_v48 = vpop.f32.mrb[10].mxu1 }
 0x283   :  { %2997 = vst.msk [vmem:[%s6281_s5 + $0x18] sm:$0xff] %vm2993_vm0, %v2690_v62  ;;  %v2710_v38 = vadd.f32 %v3443_v33, %v5872_v8  ;;  %v5936_v58 = vpop.eup %3780  ;;  %v2206_v50 = vsub.f32 0.0, %v2078_v2  ;;  %v1569_v22 = vmul.f32 %v5880_v16, %v1505_v46  ;;  %2996 = vst.msk [vmem:[%s6281_s5 + $0x10] sm:$0xff] %vm2993_vm0, %v2685_v36  ;;  %v2705_v51 = vadd.f32 %v5872_v8, %v2704_v57  ;;  %v2724_v41 = vpop.f32.mrb[11].mxu1 }
 0x284   :  { %2999 = vst.msk [vmem:[%s6281_s5 + $0x28] sm:$0xff] %vm2993_vm0, %v2700_v11  ;;  %v2720_v59 = vadd.f32 %v3446_v52, %v5872_v8  ;;  %v1376_v12 = vadd.f32 1.4214138, %v1312_v63  ;;  %v1187_v9 = vmul.f32 1.0614054, %v5936_v58  ;;  %v1762_v53 = vsub.f32 0.0, %v5892_v32 }
 0x285   :  { %2998 = vst.msk [vmem:[%s6281_s5 + $0x20] sm:$0xff] %vm2993_vm0, %v2695_v39  ;;  %3001 = vst.msk [vmem:[%s6281_s5 + $0x38] sm:$0xff] %vm2993_vm0, %v2710_v38  ;;  %v2715_v40 = vadd.f32 %v5872_v8, %v2714_v37  ;;  %v2335_v23 = vadd.f32 1.0, %v2271_v25  ;;  %v2270_v30 = vsel %vm2142_vm1, %v2078_v2, %v2206_v50  ;;  %v1633_v60 = vadd.f32 0.2548296, %v1569_v22 }
 0x286   :  { %3786 = vpow2.f32 %v1948_v44  ;;  %3000 = vst.msk [vmem:[%s6281_s5 + $0x30] sm:$0xff] %vm2993_vm0, %v2705_v51  ;;  %3003 = vst.msk [vmem:[%s6281_s5 + $0x48] sm:$0xff] %vm2993_vm0, %v2720_v59  ;;  %v2334_v14 = vadd.f32 1.0, %v2270_v30  ;;  %v1440_v34 = vmul.f32 %v5900_v31, %v1376_v12  ;;  %v1251_v42 = vadd.f32 -1.4531521, %v1187_v9 }
 0x287   :  { %3002 = vst.msk [vmem:[%s6281_s5 + $0x40] sm:$0xff] %vm2993_vm0, %v2715_v40  ;;  %v2730_v6 = vadd.f32 %v3449_v48, %v5872_v8  ;;  %v735_v5 = vmul.f32 0.5, %v5743_v45  ;;  %v1697_v20 = vmul.f32 %v5880_v16, %v1633_v60  ;;  %v1954_v29 = vmul.f32 1.442695, %v1827_v10 }
 0x288   :  { %v3783_v13 = vpop.eup %3782  ;;  %v2725_v56 = vadd.f32 %v5872_v8, %v2724_v41  ;;  %v2398_v28 = vmul.f32 %v2334_v14, %v5875_v17  ;;  %v1504_v15 = vadd.f32 -0.28449672, %v1440_v34  ;;  %v1315_v33 = vmul.f32 %v5936_v58, %v1251_v42  ;;  %v3452_v17 = vpop.f32.mrb[12].mxu1 }
 0x289   :  { %v5979_v61 = vpop.eup %3784  ;;  %v1826_v24 = vmul.f32 %v1762_v53, %v5892_v32  ;;  %3005 = vst.msk [vmem:[%s6281_s5 + $0x58] sm:$0xff] %vm2993_vm0, %v2730_v6  ;;  %v2399_v45 = vmul.f32 %v2335_v23, %v735_v5  ;;  %v2017_v55 = vmul.f32 %v3783_v13, %v1697_v20  ;;  %v2740_v32 = vadd.f32 %v3452_v17, %v5872_v8  ;;  %v2734_v57 = vpop.f32.mrb[13].mxu1 }
 0x28a   :  { %v1186_v16 = vmul.f32 1.0614054, %v5979_v61  ;;  %3004 = vst.msk [vmem:[%s6281_s5 + $0x50] sm:$0xff] %vm2993_vm0, %v2725_v56  ;;  %v1568_v21 = vmul.f32 %v5900_v31, %v1504_v15  ;;  %v1379_v43 = vadd.f32 1.4214138, %v1315_v33  ;;  %3519 = vmatprep.mubr.msk.f32.mxu1 %vm2415_vm10, %v2398_v28  ;;  %3788 = vpow2.f32 %v1954_v29 }
 0x28b   :  { %v2081_v19 = vsub.f32 1.0, %v2017_v55  ;;  %3520 = vmatmul.mubr.msk.f32.gmra.mrb[58].mxu1 %vm2415_vm10, %v2399_v45  ;;  %v2735_v0 = vadd.f32 %v5872_v8, %v2734_v57  ;;  %v1952_v3 = vmul.f32 1.442695, %v1826_v24  ;;  %3007 = vst.msk [vmem:[%s6281_s5 + $0x68] sm:$0xff] %vm2993_vm0, %v2740_v32  ;;  %v3455_v62 = vpop.f32.mrb[14].mxu1  ;;  %vm2145_vm2 = vcmp.ge.f32.partialorder %v5803_v54, 0.0 }
 0x28c   :  { %v1250_v7 = vadd.f32 -1.4531521, %v1186_v16  ;;  %v1632_v44 = vadd.f32 0.2548296, %v1568_v21  ;;  %v1443_v49 = vmul.f32 %v5936_v58, %v1379_v43  ;;  %v2750_v36 = vadd.f32 %v3455_v62, %v5872_v8  ;;  %v2744_v11 = vpop.f32.mrb[15].mxu1 }
 0x28d   :  { %3006 = vst.msk [vmem:[%s6281_s5 + $0x60] sm:$0xff] %vm2993_vm0, %v2735_v0  ;;  %v2209_v25 = vsub.f32 0.0, %v2081_v19  ;;  %v2745_v39 = vadd.f32 %v5872_v8, %v2744_v11  ;;  %3790 = vpow2.f32 %v1952_v3  ;;  %vm2144_vm3 = vcmp.ge.f32.partialorder %v5826_v26, 0.0 }
 0x28e   :  { %v1314_v10 = vmul.f32 %v5979_v61, %v1250_v7  ;;  %v1696_v2 = vmul.f32 %v5900_v31, %v1632_v44  ;;  %v1507_v46 = vadd.f32 -0.28449672, %v1443_v49  ;;  %3009 = vst.msk [vmem:[%s6281_s5 + $0x78] sm:$0xff] %vm2993_vm0, %v2750_v36  ;;  %v736_v41 = vmul.f32 0.5, %v5809_v4 }
 0x28f   :  { %3008 = vst.msk [vmem:[%s6281_s5 + $0x70] sm:$0xff] %vm2993_vm0, %v2745_v39  ;;  %v3458_v50 = vpop.f32.mrb[16].mxu1  ;;  %v2273_v9 = vsel %vm2145_vm2, %v2081_v19, %v2209_v25  ;;  %v737_v20 = vmul.f32 0.5, %v5785_v27  ;;  %vm2147_vm4 = vcmp.ge.f32.partialorder %v5852_v1, 0.0  ;;  %vm2146_vm5 = vcmp.ge.f32.partialorder %v5884_v47, 0.0 }
 0x290   :  { %v3787_v52 = vpop.eup %3786  ;;  %v1378_v63 = vadd.f32 1.4214138, %v1314_v10  ;;  %v1571_v37 = vmul.f32 %v5936_v58, %v1507_v46  ;;  %v2760_v59 = vadd.f32 %v3458_v50, %v5872_v8  ;;  %v2754_v12 = vpop.f32.mrb[17].mxu1  ;;  %v2337_v14 = vadd.f32 1.0, %v2273_v9 }
 0x291   :  { %v2016_v38 = vmul.f32 %v3787_v52, %v1696_v2  ;;  %v2755_v40 = vadd.f32 %v5872_v8, %v2754_v12  ;;  %v738_v44 = vmul.f32 0.5, %v5860_v35  ;;  %v739_v47 = vmul.f32 0.5, %v5841_v18 }
 0x292   :  { %v1442_v31 = vmul.f32 %v5979_v61, %v1378_v63  ;;  %v1635_v51 = vadd.f32 0.2548296, %v1571_v37  ;;  %3011 = vst.msk [vmem:[%s6281_s5 + $0x88] sm:$0xff] %vm2993_vm0, %v2760_v59  ;;  %v2401_v33 = vmul.f32 %v2337_v14, %v737_v20 }
 0x293   :  { %v2080_v22 = vsub.f32 1.0, %v2016_v38  ;;  %3010 = vst.msk [vmem:[%s6281_s5 + $0x80] sm:$0xff] %vm2993_vm0, %v2755_v40  ;;  %v3461_v48 = vpop.f32.mrb[18].mxu1 }
 0x294   :  { %v1506_v53 = vadd.f32 -0.28449672, %v1442_v31  ;;  %v1699_v30 = vmul.f32 %v5936_v58, %v1635_v51  ;;  %v3789_v60 = vpop.eup %3788  ;;  %v2770_v58 = vadd.f32 %v3461_v48, %v5872_v8  ;;  %v2764_v6 = vpop.f32.mrb[19].mxu1 }
 0x295   :  { %v2208_v23 = vsub.f32 0.0, %v2080_v22  ;;  %v2765_v26 = vadd.f32 %v5872_v8, %v2764_v6 }
 0x296   :  { %v1570_v54 = vmul.f32 %v5979_v61, %v1506_v53  ;;  %v2019_v42 = vmul.f32 %v3789_v60, %v1699_v30  ;;  %3013 = vst.msk [vmem:[%s6281_s5 + $0x98] sm:$0xff] %vm2993_vm0, %v2770_v58 }
 0x297   :  { %v2272_v34 = vsel %vm2144_vm3, %v2080_v22, %v2208_v23  ;;  %3012 = vst.msk [vmem:[%s6281_s5 + $0x90] sm:$0xff] %vm2993_vm0, %v2765_v26  ;;  %v3464_v4 = vpop.f32.mrb[20].mxu1  ;;  %v3791_v15 = vpop.eup %3790 }
 0x298   :  { %v2336_v13 = vadd.f32 1.0, %v2272_v34  ;;  %v1634_v5 = vadd.f32 0.2548296, %v1570_v54  ;;  %v2083_v29 = vsub.f32 1.0, %v2019_v42  ;;  %v2780_v27 = vadd.f32 %v3464_v4, %v5872_v8  ;;  %v2774_v45 = vpop.f32.mrb[21].mxu1 }
 0x299   :  { %v2775_v16 = vadd.f32 %v5872_v8, %v2774_v45 }
 0x29a   :  { %v2400_v56 = vmul.f32 %v2336_v13, %v736_v41  ;;  %v1698_v28 = vmul.f32 %v5979_v61, %v1634_v5  ;;  %v2211_v24 = vsub.f32 0.0, %v2083_v29  ;;  %3015 = vst.msk [vmem:[%s6281_s5 + $0xa8] sm:$0xff] %vm2993_vm0, %v2780_v27 }
 0x29b   :  { %3014 = vst.msk [vmem:[%s6281_s5 + $0xa0] sm:$0xff] %vm2993_vm0, %v2775_v16  ;;  %v3467_v17 = vpop.f32.mrb[22].mxu1 }
 0x29c   :  { %v2018_v55 = vmul.f32 %v3791_v15, %v1698_v28  ;;  %3522 = vmatprep.mubr.msk.f32.mxu1 %vm2415_vm10, %v2400_v56  ;;  %v2275_v21 = vsel %vm2147_vm4, %v2083_v29, %v2211_v24  ;;  %v2790_v43 = vadd.f32 %v3467_v17, %v5872_v8  ;;  %v2784_v32 = vpop.f32.mrb[23].mxu1 }
 0x29d   :  { %3523 = vmatmul.mubr.msk.f32.gmra.mrb[60].mxu1 %vm2415_vm10, %v2401_v33  ;;  %v2785_v19 = vadd.f32 %v5872_v8, %v2784_v32  ;;  %v2339_v1 = vadd.f32 1.0, %v2275_v21 }
 0x29e   :  { %v2082_v61 = vsub.f32 1.0, %v2018_v55  ;;  %3017 = vst.msk [vmem:[%s6281_s5 + $0xb8] sm:$0xff] %vm2993_vm0, %v2790_v43 }
 0x29f   :  { %3016 = vst.msk [vmem:[%s6281_s5 + $0xb0] sm:$0xff] %vm2993_vm0, %v2785_v19  ;;  %v3470_v0 = vpop.f32.mrb[24].mxu1  ;;  %v2403_v46 = vmul.f32 %v2339_v1, %v739_v47 }
 0x2a0   :  { %v2210_v57 = vsub.f32 0.0, %v2082_v61  ;;  %v2800_v3 = vadd.f32 %v3470_v0, %v5872_v8  ;;  %v2794_v10 = vpop.f32.mrb[25].mxu1 }
 0x2a1   :  { %v2795_v62 = vadd.f32 %v5872_v8, %v2794_v10 }
 0x2a2   :  { %v2274_v7 = vsel %vm2146_vm5, %v2082_v61, %v2210_v57  ;;  %3019 = vst.msk [vmem:[%s6281_s5 + $0xc8] sm:$0xff] %vm2993_vm0, %v2800_v3 }
 0x2a3   :  { %v2338_v49 = vadd.f32 1.0, %v2274_v7  ;;  %3018 = vst.msk [vmem:[%s6281_s5 + $0xc0] sm:$0xff] %vm2993_vm0, %v2795_v62  ;;  %v3473_v35 = vpop.f32.mrb[26].mxu1 }
 0x2a4   :  { %v2810_v36 = vadd.f32 %v3473_v35, %v5872_v8  ;;  %v2804_v18 = vpop.f32.mrb[27].mxu1 }
 0x2a5   :  { %v2402_v2 = vmul.f32 %v2338_v49, %v738_v44  ;;  %v2805_v11 = vadd.f32 %v5872_v8, %v2804_v18 }
 0x2a6   :  { %3021 = vst.msk [vmem:[%s6281_s5 + $0xd8] sm:$0xff] %vm2993_vm0, %v2810_v36 }
 0x2a7   :  { %3525 = vmatprep.mubr.msk.f32.mxu1 %vm2415_vm10, %v2402_v2  ;;  %3020 = vst.msk [vmem:[%s6281_s5 + $0xd0] sm:$0xff] %vm2993_vm0, %v2805_v11  ;;  %v3476_v52 = vpop.f32.mrb[28].mxu1 }
 0x2a8   :  { %3526 = vmatmul.mubr.msk.f32.gmra.mrb[62].mxu1 %vm2415_vm10, %v2403_v46  ;;  %v2820_v25 = vadd.f32 %v3476_v52, %v5872_v8  ;;  %v2814_v63 = vpop.f32.mrb[29].mxu1 }
 0x2a9   :  { %v2815_v39 = vadd.f32 %v5872_v8, %v2814_v63 }
 0x2aa   :  { %3023 = vst.msk [vmem:[%s6281_s5 + $0xe8] sm:$0xff] %vm2993_vm0, %v2820_v25 }
 0x2ab   :  { %3022 = vst.msk [vmem:[%s6281_s5 + $0xe0] sm:$0xff] %vm2993_vm0, %v2815_v39 }
 0x2ac   :  { %v3479_v38 = vpop.f32.mrb[30].mxu1 }
 0x2ad   :  { %v2830_v37 = vadd.f32 %v3479_v38, %v5872_v8  ;;  %v2824_v31 = vpop.f32.mrb[31].mxu1 }
 0x2ae   :  { %v2825_v50 = vadd.f32 %v5872_v8, %v2824_v31 }
 0x2af   :  { %3025 = vst.msk [vmem:[%s6281_s5 + $0xf8] sm:$0xff] %vm2993_vm0, %v2830_v37 }
 0x2b0   :  { %3024 = vst.msk [vmem:[%s6281_s5 + $0xf0] sm:$0xff] %vm2993_vm0, %v2825_v50  ;;  %v3482_v22 = vpop.f32.mrb[32].mxu1 }
 0x2b1   :  { %v2840_v51 = vadd.f32 %v3482_v22, %v5872_v8  ;;  %v2834_v59 = vpop.f32.mrb[33].mxu1 }
 0x2b2   :  { %v2835_v12 = vadd.f32 %v5872_v8, %v2834_v59 }
 0x2b3   :  { %3027 = vst.msk [vmem:[%s6281_s5 + $0x108] sm:$0xff] %vm2993_vm0, %v2840_v51 }
 0x2b4   :  { %3026 = vst.msk [vmem:[%s6281_s5 + $0x100] sm:$0xff] %vm2993_vm0, %v2835_v12 }
 0x2be   :  { %v3485_v9 = vpop.f32.mrb[34].mxu1 }
 0x2bf   :  { %v2850_v53 = vadd.f32 %v3485_v9, %v5872_v8  ;;  %v2844_v40 = vpop.f32.mrb[35].mxu1 }
 0x2c0   :  { %v2845_v23 = vadd.f32 %v5872_v8, %v2844_v40 }
 0x2c1   :  { %3029 = vst.msk [vmem:[%s6281_s5 + $0x118] sm:$0xff] %vm2993_vm0, %v2850_v53 }
 0x2c2   :  { %3028 = vst.msk [vmem:[%s6281_s5 + $0x110] sm:$0xff] %vm2993_vm0, %v2845_v23 }
 0x2cf   :  { %v3488_v30 = vpop.f32.mrb[36].mxu1 }
 0x2d0   :  { %v2860_v60 = vadd.f32 %v3488_v30, %v5872_v8  ;;  %v2854_v54 = vpop.f32.mrb[37].mxu1 }
 0x2d1   :  { %v2855_v48 = vadd.f32 %v5872_v8, %v2854_v54 }
 0x2d2   :  { %3031 = vst.msk [vmem:[%s6281_s5 + $0x128] sm:$0xff] %vm2993_vm0, %v2860_v60 }
 0x2d3   :  { %3030 = vst.msk [vmem:[%s6281_s5 + $0x120] sm:$0xff] %vm2993_vm0, %v2855_v48 }
 0x2db   :  { %v3491_v14 = vpop.f32.mrb[38].mxu1 }
 0x2dc   :  { %v2870_v34 = vadd.f32 %v3491_v14, %v5872_v8  ;;  %v2864_v42 = vpop.f32.mrb[39].mxu1 }
 0x2dd   :  { %v2865_v58 = vadd.f32 %v5872_v8, %v2864_v42 }
 0x2de   :  { %3033 = vst.msk [vmem:[%s6281_s5 + $0x138] sm:$0xff] %vm2993_vm0, %v2870_v34 }
 0x2df   :  { %3032 = vst.msk [vmem:[%s6281_s5 + $0x130] sm:$0xff] %vm2993_vm0, %v2865_v58 }
 0x2e5   :  { %v3494_v6 = vpop.f32.mrb[40].mxu1 }
 0x2e6   :  { %v2880_v41 = vadd.f32 %v3494_v6, %v5872_v8  ;;  %v2874_v13 = vpop.f32.mrb[41].mxu1 }
 0x2e7   :  { %v2875_v5 = vadd.f32 %v5872_v8, %v2874_v13 }
 0x2e8   :  { %3035 = vst.msk [vmem:[%s6281_s5 + $0x148] sm:$0xff] %vm2993_vm0, %v2880_v41 }
 0x2e9   :  { %3034 = vst.msk [vmem:[%s6281_s5 + $0x140] sm:$0xff] %vm2993_vm0, %v2875_v5 }
 0x2f2   :  { %v3497_v26 = vpop.f32.mrb[42].mxu1 }
 0x2f3   :  { %v2890_v20 = vadd.f32 %v3497_v26, %v5872_v8  ;;  %v2884_v29 = vpop.f32.mrb[43].mxu1 }
 0x2f4   :  { %v2885_v56 = vadd.f32 %v5872_v8, %v2884_v29 }
 0x2f5   :  { %3037 = vst.msk [vmem:[%s6281_s5 + $0x158] sm:$0xff] %vm2993_vm0, %v2890_v20 }
 0x2f6   :  { %3036 = vst.msk [vmem:[%s6281_s5 + $0x150] sm:$0xff] %vm2993_vm0, %v2885_v56 }
 0x304   :  { %v3500_v28 = vpop.f32.mrb[44].mxu1 }
 0x305   :  { %v2900_v4 = vadd.f32 %v3500_v28, %v5872_v8  ;;  %v2894_v15 = vpop.f32.mrb[45].mxu1 }
 0x306   :  { %v2895_v33 = vadd.f32 %v5872_v8, %v2894_v15 }
 0x307   :  { %3039 = vst.msk [vmem:[%s6281_s5 + $0x168] sm:$0xff] %vm2993_vm0, %v2900_v4 }
 0x308   :  { %3038 = vst.msk [vmem:[%s6281_s5 + $0x160] sm:$0xff] %vm2993_vm0, %v2895_v33 }
 0x312   :  { %v3503_v24 = vpop.f32.mrb[46].mxu1 }
 0x313   :  { %v2910_v27 = vadd.f32 %v3503_v24, %v5872_v8  ;;  %v2904_v45 = vpop.f32.mrb[47].mxu1 }
 0x314   :  { %v2905_v55 = vadd.f32 %v5872_v8, %v2904_v45 }
 0x315   :  { %3041 = vst.msk [vmem:[%s6281_s5 + $0x178] sm:$0xff] %vm2993_vm0, %v2910_v27 }
 0x316   :  { %3040 = vst.msk [vmem:[%s6281_s5 + $0x170] sm:$0xff] %vm2993_vm0, %v2905_v55 }
 0x31c   :  { %v3506_v16 = vpop.f32.mrb[48].mxu1 }
 0x31d   :  { %v2920_v61 = vadd.f32 %v3506_v16, %v5872_v8  ;;  %v2914_v17 = vpop.f32.mrb[49].mxu1 }
 0x31e   :  { %v2915_v21 = vadd.f32 %v5872_v8, %v2914_v17 }
 0x31f   :  { %3043 = vst.msk [vmem:[%s6281_s5 + $0x188] sm:$0xff] %vm2993_vm0, %v2920_v61 }
 0x320   :  { %3042 = vst.msk [vmem:[%s6281_s5 + $0x180] sm:$0xff] %vm2993_vm0, %v2915_v21 }
 0x329   :  { %v3509_v43 = vpop.f32.mrb[50].mxu1 }
 0x32a   :  { %v2930_v32 = vadd.f32 %v3509_v43, %v5872_v8  ;;  %v2924_v57 = vpop.f32.mrb[51].mxu1 }
 0x32b   :  { %v2925_v19 = vadd.f32 %v5872_v8, %v2924_v57 }
 0x32c   :  { %3045 = vst.msk [vmem:[%s6281_s5 + $0x198] sm:$0xff] %vm2993_vm0, %v2930_v32 }
 0x32d   :  { %3044 = vst.msk [vmem:[%s6281_s5 + $0x190] sm:$0xff] %vm2993_vm0, %v2925_v19 }
 0x33a   :  { %v3512_v1 = vpop.f32.mrb[52].mxu1 }
 0x33b   :  { %v2940_v7 = vadd.f32 %v3512_v1, %v5872_v8  ;;  %v2934_v0 = vpop.f32.mrb[53].mxu1 }
 0x33c   :  { %v2935_v44 = vadd.f32 %v5872_v8, %v2934_v0 }
 0x33d   :  { %3047 = vst.msk [vmem:[%s6281_s5 + $0x1a8] sm:$0xff] %vm2993_vm0, %v2940_v7 }
 0x33e   :  { %3046 = vst.msk [vmem:[%s6281_s5 + $0x1a0] sm:$0xff] %vm2993_vm0, %v2935_v44 }
 0x349   :  { %v3515_v49 = vpop.f32.mrb[54].mxu1 }
 0x34a   :  { %v2950_v3 = vadd.f32 %v3515_v49, %v5872_v8  ;;  %v2944_v10 = vpop.f32.mrb[55].mxu1 }
 0x34b   :  { %v2945_v47 = vadd.f32 %v5872_v8, %v2944_v10 }
 0x34c   :  { %3049 = vst.msk [vmem:[%s6281_s5 + $0x1b8] sm:$0xff] %vm2993_vm0, %v2950_v3 }
 0x34d   :  { %3048 = vst.msk [vmem:[%s6281_s5 + $0x1b0] sm:$0xff] %vm2993_vm0, %v2945_v47 }
 0x355   :  { %v3518_v62 = vpop.f32.mrb[56].mxu1 }
 0x356   :  { %v2960_v2 = vadd.f32 %v3518_v62, %v5872_v8  ;;  %v2954_v46 = vpop.f32.mrb[57].mxu1 }
 0x357   :  { %v2955_v35 = vadd.f32 %v5872_v8, %v2954_v46 }
 0x358   :  { %3051 = vst.msk [vmem:[%s6281_s5 + $0x1c8] sm:$0xff] %vm2993_vm0, %v2960_v2 }
 0x359   :  { %3050 = vst.msk [vmem:[%s6281_s5 + $0x1c0] sm:$0xff] %vm2993_vm0, %v2955_v35 }
 0x35e   :  { %v3521_v36 = vpop.f32.mrb[58].mxu1 }
 0x35f   :  { %v2970_v18 = vadd.f32 %v3521_v36, %v5872_v8  ;;  %v2964_v11 = vpop.f32.mrb[59].mxu1 }
 0x360   :  { %v2965_v52 = vadd.f32 %v5872_v8, %v2964_v11 }
 0x361   :  { %3053 = vst.msk [vmem:[%s6281_s5 + $0x1d8] sm:$0xff] %vm2993_vm0, %v2970_v18 }
 0x362   :  { %3052 = vst.msk [vmem:[%s6281_s5 + $0x1d0] sm:$0xff] %vm2993_vm0, %v2965_v52 }
 0x370   :  { %v3524_v25 = vpop.f32.mrb[60].mxu1 }
 0x371   :  { %v2980_v63 = vadd.f32 %v3524_v25, %v5872_v8  ;;  %v2974_v39 = vpop.f32.mrb[61].mxu1 }
 0x372   :  { %v2975_v38 = vadd.f32 %v5872_v8, %v2974_v39 }
 0x373   :  { %3055 = vst.msk [vmem:[%s6281_s5 + $0x1e8] sm:$0xff] %vm2993_vm0, %v2980_v63 }
 0x374   :  { %3054 = vst.msk [vmem:[%s6281_s5 + $0x1e0] sm:$0xff] %vm2993_vm0, %v2975_v38 }
 0x37b   :  { %v3527_v37 = vpop.f32.mrb[62].mxu1 }
 0x37c   :  { %v2990_v31 = vadd.f32 %v3527_v37, %v5872_v8  ;;  %v2984_v50 = vpop.f32.mrb[63].mxu1 }
 0x37d   :  { %v2985_v22 = vadd.f32 %v5872_v8, %v2984_v50 }
 0x37e   :  { %3057 = vst.msk [vmem:[%s6281_s5 + $0x1f8] sm:$0xff] %vm2993_vm0, %v2990_v31 }
 0x37f   :  { %3056 = vst.msk [vmem:[%s6281_s5 + $0x1f0] sm:$0xff] %vm2993_vm0, %v2985_v22 }

</bundles_post_ra>
